<compile_context>
chip_gen: v5e
topology: v5e:2x2
jax: 0.10.0
libtpu: 0.0.40
codegen_flags: <defaults>
</compile_context>

<pallas_src>
import functools

import jax
import jax.numpy as jnp
from jax.experimental import pallas as pl
from jax.experimental.pallas import tpu as pltpu

EPS = 1e-5  # nn.InstanceNorm2d default eps


def _write_reflect_pad(pad_ref, x, d):
    """Write ReflectionPad2d(d) of an (H, W, C) value into pad_ref ((H+2d, W+2d, C)).

    One interior copy plus thin edge copies (rows, then columns using the already
    written rows) — replaces the two full-image concatenates of the old version.
    """
    H, W, C = x.shape
    # Interior.
    pad_ref[d:d + H, d:d + W, :] = x
    # Top / bottom reflected rows, columns [d, W+d).
    for i in range(d):
        pad_ref[i:i + 1, d:d + W, :] = x[d - i:d - i + 1, :, :]
        pad_ref[H + d + i:H + d + i + 1, d:d + W, :] = x[H - 2 - i:H - 1 - i, :, :]
    # Left / right reflected columns (full height, read back from the scratch).
    for j in range(d):
        pad_ref[:, j:j + 1, :] = pad_ref[:, 2 * d - j:2 * d - j + 1, :]
        pad_ref[:, W + d + j:W + d + j + 1, :] = pad_ref[:, W + d - 2 - j:W + d - 1 - j, :]


def _conv3x3_chunked(pad_ref, w_ref, y_ref, stats_ref, *, H, W, C, dil, ch):
    """3x3 'valid' conv from a padded bf16 scratch into f32 y_ref, row-chunked.

    Per chunk: im2col (ch*W, 9C) bf16 -> ONE MXU matmul (f32 accumulate) -> rows of
    y_ref; per-channel sum / sum-of-squares accumulate into stats_ref (2, C).
    Returns (mean, inv_std), each shaped (1, 1, C), for the fused InstanceNorm.
    """
    stats_ref[...] = jnp.zeros_like(stats_ref)
    n_chunks = H // ch

    def body(ci, carry):
        r0 = ci * ch
        if ch % 8 == 0:
            r0 = pl.multiple_of(r0, ch)   # keep chunked loads/stores aligned
        taps = []
        for dy in range(3):
            for dx in range(3):
                taps.append(pad_ref[pl.ds(r0 + dy * dil, ch), pl.ds(dx * dil, W), :])
        col = jnp.concatenate(taps, axis=-1).reshape(ch * W, 9 * C)        # bf16
        out = jax.lax.dot_general(
            col, w_ref[...],                                               # (9C, C) bf16
            dimension_numbers=(((1,), (0,)), ((), ())),
            preferred_element_type=jnp.float32)                            # (ch*W, C) f32
        y_ref[pl.ds(r0, ch), :, :] = out.reshape(ch, W, C)
        stats_ref[0:1, :] += jnp.sum(out, axis=0, keepdims=True)
        stats_ref[1:2, :] += jnp.sum(out * out, axis=0, keepdims=True)
        return carry

    jax.lax.fori_loop(0, n_chunks, body, 0)

    n_pix = float(H * W)
    mean = stats_ref[0:1, :] * (1.0 / n_pix)
    var = stats_ref[1:2, :] * (1.0 / n_pix) - mean * mean
    inv = jax.lax.rsqrt(var + EPS)
    return mean.reshape(1, 1, C), inv.reshape(1, 1, C)


def resnet_block_kernel(x_ref, w1_ref, w2_ref, o_ref,
                        pad1_ref, pad2_ref, y_ref, stats_ref, *, dil, ch):
    # x_ref: (1, H, W, C)    w*_ref: (9C, C) bf16      o_ref: (1, H, W, C)
    # pad1_ref: (H+2d, W+2d, C) bf16   pad2_ref: (H+2, W+2, C) bf16
    # y_ref: (H, W, C) f32 (reused for both conv outputs)   stats_ref: (2, C) f32
    _, H, W, C = x_ref.shape

    # conv1: reflect-pad(d) written to bf16 scratch, chunked im2col matmul + IN stats.
    _write_reflect_pad(pad1_ref, x_ref[0].astype(jnp.bfloat16), dil)
    mean1, inv1 = _conv3x3_chunked(pad1_ref, w1_ref, y_ref, stats_ref,
                                   H=H, W=W, C=C, dil=dil, ch=ch)

    # InstanceNorm + ReLU (f32), early-cast to bf16, build second padded image.
    h = jnp.maximum((y_ref[...] - mean1) * inv1, 0.0).astype(jnp.bfloat16)
    _write_reflect_pad(pad2_ref, h, 1)

    # conv2: reflect-pad(1), dilation 1; output reuses y_ref.
    mean2, inv2 = _conv3x3_chunked(pad2_ref, w2_ref, y_ref, stats_ref,
                                   H=H, W=W, C=C, dil=1, ch=ch)

    # InstanceNorm + residual add (f32), cast back to the I/O dtype.
    z = (y_ref[...] - mean2) * inv2
    o_ref[0] = (x_ref[0].astype(jnp.float32) + z).astype(o_ref.dtype)


def _pick_chunk_rows(H, W, target_rows=512):
    """Smallest divisor of H giving >= target_rows output rows (M) per matmul chunk."""
    want = min(H, max(1, -(-target_rows // W)))
    for ch in range(want, H + 1):
        if H % ch == 0:
            return ch
    return H


def _vmem_limit_bytes(H, W, C, dil, x_bytes, out_bytes):
    """VMEM budget from the actual tiles + scratch, capped by the chip's capacity."""
    blocks = 2 * H * W * C * (x_bytes + out_bytes)                  # double-buffered in/out
    weights = 2 * 2 * (9 * C * C * 2)                               # two bf16 (9C, C) mats
    scratch = ((H + 2 * dil) * (W + 2 * dil) + (H + 2) * (W + 2)) * C * 2 \
              + H * W * C * 4 + 8 * 128 * 4
    needed = blocks + weights + scratch
    try:
        cap = pltpu.get_tpu_info().vmem_capacity_bytes
    except Exception:
        cap = 64 * 1024 * 1024                                      # conservative (v7x per-TC)
    return int(min(cap - cap // 8, max(2 * needed, 32 * 1024 * 1024)))


def resnet_block_forward_nhwc(x_nhwc, w1_oihw, b1, w2_oihw, b2, dilation=1):
    """Fused ResnetBlock forward. x_nhwc: (N, H, W, C); output keeps x's dtype.

    b1 / b2 are accepted for API parity but intentionally unused: a per-channel
    bias before InstanceNorm2d(affine=False) is exactly cancelled by the mean
    subtraction, so dropping it is numerically a no-op.
    """
    del b1, b2
    N, H, W, C = x_nhwc.shape
    d = int(dilation)
    assert H >= 2 and W >= 2, "ResnetBlock needs H, W >= 2"
    assert 1 <= d <= min(H, W) - 1, "reflection pad requires dilation < min(H, W)"

    # PyTorch conv weights (C_out, C_in, kh, kw) -> im2col layout (9*C_in, C_out),
    # row index = (kh*3 + kw)*C_in + ci (matches the tap order in the kernel).
    w1c = jnp.transpose(w1_oihw, (2, 3, 1, 0)).reshape(9 * C, C).astype(jnp.bfloat16)
    w2c = jnp.transpose(w2_oihw, (2, 3, 1, 0)).reshape(9 * C, C).astype(jnp.bfloat16)

    ch = _pick_chunk_rows(H, W)
    kernel = functools.partial(resnet_block_kernel, dil=d, ch=ch)
    io_bytes = jnp.dtype(x_nhwc.dtype).itemsize

    return pl.pallas_call(
        kernel,
        out_shape=jax.ShapeDtypeStruct((N, H, W, C), x_nhwc.dtype),
        grid_spec=pltpu.PrefetchScalarGridSpec(
            num_scalar_prefetch=0,
            grid=(N,),
            in_specs=[
                pl.BlockSpec((1, H, W, C), lambda n: (n, 0, 0, 0)),
                pl.BlockSpec((9 * C, C), lambda n: (0, 0)),
                pl.BlockSpec((9 * C, C), lambda n: (0, 0)),
            ],
            out_specs=pl.BlockSpec((1, H, W, C), lambda n: (n, 0, 0, 0)),
            scratch_shapes=[
                pltpu.VMEM((H + 2 * d, W + 2 * d, C), jnp.bfloat16),   # reflect-pad(d) of x
                pltpu.VMEM((H + 2, W + 2, C), jnp.bfloat16),           # reflect-pad(1) of h
                pltpu.VMEM((H, W, C), jnp.float32),                    # conv output (reused)
                pltpu.VMEM((2, C), jnp.float32),                       # IN sum / sum-of-squares
            ],
        ),
        compiler_params=pltpu.CompilerParams(
            dimension_semantics=("parallel",),
            vmem_limit_bytes=_vmem_limit_bytes(H, W, C, d, io_bytes, io_bytes),
        ),
    )(x_nhwc, w1c, w2c)


def resnet_block_forward(x_nchw, w1_oihw, b1, w2_oihw, b2, dilation=1):
    """NCHW wrapper for PyTorch parity. Prefer the NHWC entry point in production:
    these transposes are two extra full-tensor HBM passes outside the kernel."""
    x = jnp.transpose(x_nchw, (0, 2, 3, 1))
    y = resnet_block_forward_nhwc(x, w1_oihw, b1, w2_oihw, b2, dilation)
    return jnp.transpose(y, (0, 3, 1, 2))


def _reference_forward(x_nchw, w1, b1, w2, b2, dilation=1):
    """Pure-JAX reference (lax conv, f32, with the biases) for correctness checking."""
    def conv(x, w, b, dil):
        xp = jnp.pad(x, ((0, 0), (0, 0), (dil, dil), (dil, dil)), mode="reflect")
        y = jax.lax.conv_general_dilated(
            xp, w, window_strides=(1, 1), padding="VALID",
            rhs_dilation=(dil, dil),
            dimension_numbers=("NCHW", "OIHW", "NCHW"))
        return y + b[None, :, None, None]

    def inorm(y):
        m = jnp.mean(y, axis=(2, 3), keepdims=True)
        v = jnp.mean((y - m) ** 2, axis=(2, 3), keepdims=True)
        return (y - m) / jnp.sqrt(v + EPS)

    h = jnp.maximum(inorm(conv(x_nchw, w1, b1, dilation)), 0.0)
    h = inorm(conv(h, w2, b2, 1))
    return x_nchw + h


if __name__ == "__main__":
    key = jax.random.PRNGKey(0)
    N, C, H, W = 2, 4, 16, 16
    dilation = 1

    k_x, k_w1, k_b1, k_w2, k_b2 = jax.random.split(key, 5)
    x = jax.random.normal(k_x, (N, C, H, W), jnp.float32)
    fan_in = C * 3 * 3
    w1 = jax.random.normal(k_w1, (C, C, 3, 3), jnp.float32) / jnp.sqrt(fan_in)
    b1 = jax.random.normal(k_b1, (C,), jnp.float32) * 0.01
    w2 = jax.random.normal(k_w2, (C, C, 3, 3), jnp.float32) / jnp.sqrt(fan_in)
    b2 = jax.random.normal(k_b2, (C,), jnp.float32) * 0.01

    out = jax.block_until_ready(resnet_block_forward(x, w1, b1, w2, b2, dilation))
    ref = jax.block_until_ready(_reference_forward(x, w1, b1, w2, b2, dilation))

    assert out.shape == (N, C, H, W)
    err = float(jnp.max(jnp.abs(out - ref)))
    # bf16 matmul operands with f32 accumulation -> looser tolerance than pure f32.
    assert err < 5e-2, f"mismatch vs JAX reference: max abs err {err}"

    print("KERNEL_OK")
</pallas_src>

<mosaic_0001>
module attributes {stable_mosaic.version = 11 : i64} {
  func.func @resnet_block_kernel(%arg0: i32, %arg1: memref<1x16x16x4xf32, #tpu.memory_space<vmem>>, %arg2: memref<36x4xbf16, #tpu.memory_space<vmem>>, %arg3: memref<36x4xbf16, #tpu.memory_space<vmem>>, %arg4: memref<1x16x16x4xf32, #tpu.memory_space<vmem>>, %arg5: memref<18x18x4xbf16, #tpu.memory_space<vmem>>, %arg6: memref<18x18x4xbf16, #tpu.memory_space<vmem>>, %arg7: memref<16x16x4xf32, #tpu.memory_space<vmem>>, %arg8: memref<2x4xf32, #tpu.memory_space<vmem>>) attributes {dimension_semantics = [#tpu.dimension_semantics<parallel>], iteration_bounds = array<i64: 2>, scalar_prefetch = 0 : i64, scratch_operands = 4 : i64, tpu.core_type = #tpu.core_type<tc>, window_params = [{transform_indices = @transform_0, window_bounds = array<i64: 1, 16, 16, 4>}, {pipeline_mode = #tpu.pipeline_mode<synchronous>, transform_indices = @transform_1, window_bounds = array<i64: 36, 4>}, {pipeline_mode = #tpu.pipeline_mode<synchronous>, transform_indices = @transform_2, window_bounds = array<i64: 36, 4>}, {transform_indices = @transform_3, window_bounds = array<i64: 1, 16, 16, 4>}]} {
    %c0 = arith.constant 0 : index
    %c0_0 = arith.constant 0 : index
    %c0_1 = arith.constant 0 : index
    %c0_2 = arith.constant 0 : index
    %0 = vector.load %arg1[%c0, %c0_0, %c0_1, %c0_2] : memref<1x16x16x4xf32, #tpu.memory_space<vmem>>, vector<1x16x16x4xf32>
    %1 = vector.shape_cast %0 : vector<1x16x16x4xf32> to vector<16x16x4xf32>
    %2 = arith.truncf %1 : vector<16x16x4xf32> to vector<16x16x4xbf16>
    %c1 = arith.constant 1 : index
    %c1_3 = arith.constant 1 : index
    %c0_4 = arith.constant 0 : index
    %3 = vector.load %arg5[%c1, %c1_3, %c0_4] : memref<18x18x4xbf16, #tpu.memory_space<vmem>>, vector<16x16x4xbf16>
    tpu.vector_store %arg5[%c1, %c1_3, %c0_4], %2 {strides = array<i32>} : memref<18x18x4xbf16, #tpu.memory_space<vmem>>, vector<16x16x4xbf16>,
    %4 = vector.extract_strided_slice %2 {offsets = [1, 0, 0], sizes = [1, 16, 4], strides = [1, 1, 1]} : vector<16x16x4xbf16> to vector<1x16x4xbf16>
    %c0_5 = arith.constant 0 : index
    %c1_6 = arith.constant 1 : index
    %c0_7 = arith.constant 0 : index
    %5 = vector.load %arg5[%c0_5, %c1_6, %c0_7] : memref<18x18x4xbf16, #tpu.memory_space<vmem>>, vector<1x16x4xbf16>
    tpu.vector_store %arg5[%c0_5, %c1_6, %c0_7], %4 {strides = array<i32>} : memref<18x18x4xbf16, #tpu.memory_space<vmem>>, vector<1x16x4xbf16>,
    %6 = vector.extract_strided_slice %2 {offsets = [14, 0, 0], sizes = [1, 16, 4], strides = [1, 1, 1]} : vector<16x16x4xbf16> to vector<1x16x4xbf16>
    %c17 = arith.constant 17 : index
    %c1_8 = arith.constant 1 : index
    %c0_9 = arith.constant 0 : index
    %7 = vector.load %arg5[%c17, %c1_8, %c0_9] : memref<18x18x4xbf16, #tpu.memory_space<vmem>>, vector<1x16x4xbf16>
    tpu.vector_store %arg5[%c17, %c1_8, %c0_9], %6 {strides = array<i32>} : memref<18x18x4xbf16, #tpu.memory_space<vmem>>, vector<1x16x4xbf16>,
    %c0_10 = arith.constant 0 : index
    %c2 = arith.constant 2 : index
    %c0_11 = arith.constant 0 : index
    %8 = vector.load %arg5[%c0_10, %c2, %c0_11] : memref<18x18x4xbf16, #tpu.memory_space<vmem>>, vector<18x1x4xbf16>
    %c0_12 = arith.constant 0 : index
    %c0_13 = arith.constant 0 : index
    %c0_14 = arith.constant 0 : index
    %9 = vector.load %arg5[%c0_12, %c0_13, %c0_14] : memref<18x18x4xbf16, #tpu.memory_space<vmem>>, vector<18x1x4xbf16>
    tpu.vector_store %arg5[%c0_12, %c0_13, %c0_14], %8 {strides = array<i32>} : memref<18x18x4xbf16, #tpu.memory_space<vmem>>, vector<18x1x4xbf16>,
    %c0_15 = arith.constant 0 : index
    %c15 = arith.constant 15 : index
    %c0_16 = arith.constant 0 : index
    %10 = vector.load %arg5[%c0_15, %c15, %c0_16] : memref<18x18x4xbf16, #tpu.memory_space<vmem>>, vector<18x1x4xbf16>
    %c0_17 = arith.constant 0 : index
    %c17_18 = arith.constant 17 : index
    %c0_19 = arith.constant 0 : index
    %11 = vector.load %arg5[%c0_17, %c17_18, %c0_19] : memref<18x18x4xbf16, #tpu.memory_space<vmem>>, vector<18x1x4xbf16>
    tpu.vector_store %arg5[%c0_17, %c17_18, %c0_19], %10 {strides = array<i32>} : memref<18x18x4xbf16, #tpu.memory_space<vmem>>, vector<18x1x4xbf16>,
    %cst = arith.constant 0.000000e+00 : f32
    %12 = vector.broadcast %cst : f32 to vector<2x4xf32>
    %c0_20 = arith.constant 0 : index
    %c0_21 = arith.constant 0 : index
    %13 = vector.load %arg8[%c0_20, %c0_21] : memref<2x4xf32, #tpu.memory_space<vmem>>, vector<2x4xf32>
    tpu.vector_store %arg8[%c0_20, %c0_21], %12 {strides = array<i32>} : memref<2x4xf32, #tpu.memory_space<vmem>>, vector<2x4xf32>,
    %c0_i32 = arith.constant 0 : i32
    %c16_i32 = arith.constant 16 : i32
    %14 = arith.muli %c0_i32, %c16_i32 : i32
    %15 = tpu.assume_multiple %14, 16 : i32
    %c0_i32_22 = arith.constant 0 : i32
    %16 = arith.addi %15, %c0_i32_22 : i32
    %17 = arith.index_cast %16 : i32 to index
    %c0_23 = arith.constant 0 : index
    %c0_24 = arith.constant 0 : index
    %18 = vector.load %arg5[%17, %c0_23, %c0_24] : memref<18x18x4xbf16, #tpu.memory_space<vmem>>, vector<16x16x4xbf16>
    %c0_i32_25 = arith.constant 0 : i32
    %19 = arith.addi %15, %c0_i32_25 : i32
    %20 = arith.index_cast %19 : i32 to index
    %c1_26 = arith.constant 1 : index
    %c0_27 = arith.constant 0 : index
    %21 = vector.load %arg5[%20, %c1_26, %c0_27] : memref<18x18x4xbf16, #tpu.memory_space<vmem>>, vector<16x16x4xbf16>
    %c0_i32_28 = arith.constant 0 : i32
    %22 = arith.addi %15, %c0_i32_28 : i32
    %23 = arith.index_cast %22 : i32 to index
    %c2_29 = arith.constant 2 : index
    %c0_30 = arith.constant 0 : index
    %24 = vector.load %arg5[%23, %c2_29, %c0_30] : memref<18x18x4xbf16, #tpu.memory_space<vmem>>, vector<16x16x4xbf16>
    %c1_i32 = arith.constant 1 : i32
    %25 = arith.addi %15, %c1_i32 : i32
    %26 = arith.index_cast %25 : i32 to index
    %c0_31 = arith.constant 0 : index
    %c0_32 = arith.constant 0 : index
    %27 = vector.load %arg5[%26, %c0_31, %c0_32] : memref<18x18x4xbf16, #tpu.memory_space<vmem>>, vector<16x16x4xbf16>
    %c1_i32_33 = arith.constant 1 : i32
    %28 = arith.addi %15, %c1_i32_33 : i32
    %29 = arith.index_cast %28 : i32 to index
    %c1_34 = arith.constant 1 : index
    %c0_35 = arith.constant 0 : index
    %30 = vector.load %arg5[%29, %c1_34, %c0_35] : memref<18x18x4xbf16, #tpu.memory_space<vmem>>, vector<16x16x4xbf16>
    %c1_i32_36 = arith.constant 1 : i32
    %31 = arith.addi %15, %c1_i32_36 : i32
    %32 = arith.index_cast %31 : i32 to index
    %c2_37 = arith.constant 2 : index
    %c0_38 = arith.constant 0 : index
    %33 = vector.load %arg5[%32, %c2_37, %c0_38] : memref<18x18x4xbf16, #tpu.memory_space<vmem>>, vector<16x16x4xbf16>
    %c2_i32 = arith.constant 2 : i32
    %34 = arith.addi %15, %c2_i32 : i32
    %35 = arith.index_cast %34 : i32 to index
    %c0_39 = arith.constant 0 : index
    %c0_40 = arith.constant 0 : index
    %36 = vector.load %arg5[%35, %c0_39, %c0_40] : memref<18x18x4xbf16, #tpu.memory_space<vmem>>, vector<16x16x4xbf16>
    %c2_i32_41 = arith.constant 2 : i32
    %37 = arith.addi %15, %c2_i32_41 : i32
    %38 = arith.index_cast %37 : i32 to index
    %c1_42 = arith.constant 1 : index
    %c0_43 = arith.constant 0 : index
    %39 = vector.load %arg5[%38, %c1_42, %c0_43] : memref<18x18x4xbf16, #tpu.memory_space<vmem>>, vector<16x16x4xbf16>
    %c2_i32_44 = arith.constant 2 : i32
    %40 = arith.addi %15, %c2_i32_44 : i32
    %41 = arith.index_cast %40 : i32 to index
    %c2_45 = arith.constant 2 : index
    %c0_46 = arith.constant 0 : index
    %42 = vector.load %arg5[%41, %c2_45, %c0_46] : memref<18x18x4xbf16, #tpu.memory_space<vmem>>, vector<16x16x4xbf16>
    %43 = tpu.concatenate %18, %21, %24, %27, %30, %33, %36, %39, %42 in 2 : vector<16x16x4xbf16>, vector<16x16x4xbf16>, vector<16x16x4xbf16>, vector<16x16x4xbf16>, vector<16x16x4xbf16>, vector<16x16x4xbf16>, vector<16x16x4xbf16>, vector<16x16x4xbf16>, vector<16x16x4xbf16> -> vector<16x16x36xbf16>
    %44 = vector.shape_cast %43 : vector<16x16x36xbf16> to vector<256x36xbf16>
    %c0_47 = arith.constant 0 : index
    %c0_48 = arith.constant 0 : index
    %45 = vector.load %arg2[%c0_47, %c0_48] : memref<36x4xbf16, #tpu.memory_space<vmem>>, vector<36x4xbf16>
    %cst_49 = arith.constant dense<0.000000e+00> : vector<256x4xf32>
    %46 = tpu.matmul %44, %45, %cst_49 {dimension_numbers = #tpu.dot_dimension_numbers<[1], [0], [0], [1], [0, 0, 1, 1], [], []>} : vector<256x36xbf16>, vector<36x4xbf16>, vector<256x4xf32> -> vector<256x4xf32>
    %47 = vector.shape_cast %46 : vector<256x4xf32> to vector<16x16x4xf32>
    %48 = arith.index_cast %15 : i32 to index
    %c0_50 = arith.constant 0 : index
    %c0_51 = arith.constant 0 : index
    %49 = vector.load %arg7[%48, %c0_50, %c0_51] : memref<16x16x4xf32, #tpu.memory_space<vmem>>, vector<16x16x4xf32>
    tpu.vector_store %arg7[%48, %c0_50, %c0_51], %47 {strides = array<i32>} : memref<16x16x4xf32, #tpu.memory_space<vmem>>, vector<16x16x4xf32>,
    %c0_52 = arith.constant 0 : index
    %c0_53 = arith.constant 0 : index
    %50 = vector.load %arg8[%c0_52, %c0_53] : memref<2x4xf32, #tpu.memory_space<vmem>>, vector<1x4xf32>
    %cst_54 = arith.constant dense<0.000000e+00> : vector<4xf32>
    %51 = vector.multi_reduction <add>, %46, %cst_54 [0] : vector<256x4xf32> to vector<4xf32>
    %52 = vector.shape_cast %51 : vector<4xf32> to vector<1x4xf32>
    %53 = arith.addf %50, %52 : vector<1x4xf32>
    %c0_55 = arith.constant 0 : index
    %c0_56 = arith.constant 0 : index
    %54 = vector.load %arg8[%c0_55, %c0_56] : memref<2x4xf32, #tpu.memory_space<vmem>>, vector<1x4xf32>
    tpu.vector_store %arg8[%c0_55, %c0_56], %53 {strides = array<i32>} : memref<2x4xf32, #tpu.memory_space<vmem>>, vector<1x4xf32>,
    %c1_57 = arith.constant 1 : index
    %c0_58 = arith.constant 0 : index
    %55 = vector.load %arg8[%c1_57, %c0_58] : memref<2x4xf32, #tpu.memory_space<vmem>>, vector<1x4xf32>
    %56 = arith.mulf %46, %46 : vector<256x4xf32>
    %cst_59 = arith.constant dense<0.000000e+00> : vector<4xf32>
    %57 = vector.multi_reduction <add>, %56, %cst_59 [0] : vector<256x4xf32> to vector<4xf32>
    %58 = vector.shape_cast %57 : vector<4xf32> to vector<1x4xf32>
    %59 = arith.addf %55, %58 : vector<1x4xf32>
    %c1_60 = arith.constant 1 : index
    %c0_61 = arith.constant 0 : index
    %60 = vector.load %arg8[%c1_60, %c0_61] : memref<2x4xf32, #tpu.memory_space<vmem>>, vector<1x4xf32>
    tpu.vector_store %arg8[%c1_60, %c0_61], %59 {strides = array<i32>} : memref<2x4xf32, #tpu.memory_space<vmem>>, vector<1x4xf32>,
    %c1_i32_62 = arith.constant 1 : i32
    %c0_63 = arith.constant 0 : index
    %c0_64 = arith.constant 0 : index
    %61 = vector.load %arg8[%c0_63, %c0_64] : memref<2x4xf32, #tpu.memory_space<vmem>>, vector<1x4xf32>
    %cst_65 = arith.constant 3.906250e-03 : f32
    %62 = vector.broadcast %cst_65 : f32 to vector<1x4xf32>
    %63 = arith.mulf %61, %62 : vector<1x4xf32>
    %c1_66 = arith.constant 1 : index
    %c0_67 = arith.constant 0 : index
    %64 = vector.load %arg8[%c1_66, %c0_67] : memref<2x4xf32, #tpu.memory_space<vmem>>, vector<1x4xf32>
    %cst_68 = arith.constant 3.906250e-03 : f32
    %65 = vector.broadcast %cst_68 : f32 to vector<1x4xf32>
    %66 = arith.mulf %64, %65 : vector<1x4xf32>
    %67 = arith.mulf %63, %63 : vector<1x4xf32>
    %68 = arith.subf %66, %67 : vector<1x4xf32>
    %cst_69 = arith.constant 9.99999974E-6 : f32
    %69 = vector.broadcast %cst_69 : f32 to vector<1x4xf32>
    %70 = arith.addf %68, %69 : vector<1x4xf32>
    %71 = math.rsqrt %70 : vector<1x4xf32>
    %72 = vector.shape_cast %63 : vector<1x4xf32> to vector<1x1x4xf32>
    %73 = vector.shape_cast %71 : vector<1x4xf32> to vector<1x1x4xf32>
    %c0_70 = arith.constant 0 : index
    %c0_71 = arith.constant 0 : index
    %c0_72 = arith.constant 0 : index
    %74 = vector.load %arg7[%c0_70, %c0_71, %c0_72] : memref<16x16x4xf32, #tpu.memory_space<vmem>>, vector<16x16x4xf32>
    %75 = vector.broadcast %72 : vector<1x1x4xf32> to vector<16x16x4xf32>
    %76 = arith.subf %74, %75 : vector<16x16x4xf32>
    %77 = vector.broadcast %73 : vector<1x1x4xf32> to vector<16x16x4xf32>
    %78 = arith.mulf %76, %77 : vector<16x16x4xf32>
    %cst_73 = arith.constant 0.000000e+00 : f32
    %79 = vector.broadcast %cst_73 : f32 to vector<16x16x4xf32>
    %80 = arith.maximumf %78, %79 : vector<16x16x4xf32>
    %81 = arith.truncf %80 : vector<16x16x4xf32> to vector<16x16x4xbf16>
    %c1_74 = arith.constant 1 : index
    %c1_75 = arith.constant 1 : index
    %c0_76 = arith.constant 0 : index
    %82 = vector.load %arg6[%c1_74, %c1_75, %c0_76] : memref<18x18x4xbf16, #tpu.memory_space<vmem>>, vector<16x16x4xbf16>
    tpu.vector_store %arg6[%c1_74, %c1_75, %c0_76], %81 {strides = array<i32>} : memref<18x18x4xbf16, #tpu.memory_space<vmem>>, vector<16x16x4xbf16>,
    %83 = vector.extract_strided_slice %81 {offsets = [1, 0, 0], sizes = [1, 16, 4], strides = [1, 1, 1]} : vector<16x16x4xbf16> to vector<1x16x4xbf16>
    %c0_77 = arith.constant 0 : index
    %c1_78 = arith.constant 1 : index
    %c0_79 = arith.constant 0 : index
    %84 = vector.load %arg6[%c0_77, %c1_78, %c0_79] : memref<18x18x4xbf16, #tpu.memory_space<vmem>>, vector<1x16x4xbf16>
    tpu.vector_store %arg6[%c0_77, %c1_78, %c0_79], %83 {strides = array<i32>} : memref<18x18x4xbf16, #tpu.memory_space<vmem>>, vector<1x16x4xbf16>,
    %85 = vector.extract_strided_slice %81 {offsets = [14, 0, 0], sizes = [1, 16, 4], strides = [1, 1, 1]} : vector<16x16x4xbf16> to vector<1x16x4xbf16>
    %c17_80 = arith.constant 17 : index
    %c1_81 = arith.constant 1 : index
    %c0_82 = arith.constant 0 : index
    %86 = vector.load %arg6[%c17_80, %c1_81, %c0_82] : memref<18x18x4xbf16, #tpu.memory_space<vmem>>, vector<1x16x4xbf16>
    tpu.vector_store %arg6[%c17_80, %c1_81, %c0_82], %85 {strides = array<i32>} : memref<18x18x4xbf16, #tpu.memory_space<vmem>>, vector<1x16x4xbf16>,
    %c0_83 = arith.constant 0 : index
    %c2_84 = arith.constant 2 : index
    %c0_85 = arith.constant 0 : index
    %87 = vector.load %arg6[%c0_83, %c2_84, %c0_85] : memref<18x18x4xbf16, #tpu.memory_space<vmem>>, vector<18x1x4xbf16>
    %c0_86 = arith.constant 0 : index
    %c0_87 = arith.constant 0 : index
    %c0_88 = arith.constant 0 : index
    %88 = vector.load %arg6[%c0_86, %c0_87, %c0_88] : memref<18x18x4xbf16, #tpu.memory_space<vmem>>, vector<18x1x4xbf16>
    tpu.vector_store %arg6[%c0_86, %c0_87, %c0_88], %87 {strides = array<i32>} : memref<18x18x4xbf16, #tpu.memory_space<vmem>>, vector<18x1x4xbf16>,
    %c0_89 = arith.constant 0 : index
    %c15_90 = arith.constant 15 : index
    %c0_91 = arith.constant 0 : index
    %89 = vector.load %arg6[%c0_89, %c15_90, %c0_91] : memref<18x18x4xbf16, #tpu.memory_space<vmem>>, vector<18x1x4xbf16>
    %c0_92 = arith.constant 0 : index
    %c17_93 = arith.constant 17 : index
    %c0_94 = arith.constant 0 : index
    %90 = vector.load %arg6[%c0_92, %c17_93, %c0_94] : memref<18x18x4xbf16, #tpu.memory_space<vmem>>, vector<18x1x4xbf16>
    tpu.vector_store %arg6[%c0_92, %c17_93, %c0_94], %89 {strides = array<i32>} : memref<18x18x4xbf16, #tpu.memory_space<vmem>>, vector<18x1x4xbf16>,
    %cst_95 = arith.constant 0.000000e+00 : f32
    %91 = vector.broadcast %cst_95 : f32 to vector<2x4xf32>
    %c0_96 = arith.constant 0 : index
    %c0_97 = arith.constant 0 : index
    %92 = vector.load %arg8[%c0_96, %c0_97] : memref<2x4xf32, #tpu.memory_space<vmem>>, vector<2x4xf32>
    tpu.vector_store %arg8[%c0_96, %c0_97], %91 {strides = array<i32>} : memref<2x4xf32, #tpu.memory_space<vmem>>, vector<2x4xf32>,
    %c0_i32_98 = arith.constant 0 : i32
    %c16_i32_99 = arith.constant 16 : i32
    %93 = arith.muli %c0_i32_98, %c16_i32_99 : i32
    %94 = tpu.assume_multiple %93, 16 : i32
    %c0_i32_100 = arith.constant 0 : i32
    %95 = arith.addi %94, %c0_i32_100 : i32
    %96 = arith.index_cast %95 : i32 to index
    %c0_101 = arith.constant 0 : index
    %c0_102 = arith.constant 0 : index
    %97 = vector.load %arg6[%96, %c0_101, %c0_102] : memref<18x18x4xbf16, #tpu.memory_space<vmem>>, vector<16x16x4xbf16>
    %c0_i32_103 = arith.constant 0 : i32
    %98 = arith.addi %94, %c0_i32_103 : i32
    %99 = arith.index_cast %98 : i32 to index
    %c1_104 = arith.constant 1 : index
    %c0_105 = arith.constant 0 : index
    %100 = vector.load %arg6[%99, %c1_104, %c0_105] : memref<18x18x4xbf16, #tpu.memory_space<vmem>>, vector<16x16x4xbf16>
    %c0_i32_106 = arith.constant 0 : i32
    %101 = arith.addi %94, %c0_i32_106 : i32
    %102 = arith.index_cast %101 : i32 to index
    %c2_107 = arith.constant 2 : index
    %c0_108 = arith.constant 0 : index
    %103 = vector.load %arg6[%102, %c2_107, %c0_108] : memref<18x18x4xbf16, #tpu.memory_space<vmem>>, vector<16x16x4xbf16>
    %c1_i32_109 = arith.constant 1 : i32
    %104 = arith.addi %94, %c1_i32_109 : i32
    %105 = arith.index_cast %104 : i32 to index
    %c0_110 = arith.constant 0 : index
    %c0_111 = arith.constant 0 : index
    %106 = vector.load %arg6[%105, %c0_110, %c0_111] : memref<18x18x4xbf16, #tpu.memory_space<vmem>>, vector<16x16x4xbf16>
    %c1_i32_112 = arith.constant 1 : i32
    %107 = arith.addi %94, %c1_i32_112 : i32
    %108 = arith.index_cast %107 : i32 to index
    %c1_113 = arith.constant 1 : index
    %c0_114 = arith.constant 0 : index
    %109 = vector.load %arg6[%108, %c1_113, %c0_114] : memref<18x18x4xbf16, #tpu.memory_space<vmem>>, vector<16x16x4xbf16>
    %c1_i32_115 = arith.constant 1 : i32
    %110 = arith.addi %94, %c1_i32_115 : i32
    %111 = arith.index_cast %110 : i32 to index
    %c2_116 = arith.constant 2 : index
    %c0_117 = arith.constant 0 : index
    %112 = vector.load %arg6[%111, %c2_116, %c0_117] : memref<18x18x4xbf16, #tpu.memory_space<vmem>>, vector<16x16x4xbf16>
    %c2_i32_118 = arith.constant 2 : i32
    %113 = arith.addi %94, %c2_i32_118 : i32
    %114 = arith.index_cast %113 : i32 to index
    %c0_119 = arith.constant 0 : index
    %c0_120 = arith.constant 0 : index
    %115 = vector.load %arg6[%114, %c0_119, %c0_120] : memref<18x18x4xbf16, #tpu.memory_space<vmem>>, vector<16x16x4xbf16>
    %c2_i32_121 = arith.constant 2 : i32
    %116 = arith.addi %94, %c2_i32_121 : i32
    %117 = arith.index_cast %116 : i32 to index
    %c1_122 = arith.constant 1 : index
    %c0_123 = arith.constant 0 : index
    %118 = vector.load %arg6[%117, %c1_122, %c0_123] : memref<18x18x4xbf16, #tpu.memory_space<vmem>>, vector<16x16x4xbf16>
    %c2_i32_124 = arith.constant 2 : i32
    %119 = arith.addi %94, %c2_i32_124 : i32
    %120 = arith.index_cast %119 : i32 to index
    %c2_125 = arith.constant 2 : index
    %c0_126 = arith.constant 0 : index
    %121 = vector.load %arg6[%120, %c2_125, %c0_126] : memref<18x18x4xbf16, #tpu.memory_space<vmem>>, vector<16x16x4xbf16>
    %122 = tpu.concatenate %97, %100, %103, %106, %109, %112, %115, %118, %121 in 2 : vector<16x16x4xbf16>, vector<16x16x4xbf16>, vector<16x16x4xbf16>, vector<16x16x4xbf16>, vector<16x16x4xbf16>, vector<16x16x4xbf16>, vector<16x16x4xbf16>, vector<16x16x4xbf16>, vector<16x16x4xbf16> -> vector<16x16x36xbf16>
    %123 = vector.shape_cast %122 : vector<16x16x36xbf16> to vector<256x36xbf16>
    %c0_127 = arith.constant 0 : index
    %c0_128 = arith.constant 0 : index
    %124 = vector.load %arg3[%c0_127, %c0_128] : memref<36x4xbf16, #tpu.memory_space<vmem>>, vector<36x4xbf16>
    %cst_129 = arith.constant dense<0.000000e+00> : vector<256x4xf32>
    %125 = tpu.matmul %123, %124, %cst_129 {dimension_numbers = #tpu.dot_dimension_numbers<[1], [0], [0], [1], [0, 0, 1, 1], [], []>} : vector<256x36xbf16>, vector<36x4xbf16>, vector<256x4xf32> -> vector<256x4xf32>
    %126 = vector.shape_cast %125 : vector<256x4xf32> to vector<16x16x4xf32>
    %127 = arith.index_cast %94 : i32 to index
    %c0_130 = arith.constant 0 : index
    %c0_131 = arith.constant 0 : index
    %128 = vector.load %arg7[%127, %c0_130, %c0_131] : memref<16x16x4xf32, #tpu.memory_space<vmem>>, vector<16x16x4xf32>
    tpu.vector_store %arg7[%127, %c0_130, %c0_131], %126 {strides = array<i32>} : memref<16x16x4xf32, #tpu.memory_space<vmem>>, vector<16x16x4xf32>,
    %c0_132 = arith.constant 0 : index
    %c0_133 = arith.constant 0 : index
    %129 = vector.load %arg8[%c0_132, %c0_133] : memref<2x4xf32, #tpu.memory_space<vmem>>, vector<1x4xf32>
    %cst_134 = arith.constant dense<0.000000e+00> : vector<4xf32>
    %130 = vector.multi_reduction <add>, %125, %cst_134 [0] : vector<256x4xf32> to vector<4xf32>
    %131 = vector.shape_cast %130 : vector<4xf32> to vector<1x4xf32>
    %132 = arith.addf %129, %131 : vector<1x4xf32>
    %c0_135 = arith.constant 0 : index
    %c0_136 = arith.constant 0 : index
    %133 = vector.load %arg8[%c0_135, %c0_136] : memref<2x4xf32, #tpu.memory_space<vmem>>, vector<1x4xf32>
    tpu.vector_store %arg8[%c0_135, %c0_136], %132 {strides = array<i32>} : memref<2x4xf32, #tpu.memory_space<vmem>>, vector<1x4xf32>,
    %c1_137 = arith.constant 1 : index
    %c0_138 = arith.constant 0 : index
    %134 = vector.load %arg8[%c1_137, %c0_138] : memref<2x4xf32, #tpu.memory_space<vmem>>, vector<1x4xf32>
    %135 = arith.mulf %125, %125 : vector<256x4xf32>
    %cst_139 = arith.constant dense<0.000000e+00> : vector<4xf32>
    %136 = vector.multi_reduction <add>, %135, %cst_139 [0] : vector<256x4xf32> to vector<4xf32>
    %137 = vector.shape_cast %136 : vector<4xf32> to vector<1x4xf32>
    %138 = arith.addf %134, %137 : vector<1x4xf32>
    %c1_140 = arith.constant 1 : index
    %c0_141 = arith.constant 0 : index
    %139 = vector.load %arg8[%c1_140, %c0_141] : memref<2x4xf32, #tpu.memory_space<vmem>>, vector<1x4xf32>
    tpu.vector_store %arg8[%c1_140, %c0_141], %138 {strides = array<i32>} : memref<2x4xf32, #tpu.memory_space<vmem>>, vector<1x4xf32>,
    %c1_i32_142 = arith.constant 1 : i32
    %c0_143 = arith.constant 0 : index
    %c0_144 = arith.constant 0 : index
    %140 = vector.load %arg8[%c0_143, %c0_144] : memref<2x4xf32, #tpu.memory_space<vmem>>, vector<1x4xf32>
    %cst_145 = arith.constant 3.906250e-03 : f32
    %141 = vector.broadcast %cst_145 : f32 to vector<1x4xf32>
    %142 = arith.mulf %140, %141 : vector<1x4xf32>
    %c1_146 = arith.constant 1 : index
    %c0_147 = arith.constant 0 : index
    %143 = vector.load %arg8[%c1_146, %c0_147] : memref<2x4xf32, #tpu.memory_space<vmem>>, vector<1x4xf32>
    %cst_148 = arith.constant 3.906250e-03 : f32
    %144 = vector.broadcast %cst_148 : f32 to vector<1x4xf32>
    %145 = arith.mulf %143, %144 : vector<1x4xf32>
    %146 = arith.mulf %142, %142 : vector<1x4xf32>
    %147 = arith.subf %145, %146 : vector<1x4xf32>
    %cst_149 = arith.constant 9.99999974E-6 : f32
    %148 = vector.broadcast %cst_149 : f32 to vector<1x4xf32>
    %149 = arith.addf %147, %148 : vector<1x4xf32>
    %150 = math.rsqrt %149 : vector<1x4xf32>
    %151 = vector.shape_cast %142 : vector<1x4xf32> to vector<1x1x4xf32>
    %152 = vector.shape_cast %150 : vector<1x4xf32> to vector<1x1x4xf32>
    %c0_150 = arith.constant 0 : index
    %c0_151 = arith.constant 0 : index
    %c0_152 = arith.constant 0 : index
    %153 = vector.load %arg7[%c0_150, %c0_151, %c0_152] : memref<16x16x4xf32, #tpu.memory_space<vmem>>, vector<16x16x4xf32>
    %154 = vector.broadcast %151 : vector<1x1x4xf32> to vector<16x16x4xf32>
    %155 = arith.subf %153, %154 : vector<16x16x4xf32>
    %156 = vector.broadcast %152 : vector<1x1x4xf32> to vector<16x16x4xf32>
    %157 = arith.mulf %155, %156 : vector<16x16x4xf32>
    %c0_153 = arith.constant 0 : index
    %c0_154 = arith.constant 0 : index
    %c0_155 = arith.constant 0 : index
    %c0_156 = arith.constant 0 : index
    %158 = vector.load %arg1[%c0_153, %c0_154, %c0_155, %c0_156] : memref<1x16x16x4xf32, #tpu.memory_space<vmem>>, vector<1x16x16x4xf32>
    %159 = vector.shape_cast %158 : vector<1x16x16x4xf32> to vector<16x16x4xf32>
    %160 = arith.addf %159, %157 : vector<16x16x4xf32>
    %c0_157 = arith.constant 0 : index
    %c0_158 = arith.constant 0 : index
    %c0_159 = arith.constant 0 : index
    %c0_160 = arith.constant 0 : index
    %161 = vector.load %arg4[%c0_157, %c0_158, %c0_159, %c0_160] : memref<1x16x16x4xf32, #tpu.memory_space<vmem>>, vector<1x16x16x4xf32>
    %162 = vector.shape_cast %161 : vector<1x16x16x4xf32> to vector<16x16x4xf32>
    %163 = vector.shape_cast %160 : vector<16x16x4xf32> to vector<1x16x16x4xf32>
    tpu.vector_store %arg4[%c0_157, %c0_158, %c0_159, %c0_160], %163 {strides = array<i32>} : memref<1x16x16x4xf32, #tpu.memory_space<vmem>>, vector<1x16x16x4xf32>,
    return
  }
  func.func @transform_0(%arg0: i32) -> (i32, i32, i32, i32) {
    %c0_i32 = arith.constant 0 : i32
    %c0_i32_0 = arith.constant 0 : i32
    %c0_i32_1 = arith.constant 0 : i32
    %c0_i32_2 = arith.constant 0 : i32
    return %arg0, %c0_i32, %c0_i32_0, %c0_i32_1 : i32, i32, i32, i32
  }
  func.func @transform_1(%arg0: i32) -> (i32, i32) {
    %c0_i32 = arith.constant 0 : i32
    %c0_i32_0 = arith.constant 0 : i32
    %c0_i32_1 = arith.constant 0 : i32
    return %c0_i32, %c0_i32_0 : i32, i32
  }
  func.func @transform_2(%arg0: i32) -> (i32, i32) {
    %c0_i32 = arith.constant 0 : i32
    %c0_i32_0 = arith.constant 0 : i32
    %c0_i32_1 = arith.constant 0 : i32
    return %c0_i32, %c0_i32_0 : i32, i32
  }
  func.func @transform_3(%arg0: i32) -> (i32, i32, i32, i32) {
    %c0_i32 = arith.constant 0 : i32
    %c0_i32_0 = arith.constant 0 : i32
    %c0_i32_1 = arith.constant 0 : i32
    %c0_i32_2 = arith.constant 0 : i32
    return %arg0, %c0_i32, %c0_i32_0, %c0_i32_1 : i32, i32, i32, i32
  }
}

</mosaic_0001>

<bundles_post_ra>
// kernel: tpu_custom_call.1
= control target key start
LH: loop header
LB: loop body
LE: loop exit
PB: predicated region body
PF: predicated region fallthrough
CT: control target
= control target key end

     0   :  { %s7551_s12 = smov 0   ;;  %s10871_s0 = inlined_call_operand.vmem [shape: f32[2,16,16,4], index: 0, kind: input, shape index: {}]   ;;  %s10872_s1 = inlined_call_operand.vmem [shape: bf16[36,4], index: 1, kind: input, shape index: {}]   ;;  %s10873_s2 = inlined_call_operand.vmem [shape: bf16[36,4], index: 2, kind: input, shape index: {}]   ;;  %s10874_s3 = inlined_call_operand.vmem [shape: f32[2,16,16,4], index: 3, kind: output, shape index: {}]  }
   0x1 LB: > { %s6810_s13 = sadd.s32 4294967295, %s7520_s12   ;;  %p6814_p0 = scmp.ge.s32.totalorder %s7520_s12, 1  ;;  %s7520_s12 = sphi %s7551_s12, %s13_s12  }
   0x2   : > { %p137_p1 = scmp.lt.s32.totalorder %s7520_s12, 3 }
   0x4   : > { %p138_p2 = pnand %p6814_p0, %p137_p1 }
   0x6   : > { %141 = sbr.rel (%p138_p2) target bundleno = 1438 (0x59e), region = 32 }
   0xb   : > { %p161_p3 = scmp.lt.s32.totalorder %s6810_s13, 1  ;;  %vm236_vm0 = vsmask.f32 256  ;;  %vm237_vm1 = vsmask.f32 4368  ;;  %vm560_vm2 = vcmask 27648  }
   0xc   : > { %vm561_vm3 = vsmask.f32 7938  ;;  %vm7577_vm4 = vmor %vm236_vm0, %vm237_vm1  ;;  %v10921_v19 = vmov 0  ;;  %vm10876_vm5 = vcmask 24576   ;;  %v10924_v23 = vmov 0  ;;  %s7522_s18 = smov 12  }
   0xd   : > { %s11135_s13 = smov (!%p161_p3, %s6810_s13), 1  ;;  %v10922_v19 = vsel %vm7577_vm4, 4294967295, %v10921_v19  ;;  %vm7585_vm6 = vmand %vm560_vm2, %vm561_vm3  ;;  %v573_v24 = vld [vmem:[#allocation2 + $0x18] sm:$0xf]  ;;  %v678_v33 = vld [vmem:[#allocation2] sm:$0xf] }
   0xe   : > { %s6941_s14 = sshll.u32 %s11135_s13, 8  ;;  %10923 = vst [vmem:[#allocation6_spill] sm:$0xff] %v10922_v19  ;;  %v10925_v23 = vsel %vm7585_vm6, 4294967295, %v10924_v23  ;;  %v682_v34 = vld [vmem:[#allocation2 + $0x8] sm:$0x1]  ;;  %vm7593_vm7 = vmand %vm10876_vm5, %vm236_vm0  ;;  %s7523_s19 = smov 24  }
   0xf   : > { %s7567_s17 = scalar_lea.vmem %s10871_s0, %s6941_s14  ;;  %10926 = vst [vmem:[#allocation7_spill] sm:$0xff] %v10925_v23  ;;  %v563_v45 = vld [vmem:[#allocation2 + $0xc] sm:$0xf]  ;;  %v570_v50 = vld [vmem:[#allocation2 + $0x14] sm:$0x1]  ;;  %vm7627_vm8 = vmand %vm10876_vm5, %vm561_vm3  ;;  %vm1588_vm9 = vcmask 1046528   ;;  %s10722_s16 = scalar_lea.vmem %s10874_s3, %s6941_s14 }
  0x10   : > { %v174_v0 = vld [vmem:[%s7567_s17 + $0x10] sm:$0xff]  ;;  %v175_v1 = vld [vmem:[%s7567_s17 + $0x18] sm:$0xff]  ;;  %v172_v2 = vld [vmem:[%s7567_s17] sm:$0xff]  ;;  %s7524_s20 = smov 8   ;;  %s7525_s21 = smov 20   ;;  %vm10875_vm11 = vcmask 1041408  }
  0x11   : > { %v206_v3 = vpack.c.bf16 %v174_v0, %v174_v0  ;;  %v207_v4 = vpack.c.bf16 %v175_v1, %v175_v1  ;;  %v173_v5 = vld [vmem:[%s7567_s17 + $0x8] sm:$0xff]  ;;  %v204_v6 = vpack.c.bf16 %v172_v2, %v172_v2  ;;  %v176_v7 = vld [vmem:[%s7567_s17 + $0x20] sm:$0xff]  ;;  %v186_v39 = vld [vmem:[%s7567_s17 + $0x70] sm:$0xff]  ;;  %vm1315_vm10 = vsmask.f32 7424  ;;  %s7526_s22 = smov 32  }
  0x12   : > { %v177_v8 = vld [vmem:[%s7567_s17 + $0x28] sm:$0xff]  ;;  %v205_v9 = vpack.c.bf16 %v173_v5, %v173_v5  ;;  %v208_v10 = vpack.c.bf16 %v176_v7, %v176_v7  ;;  %v187_v40 = vld [vmem:[%s7567_s17 + $0x78] sm:$0xff]  ;;  %v218_v52 = vpack.c.bf16 %v186_v39, %v186_v39  ;;  %v580_v57 = vld [vmem:[#allocation2 + $0x24] sm:$0xf]  ;;  %s7527_s23 = smov 16   ;;  %s7528_s24 = smov 4  }
  0x13   : > { %v209_v11 = vpack.c.bf16 %v177_v8, %v177_v8  ;;  %v257_v12 = vshrl.u32 %v206_v3, 16  ;;  %v260_v13 = vshll.u32 %v206_v3, 16  ;;  %v265_v14 = vshrl.u32 %v207_v4, 16  ;;  %v615_v5 = vld [vmem:[#allocation2 + $0x60] sm:$0xf]  ;;  %s7529_s25 = smov 28  }
  0x14   : > { %v268_v15 = vshll.u32 %v207_v4, 16  ;;  %v240_v16 = vshrl.u32 %v204_v6, 16  ;;  %v243_v17 = vshll.u32 %v204_v6, 16  ;;  %v248_v18 = vshrl.u32 %v205_v9, 16 }
  0x15   : > { %v259_v20 = vrot.slane %v257_v12, 7  ;;  %v7581_v21 = vrot.slane %v265_v14, 7  ;;  %v251_v22 = vshll.u32 %v205_v9, 16  ;;  %v274_v27 = vshrl.u32 %v208_v10, 16 }
  0x16   : > { %v242_v25 = vrot.slane %v240_v16, 7  ;;  %v250_v26 = vrot.slane %v248_v18, 7  ;;  %v282_v28 = vshrl.u32 %v209_v11, 16  ;;  %v277_v37 = vshll.u32 %v208_v10, 16  ;;  %v188_v18 = vld [vmem:[%s7567_s17 + $0x80] sm:$0xff] }
  0x17   : > { %v262_v29 = vor.u32 %v260_v13, %v259_v20  ;;  %v263_v30 = vrot.slane %v259_v20, 4  ;;  %v270_v31 = vor.u32 %v268_v15, %v7581_v21  ;;  %v272_v32 = vrot.slane %v7581_v21, 4 }
  0x18   : > { %v245_v36 = vor.u32 %v243_v17, %v242_v25  ;;  %v285_v38 = vshll.u32 %v209_v11, 16  ;;  %v246_v43 = vrot.slane %v242_v25, 4  ;;  %v253_v44 = vor.u32 %v251_v22, %v250_v26  ;;  %v619_v17 = vld [vmem:[#allocation2 + $0x68] sm:$0x1] }
  0x19   : > { %v271_v41 = vsel %vm7577_vm4, %v263_v30, %v270_v31  ;;  %v574_v42 = vsel %vm7585_vm6, %v262_v29, %v573_v24  ;;  %v679_v46 = vsel %vm7585_vm6, %v262_v29, %v678_v33  ;;  %v255_v47 = vrot.slane %v250_v26, 4  ;;  %v584_v33 = vld [vmem:[#allocation2 + $0x2c] sm:$0x1] }
  0x1a   : > { %575 = vst [vmem:[#allocation2 + $0x18] sm:$0xf] %v574_v42  ;;  %v276_v48 = vrot.slane %v274_v27, 7  ;;  %v683_v49 = vsel %vm7593_vm7, %v272_v32, %v682_v34  ;;  %v7610_v51 = vrot.slane %v282_v28, 7  ;;  %v219_v53 = vpack.c.bf16 %v187_v40, %v187_v40  ;;  %v577_v28 = vld [vmem:[#allocation2 + $0x20] sm:$0x1] }
  0x1b   : > { %576 = vst.msk [vmem:[#allocation2 + $0x1c] sm:$0xf] %vm560_vm2, %v271_v41  ;;  %v564_v54 = vsel %vm7585_vm6, %v245_v36, %v563_v45  ;;  %v254_v58 = vsel %vm7577_vm4, %v246_v43, %v253_v44  ;;  %v359_v60 = vshrl.u32 %v218_v52, 16  ;;  %v362_v61 = vshll.u32 %v218_v52, 16  ;;  %v189_v34 = vld [vmem:[%s7567_s17 + $0x88] sm:$0xff] }
  0x1c   : > { %681 = vst.msk [vmem:[#allocation2 + $0x4] sm:$0xf] %vm560_vm2, %v271_v41  ;;  %v279_v55 = vor.u32 %v277_v37, %v276_v48  ;;  %v280_v56 = vrot.slane %v276_v48, 4  ;;  %v287_v59 = vor.u32 %v285_v38, %v7610_v51  ;;  %v571_v62 = vsel %vm7593_vm7, %v255_v47, %v570_v50 }
  0x1d   : > { %680 = vst [vmem:[#allocation2] sm:$0xf] %v679_v46  ;;  %v367_v63 = vshrl.u32 %v219_v53, 16  ;;  %v370_v0 = vshll.u32 %v219_v53, 16  ;;  %v361_v2 = vrot.slane %v359_v60, 7  ;;  %v10929_v12 = vmov 0 }
  0x1e   : > { %684 = vst [vmem:[#allocation2 + $0x8] sm:$0x1] %v683_v49  ;;  %v581_v1 = vsel %vm7585_vm6, %v279_v55, %v580_v57  ;;  %v288_v3 = vsel %vm7577_vm4, %v280_v56, %v287_v59  ;;  %v10930_v12 = vsel %vm7627_vm8, 4294967295, %v10929_v12  ;;  %v7642_v36 = vpack.c.bf16 %v188_v18, %v188_v18 }
  0x1f   : > { %565 = vst [vmem:[#allocation2 + $0xc] sm:$0xf] %v564_v54  ;;  %v369_v4 = vrot.slane %v367_v63, 7  ;;  %v364_v8 = vor.u32 %v362_v61, %v361_v2  ;;  %v365_v10 = vrot.slane %v361_v2, 4  ;;  %v289_v40 = vrot.slane %v7610_v51, 4 }
  0x20   : > { %567 = vst.msk [vmem:[#allocation2 + $0x10] sm:$0xf] %vm560_vm2, %v254_v58  ;;  %v578_v47 = vsel %vm7593_vm7, %v272_v32, %v577_v28  ;;  %v376_v48 = vshrl.u32 %v7642_v36, 16  ;;  %v7663_v55 = vpack.c.bf16 %v189_v34, %v189_v34  ;;  %v379_v60 = vshll.u32 %v7642_v36, 16 }
  0x21   : > { %v695_v6 = vld [vmem:[#allocation2 + $0x18] sm:$0x2]  ;;  %v789_v7 = vld [vmem:[#allocation2 + $0x18] sm:$0x1]  ;;  %572 = vst [vmem:[#allocation2 + $0x14] sm:$0x1] %v571_v62  ;;  %v372_v11 = vor.u32 %v370_v0, %v369_v4  ;;  %v616_v14 = vsel %vm7585_vm6, %v364_v8, %v615_v5  ;;  %v585_v54 = vsel %vm7593_vm7, %v289_v40, %v584_v33 }
  0x22   : > { %v6821_v9 = vrot.slane %v695_v6, 9  ;;  %582 = vst [vmem:[#allocation2 + $0x24] sm:$0xf] %v581_v1  ;;  %v374_v22 = vrot.slane %v369_v4, 4  ;;  %v839_v53 = vld [vmem:[#allocation2 + $0x1c] sm:$0x8] }
  0x23   : > { %10931 = vst [vmem:[#allocation8_spill] sm:$0xff] %v10930_v12  ;;  %v837_v13 = vld [vmem:[#allocation2 + $0x4] sm:$0x8]  ;;  %v373_v27 = vsel %vm7577_vm4, %v365_v10, %v372_v11  ;;  %v7669_v32 = vld [vmem:[#allocation2 + $0x18] sm:$0xf0]  ;;  %v7673_v59 = vrot.slane %v376_v48, 7 }
  0x24   : > { %583 = vst.msk [vmem:[#allocation2 + $0x28] sm:$0xf] %vm560_vm2, %v288_v3  ;;  %v790_v15 = vsel %vm7593_vm7, %v6821_v9, %v789_v7  ;;  %v6837_v16 = vrot.slane %v837_v13, 11  ;;  %v7161_v29 = vld [vmem:[#allocation2] sm:$0xf0]  ;;  %v620_v44 = vsel %vm7593_vm7, %v374_v22, %v619_v17  ;;  %v384_v63 = vshrl.u32 %v7663_v55, 16 }
  0x25   : > { %617 = vst [vmem:[#allocation2 + $0x60] sm:$0xf] %v616_v14  ;;  %v928_v20 = vld [vmem:[#allocation2 + $0x8] sm:$0x1]  ;;  %v7162_v37 = vld [vmem:[#allocation2] sm:$0xe] }
  0x26   : > { %791 = vst [vmem:[#allocation2 + $0x18] sm:$0x1] %v790_v15  ;;  %v929_v24 = vsel %vm7627_vm8, %v6837_v16, %v928_v20  ;;  %v694_v25 = vld [vmem:[#allocation2 + $0xc] sm:$0x2]  ;;  %v786_v26 = vld [vmem:[#allocation2 + $0xc] sm:$0x1]  ;;  %v7163_v50 = vor.u32 %v7162_v37, %v7161_v29 }
  0x27   : > { %930 = vst [vmem:[#allocation2 + $0x8] sm:$0x1] %v929_v24  ;;  %v6820_v30 = vrot.slane %v694_v25, 9  ;;  %v838_v31 = vld [vmem:[#allocation2 + $0x10] sm:$0x8]  ;;  %v6839_v5 = vrot.slane %v839_v53, 11 }
  0x28   : > { %v6838_v38 = vrot.slane %v838_v31, 11  ;;  %v931_v39 = vld [vmem:[#allocation2 + $0x14] sm:$0x1]  ;;  %618 = vst.msk [vmem:[#allocation2 + $0x64] sm:$0xf] %vm560_vm2, %v373_v27  ;;  %v1589_v61 = vrot.slane %v7163_v50, 1  ;;  %v381_v50 = vor.u32 %v379_v60, %v7673_v59 }
  0x29   : > { %v787_v41 = vsel %vm7593_vm7, %v6820_v30, %v786_v26  ;;  %v696_v42 = vld [vmem:[#allocation2 + $0x24] sm:$0x2]  ;;  %v792_v43 = vld [vmem:[#allocation2 + $0x24] sm:$0x1]  ;;  %v7371_v51 = vld [vmem:[#allocation2 + $0xc] sm:$0xe] }
  0x2a   : > { %788 = vst [vmem:[#allocation2 + $0xc] sm:$0x1] %v787_v41  ;;  %v932_v45 = vsel %vm7627_vm8, %v6838_v38, %v931_v39  ;;  %v6822_v46 = vrot.slane %v696_v42, 9  ;;  %v7507_v21 = vld [vmem:[#allocation2 + $0xc] sm:$0xe]  ;;  %v382_v7 = vrot.slane %v7673_v59, 4 }
  0x2b   : > { %933 = vst [vmem:[#allocation2 + $0x14] sm:$0x1] %v932_v45  ;;  %v7671_v57 = vld [vmem:[#allocation2 + $0x18] sm:$0xe]  ;;  %v7370_v2 = vld [vmem:[#allocation2 + $0xc] sm:$0xf0] }
  0x2c   : > { %v793_v52 = vsel %vm7593_vm7, %v6822_v46, %v792_v43  ;;  %621 = vst [vmem:[#allocation2 + $0x68] sm:$0x1] %v620_v44  ;;  %v7506_v4 = vld [vmem:[#allocation2 + $0xc] sm:$0xf0]  ;;  %v7187_v6 = vor.u32 %v7671_v57, %v7669_v32  ;;  %v7209_v16 = vld [vmem:[#allocation2 + $0x18] sm:$0xf0]  ;;  %v7372_v18 = vor.u32 %v7371_v51, %v7370_v2 }
  0x2d   : > { %v7657_v49 = vld [vmem:[#allocation2 + $0x18] sm:$0xff]   ;;  %794 = vst [vmem:[#allocation2 + $0x24] sm:$0x1] %v793_v52  ;;  %v7508_v20 = vor.u32 %v7507_v21, %v7506_v4  ;;  %v7691_v24 = vld [vmem:[#allocation2 + $0x24] sm:$0xf0]  ;;  %v386_v53 = vrot.slane %v384_v63, 7 }
  0x2e   : > { %1751 = vrot.lane.b32.xlu1 %v7657_v49, %s7522_s18  ;;  %2261 = vrot.lane.b32.xlu2 %v7657_v49, %s7523_s19  ;;  %v1019_v56 = vld [vmem:[#allocation2 + $0x8] sm:$0x1]  ;;  %579 = vst [vmem:[#allocation2 + $0x20] sm:$0x1] %v578_v47  ;;  %v1842_v8 = vshrl.u32 %v7657_v49, 16  ;;  %v1844_v17 = vshll.u32 %v7657_v49, 16 }
  0x2f   : > { %v1283_v58 = vunpack.c.l.b16 %v1019_v56  ;;  %586 = vst [vmem:[#allocation2 + $0x2c] sm:$0x1] %v585_v54  ;;  %v845_v62 = vld [vmem:[#allocation2 + $0x64] sm:$0x8]  ;;  %v7210_v26 = vld [vmem:[#allocation2 + $0x18] sm:$0xe] }
  0x30   : > { %v6845_v15 = vrot.slane %v845_v62, 11  ;;  %v840_v31 = vld [vmem:[#allocation2 + $0x28] sm:$0x8]  ;;  %v701_v33 = vld [vmem:[#allocation2 + $0x60] sm:$0x2]  ;;  %v2101_v34 = vrot.slane %v7372_v18, 1  ;;  %v7211_v45 = vor.u32 %v7210_v26, %v7209_v16 }
  0x31   : > { %v7677_v0 = vpack.c.b16 %v1283_v58, %v1283_v58  ;;  %v7679_v1 = vld [vmem:[#allocation2 + $0xc] sm:$0xff]   ;;  %v1592_v36 = vrot.slane %v7508_v20, 1  ;;  %v7173_v37 = vld [vmem:[#allocation2 + $0x60] sm:$0xf0]  ;;  %v7174_v38 = vld [vmem:[#allocation2 + $0x60] sm:$0xe] }
  0x32   : > { %v7681_v3 = vld [vmem:[#allocation2 + $0xc] sm:$0xff]   ;;  %v1087_v9 = vld [vmem:[#allocation2 + $0x14] sm:$0x1]  ;;  %v807_v44 = vld [vmem:[#allocation2 + $0x60] sm:$0x1]  ;;  %v6840_v46 = vrot.slane %v840_v31, 11  ;;  %v7175_v60 = vor.u32 %v7174_v38, %v7173_v37 }
  0x33   : > { %v1020_v10 = vld [vmem:[#allocation2 + $0x14] sm:$0x1]  ;;  %v1590_v11 = vrot.slane %v7677_v0, 1  ;;  %v1797_v13 = vunpack.c.l.b16 %v1087_v9  ;;  %v952_v25 = vld [vmem:[#allocation2 + $0x68] sm:$0x1]  ;;  %v6827_v47 = vrot.slane %v701_v33, 9 }
  0x34   : > { %v1284_v14 = vunpack.c.l.b16 %v1020_v10  ;;  %v7689_v22 = vld [vmem:[#allocation2 + $0x24] sm:$0xff]   ;;  %v953_v41 = vsel %vm7627_vm8, %v6845_v15, %v952_v25  ;;  %v693_v48 = vld [vmem:[#allocation2] sm:$0x2]  ;;  %v1846_v51 = vrot.slane %v1844_v17, 1  ;;  %v387_v54 = vshll.u32 %v7663_v55, 16  ;;  %v190_v18 = vld [vmem:[%s7567_s17 + $0x90] sm:$0xff] }
  0x35   : > { %v1591_v27 = vsel %vm1588_vm9, %v1589_v61, %v1590_v11  ;;  %v7694_v28 = vpack.c.b16 %v1797_v13, %v1797_v13  ;;  %v934_v30 = vld [vmem:[#allocation2 + $0x20] sm:$0x1]  ;;  %954 = vst [vmem:[#allocation2 + $0x68] sm:$0x1] %v953_v41  ;;  %v808_v56 = vsel %vm7593_vm7, %v6827_v47, %v807_v44  ;;  %v7374_v62 = vld [vmem:[#allocation2 + $0x24] sm:$0xe]  ;;  %v222_v59 = vpack.c.bf16 %v190_v18, %v190_v18 }
  0x36   : > { %v7696_v29 = vpack.c.b16 %v1284_v14, %v1284_v14  ;;  %1637 = vrot.lane.b32.xlu0 %v1591_v27, %s7524_s20  ;;  %1749 = vrot.lane.b32.xlu1 %v7679_v1, %s7522_s18  ;;  %v935_v42 = vsel %vm7627_vm8, %v6839_v5, %v934_v30  ;;  %v937_v43 = vld [vmem:[#allocation2 + $0x2c] sm:$0x1]  ;;  %v783_v58 = vld [vmem:[#allocation2] sm:$0x1]  ;;  %v6819_v2 = vrot.slane %v693_v48, 9  ;;  %v391_v4 = vrot.slane %v386_v53, 4 }
  0x37   : > { %v2102_v39 = vrot.slane %v7694_v28, 1  ;;  %936 = vst [vmem:[#allocation2 + $0x20] sm:$0x1] %v935_v42  ;;  %v938_v21 = vsel %vm7627_vm8, %v6840_v46, %v937_v43  ;;  %v622_v55 = vld [vmem:[#allocation2 + $0x6c] sm:$0xf]  ;;  %v2104_v9 = vrot.slane %v7187_v6, 1  ;;  %v389_v11 = vor.u32 %v387_v54, %v386_v53 }
  0x38   : > { %v1593_v40 = vrot.slane %v7696_v29, 1  ;;  %939 = vst [vmem:[#allocation2 + $0x2c] sm:$0x1] %v938_v21  ;;  %v626_v63 = vld [vmem:[#allocation2 + $0x74] sm:$0x1]  ;;  %v784_v5 = vsel %vm7593_vm7, %v6819_v2, %v783_v58  ;;  %v1331_v10 = vshll.u32 %v7681_v3, 16  ;;  %v623_v16 = vsel %vm7585_vm6, %v381_v50, %v622_v55 }
  0x39   : > { %v2103_v52 = vsel %vm1588_vm9, %v2101_v34, %v2102_v39  ;;  %809 = vst [vmem:[#allocation2 + $0x60] sm:$0x1] %v808_v56  ;;  %v1613_v14 = vrot.slane %v7175_v60, 1  ;;  %v2613_v15 = vrot.slane %v7211_v45, 1  ;;  %v627_v17 = vsel %vm7593_vm7, %v391_v4, %v626_v63  ;;  %v191_v20 = vld [vmem:[%s7567_s17 + $0x98] sm:$0xff] }
  0x3a   : > { %2149 = vrot.lane.b32.xlu2 %v2103_v52, %s7525_s21  ;;  %v1594_v61 = vsel %vm1588_vm9, %v1592_v36, %v1593_v40  ;;  %785 = vst [vmem:[#allocation2] sm:$0x1] %v784_v5  ;;  %v7733_v25 = vor.u32 %v1846_v51, %v1842_v8  ;;  %v390_v26 = vsel %vm7577_vm4, %v382_v7, %v389_v11  ;;  %v1832_v27 = vshll.u32 %v7679_v1, 16 }
  0x3b   : > { %624 = vst [vmem:[#allocation2 + $0x6c] sm:$0xf] %v623_v16  ;;  %v1329_v33 = vshrl.u32 %v7681_v3, 16  ;;  %v7375_v34 = vor.u32 %v7374_v62, %v7691_v24  ;;  %v7743_v36 = vrot.slane %v1331_v10, 1  ;;  %v223_v40 = vpack.c.bf16 %v191_v20, %v191_v20 }
  0x3c   : > { %v1027_v13 = vld [vmem:[#allocation2 + $0x68] sm:$0x1]  ;;  %625 = vst.msk [vmem:[#allocation2 + $0x70] sm:$0xf] %vm560_vm2, %v390_v26  ;;  %v1336_v52 = vshll.u32 %v7696_v29, 16  ;;  %v396_v60 = vshll.u32 %v222_v59, 16 }
  0x3d   : > { %v1291_v32 = vunpack.c.l.b16 %v1027_v13  ;;  %628 = vst [vmem:[#allocation2 + $0x74] sm:$0x1] %v627_v17  ;;  %v2616_v50 = vrot.slane %v7375_v34, 1  ;;  %v401_v55 = vshrl.u32 %v223_v40, 16  ;;  %v1324_v13 = vshll.u32 %v7677_v0, 16 }
  0x3e   : > { %1639 = vrot.lane.b32.xlu0 %v1594_v61, %s7524_s20  ;;  %2263 = vrot.lane.b32.xlu1 %v7689_v22, %s7523_s19  ;;  %v1088_v57 = vld [vmem:[#allocation2 + $0x20] sm:$0x1]  ;;  %v393_v61 = vshrl.u32 %v222_v59, 16  ;;  %v1837_v18 = vshll.u32 %v7694_v28, 16  ;;  %v629_v26 = vld [vmem:[#allocation2 + $0x78] sm:$0xf] }
  0x3f   : > { %v1155_v6 = vld [vmem:[#allocation2 + $0x20] sm:$0x1]  ;;  %v1798_v30 = vunpack.c.l.b16 %v1088_v57  ;;  %v1307_v49 = vpack.c.b16 %v1291_v32, %v1291_v32  ;;  %v1156_v8 = vld [vmem:[#allocation2 + $0x2c] sm:$0x1]  ;;  %vm2693_vm12 = vcmask 31744   ;;  %vm2726_vm13 = vcmask 64512  }
  0x40   : > { %v2309_v31 = vunpack.c.l.b16 %v1155_v6  ;;  %v2310_v38 = vunpack.c.l.b16 %v1156_v8  ;;  %v7142_v39 = vld [vmem:[#allocation2 + $0x60] sm:$0xff]   ;;  %v395_v32 = vrot.slane %v393_v61, 7  ;;  %v404_v6 = vshll.u32 %v223_v40, 16 }
  0x41   : > { %v1814_v37 = vpack.c.b16 %v1798_v30, %v1798_v30  ;;  %v1614_v41 = vrot.slane %v1307_v49, 1  ;;  %v1413_v42 = vshrl.u32 %v7142_v39, 16  ;;  %v1415_v43 = vshll.u32 %v7142_v39, 16  ;;  %v6948_v53 = vld [vmem:[#allocation2] sm:$0xff]  }
  0x42   : > { %v7745_v7 = vpack.c.b16 %v2309_v31, %v2309_v31  ;;  %v1420_v44 = vshll.u32 %v1307_v49, 16  ;;  %v7748_v48 = vpack.c.b16 %v2310_v38, %v2310_v38  ;;  %v702_v56 = vld [vmem:[#allocation2 + $0x6c] sm:$0x2]  ;;  %v810_v58 = vld [vmem:[#allocation2 + $0x6c] sm:$0x1]  ;;  %v1317_v17 = vshrl.u32 %v6948_v53, 16 }
  0x43   : > { %v2105_v45 = vrot.slane %v1814_v37, 1  ;;  %v1849_v47 = vshll.u32 %v1814_v37, 16  ;;  %v1615_v24 = vsel %vm1588_vm9, %v1613_v14, %v1614_v41  ;;  %v1417_v51 = vrot.slane %v1415_v43, 1  ;;  %v846_v4 = vld [vmem:[#allocation2 + $0x70] sm:$0x8] }
  0x44   : > { %v2614_v46 = vrot.slane %v7745_v7, 1  ;;  %1653 = vrot.lane.b32.xlu2 %v1615_v24, %s7524_s20  ;;  %v2617_v2 = vrot.slane %v7748_v48, 1  ;;  %v6828_v29 = vrot.slane %v702_v56, 9  ;;  %v1422_v5 = vrot.slane %v1420_v44, 1  ;;  %v955_v11 = vld [vmem:[#allocation2 + $0x74] sm:$0x1] }
  0x45   : > { %v2106_v54 = vsel %vm1588_vm9, %v2104_v9, %v2105_v45  ;;  %v1851_v62 = vrot.slane %v1849_v47, 1  ;;  %v1418_v63 = vor.u32 %v1417_v51, %v1413_v42  ;;  %v1319_v9 = vshll.u32 %v6948_v53, 16  ;;  %v633_v49 = vld [vmem:[#allocation2 + $0x80] sm:$0x1]  ;;  %v178_v37 = vld [vmem:[%s7567_s17 + $0x30] sm:$0xff] }
  0x46   : > { %v2615_v21 = vsel %vm1588_vm9, %v2613_v15, %v2614_v46  ;;  %2151 = vrot.lane.b32.xlu0 %v2106_v54, %s7525_s21  ;;  %v6846_v10 = vrot.slane %v846_v4, 11  ;;  %v1830_v14 = vshrl.u32 %v7679_v1, 16  ;;  %v1834_v15 = vrot.slane %v1832_v27, 1  ;;  %v7376_v24 = vld [vmem:[#allocation2 + $0x6c] sm:$0xf0] }
  0x47   : > { %2661 = vrot.lane.b32.xlu1 %v2615_v21, %s7526_s22  ;;  %v811_v16 = vsel %vm7593_vm7, %v6828_v29, %v810_v58  ;;  %v1852_v57 = vsel %vm1315_vm10, %v7733_v25, %v1851_v62  ;;  %v2618_v0 = vsel %vm1588_vm9, %v2616_v50, %v2617_v2  ;;  %v403_v1 = vrot.slane %v401_v55, 7  ;;  %v7377_v61 = vld [vmem:[#allocation2 + $0x6c] sm:$0xe] }
  0x48   : > { %812 = vst [vmem:[#allocation2 + $0x6c] sm:$0x1] %v811_v16  ;;  %v956_v20 = vsel %vm7627_vm8, %v6846_v10, %v955_v11  ;;  %v1423_v27 = vsel %vm1315_vm10, %v1418_v63, %v1422_v5  ;;  %v1321_v30 = vrot.slane %v1319_v9, 1  ;;  %v398_v31 = vor.u32 %v396_v60, %v395_v32 }
  0x49   : > { %957 = vst [vmem:[#allocation2 + $0x74] sm:$0x1] %v956_v20  ;;  %v399_v28 = vrot.slane %v395_v32, 4  ;;  %v2356_v8 = vshll.u32 %v7689_v22, 16  ;;  %v406_v34 = vor.u32 %v404_v6, %v403_v1  ;;  %v408_v59 = vrot.slane %v403_v1, 4 }
  0x4a   : > { %v1334_v38 = vor.u32 %v7743_v36, %v1329_v33  ;;  %v1338_v39 = vrot.slane %v1336_v52, 1  ;;  %v1835_v40 = vor.u32 %v1834_v15, %v1830_v14  ;;  %v630_v41 = vsel %vm7585_vm6, %v398_v31, %v629_v26  ;;  %v1021_v36 = vld [vmem:[#allocation2 + $0x20] sm:$0x1] }
  0x4b   : > { %v1839_v42 = vrot.slane %v1837_v18, 1  ;;  %v407_v43 = vsel %vm7577_vm4, %v399_v28, %v406_v34  ;;  %631 = vst [vmem:[#allocation2 + $0x78] sm:$0xf] %v630_v41  ;;  %v634_v44 = vsel %vm7593_vm7, %v408_v59, %v633_v49  ;;  %v1322_v45 = vor.u32 %v1321_v30, %v1317_v17  ;;  %v192_v15 = vld [vmem:[%s7567_s17 + $0xa0] sm:$0xff]  ;;  %v193_v34 = vld [vmem:[%s7567_s17 + $0xa8] sm:$0xff] }
  0x4c   : > { %2023 = vrot.lane.b32.xlu2 %v1852_v57, %s7527_s23  ;;  %v1326_v33 = vrot.slane %v1324_v13, 1  ;;  %632 = vst.msk [vmem:[#allocation2 + $0x7c] sm:$0xf] %vm560_vm2, %v407_v43  ;;  %v210_v46 = vpack.c.bf16 %v178_v37, %v178_v37  ;;  %v2354_v50 = vshrl.u32 %v7689_v22, 16  ;;  %v1339_v51 = vsel %vm1315_vm10, %v1334_v38, %v1338_v39  ;;  %v179_v22 = vld [vmem:[%s7567_s17 + $0x38] sm:$0xff] }
  0x4d   : > { %635 = vst [vmem:[#allocation2 + $0x80] sm:$0x1] %v634_v44  ;;  %v2358_v53 = vrot.slane %v2356_v8, 1  ;;  %v1840_v54 = vsel %vm1315_vm10, %v1835_v40, %v1839_v42  ;;  %v2361_v56 = vshll.u32 %v7748_v48, 16  ;;  %v1285_v58 = vunpack.c.l.b16 %v1021_v36  ;;  %v587_v8 = vld [vmem:[#allocation2 + $0x30] sm:$0xf] }
  0x4e   : > { %2663 = vrot.lane.b32.xlu0 %v2618_v0, %s7526_s22  ;;  %v1327_v60 = vsel %vm1315_vm10, %v1322_v45, %v1326_v33  ;;  %v2349_v62 = vshll.u32 %v7745_v7, 16  ;;  %v291_v2 = vshrl.u32 %v210_v46, 16  ;;  %v294_v4 = vshll.u32 %v210_v46, 16  ;;  %v591_v43 = vld [vmem:[#allocation2 + $0x38] sm:$0x1] }
  0x4f   : > { %1524 = vrot.lane.b32.xlu1 %v1423_v27, %s7528_s24  ;;  %v7784_v47 = vld [vmem:[#allocation2 + $0x6c] sm:$0xff]   ;;  %v2359_v5 = vor.u32 %v2358_v53, %v2354_v50  ;;  %v2363_v7 = vrot.slane %v2361_v56, 1  ;;  %v7798_v11 = vpack.c.b16 %v1285_v58, %v1285_v58  ;;  %v7378_v1 = vor.u32 %v7377_v61, %v7376_v24 }
  0x50   : > { %v1095_v52 = vld [vmem:[#allocation2 + $0x74] sm:$0x1]  ;;  %v1926_v55 = vshrl.u32 %v7784_v47, 16  ;;  %v1928_v63 = vshll.u32 %v7784_v47, 16  ;;  %v2351_v16 = vrot.slane %v2349_v62, 1  ;;  %v293_v32 = vrot.slane %v291_v2, 7 }
  0x51   : > { %v1805_v21 = vunpack.c.l.b16 %v1095_v52  ;;  %v211_v6 = vpack.c.bf16 %v179_v22, %v179_v22  ;;  %v224_v31 = vpack.c.bf16 %v192_v15, %v192_v15  ;;  %v2364_v28 = vsel %vm1315_vm10, %v2359_v5, %v2363_v7  ;;  %v7821_v22 = vld [vmem:[#allocation2 + $0x24] sm:$0xff]  }
  0x52   : > { %v703_v9 = vld [vmem:[#allocation2 + $0x78] sm:$0x2]  ;;  %v813_v48 = vld [vmem:[#allocation2 + $0x78] sm:$0x1]  ;;  %v1930_v17 = vrot.slane %v1928_v63, 1  ;;  %v296_v30 = vor.u32 %v294_v4, %v293_v32  ;;  %v1348_v49 = vshll.u32 %v7798_v11, 16  ;;  %v2352_v59 = vsel %vm1315_vm10, %v7733_v25, %v2351_v16 }
  0x53   : > { %v1821_v29 = vpack.c.b16 %v1805_v21, %v1805_v21  ;;  %v6829_v13 = vrot.slane %v703_v9, 9  ;;  %v847_v14 = vld [vmem:[#allocation2 + $0x7c] sm:$0x8]  ;;  %v2125_v38 = vrot.slane %v7378_v1, 1  ;;  %v299_v40 = vshrl.u32 %v211_v6, 16 }
  0x54   : > { %1510 = vrot.lane.b32.xlu2 %v1339_v51, %s7528_s24  ;;  %v6847_v18 = vrot.slane %v847_v14, 11  ;;  %v958_v20 = vld [vmem:[#allocation2 + $0x80] sm:$0x1]  ;;  %v1931_v26 = vor.u32 %v1930_v17, %v1926_v55  ;;  %v302_v41 = vshll.u32 %v211_v6, 16  ;;  %v588_v42 = vsel %vm7585_vm6, %v296_v30, %v587_v8  ;;  %v7221_v50 = vld [vmem:[#allocation2 + $0x78] sm:$0xf0] }
  0x55   : > { %v1933_v10 = vshll.u32 %v1821_v29, 16  ;;  %v814_v0 = vsel %vm7593_vm7, %v6829_v13, %v813_v48  ;;  %v2126_v39 = vrot.slane %v1821_v29, 1  ;;  %v225_v44 = vpack.c.bf16 %v193_v34, %v193_v34  ;;  %589 = vst [vmem:[#allocation2 + $0x30] sm:$0xf] %v588_v42  ;;  %v7222_v51 = vld [vmem:[#allocation2 + $0x78] sm:$0xe] }
  0x56   : > { %1508 = vrot.lane.b32.xlu0 %v1327_v60, %s7528_s24  ;;  %815 = vst [vmem:[#allocation2 + $0x78] sm:$0x1] %v814_v0  ;;  %v959_v27 = vsel %vm7627_vm8, %v6847_v18, %v958_v20  ;;  %v410_v45 = vshrl.u32 %v224_v31, 16  ;;  %v1350_v33 = vrot.slane %v1348_v49, 1  ;;  %v297_v36 = vrot.slane %v293_v32, 4  ;;  %v180_v14 = vld [vmem:[%s7567_s17 + $0x40] sm:$0xff] }
  0x57   : > { %2021 = vrot.lane.b32.xlu1 %v1840_v54, %s7527_s23  ;;  %v1935_v57 = vrot.slane %v1933_v10, 1  ;;  %960 = vst [vmem:[#allocation2 + $0x80] sm:$0x1] %v959_v27  ;;  %v301_v46 = vrot.slane %v299_v40, 7  ;;  %v413_v24 = vshll.u32 %v224_v31, 16  ;;  %v418_v53 = vshrl.u32 %v225_v44, 16 }
  0x58   : > { %v412_v52 = vrot.slane %v410_v45, 7  ;;  %v2127_v21 = vsel %vm1588_vm9, %v2125_v38, %v2126_v39  ;;  %v421_v61 = vshll.u32 %v225_v44, 16  ;;  %v636_v60 = vld [vmem:[#allocation2 + $0x84] sm:$0xf]  ;;  %v7509_v4 = vld [vmem:[#allocation2 + $0x24] sm:$0xf0]  ;;  %v1351_v15 = vsel %vm1315_vm10, %v7733_v25, %v1350_v33 }
  0x59   : > { %v1936_v37 = vsel %vm1315_vm10, %v1931_v26, %v1935_v57  ;;  %v304_v56 = vor.u32 %v302_v41, %v301_v46  ;;  %v306_v58 = vrot.slane %v301_v46, 4  ;;  %v1089_v9 = vld [vmem:[#allocation2 + $0x2c] sm:$0x1]  ;;  %v7510_v48 = vld [vmem:[#allocation2 + $0x24] sm:$0xe]  ;;  %v420_v13 = vrot.slane %v418_v53, 7 }
  0x5a   : > { %v415_v55 = vor.u32 %v413_v24, %v412_v52  ;;  %v416_v63 = vrot.slane %v412_v52, 4  ;;  %v7223_v17 = vor.u32 %v7222_v51, %v7221_v50  ;;  %v7164_v18 = vld [vmem:[#allocation2 + $0x18] sm:$0xf0]  ;;  %v640_v1 = vld [vmem:[#allocation2 + $0x8c] sm:$0x1]  ;;  %v1799_v26 = vunpack.c.l.b16 %v1089_v9 }
  0x5b   : > { %v305_v10 = vsel %vm7577_vm4, %v297_v36, %v304_v56  ;;  %v592_v7 = vsel %vm7593_vm7, %v306_v58, %v591_v43  ;;  %v423_v32 = vor.u32 %v421_v61, %v420_v13  ;;  %v425_v57 = vrot.slane %v420_v13, 4  ;;  %v7165_v6 = vld [vmem:[#allocation2 + $0x18] sm:$0xe]  ;;  %v181_v42 = vld [vmem:[%s7567_s17 + $0x48] sm:$0xff] }
  0x5c   : > { %2535 = vrot.lane.b32.xlu2 %v2364_v28, %s7529_s25  ;;  %590 = vst.msk [vmem:[#allocation2 + $0x34] sm:$0xf] %vm560_vm2, %v305_v10  ;;  %v637_v0 = vsel %vm7585_vm6, %v415_v55, %v636_v60  ;;  %v697_v27 = vld [vmem:[#allocation2 + $0x30] sm:$0x2]  ;;  %v795_v30 = vld [vmem:[#allocation2 + $0x30] sm:$0x1]  ;;  %v212_v25 = vpack.c.bf16 %v180_v14, %v180_v14  ;;  %v7166_v38 = vor.u32 %v7165_v6, %v7164_v18 }
  0x5d   : > { %v7816_v54 = vld [vmem:[#allocation2 + $0x78] sm:$0xff]   ;;  %593 = vst [vmem:[#allocation2 + $0x38] sm:$0x1] %v592_v7  ;;  %v6823_v49 = vrot.slane %v697_v27, 9  ;;  %v424_v8 = vsel %vm7577_vm4, %v416_v63, %v423_v32  ;;  %v2637_v34 = vrot.slane %v7223_v17, 1  ;;  %v1815_v40 = vpack.c.b16 %v1799_v26, %v1799_v26  ;;  %v7856_v60 = vld [vmem:[#allocation2 + $0x6c] sm:$0xff]  }
  0x5e   : > { %2533 = vrot.lane.b32.xlu0 %v2352_v59, %s7529_s25  ;;  %v2438_v62 = vshrl.u32 %v7816_v54, 16  ;;  %v2440_v2 = vshll.u32 %v7816_v54, 16  ;;  %v1163_v29 = vld [vmem:[#allocation2 + $0x80] sm:$0x1]  ;;  %638 = vst [vmem:[#allocation2 + $0x84] sm:$0xf] %v637_v0  ;;  %v7511_v41 = vor.u32 %v7510_v48, %v7509_v4  ;;  %v213_v53 = vpack.c.bf16 %v181_v42, %v181_v42 }
  0x5f   : > { %2037 = vrot.lane.b32.xlu1 %v1936_v37, %s7527_s23  ;;  %v2317_v5 = vunpack.c.l.b16 %v1163_v29  ;;  %v641_v37 = vsel %vm7593_vm7, %v425_v57, %v640_v1  ;;  %639 = vst.msk [vmem:[#allocation2 + $0x88] sm:$0xf] %vm560_vm2, %v424_v8  ;;  %v308_v43 = vshrl.u32 %v212_v25, 16  ;;  %v311_v44 = vshll.u32 %v212_v25, 16  ;;  %v7213_v7 = vld [vmem:[#allocation2 + $0x30] sm:$0xe] }
  0x60   : > { %v2442_v16 = vrot.slane %v2440_v2, 1  ;;  %642 = vst [vmem:[#allocation2 + $0x8c] sm:$0x1] %v641_v37  ;;  %v1595_v51 = vrot.slane %v7166_v38, 1  ;;  %v1596_v52 = vrot.slane %v7798_v11, 1  ;;  %v2107_v56 = vrot.slane %v7511_v41, 1 }
  0x61   : > { %v2333_v20 = vpack.c.b16 %v2317_v5, %v2317_v5  ;;  %v7850_v50 = vrot.slane %v308_v43, 7  ;;  %v2108_v58 = vrot.slane %v1815_v40, 1  ;;  %v1856_v4 = vshll.u32 %v7821_v22, 16  ;;  %v1028_v5 = vld [vmem:[#allocation2 + $0x74] sm:$0x1] }
  0x62   : > { %v7837_v31 = vor.u32 %v2442_v16, %v2438_v62  ;;  %v7858_v62 = vld [vmem:[#allocation2 + $0x6c] sm:$0xf0]  ;;  %v316_v9 = vshrl.u32 %v213_v53, 16  ;;  %v1854_v48 = vshrl.u32 %v7821_v22, 16  ;;  %v1861_v32 = vshll.u32 %v1815_v40, 16 }
  0x63   : > { %v2445_v28 = vshll.u32 %v2333_v20, 16  ;;  %v2638_v59 = vrot.slane %v2333_v20, 1  ;;  %v841_v45 = vld [vmem:[#allocation2 + $0x34] sm:$0x8]  ;;  %v313_v2 = vor.u32 %v311_v44, %v7850_v50  ;;  %v2109_v16 = vsel %vm1588_vm9, %v2107_v56, %v2108_v58  ;;  %v598_v42 = vld [vmem:[#allocation2 + $0x44] sm:$0x1] }
  0x64   : > { %2165 = vrot.lane.b32.xlu2 %v2127_v21, %s7525_s21  ;;  %v6841_v46 = vrot.slane %v841_v45, 11  ;;  %v940_v24 = vld [vmem:[#allocation2 + $0x38] sm:$0x1]  ;;  %v594_v21 = vld [vmem:[#allocation2 + $0x3c] sm:$0xf]  ;;  %v1858_v20 = vrot.slane %v1856_v4, 1  ;;  %v1292_v57 = vunpack.c.l.b16 %v1028_v5 }
  0x65   : > { %v2447_v39 = vrot.slane %v2445_v28, 1  ;;  %v2639_v36 = vsel %vm1588_vm9, %v2637_v34, %v2638_v59  ;;  %v704_v11 = vld [vmem:[#allocation2 + $0x84] sm:$0x2]  ;;  %v816_v29 = vld [vmem:[#allocation2 + $0x84] sm:$0x1]  ;;  %v595_v63 = vsel %vm7585_vm6, %v313_v2, %v594_v21  ;;  %v318_v6 = vrot.slane %v316_v9, 7 }
  0x66   : > { %1765 = vrot.lane.b32.xlu0 %v7784_v47, %s7522_s18  ;;  %v796_v47 = vsel %vm7593_vm7, %v6823_v49, %v795_v30  ;;  %v941_v61 = vsel %vm7627_vm8, %v6841_v46, %v940_v24  ;;  %v6830_v55 = vrot.slane %v704_v11, 9  ;;  %596 = vst [vmem:[#allocation2 + $0x3c] sm:$0xf] %v595_v63  ;;  %v7212_v10 = vld [vmem:[#allocation2 + $0x30] sm:$0xf0]  ;;  %v319_v26 = vshll.u32 %v213_v53, 16 }
  0x67   : > { %1512 = vrot.lane.b32.xlu1 %v1351_v15, %s7528_s24  ;;  %797 = vst [vmem:[#allocation2 + $0x30] sm:$0x1] %v796_v47  ;;  %v2448_v33 = vsel %vm1315_vm10, %v7837_v31, %v2447_v39  ;;  %v1597_v15 = vsel %vm1588_vm9, %v1595_v51, %v1596_v52  ;;  %v848_v17 = vld [vmem:[#allocation2 + $0x88] sm:$0x8]  ;;  %v961_v18 = vld [vmem:[#allocation2 + $0x8c] sm:$0x1]  ;;  %v7214_v1 = vor.u32 %v7213_v7, %v7212_v10 }
  0x68   : > { %942 = vst [vmem:[#allocation2 + $0x38] sm:$0x1] %v941_v61  ;;  %v817_v14 = vsel %vm7593_vm7, %v6830_v55, %v816_v29  ;;  %v6848_v0 = vrot.slane %v848_v17, 11  ;;  %v1427_v49 = vshll.u32 %v7856_v60, 16  ;;  %v1859_v8 = vor.u32 %v1858_v20, %v1854_v48  ;;  %v7885_v47 = vld [vmem:[#allocation2 + $0x6c] sm:$0xe] }
  0x69   : > { %818 = vst [vmem:[#allocation2 + $0x84] sm:$0x1] %v817_v14  ;;  %v1863_v34 = vrot.slane %v1861_v32, 1  ;;  %v7882_v59 = vpack.c.b16 %v1292_v57, %v1292_v57  ;;  %v314_v37 = vrot.slane %v7850_v50, 4  ;;  %v321_v40 = vor.u32 %v319_v26, %v318_v6  ;;  %v194_v53 = vld [vmem:[%s7567_s17 + $0xb0] sm:$0xff]  ;;  %v195_v21 = vld [vmem:[%s7567_s17 + $0xb8] sm:$0xff] }
  0x6a   : > { %v962_v25 = vsel %vm7627_vm8, %v6848_v0, %v961_v18  ;;  %v323_v41 = vrot.slane %v318_v6, 4  ;;  %v1429_v51 = vrot.slane %v1427_v49, 1  ;;  %v7905_v55 = vld [vmem:[#allocation2 + $0x24] sm:$0xff]   ;;  %v226_v5 = vpack.c.bf16 %v194_v53, %v194_v53  ;;  %v1022_v20 = vld [vmem:[#allocation2 + $0x2c] sm:$0x1] }
  0x6b   : > { %963 = vst [vmem:[#allocation2 + $0x8c] sm:$0x1] %v962_v25  ;;  %v1432_v52 = vshll.u32 %v7882_v59, 16  ;;  %v1864_v56 = vsel %vm1315_vm10, %v1859_v8, %v1863_v34  ;;  %v322_v58 = vsel %vm7577_vm4, %v314_v37, %v321_v40  ;;  %v7907_v63 = vld [vmem:[#allocation2 + $0x24] sm:$0xf0]  ;;  %v227_v9 = vpack.c.bf16 %v195_v21, %v195_v21 }
  0x6c   : > { %2549 = vrot.lane.b32.xlu2 %v2448_v33, %s7529_s25  ;;  %v1096_v33 = vld [vmem:[#allocation2 + $0x80] sm:$0x1]  ;;  %v599_v61 = vsel %vm7593_vm7, %v323_v41, %v598_v42  ;;  %597 = vst.msk [vmem:[#allocation2 + $0x40] sm:$0xf] %vm560_vm2, %v322_v58  ;;  %v427_v14 = vshrl.u32 %v226_v5, 16  ;;  %v7381_v18 = vor.u32 %v7885_v47, %v7858_v62  ;;  %v430_v57 = vshll.u32 %v226_v5, 16 }
  0x6d   : > { %v698_v38 = vld [vmem:[#allocation2 + $0x3c] sm:$0x2]  ;;  %v798_v43 = vld [vmem:[#allocation2 + $0x3c] sm:$0x1]  ;;  %v1806_v29 = vunpack.c.l.b16 %v1096_v33  ;;  %600 = vst [vmem:[#allocation2 + $0x44] sm:$0x1] %v599_v61 }
  0x6e   : > { %2277 = vrot.lane.b32.xlu0 %v7816_v54, %s7523_s19  ;;  %v7868_v13 = vld [vmem:[#allocation2 + $0x30] sm:$0xff]   ;;  %v6824_v46 = vrot.slane %v698_v38, 9  ;;  %v1434_v7 = vrot.slane %v1432_v52, 1  ;;  %v438_v17 = vshll.u32 %v227_v9, 16  ;;  %v429_v32 = vrot.slane %v427_v14, 7 }
  0x6f   : > { %2677 = vrot.lane.b32.xlu1 %v2639_v36, %s7526_s22  ;;  %v1157_v27 = vld [vmem:[#allocation2 + $0x38] sm:$0x1]  ;;  %v2368_v30 = vshll.u32 %v7868_v13, 16  ;;  %v2366_v44 = vshrl.u32 %v7868_v13, 16  ;;  %v1425_v36 = vshrl.u32 %v7856_v60, 16  ;;  %vm2759_vm14 = vcmask 97280  }
  0x70   : > { %v2311_v28 = vunpack.c.l.b16 %v1157_v27  ;;  %v799_v2 = vsel %vm7593_vm7, %v6824_v46, %v798_v43  ;;  %v7917_v6 = vld [vmem:[#allocation2 + $0x84] sm:$0xff]   ;;  %v432_v8 = vor.u32 %v430_v57, %v429_v32  ;;  %v433_v62 = vrot.slane %v429_v32, 4  ;;  %v7198_v38 = vld [vmem:[#allocation2 + $0x78] sm:$0xe]  ;;  %v1090_v40 = vld [vmem:[#allocation2 + $0x38] sm:$0x1] }
  0x71   : > { %v2370_v45 = vrot.slane %v2368_v30, 1  ;;  %v1430_v10 = vor.u32 %v1429_v51, %v1425_v36  ;;  %800 = vst [vmem:[#allocation2 + $0x3c] sm:$0x1] %v799_v2  ;;  %v7919_v26 = vld [vmem:[#allocation2 + $0x84] sm:$0xf0]  ;;  %v1355_v36 = vshll.u32 %v7905_v55, 16 }
  0x72   : > { %v2327_v39 = vpack.c.b16 %v2311_v28, %v2311_v28  ;;  %v7383_v27 = vld [vmem:[#allocation2 + $0x24] sm:$0xe]  ;;  %v7197_v28 = vld [vmem:[#allocation2 + $0x78] sm:$0xf0]  ;;  %v643_v42 = vld [vmem:[#allocation2 + $0x90] sm:$0xf] }
  0x73   : > { %v7901_v4 = vor.u32 %v2370_v45, %v2366_v44  ;;  %v1435_v30 = vsel %vm1315_vm10, %v1430_v10, %v1434_v7  ;;  %v842_v49 = vld [vmem:[#allocation2 + $0x40] sm:$0x8]  ;;  %v647_v43 = vld [vmem:[#allocation2 + $0x98] sm:$0x1]  ;;  %v1164_v44 = vld [vmem:[#allocation2 + $0x8c] sm:$0x1]  ;;  %v7384_v53 = vor.u32 %v7383_v27, %v7907_v63 }
  0x74   : > { %1753 = vrot.lane.b32.xlu2 %v7821_v22, %s7522_s18  ;;  %v2619_v22 = vrot.slane %v7214_v1, 1  ;;  %v2620_v24 = vrot.slane %v2327_v39, 1  ;;  %v2373_v50 = vshll.u32 %v2327_v39, 16  ;;  %v1286_v39 = vunpack.c.l.b16 %v1022_v20  ;;  %v943_v47 = vld [vmem:[#allocation2 + $0x44] sm:$0x1] }
  0x75   : > { %v1616_v46 = vrot.slane %v7381_v18, 1  ;;  %v2318_v21 = vunpack.c.l.b16 %v1164_v44  ;;  %v1357_v61 = vrot.slane %v1355_v36, 1  ;;  %v7386_v5 = vld [vmem:[#allocation2 + $0x84] sm:$0xe]  ;;  %v7947_v10 = vld [vmem:[#allocation2 + $0x3c] sm:$0xf0] }
  0x76   : > { %1641 = vrot.lane.b32.xlu0 %v1597_v15, %s7524_s20  ;;  %v2621_v11 = vsel %vm1588_vm9, %v2619_v22, %v2620_v24  ;;  %v2375_v48 = vrot.slane %v2373_v50, 1  ;;  %v435_v15 = vshrl.u32 %v227_v9, 16  ;;  %v6842_v22 = vrot.slane %v842_v49, 11 }
  0x77   : > { %2153 = vrot.lane.b32.xlu1 %v2109_v16, %s7525_s21  ;;  %v7911_v16 = vpack.c.b16 %v1806_v29, %v1806_v29  ;;  %v1617_v24 = vrot.slane %v7882_v59, 1  ;;  %v644_v50 = vsel %vm7585_vm6, %v432_v8, %v643_v42  ;;  %v1302_v52 = vpack.c.b16 %v1286_v39, %v1286_v39 }
  0x78   : > { %v437_v0 = vrot.slane %v435_v15, 7  ;;  %v2376_v1 = vsel %vm1315_vm10, %v7901_v4, %v2375_v48  ;;  %v944_v33 = vsel %vm7627_vm8, %v6842_v22, %v943_v47  ;;  %645 = vst [vmem:[#allocation2 + $0x90] sm:$0xf] %v644_v50  ;;  %v1353_v59 = vshrl.u32 %v7905_v55, 16  ;;  %v7945_v48 = vld [vmem:[#allocation2 + $0x3c] sm:$0xff]  }
  0x79   : > { %v1945_v25 = vshll.u32 %v7911_v16, 16  ;;  %945 = vst [vmem:[#allocation2 + $0x44] sm:$0x1] %v944_v33  ;;  %v1360_v2 = vshll.u32 %v1302_v52, 16  ;;  %v2452_v63 = vshll.u32 %v7917_v6, 16  ;;  %v2129_v7 = vrot.slane %v7911_v16, 1 }
  0x7a   : > { %v440_v34 = vor.u32 %v438_v17, %v437_v0  ;;  %v442_v37 = vrot.slane %v437_v0, 4  ;;  %v2334_v14 = vpack.c.b16 %v2318_v21, %v2318_v21  ;;  %v1598_v18 = vrot.slane %v7384_v53, 1  ;;  %v1029_v53 = vld [vmem:[#allocation2 + $0x80] sm:$0x1] }
  0x7b   : > { %v1947_v45 = vrot.slane %v1945_v25, 1  ;;  %v1358_v20 = vor.u32 %v1357_v61, %v1353_v59  ;;  %v1362_v32 = vrot.slane %v1360_v2, 1  ;;  %v1599_v57 = vrot.slane %v1302_v52, 1 }
  0x7c   : > { %2265 = vrot.lane.b32.xlu2 %v7868_v13, %s7523_s19  ;;  %v441_v41 = vsel %vm7577_vm4, %v433_v62, %v440_v34  ;;  %v648_v51 = vsel %vm7593_vm7, %v442_v37, %v647_v43  ;;  %v2450_v25 = vshrl.u32 %v7917_v6, 16  ;;  %v2457_v49 = vshll.u32 %v2334_v14, 16 }
  0x7d   : > { %646 = vst.msk [vmem:[#allocation2 + $0x94] sm:$0xf] %vm560_vm2, %v441_v41  ;;  %v1948_v58 = vsel %vm1315_vm10, %v7837_v31, %v1947_v45  ;;  %v1363_v34 = vsel %vm1315_vm10, %v1358_v20, %v1362_v32  ;;  %v7387_v37 = vor.u32 %v7386_v5, %v7919_v26  ;;  %v1600_v47 = vsel %vm1588_vm9, %v1598_v18, %v1599_v57 }
  0x7e   : > { %2025 = vrot.lane.b32.xlu0 %v1864_v56, %s7527_s23  ;;  %v1800_v56 = vunpack.c.l.b16 %v1090_v40  ;;  %649 = vst [vmem:[#allocation2 + $0x98] sm:$0x1] %v648_v51  ;;  %v182_v40 = vld [vmem:[%s7567_s17 + $0x50] sm:$0xff]  ;;  %v2459_v43 = vrot.slane %v2457_v49, 1  ;;  %v2641_v45 = vrot.slane %v2334_v14, 1  ;;  %v2380_v36 = vshll.u32 %v7945_v48, 16 }
  0x7f   : > { %2665 = vrot.lane.b32.xlu1 %v2621_v11, %s7526_s22  ;;  %v1618_v11 = vsel %vm1588_vm9, %v1616_v46, %v1617_v24  ;;  %v705_v0 = vld [vmem:[#allocation2 + $0x90] sm:$0x2]  ;;  %v2640_v26 = vrot.slane %v7387_v37, 1  ;;  %v7188_v46 = vld [vmem:[#allocation2 + $0x30] sm:$0xf0]  ;;  %v214_v50 = vpack.c.bf16 %v182_v40, %v182_v40  ;;  %v2378_v52 = vshrl.u32 %v7945_v48, 16 }
  0x80   : > { %v7951_v15 = vpack.c.b16 %v1800_v56, %v1800_v56  ;;  %v1158_v16 = vld [vmem:[#allocation2 + $0x44] sm:$0x1]  ;;  %v7189_v24 = vld [vmem:[#allocation2 + $0x30] sm:$0xe]  ;;  %v2382_v61 = vrot.slane %v2380_v36, 1  ;;  %vm2792_vm15 = vcmask 130048  }
  0x81   : > { %v2642_v21 = vsel %vm1588_vm9, %v2640_v26, %v2641_v45  ;;  %v7190_v56 = vor.u32 %v7189_v24, %v7188_v46  ;;  %v325_v59 = vshrl.u32 %v214_v50, 16  ;;  %v7177_v14 = vld [vmem:[#allocation2 + $0x78] sm:$0xe]  ;;  %v605_v45 = vld [vmem:[#allocation2 + $0x50] sm:$0x1]  ;;  %vm2825_vm0 = vcmask 162816  }
  0x82   : > { %v1873_v8 = vshll.u32 %v7951_v15, 16  ;;  %v2111_v32 = vrot.slane %v7951_v15, 1  ;;  %vm10880_vm1 = vcmask 195584   ;;  %vm10879_vm3 = vcmask 228352  }
  0x83   : > { %v327_v18 = vrot.slane %v325_v59, 7  ;;  %v2110_v20 = vrot.slane %v7190_v56, 1  ;;  %vm10877_vm5 = vcmask 293888  }
  0x84   : > { %1526 = vrot.lane.b32.xlu2 %v1435_v30, %s7528_s24  ;;  %v849_v17 = vld [vmem:[#allocation2 + $0x94] sm:$0x8]  ;;  %v6831_v30 = vrot.slane %v705_v0, 9  ;;  %v1875_v44 = vrot.slane %v1873_v8, 1  ;;  %v601_v0 = vld [vmem:[#allocation2 + $0x48] sm:$0xf] }
  0x85   : > { %v6849_v27 = vrot.slane %v849_v17, 11  ;;  %v964_v62 = vld [vmem:[#allocation2 + $0x98] sm:$0x1]  ;;  %v1293_v17 = vunpack.c.l.b16 %v1029_v53  ;;  %v2112_v37 = vsel %vm1588_vm9, %v2110_v20, %v2111_v32 }
  0x86   : > { %2537 = vrot.lane.b32.xlu0 %v2376_v1, %s7529_s25  ;;  %v819_v1 = vld [vmem:[#allocation2 + $0x90] sm:$0x1] }
  0x87   : > { %1767 = vrot.lane.b32.xlu1 %v7816_v54, %s7522_s18  ;;  %v7199_v54 = vor.u32 %v7198_v38, %v7197_v28  ;;  %v2454_v28 = vrot.slane %v2452_v63, 1  ;;  %v820_v38 = vsel %vm7593_vm7, %v6831_v30, %v819_v1  ;;  %v965_v39 = vsel %vm7627_vm8, %v6849_v27, %v964_v62 }
  0x88   : > { %v7943_v29 = vpop.permute.xlu2 %2261  ;;  %821 = vst [vmem:[#allocation2 + $0x90] sm:$0x1] %v820_v38  ;;  %v2383_v27 = vor.u32 %v2382_v61, %v2378_v52  ;;  %v7991_v49 = vpack.c.b16 %v1293_v17, %v1293_v17  ;;  %v331_v62 = vrot.slane %v327_v18, 4  ;;  %v2961_v38 = vld [vmem:[%s10872_s1 + $0x10] sm:$0x3] }
  0x89   : > { %v2128_v9 = vrot.slane %v7199_v54, 1  ;;  %v2455_v42 = vor.u32 %v2454_v28, %v2450_v25  ;;  %966 = vst [vmem:[#allocation2 + $0x98] sm:$0x1] %v965_v39  ;;  %v1876_v54 = vsel %vm1315_vm10, %v7901_v4, %v1875_v44  ;;  %v2971_v40 = vunpack.c.l.b16 %v2961_v38  ;;  %v7392_v44 = vld [vmem:[#allocation2 + $0x84] sm:$0xe] }
  0x8a   : > { %v1620_v36 = vrot.slane %v7991_v49, 1  ;;  %v1444_v61 = vshll.u32 %v7991_v49, 16 }
  0x8b   : > { %v2130_v22 = vsel %vm1588_vm9, %v2128_v9, %v2129_v7  ;;  %v2460_v51 = vsel %vm1315_vm10, %v2455_v42, %v2459_v43  ;;  %v328_v9 = vshll.u32 %v214_v50, 16  ;;  %v7176_v7 = vld [vmem:[#allocation2 + $0x78] sm:$0xf0]  ;;  %v1097_v43 = vld [vmem:[#allocation2 + $0x8c] sm:$0x1]  ;;  %v2974_v46 = vpack.c.b16 %v2971_v40, %v2971_v40 }
  0x8c   : > { %2039 = vrot.lane.b32.xlu2 %v1948_v58, %s7527_s23  ;;  %v183_v58 = vld [vmem:[%s7567_s17 + $0x58] sm:$0xff]  ;;  %v7178_v8 = vor.u32 %v7177_v14, %v7176_v7 }
  0x8d   : > { %v215_v5 = vpack.c.bf16 %v183_v58, %v183_v58  ;;  %v330_v30 = vor.u32 %v328_v9, %v327_v18  ;;  %v3012_v56 = vsel %vm10875_vm11, %v2974_v46, 0  ;;  %vm10878_vm11 = vcmask 261120  }
  0x8e   : > { %1655 = vrot.lane.b32.xlu0 %v1618_v11, %s7524_s20  ;;  %v7389_v11 = vld [vmem:[#allocation2 + $0x3c] sm:$0xe]  ;;  %3019 = vmatpush.bf16.msra.mxu0 %v3012_v56 }
  0x8f   : > { %2279 = vrot.lane.b32.xlu1 %v7917_v6, %s7523_s19  ;;  %v2312_v6 = vunpack.c.l.b16 %v1158_v16  ;;  %v333_v57 = vshrl.u32 %v215_v5, 16  ;;  %v336_v25 = vshll.u32 %v215_v5, 16  ;;  %v7390_v15 = vor.u32 %v7389_v11, %v7947_v10  ;;  %7327 = vmatpush.bf16.msra.mxu2 %v3012_v56  ;;  %v6944_v11 = vld [vmem:[%s10872_s1 + $0x8] sm:$0xff]  ;;  %v8027_v17 = vld [vmem:[#allocation2 + $0x90] sm:$0xff]  }
  0x90   : > { %v1619_v10 = vrot.slane %v7178_v8, 1  ;;  %v2464_v49 = vshll.u32 %v8027_v17, 16  ;;  %v6943_v8 = vld [vmem:[%s10872_s1] sm:$0xff] }
  0x91   : > { %v7973_v33 = vpack.c.b16 %v2312_v6, %v2312_v6  ;;  %v335_v28 = vrot.slane %v333_v57, 7  ;;  %v7391_v6 = vld [vmem:[#allocation2 + $0x84] sm:$0xf0]  ;;  %v196_v57 = vld [vmem:[%s7567_s17 + $0xc0] sm:$0xff] }
  0x92   : > { %v1621_v9 = vsel %vm1588_vm9, %v1619_v10, %v1620_v36  ;;  %v7393_v14 = vor.u32 %v7392_v44, %v7391_v6  ;;  %3020 = vmatpush.bf16.msra.mxu0 %v6944_v11  ;;  %v2462_v44 = vshrl.u32 %v8027_v17, 16  ;;  %v8062_v56 = vld [vmem:[#allocation2 + $0x84] sm:$0xff]  }
  0x93   : > { %v2385_v2 = vshll.u32 %v7973_v33, 16  ;;  %v338_v39 = vor.u32 %v336_v25, %v335_v28  ;;  %v340_v42 = vrot.slane %v335_v28, 4  ;;  %7328 = vmatpush.bf16.msra.mxu2 %v6944_v11  ;;  %v1446_v28 = vrot.slane %v1444_v61, 1  ;;  %v650_v11 = vld [vmem:[#allocation2 + $0x9c] sm:$0xf] }
  0x94   : > { %v7968_v41 = vpop.permute.xlu2 %2149  ;;  %1514 = vrot.lane.b32.xlu2 %v1363_v34, %s7528_s24  ;;  %v602_v34 = vsel %vm7585_vm6, %v330_v30, %v601_v0 }
  0x95   : > { %v2387_v16 = vrot.slane %v2385_v2, 1  ;;  %603 = vst [vmem:[#allocation2 + $0x48] sm:$0xf] %v602_v34  ;;  %v339_v26 = vsel %vm7577_vm4, %v331_v62, %v338_v39  ;;  %v606_v52 = vsel %vm7593_vm7, %v340_v42, %v605_v45  ;;  %v1023_v2 = vld [vmem:[#allocation2 + $0x38] sm:$0x1]  ;;  %v228_v62 = vpack.c.bf16 %v196_v57, %v196_v57 }
  0x96   : > { %2167 = vrot.lane.b32.xlu0 %v2130_v22, %s7525_s21  ;;  %604 = vst.msk [vmem:[#allocation2 + $0x4c] sm:$0xf] %vm560_vm2, %v339_v26  ;;  %3021 = vmatpush.bf16.msra.mxu0 %v6943_v8  ;;  %v2466_v26 = vrot.slane %v2464_v49, 1  ;;  %v1447_v10 = vsel %vm1315_vm10, %v7837_v31, %v1446_v28  ;;  %v7395_v31 = vld [vmem:[#allocation2 + $0x3c] sm:$0xe] }
  0x97   : > { %1643 = vrot.lane.b32.xlu1 %v1600_v47, %s7524_s20  ;;  %v2388_v22 = vsel %vm1315_vm10, %v2383_v27, %v2387_v16  ;;  %v8001_v47 = vld [vmem:[#allocation2 + $0x84] sm:$0xff]   ;;  %607 = vst [vmem:[#allocation2 + $0x50] sm:$0x1] %v606_v52  ;;  %v1287_v27 = vunpack.c.l.b16 %v1023_v2  ;;  %7329 = vmatpush.bf16.msra.mxu2 %v6943_v8  ;;  %v444_v6 = vshrl.u32 %v228_v62, 16  ;;  %v7224_v52 = vld [vmem:[#allocation2 + $0x90] sm:$0xf0] }
  0x98   : > { %v1952_v0 = vshll.u32 %v8001_v47, 16  ;;  %v1950_v40 = vshrl.u32 %v8001_v47, 16  ;;  %v7394_v2 = vld [vmem:[#allocation2 + $0x3c] sm:$0xf0]  ;;  %v1030_v49 = vld [vmem:[#allocation2 + $0x8c] sm:$0x1] }
  0x99   : > { %v8055_v45 = vrot.slane %v444_v6, 7  ;;  %v7396_v6 = vor.u32 %v7395_v31, %v7394_v2 }
  0x9a   : > { %v1954_v42 = vrot.slane %v1952_v0, 1 }
  0x9c   : > { %2679 = vrot.lane.b32.xlu2 %v2642_v21, %s7526_s22  ;;  %v1807_v21 = vunpack.c.l.b16 %v1097_v43  ;;  %v699_v58 = vld [vmem:[#allocation2 + $0x48] sm:$0x2]  ;;  %v801_v59 = vld [vmem:[#allocation2 + $0x48] sm:$0x1]  ;;  %v8052_v43 = vpack.c.b16 %v1287_v27, %v1287_v27 }
  0x9d   : > { %v6825_v5 = vrot.slane %v699_v58, 9  ;;  %v843_v32 = vld [vmem:[#allocation2 + $0x4c] sm:$0x8]  ;;  %v447_v58 = vshll.u32 %v228_v62, 16 }
  0x9e   : > { %2551 = vrot.lane.b32.xlu0 %v2460_v51, %s7529_s25  ;;  %v7989_v1 = vpop.permute.xlu2 %1653  ;;  %v2622_v51 = vrot.slane %v7390_v15, 1  ;;  %v1823_v7 = vpack.c.b16 %v1807_v21, %v1807_v21  ;;  %v6843_v16 = vrot.slane %v843_v32, 11  ;;  %v946_v39 = vld [vmem:[#allocation2 + $0x50] sm:$0x1]  ;;  %v7225_v21 = vld [vmem:[#allocation2 + $0x90] sm:$0xe] }
  0x9f   : > { %2027 = vrot.lane.b32.xlu1 %v1876_v54, %s7527_s23  ;;  %v2623_v54 = vrot.slane %v7973_v33, 1  ;;  %v802_v20 = vsel %vm7593_vm7, %v6825_v5, %v801_v59  ;;  %v1955_v59 = vor.u32 %v1954_v42, %v1950_v40  ;;  %v1372_v61 = vshll.u32 %v8052_v43, 16 }
  0xa0   : > { %v7983_v63 = vpop.permute.xlu1 %1751  ;;  %803 = vst [vmem:[#allocation2 + $0x48] sm:$0x1] %v802_v20  ;;  %v2132_v15 = vrot.slane %v1823_v7, 1  ;;  %v1957_v38 = vshll.u32 %v1823_v7, 16  ;;  %v8073_v5 = vor.u32 %v2466_v26, %v2462_v44  ;;  %v7167_v7 = vld [vmem:[#allocation2 + $0x30] sm:$0xf0]  ;;  %v449_v20 = vor.u32 %v447_v58, %v8055_v45 }
  0xa1   : > { %v2624_v33 = vsel %vm1588_vm9, %v2622_v51, %v2623_v54  ;;  %v197_v54 = vld [vmem:[%s7567_s17 + $0xc8] sm:$0xff]  ;;  %v7226_v0 = vor.u32 %v7225_v21, %v7224_v52  ;;  %v1294_v40 = vunpack.c.l.b16 %v1030_v49  ;;  %v184_v44 = vld [vmem:[%s7567_s17 + $0x60] sm:$0xff] }
  0xa2   : > { %v1959_v46 = vrot.slane %v1957_v38, 1 }
  0xa4   : > { %2155 = vrot.lane.b32.xlu2 %v2112_v37, %s7525_s21  ;;  %v2131_v37 = vrot.slane %v7393_v14, 1  ;;  %v7168_v14 = vld [vmem:[#allocation2 + $0x30] sm:$0xe]  ;;  %v1960_v62 = vsel %vm1315_vm10, %v1955_v59, %v1959_v46  ;;  %v1098_v59 = vld [vmem:[#allocation2 + $0x98] sm:$0x1] }
  0xa5   : > { %v7169_v8 = vor.u32 %v7168_v14, %v7167_v7  ;;  %v654_v14 = vld [vmem:[#allocation2 + $0xa4] sm:$0x1] }
  0xa6   : > { %1755 = vrot.lane.b32.xlu0 %v7868_v13, %s7522_s18  ;;  %v8018_v53 = vpop.permute.xlu2 %2023  ;;  %v1165_v13 = vld [vmem:[#allocation2 + $0x98] sm:$0x1]  ;;  %v2133_v36 = vsel %vm1588_vm9, %v2131_v37, %v2132_v15  ;;  %v1374_v37 = vrot.slane %v1372_v61, 1  ;;  %v216_v61 = vpack.c.bf16 %v184_v44, %v184_v44 }
  0xa7   : > { %2539 = vrot.lane.b32.xlu1 %v2388_v22, %s7529_s25  ;;  %v2319_v18 = vunpack.c.l.b16 %v1165_v13  ;;  %v947_v22 = vsel %vm7627_vm8, %v6843_v16, %v946_v39  ;;  %v8064_v13 = vld [vmem:[#allocation2 + $0x84] sm:$0xf0]  ;;  %v651_v16 = vsel %vm7585_vm6, %v449_v20, %v650_v11  ;;  %v2643_v39 = vrot.slane %v7226_v0, 1 }
  0xa8   : > { %v8010_v24 = vpop.permute.xlu0 %1637  ;;  %v8013_v50 = vpop.permute.xlu1 %1749  ;;  %948 = vst [vmem:[#allocation2 + $0x50] sm:$0x1] %v947_v22  ;;  %v1375_v52 = vsel %vm1315_vm10, %v7901_v4, %v1374_v37  ;;  %v8111_v11 = vrot.slane %v7396_v6, 1  ;;  %v8118_v49 = vld [vmem:[#allocation2 + $0x48] sm:$0xff]   ;;  %v342_v6 = vshrl.u32 %v216_v61, 16 }
  0xa9   : > { %652 = vst [vmem:[#allocation2 + $0x9c] sm:$0xf] %v651_v16 }
  0xac   : > { %2667 = vrot.lane.b32.xlu2 %v2624_v33, %s7526_s22  ;;  %v8067_v33 = vld [vmem:[#allocation2 + $0x3c] sm:$0xff]  }
  0xad   : > { %v1880_v46 = vshll.u32 %v8067_v33, 16  ;;  %v1878_v0 = vshrl.u32 %v8067_v33, 16 }
  0xae   : > { %2267 = vrot.lane.b32.xlu0 %v7945_v48, %s7523_s19  ;;  %v8045_v34 = vpop.permute.xlu2 %1510  ;;  %v8047_v48 = vpack.c.b16 %v2319_v18, %v2319_v18  ;;  %v229_v18 = vpack.c.bf16 %v197_v54, %v197_v54  ;;  %v185_v54 = vld [vmem:[%s7567_s17 + $0x68] sm:$0xff] }
  0xaf   : > { %1657 = vrot.lane.b32.xlu1 %v1621_v9, %s7524_s20  ;;  %v1091_v9 = vld [vmem:[#allocation2 + $0x44] sm:$0x1] }
  0xb0   : > { %v8036_v30 = vpop.permute.xlu0 %1639  ;;  %v8039_v25 = vpop.permute.xlu1 %2263  ;;  %v2469_v51 = vshll.u32 %v8047_v48, 16  ;;  %v1801_v28 = vunpack.c.l.b16 %v1091_v9  ;;  %v452_v15 = vshrl.u32 %v229_v18, 16  ;;  %v2644_v22 = vrot.slane %v8047_v48, 1  ;;  %v706_v4 = vld [vmem:[#allocation2 + $0x9c] sm:$0x2] }
  0xb1   : > { %v455_v42 = vshll.u32 %v229_v18, 16  ;;  %v450_v48 = vrot.slane %v8055_v45, 4  ;;  %v8113_v45 = vpack.c.b16 %v1294_v40, %v1294_v40  ;;  %v822_v16 = vld [vmem:[#allocation2 + $0x9c] sm:$0x1] }
  0xb2   : > { %v2471_v57 = vrot.slane %v2469_v51, 1  ;;  %v8091_v26 = vpack.c.b16 %v1801_v28, %v1801_v28  ;;  %v454_v51 = vrot.slane %v452_v15, 7  ;;  %v8102_v21 = vsel %vm1588_vm9, %v2643_v39, %v2644_v22 }
  0xb3   : > { %v217_v28 = vpack.c.bf16 %v185_v54, %v185_v54  ;;  %v6832_v15 = vrot.slane %v706_v4, 9  ;;  %v1449_v39 = vshrl.u32 %v8062_v56, 16 }
  0xb4   : > { %1769 = vrot.lane.b32.xlu2 %v8001_v47, %s7522_s18  ;;  %v2472_v38 = vsel %vm1315_vm10, %v8073_v5, %v2471_v57  ;;  %v457_v9 = vor.u32 %v455_v42, %v454_v51  ;;  %v459_v7 = vrot.slane %v454_v51, 4  ;;  %v2114_v18 = vrot.slane %v8091_v26, 1  ;;  %v1159_v57 = vld [vmem:[#allocation2 + $0x50] sm:$0x1] }
  0xb5   : > { %v2313_v40 = vunpack.c.l.b16 %v1159_v57  ;;  %v1808_v42 = vunpack.c.l.b16 %v1098_v59  ;;  %v823_v44 = vsel %vm7593_vm7, %v6832_v15, %v822_v16  ;;  %v344_v51 = vrot.slane %v342_v6, 7  ;;  %v608_v16 = vld [vmem:[#allocation2 + $0x54] sm:$0xf] }
  0xb6   : > { %1528 = vrot.lane.b32.xlu0 %v1447_v10, %s7528_s24  ;;  %v8076_v32 = vpop.permute.xlu2 %2535  ;;  %v1601_v10 = vrot.slane %v7169_v8, 1  ;;  %v1882_v8 = vrot.slane %v1880_v46, 1  ;;  %v458_v37 = vsel %vm7577_vm4, %v450_v48, %v457_v9  ;;  %v655_v22 = vsel %vm7593_vm7, %v459_v7, %v654_v14  ;;  %v8134_v46 = vld [vmem:[#allocation2 + $0x3c] sm:$0xff]   ;;  %824 = vst [vmem:[#allocation2 + $0x9c] sm:$0x1] %v823_v44 }
  0xb7   : > { %2169 = vrot.lane.b32.xlu1 %v2133_v36, %s7525_s21  ;;  %v1602_v36 = vrot.slane %v8052_v43, 1  ;;  %v1451_v43 = vshll.u32 %v8062_v56, 16  ;;  %653 = vst.msk [vmem:[#allocation2 + $0xa0] sm:$0xf] %vm560_vm2, %v458_v37  ;;  %v8136_v48 = vld [vmem:[#allocation2 + $0x3c] sm:$0xf0] }
  0xb8   : > { %v8078_v27 = vpop.permute.xlu0 %2151  ;;  %656 = vst [vmem:[#allocation2 + $0xa4] sm:$0x1] %v655_v22  ;;  %v350_v54 = vshrl.u32 %v217_v28, 16  ;;  %v353_v9 = vshll.u32 %v217_v28, 16  ;;  %v1883_v7 = vor.u32 %v1882_v8, %v1878_v0  ;;  %v8147_v22 = vpack.c.b16 %v1808_v42, %v1808_v42  ;;  %v1024_v8 = vld [vmem:[#allocation2 + $0x44] sm:$0x1] }
  0xb9   : > { %v8080_v47 = vpop.permute.xlu1 %2661  ;;  %v1603_v20 = vsel %vm1588_vm9, %v1601_v10, %v1602_v36  ;;  %v345_v10 = vshll.u32 %v216_v61, 16  ;;  %v2697_v36 = vsel %vm2693_vm12, %v7681_v3, %v8045_v34  ;;  %v1453_v59 = vrot.slane %v1451_v43, 1  ;;  %v7354_v43 = vld [vmem:[#allocation2] sm:$0xff]  }
  0xba   : > { %v1456_v61 = vshll.u32 %v8113_v45, 16  ;;  %v2390_v34 = vshrl.u32 %v8118_v49, 16  ;;  %v352_v57 = vrot.slane %v350_v54, 7 }
  0xbb   : > { %v347_v14 = vor.u32 %v345_v10, %v344_v51 }
  0xbc   : > { %2281 = vrot.lane.b32.xlu2 %v8027_v17, %s7523_s19  ;;  %v357_v6 = vrot.slane %v352_v57, 4 }
  0xbe   : > { %2041 = vrot.lane.b32.xlu0 %v1960_v62, %s7527_s23  ;;  %v8104_v58 = vpop.permute.xlu2 %2165  ;;  %v1885_v62 = vshll.u32 %v8091_v26, 16  ;;  %v850_v54 = vld [vmem:[#allocation2 + $0xa0] sm:$0x8] }
  0xbf   : > { %2553 = vrot.lane.b32.xlu1 %v2472_v38, %s7529_s25  ;;  %v2392_v38 = vshll.u32 %v8118_v49, 16 }
  0xc0   : > { %v8107_v2 = vpop.permute.xlu0 %2663  ;;  %v1887_v3 = vrot.slane %v1885_v62, 1  ;;  %v355_v62 = vor.u32 %v353_v9, %v352_v57  ;;  %v7215_v57 = vld [vmem:[#allocation2 + $0x48] sm:$0xf0] }
  0xc1   : > { %v8109_v31 = vpop.permute.xlu1 %1524  ;;  %v2394_v15 = vrot.slane %v2392_v38, 1  ;;  %v8154_v38 = vld [vmem:[#allocation2 + $0x84] sm:$0xe] }
  0xc2   : > { %v1888_v10 = vsel %vm1315_vm10, %v1883_v7, %v1887_v3  ;;  %v2730_v7 = vsel %vm2726_vm13, %v2697_v36, %v8036_v30  ;;  %v1288_v36 = vunpack.c.l.b16 %v1024_v8  ;;  %v2115_v8 = vsel %vm1588_vm9, %v8111_v11, %v2114_v18  ;;  %v8205_v18 = vld [vmem:[#allocation2 + $0x9c] sm:$0xff]  }
  0xc3   : > { %v8175_v30 = vor.u32 %v2394_v15, %v2390_v34  ;;  %v2763_v34 = vsel %vm2759_vm14, %v2730_v7, %v7983_v63  ;;  %v7399_v63 = vor.u32 %v8154_v38, %v8064_v13  ;;  %v1379_v11 = vshll.u32 %v8134_v46, 16  ;;  %v7201_v7 = vld [vmem:[#allocation2 + $0x90] sm:$0xe] }
  0xc4   : > { %1645 = vrot.lane.b32.xlu2 %v1603_v20, %s7524_s20  ;;  %v348_v20 = vrot.slane %v344_v51, 4 }
  0xc6   : > { %1516 = vrot.lane.b32.xlu0 %v1375_v52, %s7528_s24  ;;  %v8143_v4 = vpop.permute.xlu2 %2549  ;;  %v8145_v52 = vpack.c.b16 %v2313_v40, %v2313_v40  ;;  %v609_v40 = vsel %vm7585_vm6, %v347_v14, %v608_v16  ;;  %v356_v9 = vsel %vm7577_vm4, %v348_v20, %v355_v62  ;;  %v1454_v14 = vor.u32 %v1453_v59, %v1449_v39 }
  0xc7   : > { %1757 = vrot.lane.b32.xlu1 %v8067_v33, %s7522_s18  ;;  %v612_v33 = vld [vmem:[#allocation2 + $0x5c] sm:$0x1]  ;;  %610 = vst [vmem:[#allocation2 + $0x54] sm:$0xf] %v609_v40  ;;  %v1458_v16 = vrot.slane %v1456_v61, 1  ;;  %v1969_v39 = vshll.u32 %v8147_v22, 16  ;;  %v2796_v40 = vsel %vm2792_vm15, %v2763_v34, %v8018_v53 }
  0xc8   : > { %v1509_v37 = vpop.permute.xlu0 %1508  ;;  %v2397_v51 = vshll.u32 %v8145_v52, 16  ;;  %611 = vst.msk [vmem:[#allocation2 + $0x58] sm:$0xf] %vm560_vm2, %v356_v9  ;;  %v2626_v26 = vrot.slane %v8145_v52, 1  ;;  %v2829_v38 = vsel %vm2825_vm0, %v2796_v40, %v8078_v27  ;;  %v7355_v9 = vld [vmem:[#allocation2 + $0x60] sm:$0xff]   ;;  %v1377_v53 = vshrl.u32 %v8134_v46, 16 }
  0xc9   : > { %v2022_v28 = vpop.permute.xlu1 %2021  ;;  %v2695_v0 = vsel %vm2693_vm12, %v7354_v43, %v1509_v37  ;;  %v6850_v37 = vrot.slane %v850_v54, 11  ;;  %v967_v43 = vld [vmem:[#allocation2 + $0xa4] sm:$0x1]  ;;  %v1459_v62 = vsel %vm1315_vm10, %v1454_v14, %v1458_v16  ;;  %v8207_v54 = vld [vmem:[#allocation2 + $0x9c] sm:$0xf0]  ;;  %v2711_v52 = vsel %vm2693_vm12, %v7355_v9, %v8109_v31 }
  0xca   : > { %v2728_v44 = vsel %vm2726_vm13, %v2695_v0, %v8010_v24  ;;  %v613_v24 = vsel %vm7593_vm7, %v357_v6, %v612_v33  ;;  %v7216_v0 = vld [vmem:[#allocation2 + $0x48] sm:$0xe]  ;;  %v8196_v6 = vpack.c.b16 %v1288_v36, %v1288_v36  ;;  %v1622_v27 = vrot.slane %v7399_v63, 1 }
  0xcb   : > { %v2761_v42 = vsel %vm2759_vm14, %v2728_v44, %v8013_v50  ;;  %v968_v20 = vsel %vm7627_vm8, %v6850_v37, %v967_v43  ;;  %614 = vst [vmem:[#allocation2 + $0x5c] sm:$0x1] %v613_v24  ;;  %v7200_v24 = vld [vmem:[#allocation2 + $0x90] sm:$0xf0]  ;;  %v1381_v31 = vrot.slane %v1379_v11, 1  ;;  %v2744_v34 = vsel %vm2726_vm13, %v2711_v52, %v7989_v1 }
  0xcc   : > { %v2794_v3 = vsel %vm2792_vm15, %v2761_v42, %v2022_v28  ;;  %2029 = vrot.lane.b32.xlu2 %v1888_v10, %s7527_s23  ;;  %v2399_v28 = vrot.slane %v2397_v51, 1  ;;  %969 = vst [vmem:[#allocation2 + $0xa4] sm:$0x1] %v968_v20  ;;  %v1971_v51 = vrot.slane %v1969_v39, 1  ;;  %v2135_v1 = vrot.slane %v8147_v22, 1 }
  0xcd   : > { %v2827_v50 = vsel %vm2825_vm0, %v2794_v3, %v7968_v41  ;;  %v7217_v41 = vor.u32 %v7216_v0, %v7215_v57  ;;  %v1384_v0 = vshll.u32 %v8196_v6, 16  ;;  %v1382_v40 = vor.u32 %v1381_v31, %v1377_v53 }
  0xce   : > { %2681 = vrot.lane.b32.xlu0 %v8102_v21, %s7526_s22  ;;  %v8180_v59 = vpop.permute.xlu2 %1753  ;;  %v2860_v33 = vsel %vm10880_vm1, %v2827_v50, %v7943_v29  ;;  %v2400_v44 = vsel %vm1315_vm10, %v8175_v30, %v2399_v28  ;;  %v700_v42 = vld [vmem:[#allocation2 + $0x54] sm:$0x2]  ;;  %v804_v37 = vld [vmem:[#allocation2 + $0x54] sm:$0x1]  ;;  %v1623_v50 = vrot.slane %v8113_v45, 1  ;;  %v2862_v45 = vsel %vm10880_vm1, %v2829_v38, %v8039_v25 }
  0xcf   : > { %2269 = vrot.lane.b32.xlu1 %v8118_v49, %s7523_s19  ;;  %v2625_v10 = vrot.slane %v7217_v41, 1  ;;  %v844_v43 = vld [vmem:[#allocation2 + $0x58] sm:$0x8]  ;;  %v6826_v3 = vrot.slane %v700_v42, 9  ;;  %v1386_v42 = vrot.slane %v1384_v0, 1 }
  0xd0   : > { %v2534_v61 = vpop.permute.xlu0 %2533  ;;  %v6844_v57 = vrot.slane %v844_v43, 11  ;;  %v7401_v25 = vld [vmem:[#allocation2 + $0x9c] sm:$0xe]  ;;  %v657_v38 = vld [vmem:[#allocation2 + $0xa8] sm:$0xf] }
  0xd1   : > { %v8184_v21 = vpop.permute.xlu1 %2037  ;;  %v2893_v15 = vsel %vm10879_vm3, %v2860_v33, %v2534_v61  ;;  %v805_v20 = vsel %vm7593_vm7, %v6826_v3, %v804_v37  ;;  %v7202_v61 = vor.u32 %v7201_v7, %v7200_v24  ;;  %v199_v33 = vld [vmem:[%s7567_s17 + $0xd8] sm:$0xff]  ;;  %v2627_v11 = vsel %vm1588_vm9, %v2625_v10, %v2626_v26 }
  0xd2   : > { %v2926_v29 = vsel %vm10878_vm11, %v2893_v15, %v8080_v47  ;;  %v198_v47 = vld [vmem:[%s7567_s17 + $0xd0] sm:$0xff]  ;;  %v949_v14 = vld [vmem:[#allocation2 + $0x5c] sm:$0x1]  ;;  %806 = vst [vmem:[#allocation2 + $0x54] sm:$0x1] %v805_v20  ;;  %v2895_v10 = vsel %vm10879_vm3, %v2862_v45, %v8076_v32  ;;  %v2476_v26 = vshll.u32 %v8205_v18, 16  ;;  %v1387_v0 = vsel %vm1315_vm10, %v1382_v40, %v1386_v42 }
  0xd3   : > { %6863 = vmatmul.msk.bf16.vlgmr.msra.gmra.mxu0 %vm10877_vm5, %v2926_v29  ;;  %v230_v13 = vpack.c.bf16 %v198_v47, %v198_v47  ;;  %v950_v36 = vsel %vm7627_vm8, %v6844_v57, %v949_v14  ;;  %v1166_v15 = vld [vmem:[#allocation2 + $0xa4] sm:$0x1]  ;;  %v1624_v29 = vsel %vm1588_vm9, %v1622_v27, %v1623_v50  ;;  %v1972_v47 = vsel %vm1315_vm10, %v8073_v5, %v1971_v51  ;;  %v7404_v14 = vld [vmem:[#allocation2 + $0x3c] sm:$0xe] }
  0xd4   : > { %2541 = vrot.lane.b32.xlu2 %v2400_v44, %s7529_s25  ;;  %951 = vst [vmem:[#allocation2 + $0x5c] sm:$0x1] %v950_v36  ;;  %v231_v44 = vpack.c.bf16 %v199_v33, %v199_v33  ;;  %v2320_v37 = vunpack.c.l.b16 %v1166_v15  ;;  %v2134_v43 = vrot.slane %v7202_v61, 1  ;;  %v2928_v32 = vsel %vm10878_vm11, %v2895_v10, %v8107_v2  ;;  %v661_v33 = vld [vmem:[#allocation2 + $0xb0] sm:$0x1] }
  0xd5   : > { %v461_v28 = vshrl.u32 %v230_v13, 16  ;;  %v7402_v45 = vor.u32 %v7401_v25, %v8207_v54  ;;  %v7191_v25 = vld [vmem:[#allocation2 + $0x48] sm:$0xf0] }
  0xd6   : > { %2157 = vrot.lane.b32.xlu0 %v2115_v8, %s7525_s21  ;;  %v8222_v16 = vpop.permute.xlu2 %2265  ;;  %v464_v8 = vshll.u32 %v230_v13, 16  ;;  %v469_v52 = vshrl.u32 %v231_v44, 16  ;;  %v472_v24 = vshll.u32 %v231_v44, 16  ;;  %v2336_v27 = vpack.c.b16 %v2320_v37, %v2320_v37  ;;  %v7192_v37 = vld [vmem:[#allocation2 + $0x48] sm:$0xe] }
  0xd7   : > { %1530 = vrot.lane.b32.xlu1 %v1459_v62, %s7528_s24  ;;  %v463_v63 = vrot.slane %v461_v28, 7  ;;  %v2136_v31 = vsel %vm1588_vm9, %v2134_v43, %v2135_v1  ;;  %v7405_v1 = vor.u32 %v7404_v14, %v8136_v48 }
  0xd8   : > { %v1766_v41 = vpop.permute.xlu0 %1765  ;;  %v471_v7 = vrot.slane %v469_v52, 7  ;;  %v2481_v61 = vshll.u32 %v2336_v27, 16 }
  0xd9   : > { %v8228_v39 = vpop.permute.xlu1 %1512  ;;  %v2777_v62 = vsel %vm2759_vm14, %v2744_v34, %v1766_v41  ;;  %v466_v9 = vor.u32 %v464_v8, %v463_v63  ;;  %v467_v22 = vrot.slane %v463_v63, 4  ;;  %v2478_v41 = vrot.slane %v2476_v26, 1  ;;  %v8283_v10 = vld [vmem:[#allocation2 + $0x54] sm:$0xff]  }
  0xda   : > { %v2810_v13 = vsel %vm2792_vm15, %v2777_v62, %v8184_v21  ;;  %v474_v20 = vor.u32 %v472_v24, %v471_v7  ;;  %v476_v36 = vrot.slane %v471_v7, 4  ;;  %v2483_v8 = vrot.slane %v2481_v61, 1  ;;  %v7512_v26 = vld [vmem:[#allocation2 + $0x54] sm:$0xf0] }
  0xdb   : > { %v658_v21 = vsel %vm7585_vm6, %v466_v9, %v657_v38  ;;  %v2843_v57 = vsel %vm2825_vm0, %v2810_v13, %v8104_v58  ;;  %v2474_v58 = vshrl.u32 %v8205_v18, 16  ;;  %v2646_v62 = vrot.slane %v7402_v45, 1  ;;  %v7513_v38 = vld [vmem:[#allocation2 + $0x54] sm:$0xe]  ;;  %v1160_v7 = vld [vmem:[#allocation2 + $0x5c] sm:$0x1] }
  0xdc   : > { %1659 = vrot.lane.b32.xlu2 %v1624_v29, %s7524_s20  ;;  %659 = vst [vmem:[#allocation2 + $0xa8] sm:$0xf] %v658_v21  ;;  %v475_v34 = vsel %vm7577_vm4, %v467_v22, %v474_v20  ;;  %v662_v15 = vsel %vm7593_vm7, %v476_v36, %v661_v33  ;;  %v2647_v29 = vrot.slane %v2336_v27, 1  ;;  %v7193_v24 = vor.u32 %v7192_v37, %v7191_v25  ;;  %v8302_v45 = vld [vmem:[#allocation2 + $0x9c] sm:$0xff]   ;;  %v1099_v37 = vld [vmem:[#allocation2 + $0xa4] sm:$0x1] }
  0xdd   : > { %660 = vst.msk [vmem:[#allocation2 + $0xac] sm:$0xf] %vm560_vm2, %v475_v34  ;;  %v2479_v54 = vor.u32 %v2478_v41, %v2474_v58  ;;  %v1031_v58 = vld [vmem:[#allocation2 + $0x98] sm:$0x1]  ;;  %v7514_v41 = vor.u32 %v7513_v38, %v7512_v26  ;;  %v8304_v34 = vld [vmem:[#allocation2 + $0x9c] sm:$0xf0]  ;;  %v1809_v26 = vunpack.c.l.b16 %v1099_v37 }
  0xde   : > { %2669 = vrot.lane.b32.xlu0 %v2627_v11, %s7526_s22  ;;  %v8249_v51 = vpop.permute.xlu2 %1526  ;;  %663 = vst [vmem:[#allocation2 + $0xb0] sm:$0x1] %v662_v15  ;;  %v2648_v9 = vsel %vm1588_vm9, %v2646_v62, %v2647_v29  ;;  %v1295_v15 = vunpack.c.l.b16 %v1031_v58  ;;  %v2404_v62 = vshll.u32 %v8283_v10, 16  ;;  %v2402_v38 = vshrl.u32 %v8283_v10, 16  ;;  %v7170_v37 = vld [vmem:[#allocation2 + $0x48] sm:$0xf0] }
  0xdf   : > { %2043 = vrot.lane.b32.xlu1 %v1972_v47, %s7527_s23  ;;  %v1974_v58 = vshrl.u32 %v8302_v45, 16 }
  0xe0   : > { %v2278_v3 = vpop.permute.xlu0 %2277 }
  0xe1   : > { %v2678_v53 = vpop.permute.xlu1 %2677  ;;  %v2876_v50 = vsel %vm10880_vm1, %v2843_v57, %v2278_v3  ;;  %v7356_v57 = vld [vmem:[#allocation2 + $0x18] sm:$0xff]  }
  0xe2   : > { %v2909_v28 = vsel %vm10879_vm3, %v2876_v50, %v8143_v4  ;;  %v1092_v4 = vld [vmem:[#allocation2 + $0x50] sm:$0x1]  ;;  %v2699_v48 = vsel %vm2693_vm12, %v7356_v57, %v8228_v39  ;;  %v2116_v50 = vrot.slane %v7193_v24, 1 }
  0xe3   : > { %6864 = vmatmul.msk.bf16.gmra.mxu0 %vm10877_vm5, %v2928_v32  ;;  %v2942_v2 = vsel %vm10878_vm11, %v2909_v28, %v2678_v53  ;;  %v1802_v44 = vunpack.c.l.b16 %v1092_v4  ;;  %v707_v11 = vld [vmem:[#allocation2 + $0xa8] sm:$0x2]  ;;  %v825_v47 = vld [vmem:[#allocation2 + $0xa8] sm:$0x1]  ;;  %v1604_v53 = vrot.slane %v7405_v1, 1  ;;  %v1605_v32 = vrot.slane %v8196_v6, 1 }
  0xe4   : > { %6871 = vmatmul.msk.bf16.vlgmr.msra.gmra.mxu2 %vm10877_vm5, %v2942_v2  ;;  %2171 = vrot.lane.b32.xlu2 %v2136_v31, %s7525_s21  ;;  %v6833_v43 = vrot.slane %v707_v11, 9  ;;  %v851_v22 = vld [vmem:[#allocation2 + $0xac] sm:$0x8]  ;;  %v2314_v31 = vunpack.c.l.b16 %v1160_v7 }
  0xe5   : > { %v1818_v52 = vpack.c.b16 %v1802_v44, %v1802_v44  ;;  %v6851_v21 = vrot.slane %v851_v22, 11  ;;  %v970_v3 = vld [vmem:[#allocation2 + $0xb0] sm:$0x1]  ;;  %v1606_v61 = vsel %vm1588_vm9, %v1604_v53, %v1605_v32  ;;  %v1976_v22 = vshll.u32 %v8302_v45, 16  ;;  %v7179_v32 = vld [vmem:[#allocation2 + $0x90] sm:$0xf0] }
  0xe6   : > { %1771 = vrot.lane.b32.xlu0 %v8027_v17, %s7522_s18  ;;  %v8276_v63 = vpop.permute.xlu2 %2039  ;;  %v2484_v17 = vsel %vm1315_vm10, %v2479_v54, %v2483_v8  ;;  %v826_v13 = vsel %vm7593_vm7, %v6833_v43, %v825_v47  ;;  %v2330_v2 = vpack.c.b16 %v2314_v31, %v2314_v31 }
  0xe7   : > { %1518 = vrot.lane.b32.xlu1 %v1387_v0, %s7528_s24  ;;  %827 = vst [vmem:[#allocation2 + $0xa8] sm:$0x1] %v826_v13  ;;  %v971_v27 = vsel %vm7627_vm8, %v6851_v21, %v970_v3  ;;  %v2117_v14 = vrot.slane %v1818_v52, 1  ;;  %v1897_v28 = vshll.u32 %v1818_v52, 16  ;;  %v2406_v52 = vrot.slane %v2404_v62, 1 }
  0xe8   : > { %v1642_v40 = vpop.permute.xlu0 %1641  ;;  %972 = vst [vmem:[#allocation2 + $0xb0] sm:$0x1] %v971_v27  ;;  %v2629_v8 = vrot.slane %v2330_v2, 1 }
  0xe9   : > { %v2154_v42 = vpop.permute.xlu1 %2153  ;;  %v2732_v0 = vsel %vm2726_vm13, %v2699_v48, %v1642_v40  ;;  %v2118_v33 = vsel %vm1588_vm9, %v2116_v50, %v2117_v14  ;;  %v1899_v54 = vrot.slane %v1897_v28, 1  ;;  %v8318_v40 = vpack.c.b16 %v1295_v15, %v1295_v15  ;;  %v1025_v28 = vld [vmem:[#allocation2 + $0x50] sm:$0x1] }
  0xea   : > { %v2765_v36 = vsel %vm2759_vm14, %v2732_v0, %v8180_v59  ;;  %v2628_v59 = vrot.slane %v7514_v41, 1  ;;  %v2407_v48 = vor.u32 %v2406_v52, %v2402_v38  ;;  %v1289_v62 = vunpack.c.l.b16 %v1025_v28 }
  0xeb   : > { %v1900_v25 = vsel %vm1315_vm10, %v8175_v30, %v1899_v54  ;;  %v1468_v13 = vshll.u32 %v8318_v40, 16  ;;  %v2713_v54 = vsel %vm2693_vm12, %v7856_v60, %v8249_v51 }
  0xec   : > { %2555 = vrot.lane.b32.xlu2 %v2484_v17, %s7529_s25  ;;  %v2409_v17 = vshll.u32 %v2330_v2, 16 }
  0xed   : > { %v1470_v3 = vrot.slane %v1468_v13, 1  ;;  %v1626_v13 = vrot.slane %v8318_v40, 1 }
  0xee   : > { %2283 = vrot.lane.b32.xlu0 %v8205_v18, %s7523_s19  ;;  %v8295_v20 = vpop.permute.xlu2 %1514  ;;  %v2411_v53 = vrot.slane %v2409_v17, 1 }
  0xef   : > { %2683 = vrot.lane.b32.xlu1 %v2648_v9, %s7526_s22  ;;  %v2630_v9 = vsel %vm1588_vm9, %v2628_v59, %v2629_v8 }
  0xf0   : > { %v2026_v39 = vpop.permute.xlu0 %2025  ;;  %v2412_v59 = vsel %vm1315_vm10, %v2407_v48, %v2411_v53 }
  0xf1   : > { %v2666_v6 = vpop.permute.xlu1 %2665  ;;  %v2798_v18 = vsel %vm2792_vm15, %v2765_v36, %v2026_v39  ;;  %v7180_v39 = vld [vmem:[#allocation2 + $0x90] sm:$0xe] }
  0xf2   : > { %v2831_v4 = vsel %vm2825_vm0, %v2798_v18, %v2154_v42  ;;  %v1978_v18 = vrot.slane %v1976_v22, 1  ;;  %v7181_v8 = vor.u32 %v7180_v39, %v7179_v32  ;;  %v1093_v22 = vld [vmem:[#allocation2 + $0x5c] sm:$0x1] }
  0xf3   : > { %v2864_v11 = vsel %vm10880_vm1, %v2831_v4, %v8222_v16  ;;  %v201_v16 = vld [vmem:[%s7567_s17 + $0xe8] sm:$0xff] }
  0xf4   : > { %1759 = vrot.lane.b32.xlu2 %v8118_v49, %s7522_s18  ;;  %v200_v49 = vld [vmem:[%s7567_s17 + $0xe0] sm:$0xff]  ;;  %v233_v24 = vpack.c.bf16 %v201_v16, %v201_v16  ;;  %v1979_v60 = vor.u32 %v1978_v18, %v1974_v58  ;;  %v1625_v17 = vrot.slane %v7181_v8, 1  ;;  %v7228_v8 = vld [vmem:[#allocation2 + $0xa8] sm:$0xe] }
  0xf5   : > { %v232_v43 = vpack.c.bf16 %v200_v49, %v200_v49 }
  0xf6   : > { %1647 = vrot.lane.b32.xlu0 %v1606_v61, %s7524_s20  ;;  %v8312_v29 = vpop.permute.xlu2 %2679  ;;  %v486_v57 = vshrl.u32 %v233_v24, 16  ;;  %v489_v50 = vshll.u32 %v233_v24, 16  ;;  %v664_v61 = vld [vmem:[#allocation2 + $0xb4] sm:$0xf]  ;;  %v1627_v53 = vsel %vm1588_vm9, %v1625_v17, %v1626_v13 }
  0xf7   : > { %2159 = vrot.lane.b32.xlu1 %v2118_v33, %s7525_s21  ;;  %v478_v7 = vshrl.u32 %v232_v43, 16  ;;  %v481_v21 = vshll.u32 %v232_v43, 16  ;;  %v1471_v33 = vsel %vm1315_vm10, %v8073_v5, %v1470_v3  ;;  %v7171_v43 = vld [vmem:[#allocation2 + $0x48] sm:$0xe] }
  0xf8   : > { %v2538_v44 = vpop.permute.xlu0 %2537  ;;  %v8341_v36 = vrot.slane %v486_v57, 7  ;;  %v8383_v3 = vld [vmem:[#allocation2 + $0xa8] sm:$0xff]  }
  0xf9   : > { %v8316_v47 = vpop.permute.xlu1 %1767  ;;  %v2897_v42 = vsel %vm10879_vm3, %v2864_v11, %v2538_v44  ;;  %v480_v27 = vrot.slane %v478_v7, 7  ;;  %v8354_v44 = vld [vmem:[#allocation2 + $0x54] sm:$0xff]   ;;  %v2488_v32 = vshll.u32 %v8383_v3, 16 }
  0xfa   : > { %v2930_v1 = vsel %vm10878_vm11, %v2897_v42, %v2666_v6  ;;  %v8339_v6 = vpack.c.b16 %v1809_v26, %v1809_v26  ;;  %v491_v4 = vor.u32 %v489_v50, %v8341_v36  ;;  %v8356_v11 = vld [vmem:[#allocation2 + $0x54] sm:$0xf0]  ;;  %v493_v49 = vrot.slane %v8341_v36, 4 }
  0xfb   : > { %6865 = vmatmul.msk.bf16.gmra.mxu0 %vm10877_vm5, %v2930_v1  ;;  %v8344_v41 = vor.u32 %v481_v21, %v480_v27  ;;  %v484_v15 = vrot.slane %v480_v27, 4  ;;  %v1305_v26 = vpack.c.b16 %v1289_v62, %v1289_v62  ;;  %v7172_v21 = vor.u32 %v7171_v43, %v7170_v37 }
  0xfc   : > { %2271 = vrot.lane.b32.xlu2 %v8283_v10, %s7523_s19  ;;  %v7407_v10 = vld [vmem:[#allocation2 + $0x9c] sm:$0xe]  ;;  %v1981_v2 = vshll.u32 %v8339_v6, 16  ;;  %v1803_v27 = vunpack.c.l.b16 %v1093_v22 }
  0xfd   : > { %v492_v5 = vsel %vm7577_vm4, %v484_v15, %v491_v4  ;;  %v665_v42 = vsel %vm7585_vm6, %v8344_v41, %v664_v61  ;;  %v1396_v48 = vshll.u32 %v1305_v26, 16  ;;  %v1607_v28 = vrot.slane %v7172_v21, 1  ;;  %v7410_v21 = vld [vmem:[#allocation2 + $0x54] sm:$0xe] }
  0xfe   : > { %2031 = vrot.lane.b32.xlu0 %v1900_v25, %s7527_s23  ;;  %v8335_v0 = vpop.permute.xlu2 %2155  ;;  %v668_v25 = vld [vmem:[#allocation2 + $0xbc] sm:$0x1]  ;;  %666 = vst [vmem:[#allocation2 + $0xb4] sm:$0xf] %v665_v42  ;;  %v1983_v1 = vrot.slane %v1981_v2, 1  ;;  %v1608_v58 = vrot.slane %v1305_v26, 1 }
  0xff   : > { %2671 = vrot.lane.b32.xlu1 %v2630_v9, %s7526_s22  ;;  %667 = vst.msk [vmem:[#allocation2 + $0xb8] sm:$0xf] %vm560_vm2, %v492_v5  ;;  %v669_v38 = vsel %vm7593_vm7, %v493_v49, %v668_v25  ;;  %v1167_v9 = vld [vmem:[#allocation2 + $0xb0] sm:$0x1]  ;;  %v1904_v4 = vshll.u32 %v8354_v44, 16  ;;  %v2486_v25 = vshrl.u32 %v8383_v3, 16 }
 0x100   : > { %v1656_v14 = vpop.permute.xlu0 %1655  ;;  %670 = vst [vmem:[#allocation2 + $0xbc] sm:$0x1] %v669_v38  ;;  %v2321_v40 = vunpack.c.l.b16 %v1167_v9  ;;  %v1984_v57 = vsel %vm1315_vm10, %v1979_v60, %v1983_v1  ;;  %v1161_v60 = vld [vmem:[#allocation2 + $0x68] sm:$0x1]  ;;  %v2490_v1 = vrot.slane %v2488_v32, 1  ;;  %v1609_v17 = vsel %vm1588_vm9, %v1607_v28, %v1608_v58  ;;  %v8438_v28 = vld [vmem:[#allocation2 + $0x9c] sm:$0xff]  }
 0x101   : > { %v8337_v31 = vpop.permute.xlu1 %2279  ;;  %v2746_v51 = vsel %vm2726_vm13, %v2713_v54, %v1656_v14  ;;  %689 = vst.msk [vmem:[#allocation2 + $0xd0] sm:$0xf] %vm560_vm2, %v492_v5  ;;  %v1906_v26 = vrot.slane %v1904_v4, 1  ;;  %v7515_v58 = vld [vmem:[#allocation2 + $0x9c] sm:$0xf0] }
 0x102   : > { %v2779_v7 = vsel %vm2759_vm14, %v2746_v51, %v8316_v47  ;;  %v2138_v47 = vrot.slane %v8339_v6, 1  ;;  %v8396_v6 = vpack.c.b16 %v1803_v27, %v1803_v27 }
 0x104   : > { %1532 = vrot.lane.b32.xlu2 %v1471_v33, %s7528_s24  ;;  %v2337_v33 = vpack.c.b16 %v2321_v40, %v2321_v40  ;;  %v1909_v22 = vshll.u32 %v8396_v6, 16  ;;  %v8418_v40 = vld [vmem:[#allocation2 + $0x60] sm:$0xff]  }
 0x105   : > { %v708_v14 = vld [vmem:[#allocation2 + $0xb4] sm:$0x2]  ;;  %v828_v39 = vld [vmem:[#allocation2 + $0xb4] sm:$0x1] }
 0x106   : > { %2543 = vrot.lane.b32.xlu0 %v2412_v59, %s7529_s25  ;;  %v8375_v16 = vpop.permute.xlu2 %2667  ;;  %v6834_v18 = vrot.slane %v708_v14, 9  ;;  %v852_v61 = vld [vmem:[#allocation2 + $0xb8] sm:$0x8]  ;;  %v7227_v59 = vld [vmem:[#allocation2 + $0xa8] sm:$0xf0]  ;;  %v2493_v9 = vshll.u32 %v2337_v33, 16 }
 0x107   : > { %1773 = vrot.lane.b32.xlu1 %v8302_v45, %s7522_s18  ;;  %v7408_v45 = vor.u32 %v7407_v10, %v8304_v34  ;;  %v2812_v34 = vsel %vm2792_vm15, %v2779_v7, %v8276_v63  ;;  %v1398_v63 = vrot.slane %v1396_v48, 1  ;;  %v6852_v2 = vrot.slane %v852_v61, 11  ;;  %v973_v15 = vld [vmem:[#allocation2 + $0xbc] sm:$0x1]  ;;  %v7516_v61 = vld [vmem:[#allocation2 + $0x9c] sm:$0xe] }
 0x108   : > { %v2168_v52 = vpop.permute.xlu0 %2167  ;;  %v829_v62 = vsel %vm7593_vm7, %v6834_v18, %v828_v39  ;;  %v2315_v7 = vunpack.c.l.b16 %v1161_v60  ;;  %v1911_v27 = vrot.slane %v1909_v22, 1  ;;  %v1032_v18 = vld [vmem:[#allocation2 + $0xa4] sm:$0x1]  ;;  %v1100_v22 = vld [vmem:[#allocation2 + $0xb0] sm:$0x1] }
 0x109   : > { %v8377_v24 = vpop.permute.xlu1 %1643  ;;  %v2137_v50 = vrot.slane %v7408_v45, 1  ;;  %v2845_v10 = vsel %vm2825_vm0, %v2812_v34, %v2168_v52  ;;  %830 = vst [vmem:[#allocation2 + $0xb4] sm:$0x1] %v829_v62  ;;  %v974_v51 = vsel %vm7627_vm8, %v6852_v2, %v973_v15  ;;  %v7229_v52 = vor.u32 %v7228_v8, %v7227_v59  ;;  %v7218_v60 = vld [vmem:[#allocation2 + $0x60] sm:$0xf0] }
 0x10a   : > { %v2878_v42 = vsel %vm10880_vm1, %v2845_v10, %v8337_v31  ;;  %v1399_v31 = vsel %vm1315_vm10, %v8175_v30, %v1398_v63  ;;  %975 = vst [vmem:[#allocation2 + $0xbc] sm:$0x1] %v974_v51  ;;  %v1902_v45 = vshrl.u32 %v8354_v44, 16  ;;  %v2495_v30 = vrot.slane %v2493_v9, 1  ;;  %v7219_v51 = vld [vmem:[#allocation2 + $0x60] sm:$0xe] }
 0x10b   : > { %v2139_v38 = vsel %vm1588_vm9, %v2137_v50, %v2138_v47  ;;  %v2649_v48 = vrot.slane %v7229_v52, 1  ;;  %v8428_v34 = vpack.c.b16 %v2315_v7, %v2315_v7  ;;  %v2416_v50 = vshll.u32 %v8418_v40, 16 }
 0x10c   : > { %2045 = vrot.lane.b32.xlu2 %v1984_v57, %s7527_s23  ;;  %v8423_v57 = vor.u32 %v2490_v1, %v2486_v25  ;;  %v1907_v32 = vor.u32 %v1906_v26, %v1902_v45  ;;  %v7411_v63 = vor.u32 %v7410_v21, %v8356_v11  ;;  %v2414_v15 = vshrl.u32 %v8418_v40, 16 }
 0x10d   : > { %v2418_v4 = vrot.slane %v2416_v50, 1  ;;  %v1296_v8 = vunpack.c.l.b16 %v1032_v18 }
 0x10e   : > { %1661 = vrot.lane.b32.xlu0 %v1627_v53, %s7524_s20  ;;  %v8399_v54 = vpop.permute.xlu2 %1769  ;;  %v2650_v53 = vrot.slane %v2337_v33, 1  ;;  %v2496_v10 = vsel %vm1315_vm10, %v8423_v57, %v2495_v30  ;;  %v1912_v2 = vsel %vm1315_vm10, %v1907_v32, %v1911_v27  ;;  %v2119_v62 = vrot.slane %v7411_v63, 1 }
 0x10f   : > { %2285 = vrot.lane.b32.xlu1 %v8383_v3, %s7523_s19  ;;  %v8450_v11 = vor.u32 %v2418_v4, %v2414_v15  ;;  %v2632_v30 = vrot.slane %v8428_v34, 1 }
 0x110   : > { %v2552_v5 = vpop.permute.xlu0 %2551  ;;  %v2651_v33 = vsel %vm1588_vm9, %v2649_v48, %v2650_v53  ;;  %v8465_v26 = vld [vmem:[#allocation2 + $0xb4] sm:$0xff]   ;;  %v1475_v48 = vshll.u32 %v8438_v28, 16  ;;  %v1810_v53 = vunpack.c.l.b16 %v1100_v22 }
 0x111   : > { %v2028_v37 = vpop.permute.xlu1 %2027  ;;  %v2911_v43 = vsel %vm10879_vm3, %v2878_v42, %v2552_v5  ;;  %v2120_v5 = vrot.slane %v8396_v6, 1 }
 0x112   : > { %v2944_v13 = vsel %vm10878_vm11, %v2911_v43, %v8312_v29  ;;  %v2701_v29 = vsel %vm2693_vm12, %v7905_v55, %v8295_v20  ;;  %v1826_v4 = vpack.c.b16 %v1810_v53, %v1810_v53 }
 0x113   : > { %6872 = vmatmul.msk.bf16.gmra.mxu2 %vm10877_vm5, %v2944_v13  ;;  %v2734_v14 = vsel %vm2726_vm13, %v2701_v29, %v8377_v24  ;;  %v2421_v24 = vshll.u32 %v8428_v34, 16  ;;  %v7517_v13 = vor.u32 %v7516_v61, %v7515_v58  ;;  %v2121_v6 = vsel %vm1588_vm9, %v2119_v62, %v2120_v5  ;;  %v203_v58 = vld [vmem:[%s7567_s17 + $0xf8] sm:$0xff] }
 0x114   : > { %1520 = vrot.lane.b32.xlu2 %v1399_v31, %s7528_s24  ;;  %v7220_v31 = vor.u32 %v7219_v51, %v7218_v60  ;;  %v8485_v34 = vld [vmem:[#allocation2 + $0x54] sm:$0xff]   ;;  %v235_v63 = vpack.c.bf16 %v203_v58, %v203_v58  ;;  %v2500_v5 = vshll.u32 %v8465_v26, 16 }
 0x115   : > { %v2423_v42 = vrot.slane %v2421_v24, 1  ;;  %v1628_v7 = vrot.slane %v7517_v13, 1  ;;  %v8487_v61 = vld [vmem:[#allocation2 + $0x54] sm:$0xf0]  ;;  %v2141_v13 = vrot.slane %v1826_v4, 1 }
 0x116   : > { %2173 = vrot.lane.b32.xlu0 %v2139_v38, %s7525_s21  ;;  %v8431_v47 = vpop.permute.xlu2 %2281  ;;  %v2631_v29 = vrot.slane %v7220_v31, 1 }
 0x117   : > { %1649 = vrot.lane.b32.xlu1 %v1609_v17, %s7524_s20  ;;  %v1312_v17 = vpack.c.b16 %v1296_v8, %v1296_v8  ;;  %v2424_v45 = vsel %vm1315_vm10, %v8450_v11, %v2423_v42  ;;  %v503_v8 = vshrl.u32 %v235_v63, 16  ;;  %v1026_v42 = vld [vmem:[#allocation2 + $0x5c] sm:$0x1] }
 0x118   : > { %v1756_v55 = vpop.permute.xlu0 %1755  ;;  %v2633_v18 = vsel %vm1588_vm9, %v2631_v29, %v2632_v30  ;;  %v2498_v29 = vshrl.u32 %v8465_v26, 16  ;;  %v1290_v30 = vunpack.c.l.b16 %v1026_v42 }
 0x119   : > { %v2540_v20 = vpop.permute.xlu1 %2539  ;;  %v2767_v39 = vsel %vm2759_vm14, %v2734_v14, %v1756_v55  ;;  %v1629_v21 = vrot.slane %v1312_v17, 1  ;;  %v7203_v55 = vld [vmem:[#allocation2 + $0xa8] sm:$0xf0]  ;;  %v1480_v15 = vshll.u32 %v1312_v17, 16  ;;  %v505_v51 = vrot.slane %v503_v8, 7 }
 0x11a   : > { %v2800_v59 = vsel %vm2792_vm15, %v2767_v39, %v2028_v37 }
 0x11b   : > { %v2833_v37 = vsel %vm2825_vm0, %v2800_v59, %v8335_v0  ;;  %v8467_v0 = vld [vmem:[#allocation2 + $0xb4] sm:$0xf0]  ;;  %v1630_v14 = vsel %vm1588_vm9, %v1628_v7, %v1629_v21  ;;  %v510_v58 = vrot.slane %v505_v51, 4 }
 0x11c   : > { %2685 = vrot.lane.b32.xlu2 %v2651_v33, %s7526_s22 }
 0x11e   : > { %2557 = vrot.lane.b32.xlu0 %v2496_v10, %s7529_s25  ;;  %v8452_v25 = vpop.permute.xlu2 %1645  ;;  %v202_v10 = vld [vmem:[%s7567_s17 + $0xf0] sm:$0xff] }
 0x11f   : > { %2033 = vrot.lane.b32.xlu1 %v1912_v2, %s7527_s23  ;;  %v234_v33 = vpack.c.bf16 %v202_v10, %v202_v10  ;;  %v1477_v2 = vrot.slane %v1475_v48, 1  ;;  %v2502_v48 = vrot.slane %v2500_v5, 1  ;;  %v671_v10 = vld [vmem:[#allocation2 + $0xc0] sm:$0xf] }
 0x120   : > { %v2268_v43 = vpop.permute.xlu0 %2267 }
 0x121   : > { %v8456_v1 = vpop.permute.xlu1 %1657  ;;  %v2866_v38 = vsel %vm10880_vm1, %v2833_v37, %v2268_v43  ;;  %v495_v59 = vshrl.u32 %v234_v33, 16  ;;  %v506_v43 = vshll.u32 %v235_v63, 16  ;;  %v498_v22 = vshll.u32 %v234_v33, 16 }
 0x122   : > { %v2899_v9 = vsel %vm10879_vm3, %v2866_v38, %v2540_v20  ;;  %v7204_v20 = vld [vmem:[#allocation2 + $0xa8] sm:$0xe]  ;;  %v1482_v38 = vrot.slane %v1480_v15, 1  ;;  %v1403_v15 = vshll.u32 %v8485_v34, 16 }
 0x123   : > { %v2932_v52 = vsel %vm10878_vm11, %v2899_v9, %v8375_v16  ;;  %v1168_v16 = vld [vmem:[#allocation2 + $0xbc] sm:$0x1]  ;;  %v7205_v24 = vor.u32 %v7204_v20, %v7203_v55  ;;  %v497_v60 = vrot.slane %v495_v59, 7  ;;  %v508_v21 = vor.u32 %v506_v43, %v505_v51 }
 0x124   : > { %6866 = vmatmul.msk.bf16.gmra.mxu0 %vm10877_vm5, %v2932_v52  ;;  %2161 = vrot.lane.b32.xlu2 %v2121_v6, %s7525_s21  ;;  %v2322_v39 = vunpack.c.l.b16 %v1168_v16  ;;  %v7357_v6 = vld [vmem:[#allocation2 + $0x78] sm:$0xff]   ;;  %v1993_v16 = vshll.u32 %v1826_v4, 16 }
 0x125   : > { %v2140_v17 = vrot.slane %v7205_v24, 1  ;;  %v501_v7 = vrot.slane %v497_v60, 4  ;;  %v500_v55 = vor.u32 %v498_v22, %v497_v60  ;;  %v2503_v24 = vor.u32 %v2502_v48, %v2498_v29  ;;  %v1094_v60 = vld [vmem:[#allocation2 + $0x68] sm:$0x1] }
 0x126   : > { %1761 = vrot.lane.b32.xlu0 %v8354_v44, %s7522_s18  ;;  %v8476_v32 = vpop.permute.xlu2 %2029  ;;  %v1473_v44 = vshrl.u32 %v8438_v28, 16  ;;  %v8489_v62 = vpack.c.b16 %v2322_v39, %v2322_v39  ;;  %v7413_v39 = vld [vmem:[#allocation2 + $0x54] sm:$0xe]  ;;  %v1995_v33 = vrot.slane %v1993_v16, 1 }
 0x127   : > { %2545 = vrot.lane.b32.xlu1 %v2424_v45, %s7529_s25  ;;  %v509_v20 = vsel %vm7577_vm4, %v501_v7, %v508_v21  ;;  %v672_v63 = vsel %vm7585_vm6, %v500_v55, %v671_v10  ;;  %v8537_v21 = vld [vmem:[#allocation2 + $0x6c] sm:$0xf0] }
 0x128   : > { %v1529_v27 = vpop.permute.xlu0 %1528  ;;  %v1478_v37 = vor.u32 %v1477_v2, %v1473_v44  ;;  %v2505_v53 = vshll.u32 %v8489_v62, 16  ;;  %v2142_v44 = vsel %vm1588_vm9, %v2140_v17, %v2141_v13  ;;  %674 = vst.msk [vmem:[#allocation2 + $0xc4] sm:$0xf] %vm560_vm2, %v509_v20  ;;  %v1306_v2 = vpack.c.b16 %v1290_v30, %v1290_v30 }
 0x129   : > { %v8478_v50 = vpop.permute.xlu1 %2169  ;;  %v2715_v31 = vsel %vm2693_vm12, %v7357_v6, %v1529_v27  ;;  %673 = vst [vmem:[#allocation2 + $0xc0] sm:$0xf] %v672_v63  ;;  %v1996_v43 = vsel %vm1315_vm10, %v8423_v57, %v1995_v33  ;;  %v1405_v6 = vrot.slane %v1403_v15, 1  ;;  %v8552_v63 = vld [vmem:[#allocation2 + $0xb4] sm:$0xff]  }
 0x12a   : > { %v2748_v27 = vsel %vm2726_vm13, %v2715_v31, %v8456_v1  ;;  %v2507_v59 = vrot.slane %v2505_v53, 1  ;;  %v1408_v31 = vshll.u32 %v1306_v2, 16  ;;  %v1611_v16 = vrot.slane %v1306_v2, 1 }
 0x12b   : > { %v2781_v1 = vsel %vm2759_vm14, %v2748_v27, %v8399_v54  ;;  %v7416_v54 = vld [vmem:[#allocation2 + $0xb4] sm:$0xe]  ;;  %v1998_v36 = vshrl.u32 %v8552_v63, 16 }
 0x12c   : > { %2673 = vrot.lane.b32.xlu2 %v2633_v18, %s7526_s22  ;;  %v675_v18 = vld [vmem:[#allocation2 + $0xc8] sm:$0x1]  ;;  %v2508_v13 = vsel %vm1315_vm10, %v2503_v24, %v2507_v59  ;;  %v1410_v53 = vrot.slane %v1408_v31, 1  ;;  %v7417_v55 = vor.u32 %v7416_v54, %v8467_v0  ;;  %v1162_v59 = vld [vmem:[#allocation2 + $0x74] sm:$0x1]  ;;  %v2653_v54 = vrot.slane %v8489_v62, 1 }
 0x12e   : > { %2273 = vrot.lane.b32.xlu0 %v8418_v40, %s7523_s19  ;;  %v8496_v9 = vpop.permute.xlu2 %2541 }
 0x12f   : > { %1663 = vrot.lane.b32.xlu1 %v1630_v14, %s7524_s20  ;;  %v1483_v14 = vsel %vm1315_vm10, %v1478_v37, %v1482_v38  ;;  %v1401_v37 = vshrl.u32 %v8485_v34, 16  ;;  %v7414_v38 = vor.u32 %v7413_v39, %v8487_v61  ;;  %v853_v17 = vld [vmem:[#allocation2 + $0xc4] sm:$0x8] }
 0x130   : > { %v2042_v52 = vpop.permute.xlu0 %2041  ;;  %v6853_v22 = vrot.slane %v853_v17, 11  ;;  %v709_v29 = vld [vmem:[#allocation2 + $0xc0] sm:$0x2]  ;;  %v831_v30 = vld [vmem:[#allocation2 + $0xc0] sm:$0x1] }
 0x131   : > { %v8499_v45 = vpop.permute.xlu1 %2553  ;;  %v2814_v4 = vsel %vm2792_vm15, %v2781_v1, %v2042_v52  ;;  %v1804_v52 = vunpack.c.l.b16 %v1094_v60  ;;  %v1610_v61 = vrot.slane %v7414_v38, 1  ;;  %v1406_v48 = vor.u32 %v1405_v6, %v1401_v37  ;;  %v8554_v1 = vld [vmem:[#allocation2 + $0xb4] sm:$0xf0]  ;;  %v1101_v60 = vld [vmem:[#allocation2 + $0xbc] sm:$0x1] }
 0x132   : > { %v2847_v51 = vsel %vm2825_vm0, %v2814_v4, %v8478_v50  ;;  %v8535_v50 = vld [vmem:[#allocation2 + $0x6c] sm:$0xff]   ;;  %v6835_v20 = vrot.slane %v709_v29, 9  ;;  %v7194_v38 = vld [vmem:[#allocation2 + $0x60] sm:$0xf0]  ;;  %v7195_v17 = vld [vmem:[#allocation2 + $0x60] sm:$0xe] }
 0x133   : > { %v2880_v7 = vsel %vm10880_vm1, %v2847_v51, %v8431_v47  ;;  %v1612_v2 = vsel %vm1588_vm9, %v1610_v61, %v1611_v16  ;;  %v1411_v24 = vsel %vm1315_vm10, %v1406_v48, %v1410_v53  ;;  %v7196_v29 = vor.u32 %v7195_v17, %v7194_v38  ;;  %v690_v53 = vld [vmem:[#allocation2 + $0xd4] sm:$0x1]  ;;  %v7183_v38 = vld [vmem:[#allocation2 + $0xa8] sm:$0xe] }
 0x134   : > { %1775 = vrot.lane.b32.xlu2 %v8383_v3, %s7522_s18  ;;  %v676_v3 = vsel %vm7593_vm7, %v510_v58, %v675_v18  ;;  %v2913_v27 = vsel %vm10879_vm3, %v2880_v7, %v8499_v45  ;;  %v8547_v58 = vpack.c.b16 %v1804_v52, %v1804_v52  ;;  %v1033_v18 = vld [vmem:[#allocation2 + $0xb0] sm:$0x1]  ;;  %v832_v45 = vsel %vm7593_vm7, %v6835_v20, %v831_v30 }
 0x135   : > { %677 = vst [vmem:[#allocation2 + $0xc8] sm:$0x1] %v676_v3  ;;  %v1297_v3 = vunpack.c.l.b16 %v1033_v18  ;;  %v1811_v7 = vunpack.c.l.b16 %v1101_v60 }
 0x136   : > { %1534 = vrot.lane.b32.xlu0 %v1483_v14, %s7528_s24  ;;  %v8520_v8 = vpop.permute.xlu2 %1659  ;;  %v7358_v14 = vld [vmem:[#allocation2 + $0x30] sm:$0xff]   ;;  %v1921_v15 = vshll.u32 %v8547_v58, 16  ;;  %833 = vst [vmem:[#allocation2 + $0xc0] sm:$0x1] %v832_v45 }
 0x137   : > { %2175 = vrot.lane.b32.xlu1 %v2142_v44, %s7525_s21  ;;  %v8573_v62 = vpack.c.b16 %v1297_v3, %v1297_v3 }
 0x138   : > { %v1517_v5 = vpop.permute.xlu0 %1516  ;;  %v1923_v37 = vrot.slane %v1921_v15, 1 }
 0x139   : > { %v1758_v42 = vpop.permute.xlu1 %1757  ;;  %v2703_v44 = vsel %vm2693_vm12, %v7358_v14, %v1517_v5  ;;  %v2652_v5 = vrot.slane %v7417_v55, 1  ;;  %v2426_v55 = vshrl.u32 %v8535_v50, 16 }
 0x13a   : > { %v2736_v4 = vsel %vm2726_vm13, %v2703_v44, %v8452_v25  ;;  %v686_v25 = vld [vmem:[#allocation2 + $0xcc] sm:$0xf]  ;;  %v1924_v48 = vsel %vm1315_vm10, %v8450_v11, %v1923_v37  ;;  %v691_v11 = vsel %vm7593_vm7, %v493_v49, %v690_v53  ;;  %v2122_v44 = vrot.slane %v7196_v29, 1 }
 0x13b   : > { %v2769_v51 = vsel %vm2759_vm14, %v2736_v4, %v1758_v42  ;;  %v687_v42 = vsel %vm7585_vm6, %v8344_v41, %v686_v25  ;;  %v2654_v61 = vsel %vm1588_vm9, %v2652_v5, %v2653_v54  ;;  %v1492_v41 = vshll.u32 %v8573_v62, 16  ;;  %692 = vst [vmem:[#allocation2 + $0xd4] sm:$0x1] %v691_v11  ;;  %v854_v54 = vld [vmem:[#allocation2 + $0xd0] sm:$0x8] }
 0x13c   : > { %2287 = vrot.lane.b32.xlu2 %v8465_v26, %s7523_s19  ;;  %v976_v26 = vld [vmem:[#allocation2 + $0xc8] sm:$0x1]  ;;  %688 = vst [vmem:[#allocation2 + $0xcc] sm:$0xf] %v687_v42  ;;  %v1632_v29 = vrot.slane %v8573_v62, 1 }
 0x13d   : > { %v977_v33 = vsel %vm7627_vm8, %v6853_v22, %v976_v26  ;;  %v7419_v22 = vld [vmem:[#allocation2 + $0x6c] sm:$0xe]  ;;  %v2000_v26 = vshll.u32 %v8552_v63, 16  ;;  %v8616_v37 = vld [vmem:[#allocation2 + $0xc0] sm:$0xff]   ;;  %v7422_v62 = vld [vmem:[#allocation2 + $0xb4] sm:$0xe] }
 0x13e   : > { %2047 = vrot.lane.b32.xlu0 %v1996_v43, %s7527_s23  ;;  %v8542_v47 = vpop.permute.xlu2 %2171  ;;  %978 = vst [vmem:[#allocation2 + $0xc8] sm:$0x1] %v977_v33  ;;  %v2316_v43 = vunpack.c.l.b16 %v1162_v59 }
 0x13f   : > { %2559 = vrot.lane.b32.xlu1 %v2508_v13, %s7529_s25  ;;  %v2428_v13 = vshll.u32 %v8535_v50, 16 }
 0x140   : > { %v2682_v39 = vpop.permute.xlu0 %2681  ;;  %v8582_v30 = vpack.c.b16 %v2316_v43, %v2316_v43  ;;  %v7182_v43 = vld [vmem:[#allocation2 + $0xa8] sm:$0xf0] }
 0x141   : > { %v2270_v10 = vpop.permute.xlu1 %2269  ;;  %v2946_v0 = vsel %vm10878_vm11, %v2913_v27, %v2682_v39  ;;  %v2430_v20 = vrot.slane %v2428_v13, 1  ;;  %v8589_v27 = vpack.c.b16 %v1811_v7, %v1811_v7  ;;  %v2123_v39 = vrot.slane %v8547_v58, 1 }
 0x142   : > { %6873 = vmatmul.msk.bf16.gmra.mxu2 %vm10877_vm5, %v2946_v0  ;;  %v1494_v0 = vrot.slane %v1492_v41, 1  ;;  %v2002_v58 = vrot.slane %v2000_v26, 1  ;;  %v6854_v13 = vrot.slane %v854_v54, 11 }
 0x143   : > { %v2431_v18 = vor.u32 %v2430_v20, %v2426_v55  ;;  %v834_v5 = vld [vmem:[#allocation2 + $0xcc] sm:$0x1]  ;;  %v2124_v60 = vsel %vm1588_vm9, %v2122_v44, %v2123_v39 }
 0x144   : > { %1651 = vrot.lane.b32.xlu2 %v1612_v2, %s7524_s20  ;;  %v710_v2 = vld [vmem:[#allocation2 + $0xcc] sm:$0x2] }
 0x145   : > { %v6836_v59 = vrot.slane %v710_v2, 9 }
 0x146   : > { %1522 = vrot.lane.b32.xlu0 %v1411_v24, %s7528_s24  ;;  %v8571_v6 = vpop.permute.xlu2 %2555  ;;  %v2005_v24 = vshll.u32 %v8589_v27, 16 }
 0x147   : > { %1763 = vrot.lane.b32.xlu1 %v8418_v40, %s7522_s18  ;;  %v2802_v40 = vsel %vm2792_vm15, %v2769_v51, %v8476_v32  ;;  %v2433_v32 = vshll.u32 %v8582_v30, 16  ;;  %v835_v17 = vsel %vm7593_vm7, %v6836_v59, %v834_v5  ;;  %v7423_v59 = vor.u32 %v7422_v62, %v8554_v1 }
 0x148   : > { %v2158_v31 = vpop.permute.xlu0 %2157  ;;  %v2007_v7 = vrot.slane %v2005_v24, 1  ;;  %836 = vst [vmem:[#allocation2 + $0xcc] sm:$0x1] %v835_v17  ;;  %v7425_v24 = vld [vmem:[#allocation2 + $0xb4] sm:$0xe]  ;;  %v2144_v5 = vrot.slane %v8589_v27, 1 }
 0x149   : > { %v1531_v52 = vpop.permute.xlu1 %1530  ;;  %v2835_v16 = vsel %vm2825_vm0, %v2802_v40, %v2158_v31  ;;  %v2435_v33 = vrot.slane %v2433_v32, 1  ;;  %v2635_v31 = vrot.slane %v8582_v30, 1 }
 0x14a   : > { %v2868_v14 = vsel %vm10880_vm1, %v2835_v16, %v2270_v10  ;;  %v7420_v10 = vor.u32 %v7419_v22, %v8537_v21  ;;  %v2003_v22 = vor.u32 %v2002_v58, %v1998_v36  ;;  %v2717_v40 = vsel %vm2693_vm12, %v8062_v56, %v1531_v52 }
 0x14b   : > { %v2901_v4 = vsel %vm10879_vm3, %v2868_v14, %v8496_v9  ;;  %v2436_v51 = vsel %vm1315_vm10, %v2431_v18, %v2435_v33  ;;  %v1495_v9 = vsel %vm1315_vm10, %v8423_v57, %v1494_v0  ;;  %v979_v57 = vld [vmem:[#allocation2 + $0xd4] sm:$0x1]  ;;  %v2512_v16 = vshll.u32 %v8616_v37, 16 }
 0x14c   : > { %2035 = vrot.lane.b32.xlu2 %v1924_v48, %s7527_s23  ;;  %v2634_v42 = vrot.slane %v7420_v10, 1  ;;  %v980_v30 = vsel %vm7627_vm8, %v6854_v13, %v979_v57  ;;  %v2750_v41 = vsel %vm2726_vm13, %v2717_v40, %v8520_v8  ;;  %v2008_v32 = vsel %vm1315_vm10, %v2003_v22, %v2007_v7  ;;  %v7230_v7 = vld [vmem:[#allocation2 + $0xc0] sm:$0xf0]  ;;  %v7231_v40 = vld [vmem:[#allocation2 + $0xc0] sm:$0xe] }
 0x14d   : > { %981 = vst [vmem:[#allocation2 + $0xd4] sm:$0x1] %v980_v30  ;;  %v2510_v18 = vshrl.u32 %v8616_v37, 16  ;;  %v2514_v10 = vrot.slane %v2512_v16, 1  ;;  %v7232_v30 = vor.u32 %v7231_v40, %v7230_v7 }
 0x14e   : > { %2687 = vrot.lane.b32.xlu0 %v2654_v61, %s7526_s22  ;;  %v8603_v45 = vpop.permute.xlu2 %1759  ;;  %v7184_v61 = vor.u32 %v7183_v38, %v7182_v43  ;;  %v2636_v26 = vsel %vm1588_vm9, %v2634_v42, %v2635_v31  ;;  %v2143_v43 = vrot.slane %v7423_v59, 1 }
 0x14f   : > { %2275 = vrot.lane.b32.xlu1 %v8535_v50, %s7523_s19  ;;  %v1169_v50 = vld [vmem:[#allocation2 + $0xc8] sm:$0x1]  ;;  %v8657_v54 = vor.u32 %v2514_v10, %v2510_v18  ;;  %v7207_v18 = vld [vmem:[#allocation2 + $0xc0] sm:$0xe] }
 0x150   : > { %v2670_v49 = vpop.permute.xlu0 %2669  ;;  %v3023_v15 = vpop.f32.mrf.mxu0  ;;  %v2323_v25 = vunpack.c.l.b16 %v1169_v50  ;;  %v1631_v52 = vrot.slane %v7184_v61, 1  ;;  %v2145_v22 = vsel %vm1588_vm9, %v2143_v43, %v2144_v5  ;;  %v7427_v5 = vld [vmem:[#allocation2 + $0xcc] sm:$0xf0] }
 0x151   : > { %3105 = vst.msk [vmem:[#allocation4] sm:$0xff] %vm2693_vm12, %v3023_v15  ;;  %v2044_v3 = vpop.permute.xlu1 %2043  ;;  %v2934_v21 = vsel %vm10878_vm11, %v2901_v4, %v2670_v49  ;;  %v3211_v48 = vmul.f32 %v3023_v15, %v3023_v15  ;;  %v3138_v14 = vsel %vm2693_vm12, %v3023_v15, 0.0  ;;  %v8649_v15 = vld [vmem:[#allocation2 + $0xb4] sm:$0xff]  }
 0x152   : > { %6867 = vmatmul.msk.bf16.gmra.mxu0 %vm10877_vm5, %v2934_v21  ;;  %v8632_v56 = vpack.c.b16 %v2323_v25, %v2323_v25  ;;  %v1633_v0 = vsel %vm1588_vm9, %v1631_v52, %v1632_v29  ;;  %v7424_v4 = vld [vmem:[#allocation2 + $0xb4] sm:$0xf0]  ;;  %v1034_v21 = vld [vmem:[#allocation2 + $0xbc] sm:$0x1]  ;;  %v1102_v52 = vld [vmem:[#allocation2 + $0xc8] sm:$0x1] }
 0x153   : > { %v3243_v36 = vsel %vm2693_vm12, %v3211_v48, 0.0  ;;  %v1298_v27 = vunpack.c.l.b16 %v1034_v21  ;;  %v7426_v16 = vor.u32 %v7425_v24, %v7424_v4  ;;  %v1153_v21 = vld [vmem:[#allocation2 + $0xcc] sm:$0xff]  }
 0x154   : > { %2547 = vrot.lane.b32.xlu2 %v2436_v51, %s7529_s25  ;;  %v2517_v49 = vshll.u32 %v8632_v56, 16 }
 0x155   : > { %v1314_v48 = vpack.c.b16 %v1298_v27, %v1298_v27 }
 0x156   : > { %2163 = vrot.lane.b32.xlu0 %v2124_v60, %s7525_s21  ;;  %v8630_v53 = vpop.permute.xlu2 %2271  ;;  %v2519_v60 = vrot.slane %v2517_v49, 1 }
 0x157   : > { %1536 = vrot.lane.b32.xlu1 %v1495_v9, %s7528_s24 }
 0x158   : > { %v1772_v55 = vpop.permute.xlu0 %1771  ;;  %v3025_v20 = vpop.f32.mrf.mxu0  ;;  %v2520_v57 = vsel %vm1315_vm10, %v8657_v54, %v2519_v60  ;;  %v7428_v60 = vld [vmem:[#allocation2 + $0xcc] sm:$0xe] }
 0x159   : > { %3106 = vst.msk [vmem:[#allocation4 + $0x8] sm:$0xff] %vm2693_vm12, %v3025_v20  ;;  %v3139_v11 = vsel %vm2693_vm12, %v3025_v20, 0.0  ;;  %v3212_v44 = vmul.f32 %v3025_v20, %v3025_v20  ;;  %v8641_v39 = vpop.permute.xlu1 %1518  ;;  %v2783_v8 = vsel %vm2759_vm14, %v2750_v41, %v1772_v55  ;;  %v2655_v41 = vrot.slane %v7232_v30, 1 }
 0x15a   : > { %v3140_v33 = vadd.f32 %v3139_v11, %v3138_v14  ;;  %v2816_v50 = vsel %vm2792_vm15, %v2783_v8, %v2044_v3  ;;  %v2656_v55 = vrot.slane %v8632_v56, 1  ;;  %v1812_v11 = vunpack.c.l.b16 %v1102_v52 }
 0x15b   : > { %v3244_v2 = vsel %vm2693_vm12, %v3212_v44, 0.0  ;;  %v2849_v3 = vsel %vm2825_vm0, %v2816_v50, %v8542_v47  ;;  %v7206_v44 = vld [vmem:[#allocation2 + $0xc0] sm:$0xf0]  ;;  %v1497_v56 = vshrl.u32 %v8649_v15, 16  ;;  %v2705_v43 = vsel %vm2693_vm12, %v8134_v46, %v8641_v39 }
 0x15c   : > { %v3245_v58 = vadd.f32 %v3244_v2, %v3243_v36  ;;  %1665 = vrot.lane.b32.xlu2 %v1633_v0, %s7524_s20  ;;  %v1504_v36 = vshll.u32 %v1314_v48, 16  ;;  %v2657_v49 = vsel %vm1588_vm9, %v2655_v41, %v2656_v55  ;;  %v7208_v24 = vor.u32 %v7207_v18, %v7206_v44 }
 0x15d   : > { %v1828_v59 = vpack.c.b16 %v1812_v11, %v1812_v11  ;;  %v2522_v44 = vshrl.u32 %v1153_v21, 16 }
 0x15e   : > { %2675 = vrot.lane.b32.xlu0 %v2636_v26, %s7526_s22  ;;  %v8659_v51 = vpop.permute.xlu2 %1532  ;;  %v1634_v26 = vrot.slane %v7426_v16, 1 }
 0x15f   : > { %2049 = vrot.lane.b32.xlu1 %v2008_v32, %s7527_s23  ;;  %v1635_v32 = vrot.slane %v1314_v48, 1 }
 0x160   : > { %v2284_v9 = vpop.permute.xlu0 %2283  ;;  %v3028_v25 = vpop.f32.mrf.mxu0 }
 0x161   : > { %v2882_v1 = vsel %vm10880_vm1, %v2849_v3, %v2284_v9  ;;  %3107 = vst.msk [vmem:[#allocation4 + $0x10] sm:$0xff] %vm2693_vm12, %v3028_v25  ;;  %v3141_v38 = vsel %vm2693_vm12, %v3028_v25, 0.0  ;;  %v3213_v17 = vmul.f32 %v3028_v25, %v3028_v25  ;;  %v2684_v13 = vpop.permute.xlu1 %2683  ;;  %v1506_v25 = vrot.slane %v1504_v36, 1 }
 0x162   : > { %v3142_v42 = vadd.f32 %v3141_v38, %v3140_v33  ;;  %v2915_v31 = vsel %vm10879_vm3, %v2882_v1, %v8571_v6  ;;  %v1499_v6 = vshll.u32 %v8649_v15, 16  ;;  %v2147_v1 = vrot.slane %v1828_v59, 1  ;;  %v1170_v38 = vld [vmem:[#allocation2 + $0xd4] sm:$0x1] }
 0x163   : > { %v3246_v47 = vsel %vm2693_vm12, %v3213_v17, 0.0  ;;  %v2948_v61 = vsel %vm10878_vm11, %v2915_v31, %v2684_v13  ;;  %v2146_v13 = vrot.slane %v7208_v24, 1 }
 0x164   : > { %v3247_v29 = vadd.f32 %v3246_v47, %v3245_v58  ;;  %6874 = vmatmul.msk.bf16.gmra.mxu2 %vm10877_vm5, %v2948_v61  ;;  %2177 = vrot.lane.b32.xlu2 %v2145_v22, %s7525_s21  ;;  %v1501_v0 = vrot.slane %v1499_v6, 1  ;;  %v1636_v58 = vsel %vm1588_vm9, %v1634_v26, %v1635_v32  ;;  %v2017_v22 = vshll.u32 %v1828_v59, 16  ;;  %v7359_v59 = vld [vmem:[#allocation2 + $0x90] sm:$0xff]  }
 0x165   : > { %v2148_v40 = vsel %vm1588_vm9, %v2146_v13, %v2147_v1  ;;  %v7429_v47 = vor.u32 %v7428_v60, %v7427_v5 }
 0x166   : > { %1777 = vrot.lane.b32.xlu0 %v8552_v63, %s7522_s18  ;;  %v8687_v2 = vpop.permute.xlu2 %2045  ;;  %v1502_v3 = vor.u32 %v1501_v0, %v1497_v56 }
 0x167   : > { %2561 = vrot.lane.b32.xlu1 %v2520_v57, %s7529_s25  ;;  %v8680_v20 = vpop.f32.mrf.mxu2  ;;  %v2658_v30 = vrot.slane %v7429_v47, 1 }
 0x168   : > { %3121 = vst.msk [vmem:[#allocation4 + $0x80] sm:$0xff] %vm2693_vm12, %v8680_v20  ;;  %v1648_v62 = vpop.permute.xlu0 %1647  ;;  %v3030_v14 = vpop.f32.mrf.mxu0  ;;  %v1507_v7 = vsel %vm1315_vm10, %v1502_v3, %v1506_v25 }
 0x169   : > { %3108 = vst.msk [vmem:[#allocation4 + $0x18] sm:$0xff] %vm2693_vm12, %v3030_v14  ;;  %v3143_v63 = vsel %vm2693_vm12, %v3030_v14, 0.0  ;;  %v3214_v8 = vmul.f32 %v3030_v14, %v3030_v14  ;;  %v2160_v33 = vpop.permute.xlu1 %2159  ;;  %v2738_v9 = vsel %vm2726_vm13, %v2705_v43, %v1648_v62 }
 0x16a   : > { %v3144_v10 = vadd.f32 %v3143_v63, %v3142_v42  ;;  %v2771_v39 = vsel %vm2759_vm14, %v2738_v9, %v8603_v45  ;;  %v2324_v42 = vunpack.c.l.b16 %v1170_v38  ;;  %v2019_v45 = vrot.slane %v2017_v22, 1  ;;  %v7360_v22 = vld [vmem:[#allocation2 + $0x48] sm:$0xff]  }
 0x16b   : > { %v3248_v4 = vsel %vm2693_vm12, %v3214_v8, 0.0 }
 0x16c   : > { %v3249_v50 = vadd.f32 %v3248_v4, %v3247_v29  ;;  %2689 = vrot.lane.b32.xlu2 %v2657_v49, %s7526_s22  ;;  %v2340_v16 = vpack.c.b16 %v2324_v42, %v2324_v42  ;;  %v2524_v29 = vshll.u32 %v1153_v21, 16  ;;  %v2020_v11 = vsel %vm1315_vm10, %v8657_v54, %v2019_v45 }
 0x16e   : > { %2289 = vrot.lane.b32.xlu0 %v8616_v37, %s7523_s19  ;;  %v8709_v61 = vpop.permute.xlu2 %1520  ;;  %v2659_v48 = vrot.slane %v2340_v16, 1  ;;  %v2529_v63 = vshll.u32 %v2340_v16, 16 }
 0x16f   : > { %1667 = vrot.lane.b32.xlu1 %v1636_v58, %s7524_s20  ;;  %v8700_v17 = vpop.f32.mrf.mxu2 }
 0x170   : > { %3122 = vst.msk [vmem:[#allocation4 + $0x88] sm:$0xff] %vm2693_vm12, %v8700_v17  ;;  %v2032_v46 = vpop.permute.xlu0 %2031  ;;  %v2660_v8 = vsel %vm1588_vm9, %v2658_v30, %v2659_v48  ;;  %v2531_v0 = vrot.slane %v2529_v63, 1 }
 0x171   : > { %v2672_v27 = vpop.permute.xlu1 %2671  ;;  %v2804_v31 = vsel %vm2792_vm15, %v2771_v39, %v2032_v46 }
 0x172   : > { %v2837_v57 = vsel %vm2825_vm0, %v2804_v31, %v2160_v33 }
 0x173   : > { %v2870_v6 = vsel %vm10880_vm1, %v2837_v57, %v8630_v53  ;;  %v2526_v53 = vrot.slane %v2524_v29, 1 }
 0x174   : > { %1779 = vrot.lane.b32.xlu2 %v8616_v37, %s7522_s18 }
 0x176   : > { %1538 = vrot.lane.b32.xlu0 %v1507_v7, %s7528_s24  ;;  %v2686_v56 = vpop.permute.xlu2 %2685  ;;  %v2707_v7 = vsel %vm2693_vm12, %v7360_v22, %v8709_v61 }
 0x177   : > { %2179 = vrot.lane.b32.xlu1 %v2148_v40, %s7525_s21 }
 0x178   : > { %v2544_v52 = vpop.permute.xlu0 %2543  ;;  %v3033_v41 = vpop.f32.mrf.mxu0 }
 0x179   : > { %v2903_v55 = vsel %vm10879_vm3, %v2870_v6, %v2544_v52  ;;  %3109 = vst.msk [vmem:[#allocation4 + $0x20] sm:$0xff] %vm2693_vm12, %v3033_v41  ;;  %v3145_v26 = vsel %vm2693_vm12, %v3033_v41, 0.0  ;;  %v3215_v37 = vmul.f32 %v3033_v41, %v3033_v41  ;;  %v1774_v32 = vpop.permute.xlu1 %1773 }
 0x17a   : > { %v3146_v62 = vadd.f32 %v3145_v26, %v3144_v10  ;;  %v2936_v14 = vsel %vm10878_vm11, %v2903_v55, %v2672_v27  ;;  %v2527_v10 = vor.u32 %v2526_v53, %v2522_v44 }
 0x17b   : > { %v3250_v18 = vsel %vm2693_vm12, %v3215_v37, 0.0  ;;  %6868 = vmatmul.msk.bf16.gmra.mxu0 %vm10877_vm5, %v2936_v14 }
 0x17c   : > { %v3251_v33 = vadd.f32 %v3250_v18, %v3249_v50  ;;  %2291 = vrot.lane.b32.xlu2 %v1153_v21, %s7523_s19  ;;  %v2719_v50 = vsel %vm2693_vm12, %v7359_v59, %v8659_v51  ;;  %v2532_v5 = vsel %vm1315_vm10, %v2527_v10, %v2531_v0 }
 0x17e   : > { %2051 = vrot.lane.b32.xlu0 %v2020_v11, %s7527_s23  ;;  %v2162_v3 = vpop.permute.xlu2 %2161 }
 0x17f   : > { %2691 = vrot.lane.b32.xlu1 %v2660_v8, %s7526_s22 }
 0x180   : > { %v1662_v54 = vpop.permute.xlu0 %1661  ;;  %v3035_v36 = vpop.f32.mrf.mxu0 }
 0x181   : > { %3110 = vst.msk [vmem:[#allocation4 + $0x28] sm:$0xff] %vm2693_vm12, %v3035_v36  ;;  %v3147_v49 = vsel %vm2693_vm12, %v3035_v36, 0.0  ;;  %v3216_v4 = vmul.f32 %v3035_v36, %v3035_v36  ;;  %v2286_v58 = vpop.permute.xlu1 %2285  ;;  %v2752_v43 = vsel %vm2726_vm13, %v2719_v50, %v1662_v54 }
 0x182   : > { %v3148_v24 = vadd.f32 %v3147_v49, %v3146_v62  ;;  %v2785_v25 = vsel %vm2759_vm14, %v2752_v43, %v1774_v32 }
 0x183   : > { %v3252_v21 = vsel %vm2693_vm12, %v3216_v4, 0.0  ;;  %v2818_v38 = vsel %vm2792_vm15, %v2785_v25, %v8687_v2 }
 0x184   : > { %v3253_v60 = vadd.f32 %v3252_v21, %v3251_v33 }
 0x186   : > { %2563 = vrot.lane.b32.xlu0 %v2532_v5, %s7529_s25  ;;  %v2674_v31 = vpop.permute.xlu2 %2673 }
 0x188   : > { %v2174_v9 = vpop.permute.xlu0 %2173 }
 0x189   : > { %v1650_v1 = vpop.permute.xlu1 %1649  ;;  %v2851_v13 = vsel %vm2825_vm0, %v2818_v38, %v2174_v9 }
 0x18a   : > { %v2884_v46 = vsel %vm10880_vm1, %v2851_v13, %v2286_v58  ;;  %v2740_v47 = vsel %vm2726_vm13, %v2707_v7, %v1650_v1 }
 0x18e   : > { %v1776_v45 = vpop.permute.xlu2 %1775 }
 0x190   : > { %v2558_v51 = vpop.permute.xlu0 %2557 }
 0x191   : > { %v2917_v39 = vsel %vm10879_vm3, %v2884_v46, %v2558_v51  ;;  %v2034_v27 = vpop.permute.xlu1 %2033 }
 0x192   : > { %v2950_v42 = vsel %vm10878_vm11, %v2917_v39, %v2686_v56 }
 0x193   : > { %6875 = vmatmul.msk.bf16.gmra.mxu2 %vm10877_vm5, %v2950_v42 }
 0x196   : > { %v8748_v40 = vpop.f32.mrf.mxu2  ;;  %v2288_v44 = vpop.permute.xlu2 %2287 }
 0x197   : > { %3123 = vst.msk [vmem:[#allocation4 + $0x90] sm:$0xff] %vm2693_vm12, %v8748_v40 }
 0x198   : > { %v1762_v2 = vpop.permute.xlu0 %1761 }
 0x199   : > { %v2546_v57 = vpop.permute.xlu1 %2545  ;;  %v2773_v16 = vsel %vm2759_vm14, %v2740_v47, %v1762_v2 }
 0x19a   : > { %v2806_v29 = vsel %vm2792_vm15, %v2773_v16, %v2034_v27 }
 0x19b   : > { %v2839_v48 = vsel %vm2825_vm0, %v2806_v29, %v2162_v3 }
 0x19e   : > { %v8755_v30 = vpop.f32.mrf.mxu2  ;;  %v1652_v49 = vpop.permute.xlu2 %1651 }
 0x19f   : > { %3124 = vst.msk [vmem:[#allocation4 + $0x98] sm:$0xff] %vm2693_vm12, %v8755_v30 }
 0x1a0   : > { %v2274_v61 = vpop.permute.xlu0 %2273 }
 0x1a1   : > { %v2872_v52 = vsel %vm10880_vm1, %v2839_v48, %v2274_v61  ;;  %v3038_v6 = vpop.f32.mrf.mxu0  ;;  %v1664_v41 = vpop.permute.xlu1 %1663 }
 0x1a2   : > { %3111 = vst.msk [vmem:[#allocation4 + $0x30] sm:$0xff] %vm2693_vm12, %v3038_v6  ;;  %v3149_v55 = vsel %vm2693_vm12, %v3038_v6, 0.0  ;;  %v3217_v26 = vmul.f32 %v3038_v6, %v3038_v6  ;;  %v2905_v37 = vsel %vm10879_vm3, %v2872_v52, %v2546_v57 }
 0x1a3   : > { %v3150_v32 = vadd.f32 %v3149_v55, %v3148_v24  ;;  %v2938_v62 = vsel %vm10878_vm11, %v2905_v37, %v2674_v31 }
 0x1a4   : > { %v3254_v14 = vsel %vm2693_vm12, %v3217_v26, 0.0  ;;  %6869 = vmatmul.msk.bf16.gmra.mxu0 %vm10877_vm5, %v2938_v62 }
 0x1a5   : > { %v3255_v11 = vadd.f32 %v3254_v14, %v3253_v60 }
 0x1a6   : > { %v2036_v60 = vpop.permute.xlu2 %2035 }
 0x1a8   : > { %v1535_v18 = vpop.permute.xlu0 %1534 }
 0x1a9   : > { %v3040_v53 = vpop.f32.mrf.mxu0  ;;  %v2176_v63 = vpop.permute.xlu1 %2175  ;;  %v2721_v54 = vsel %vm2693_vm12, %v8438_v28, %v1535_v18 }
 0x1aa   : > { %3112 = vst.msk [vmem:[#allocation4 + $0x38] sm:$0xff] %vm2693_vm12, %v3040_v53  ;;  %v3151_v8 = vsel %vm2693_vm12, %v3040_v53, 0.0  ;;  %v3218_v33 = vmul.f32 %v3040_v53, %v3040_v53  ;;  %v2754_v58 = vsel %vm2726_vm13, %v2721_v54, %v1664_v41  ;;  %v7361_v41 = vld [vmem:[#allocation2 + $0xa8] sm:$0xff]  }
 0x1ab   : > { %v3152_v56 = vadd.f32 %v3151_v8, %v3150_v32  ;;  %v2787_v24 = vsel %vm2759_vm14, %v2754_v58, %v1776_v45 }
 0x1ac   : > { %v3256_v10 = vsel %vm2693_vm12, %v3218_v33, 0.0 }
 0x1ad   : > { %v3257_v0 = vadd.f32 %v3256_v10, %v3255_v11 }
 0x1ae   : > { %v2548_v38 = vpop.permute.xlu2 %2547 }
 0x1b0   : > { %v2048_v36 = vpop.permute.xlu0 %2047 }
 0x1b1   : > { %v2560_v4 = vpop.permute.xlu1 %2559  ;;  %v2820_v59 = vsel %vm2792_vm15, %v2787_v24, %v2048_v36 }
 0x1b2   : > { %v2853_v5 = vsel %vm2825_vm0, %v2820_v59, %v2176_v63 }
 0x1b3   : > { %v2886_v43 = vsel %vm10880_vm1, %v2853_v5, %v2288_v44 }
 0x1b4   : > { %v2919_v9 = vsel %vm10879_vm3, %v2886_v43, %v2560_v4 }
 0x1b6   : > { %v1666_v31 = vpop.permute.xlu2 %1665 }
 0x1b8   : > { %v1523_v50 = vpop.permute.xlu0 %1522 }
 0x1b9   : > { %v1764_v21 = vpop.permute.xlu1 %1763  ;;  %v2709_v28 = vsel %vm2693_vm12, %v8485_v34, %v1523_v50 }
 0x1ba   : > { %v2742_v13 = vsel %vm2726_vm13, %v2709_v28, %v1652_v49 }
 0x1bb   : > { %v2775_v46 = vsel %vm2759_vm14, %v2742_v13, %v1764_v21 }
 0x1bc   : > { %v2808_v27 = vsel %vm2792_vm15, %v2775_v46, %v2036_v60 }
 0x1be   : > { %v2178_v26 = vpop.permute.xlu2 %2177 }
 0x1c0   : > { %v2688_v3 = vpop.permute.xlu0 %2687 }
 0x1c1   : > { %v2952_v25 = vsel %vm10878_vm11, %v2919_v9, %v2688_v3  ;;  %v2276_v1 = vpop.permute.xlu1 %2275 }
 0x1c2   : > { %6876 = vmatmul.msk.bf16.gmra.mxu2 %vm10877_vm5, %v2952_v25 }
 0x1c5   : > { %v8783_v51 = vpop.f32.mrf.mxu2 }
 0x1c6   : > { %3125 = vst.msk [vmem:[#allocation4 + $0xa0] sm:$0xff] %vm2693_vm12, %v8783_v51 }
 0x1c8   : > { %v2164_v39 = vpop.permute.xlu0 %2163 }
 0x1c9   : > { %v1537_v34 = vpop.permute.xlu1 %1536  ;;  %v2841_v42 = vsel %vm2825_vm0, %v2808_v27, %v2164_v39 }
 0x1ca   : > { %v2874_v22 = vsel %vm10880_vm1, %v2841_v42, %v2276_v1  ;;  %v2723_v55 = vsel %vm2693_vm12, %v7361_v41, %v1537_v34 }
 0x1cb   : > { %v2907_v47 = vsel %vm10879_vm3, %v2874_v22, %v2548_v38  ;;  %v2756_v11 = vsel %vm2726_vm13, %v2723_v55, %v1666_v31 }
 0x1cd   : > { %v8791_v7 = vpop.f32.mrf.mxu2 }
 0x1ce   : > { %3126 = vst.msk [vmem:[#allocation4 + $0xa8] sm:$0xff] %vm2693_vm12, %v8791_v7 }
 0x1cf   : > { %v3043_v2 = vpop.f32.mrf.mxu0 }
 0x1d0   : > { %3113 = vst.msk [vmem:[#allocation4 + $0x40] sm:$0xff] %vm2693_vm12, %v3043_v2  ;;  %v3153_v57 = vsel %vm2693_vm12, %v3043_v2, 0.0  ;;  %v3219_v16 = vmul.f32 %v3043_v2, %v3043_v2  ;;  %v2676_v45 = vpop.permute.xlu0 %2675 }
 0x1d1   : > { %v3154_v29 = vadd.f32 %v3153_v57, %v3152_v56  ;;  %v2940_v61 = vsel %vm10878_vm11, %v2907_v47, %v2676_v45  ;;  %v2050_v48 = vpop.permute.xlu1 %2049 }
 0x1d2   : > { %v3258_v52 = vsel %vm2693_vm12, %v3219_v16, 0.0  ;;  %6870 = vmatmul.msk.bf16.gmra.mxu0 %vm10877_vm5, %v2940_v61 }
 0x1d3   : > { %v3259_v6 = vadd.f32 %v3258_v52, %v3257_v0  ;;  %v2690_v0 = vpop.permute.xlu2 %2689 }
 0x1d7   : > { %v3045_v37 = vpop.f32.mrf.mxu0 }
 0x1d8   : > { %3114 = vst.msk [vmem:[#allocation4 + $0x48] sm:$0xff] %vm2693_vm12, %v3045_v37  ;;  %v3155_v32 = vsel %vm2693_vm12, %v3045_v37, 0.0  ;;  %v3220_v62 = vmul.f32 %v3045_v37, %v3045_v37  ;;  %v1778_v14 = vpop.permute.xlu0 %1777 }
 0x1d9   : > { %v3156_v44 = vadd.f32 %v3155_v32, %v3154_v29  ;;  %v2562_v18 = vpop.permute.xlu1 %2561  ;;  %v2789_v63 = vsel %vm2759_vm14, %v2756_v11, %v1778_v14 }
 0x1da   : > { %v3260_v53 = vsel %vm2693_vm12, %v3220_v62, 0.0  ;;  %v2822_v33 = vsel %vm2792_vm15, %v2789_v63, %v2050_v48 }
 0x1db   : > { %v3261_v8 = vadd.f32 %v3260_v53, %v3259_v6  ;;  %v2855_v56 = vsel %vm2825_vm0, %v2822_v33, %v2178_v26  ;;  %v1780_v50 = vpop.permute.xlu2 %1779 }
 0x1e0   : > { %v2290_v10 = vpop.permute.xlu0 %2289 }
 0x1e1   : > { %v2888_v54 = vsel %vm10880_vm1, %v2855_v56, %v2290_v10  ;;  %v1668_v4 = vpop.permute.xlu1 %1667 }
 0x1e2   : > { %v2921_v36 = vsel %vm10879_vm3, %v2888_v54, %v2562_v18 }
 0x1e3   : > { %v2954_v49 = vsel %vm10878_vm11, %v2921_v36, %v2690_v0  ;;  %v2292_v25 = vpop.permute.xlu2 %2291  ;;  %v3227_v36 = vmul.f32 %v8680_v20, %v8680_v20 }
 0x1e4   : > { %6877 = vmatmul.msk.bf16.gmra.mxu2 %vm10877_vm5, %v2954_v49 }
 0x1e7   : > { %v8813_v58 = vpop.f32.mrf.mxu2 }
 0x1e8   : > { %3127 = vst.msk [vmem:[#allocation4 + $0xb0] sm:$0xff] %vm2693_vm12, %v8813_v58  ;;  %v1539_v24 = vpop.permute.xlu0 %1538 }
 0x1e9   : > { %v2725_v59 = vsel %vm2693_vm12, %v8649_v15, %v1539_v24  ;;  %v2180_v21 = vpop.permute.xlu1 %2179 }
 0x1ea   : > { %v2758_v5 = vsel %vm2726_vm13, %v2725_v59, %v1668_v4 }
 0x1eb   : > { %v2791_v9 = vsel %vm2759_vm14, %v2758_v5, %v1780_v50  ;;  %v3169_v50 = vsel %vm2693_vm12, %v8680_v20, 0.0  ;;  %v3173_v20 = vsel %vm2693_vm12, %v8748_v40, 0.0 }
 0x1ef   : > { %v8820_v60 = vpop.f32.mrf.mxu2 }
 0x1f0   : > { %3128 = vst.msk [vmem:[#allocation4 + $0xb8] sm:$0xff] %vm2693_vm12, %v8820_v60  ;;  %v2052_v43 = vpop.permute.xlu0 %2051 }
 0x1f1   : > { %v2824_v28 = vsel %vm2792_vm15, %v2791_v9, %v2052_v43  ;;  %v2692_v1 = vpop.permute.xlu1 %2691 }
 0x1f2   : > { %v2857_v3 = vsel %vm2825_vm0, %v2824_v28, %v2180_v21  ;;  %v3228_v21 = vmul.f32 %v8700_v17, %v8700_v17  ;;  %v3274_v28 = vsel %vm2693_vm12, %v3227_v36, 0.0 }
 0x1f3   : > { %v2890_v15 = vsel %vm10880_vm1, %v2857_v3, %v2292_v25  ;;  %v3171_v3 = vsel %vm2693_vm12, %v8700_v17, 0.0  ;;  %v3229_v25 = vmul.f32 %v8748_v40, %v8748_v40  ;;  %v3175_v17 = vsel %vm2693_vm12, %v8755_v30, 0.0 }
 0x1f8   : > { %v2564_v38 = vpop.permute.xlu0 %2563  ;;  %v3048_v13 = vpop.f32.mrf.mxu0 }
 0x1f9   : > { %v2923_v46 = vsel %vm10879_vm3, %v2890_v15, %v2564_v38  ;;  %3115 = vst.msk [vmem:[#allocation4 + $0x50] sm:$0xff] %vm2693_vm12, %v3048_v13  ;;  %v3157_v39 = vsel %vm2693_vm12, %v3048_v13, 0.0  ;;  %v3221_v27 = vmul.f32 %v3048_v13, %v3048_v13  ;;  %v3276_v38 = vsel %vm2693_vm12, %v3228_v21, 0.0 }
 0x1fa   : > { %v3158_v34 = vadd.f32 %v3157_v39, %v3156_v44  ;;  %v2956_v42 = vsel %vm10878_vm11, %v2923_v46, %v2692_v1  ;;  %v3230_v13 = vmul.f32 %v8755_v30, %v8755_v30  ;;  %v3179_v30 = vsel %vm2693_vm12, %v8791_v7, 0.0 }
 0x1fb   : > { %v3262_v31 = vsel %vm2693_vm12, %v3221_v27, 0.0  ;;  %6878 = vmatmul.msk.bf16.gmra.mxu2 %vm10877_vm5, %v2956_v42  ;;  %v3278_v27 = vsel %vm2693_vm12, %v3229_v25, 0.0  ;;  %v3232_v42 = vmul.f32 %v8791_v7, %v8791_v7  ;;  %vm982_vm5 = vcmask 25600  }
 0x1fc   : > { %v3263_v22 = vadd.f32 %v3262_v31, %v3261_v8  ;;  %v3280_v40 = vsel %vm2693_vm12, %v3230_v13, 0.0  ;;  %vm10932_vm11 = vcmask 24576  }
 0x1fd   : > { %vm10933_vm3 = vmmov %vm10932_vm11 }
 0x200   : > { %v3050_v2 = vpop.f32.mrf.mxu0 }
 0x201   : > { %3116 = vst.msk [vmem:[#allocation4 + $0x58] sm:$0xff] %vm2693_vm12, %v3050_v2  ;;  %v3159_v47 = vsel %vm2693_vm12, %v3050_v2, 0.0  ;;  %v3222_v57 = vmul.f32 %v3050_v2, %v3050_v2  ;;  %v3177_v2 = vsel %vm2693_vm12, %v8783_v51, 0.0 }
 0x202   : > { %v3160_v16 = vadd.f32 %v3159_v47, %v3158_v34  ;;  %v3231_v34 = vmul.f32 %v8783_v51, %v8783_v51  ;;  %v3234_v51 = vmul.f32 %v8820_v60, %v8820_v60 }
 0x203   : > { %v3264_v45 = vsel %vm2693_vm12, %v3222_v57, 0.0 }
 0x204   : > { %v3265_v29 = vadd.f32 %v3264_v45, %v3263_v22  ;;  %v3233_v45 = vmul.f32 %v8813_v58, %v8813_v58 }
 0x206   : > { %v3286_v7 = vsel %vm2693_vm12, %v3233_v45, 0.0 }
 0x216   : > { %v8837_v61 = vpop.f32.mrf.mxu2 }
 0x217   : > { %3129 = vst.msk [vmem:[#allocation4 + $0xc0] sm:$0xff] %vm2693_vm12, %v8837_v61 }
 0x21e   : > { %v8841_v48 = vpop.f32.mrf.mxu2 }
 0x21f   : > { %3130 = vst.msk [vmem:[#allocation4 + $0xc8] sm:$0xff] %vm2693_vm12, %v8841_v48 }
 0x221   : > { %v3053_v52 = vpop.f32.mrf.mxu0 }
 0x222   : > { %3117 = vst.msk [vmem:[#allocation4 + $0x60] sm:$0xff] %vm2693_vm12, %v3053_v52  ;;  %v3223_v26 = vmul.f32 %v3053_v52, %v3053_v52  ;;  %v3161_v32 = vsel %vm2693_vm12, %v3053_v52, 0.0 }
 0x223   : > { %v3162_v18 = vadd.f32 %v3161_v32, %v3160_v16  ;;  %v3282_v16 = vsel %vm2693_vm12, %v3231_v34, 0.0 }
 0x224   : > { %v3266_v14 = vsel %vm2693_vm12, %v3223_v26, 0.0  ;;  %v3181_v26 = vsel %vm2693_vm12, %v8813_v58, 0.0 }
 0x225   : > { %v3267_v8 = vadd.f32 %v3266_v14, %v3265_v29  ;;  %v3284_v29 = vsel %vm2693_vm12, %v3232_v42, 0.0  ;;  %v7530_v14 = vmov 0.0  }
 0x226   : > { %983 = vst.msk [vmem:[#allocation5] sm:$0x3] %vm982_vm5, %v7530_v14 }
 0x229   : > { %v3055_v6 = vpop.f32.mrf.mxu0 }
 0x22a   : > { %3118 = vst.msk [vmem:[#allocation4 + $0x68] sm:$0xff] %vm2693_vm12, %v3055_v6  ;;  %v3224_v62 = vmul.f32 %v3055_v6, %v3055_v6  ;;  %v3163_v11 = vsel %vm2693_vm12, %v3055_v6, 0.0 }
 0x22b   : > { %v3164_v33 = vadd.f32 %v3163_v11, %v3162_v18  ;;  %v3183_v11 = vsel %vm2693_vm12, %v8820_v60, 0.0  ;;  %v3187_v60 = vsel %vm2693_vm12, %v8841_v48, 0.0 }
 0x22c   : > { %v3268_v53 = vsel %vm2693_vm12, %v3224_v62, 0.0 }
 0x22d   : > { %v3269_v10 = vadd.f32 %v3268_v53, %v3267_v8  ;;  %v3288_v53 = vsel %vm2693_vm12, %v3234_v51, 0.0  ;;  %v3236_v8 = vmul.f32 %v8841_v48, %v8841_v48 }
 0x22f   : > { %v3292_v36 = vsel %vm2693_vm12, %v3236_v8, 0.0 }
 0x245   : > { %v8847_v41 = vpop.f32.mrf.mxu2 }
 0x246   : > { %3131 = vst.msk [vmem:[#allocation4 + $0xd0] sm:$0xff] %vm2693_vm12, %v8847_v41 }
 0x24d   : > { %v8851_v55 = vpop.f32.mrf.mxu2 }
 0x24e   : > { %3132 = vst.msk [vmem:[#allocation4 + $0xd8] sm:$0xff] %vm2693_vm12, %v8851_v55  ;;  %v3238_v48 = vmul.f32 %v8851_v55, %v8851_v55 }
 0x24f   : > { %v3058_v37 = vpop.f32.mrf.mxu0 }
 0x250   : > { %3119 = vst.msk [vmem:[#allocation4 + $0x70] sm:$0xff] %vm2693_vm12, %v3058_v37  ;;  %v3225_v44 = vmul.f32 %v3058_v37, %v3058_v37  ;;  %v3165_v63 = vsel %vm2693_vm12, %v3058_v37, 0.0 }
 0x251   : > { %v3166_v0 = vadd.f32 %v3165_v63, %v3164_v33  ;;  %v3185_v63 = vsel %vm2693_vm12, %v8837_v61, 0.0 }
 0x252   : > { %v3270_v56 = vsel %vm2693_vm12, %v3225_v44, 0.0  ;;  %v3235_v44 = vmul.f32 %v8837_v61, %v8837_v61  ;;  %v3237_v61 = vmul.f32 %v8847_v41, %v8847_v41 }
 0x253   : > { %v3271_v24 = vadd.f32 %v3270_v56, %v3269_v10 }
 0x254   : > { %v3290_v10 = vsel %vm2693_vm12, %v3235_v44, 0.0  ;;  %v3210_v44 = vld [vmem:[#allocation5 + $0x1] sm:$0x1] }
 0x257   : > { %v3060_v54 = vpop.f32.mrf.mxu0 }
 0x258   : > { %3120 = vst.msk [vmem:[#allocation4 + $0x78] sm:$0xff] %vm2693_vm12, %v3060_v54  ;;  %v3167_v49 = vsel %vm2693_vm12, %v3060_v54, 0.0  ;;  %v3226_v4 = vmul.f32 %v3060_v54, %v3060_v54 }
 0x259   : > { %v3168_v59 = vadd.f32 %v3167_v49, %v3166_v0 }
 0x25a   : > { %v3272_v5 = vsel %vm2693_vm12, %v3226_v4, 0.0 }
 0x25b   : > { %v3170_v43 = vadd.f32 %v3169_v50, %v3168_v59  ;;  %v3273_v9 = vadd.f32 %v3272_v5, %v3271_v24  ;;  %v3189_v24 = vsel %vm2693_vm12, %v8847_v41, 0.0  ;;  %v3294_v50 = vsel %vm2693_vm12, %v3237_v61, 0.0 }
 0x25c   : > { %v3191_v5 = vsel %vm2693_vm12, %v8851_v55, 0.0 }
 0x25d   : > { %v3172_v1 = vadd.f32 %v3171_v3, %v3170_v43  ;;  %v3275_v15 = vadd.f32 %v3274_v28, %v3273_v9  ;;  %v3296_v9 = vsel %vm2693_vm12, %v3238_v48, 0.0 }
 0x25f   : > { %v3174_v46 = vadd.f32 %v3173_v20, %v3172_v1  ;;  %v3277_v39 = vadd.f32 %v3276_v38, %v3275_v15 }
 0x261   : > { %v3176_v31 = vadd.f32 %v3175_v17, %v3174_v46  ;;  %v3279_v22 = vadd.f32 %v3278_v27, %v3277_v39 }
 0x263   : > { %v3178_v47 = vadd.f32 %v3177_v2, %v3176_v31  ;;  %v3281_v57 = vadd.f32 %v3280_v40, %v3279_v22 }
 0x265   : > { %v3180_v52 = vadd.f32 %v3179_v30, %v3178_v47  ;;  %v3283_v6 = vadd.f32 %v3282_v16, %v3281_v57 }
 0x267   : > { %v3285_v37 = vadd.f32 %v3284_v29, %v3283_v6  ;;  %v3093_v32 = vpop.f32.mrf.mxu2  ;;  %v3182_v62 = vadd.f32 %v3181_v26, %v3180_v52 }
 0x268   : > { %3133 = vst.msk [vmem:[#allocation4 + $0xe0] sm:$0xff] %vm2693_vm12, %v3093_v32  ;;  %v3239_v28 = vmul.f32 %v3093_v32, %v3093_v32  ;;  %v3193_v1 = vsel %vm2693_vm12, %v3093_v32, 0.0 }
 0x269   : > { %v3184_v58 = vadd.f32 %v3183_v11, %v3182_v62  ;;  %v3287_v18 = vadd.f32 %v3286_v7, %v3285_v37  ;;  %v3137_v62 = vld [vmem:[#allocation5] sm:$0x1] }
 0x26a   : > { %v3298_v15 = vsel %vm2693_vm12, %v3239_v28, 0.0 }
 0x26b   : > { %v3186_v33 = vadd.f32 %v3185_v63, %v3184_v58  ;;  %v3289_v56 = vadd.f32 %v3288_v53, %v3287_v18 }
 0x26d   : > { %v3188_v0 = vadd.f32 %v3187_v60, %v3186_v33  ;;  %v3291_v54 = vadd.f32 %v3290_v10, %v3289_v56 }
 0x26f   : > { %v3293_v49 = vadd.f32 %v3292_v36, %v3291_v54  ;;  %v3095_v4 = vpop.f32.mrf.mxu2  ;;  %v3190_v59 = vadd.f32 %v3189_v24, %v3188_v0 }
 0x270   : > { %3134 = vst.msk [vmem:[#allocation4 + $0xe8] sm:$0xff] %vm2693_vm12, %v3095_v4  ;;  %v3240_v38 = vmul.f32 %v3095_v4, %v3095_v4  ;;  %v3195_v46 = vsel %vm2693_vm12, %v3095_v4, 0.0 }
 0x271   : > { %v3295_v21 = vadd.f32 %v3294_v50, %v3293_v49  ;;  %v3192_v43 = vadd.f32 %v3191_v5, %v3190_v59  ;;  %v3331_v59 = vld [vmem:[#allocation4] sm:$0xff]  ;;  %v3332_v50 = vld [vmem:[#allocation4 + $0x8] sm:$0xff] }
 0x272   : > { %v3300_v27 = vsel %vm2693_vm12, %v3240_v38, 0.0  ;;  %v3340_v38 = vld [vmem:[#allocation4 + $0x48] sm:$0xff] }
 0x273   : > { %v3297_v3 = vadd.f32 %v3296_v9, %v3295_v21  ;;  %v3194_v41 = vadd.f32 %v3193_v1, %v3192_v43  ;;  %v8945_v21 = vld [vmem:[#allocation4 + $0x10] sm:$0xff]  ;;  %v3350_v9 = vld [vmem:[#allocation4 + $0x98] sm:$0xff] }
 0x274   : > { %v3349_v43 = vld [vmem:[#allocation4 + $0x90] sm:$0xff] }
 0x275   : > { %v3299_v13 = vadd.f32 %v3298_v15, %v3297_v3  ;;  %v3196_v39 = vadd.f32 %v3195_v46, %v3194_v41  ;;  %v3336_v41 = vld [vmem:[#allocation4 + $0x28] sm:$0xff]  ;;  %v3339_v15 = vld [vmem:[#allocation4 + $0x40] sm:$0xff] }
 0x277   : > { %v3301_v34 = vadd.f32 %v3300_v27, %v3299_v13 }
 0x27e   : > { %v3098_v25 = vpop.f32.mrf.mxu2 }
 0x27f   : > { %3135 = vst.msk [vmem:[#allocation4 + $0xf0] sm:$0xff] %vm2693_vm12, %v3098_v25  ;;  %v3241_v20 = vmul.f32 %v3098_v25, %v3098_v25  ;;  %v3197_v55 = vsel %vm2693_vm12, %v3098_v25, 0.0 }
 0x280   : > { %v3198_v42 = vadd.f32 %v3197_v55, %v3196_v39 }
 0x281   : > { %v3302_v17 = vsel %vm2693_vm12, %v3241_v20, 0.0 }
 0x282   : > { %v3303_v2 = vadd.f32 %v3302_v17, %v3301_v34 }
 0x286   : > { %v3100_v31 = vpop.f32.mrf.mxu2 }
 0x287   : > { %3136 = vst.msk [vmem:[#allocation4 + $0xf8] sm:$0xff] %vm2693_vm12, %v3100_v31  ;;  %v3199_v22 = vsel %vm2693_vm12, %v3100_v31, 0.0  ;;  %v3242_v40 = vmul.f32 %v3100_v31, %v3100_v31  ;;  %v3344_v31 = vld [vmem:[#allocation4 + $0x68] sm:$0xff] }
 0x288   : > { %v3200_v47 = vadd.f32 %v3199_v22, %v3198_v42  ;;  %v3343_v42 = vld [vmem:[#allocation4 + $0x60] sm:$0xff]  ;;  %v3345_v22 = vld [vmem:[#allocation4 + $0x70] sm:$0xff] }
 0x289   : > { %v3304_v57 = vsel %vm2693_vm12, %v3242_v40, 0.0 }
 0x28a   : > { %v3201_v16 = vrot.slane %v3200_v47, 4  ;;  %v3305_v30 = vadd.f32 %v3304_v57, %v3303_v2 }
 0x28c   : > { %v3202_v45 = vadd.f32 %v3201_v16, %v3200_v47  ;;  %v3306_v29 = vrot.slane %v3305_v30, 4 }
 0x28e   : > { %v3203_v52 = vrot.slane %v3202_v45, 2  ;;  %v3307_v6 = vadd.f32 %v3306_v29, %v3305_v30  ;;  %v3362_v5 = vld [vmem:[#allocation4 + $0xf8] sm:$0xff] }
 0x290   : > { %v3204_v26 = vadd.f32 %v3203_v52, %v3202_v45  ;;  %v3308_v51 = vrot.slane %v3307_v6, 2  ;;  %v3351_v52 = vld [vmem:[#allocation4 + $0xa0] sm:$0xff] }
 0x292   : > { %v3205_v37 = vrot.slane %v3204_v26, 1  ;;  %v3309_v32 = vadd.f32 %v3308_v51, %v3307_v6  ;;  %v3352_v6 = vld [vmem:[#allocation4 + $0xa8] sm:$0xff] }
 0x294   : > { %v3206_v7 = vadd.f32 %v3205_v37, %v3204_v26  ;;  %v3310_v11 = vrot.slane %v3309_v32, 1 }
 0x296   : > { %v3207_v58 = vadd.f32 %v3206_v7, %v3137_v62  ;;  %v3311_v18 = vadd.f32 %v3310_v11, %v3309_v32  ;;  %v3355_v62 = vld [vmem:[#allocation4 + $0xc0] sm:$0xff] }
 0x298   : > { %3209 = vst.msk [vmem:[#allocation5] sm:$0x1] %vm10932_vm11, %v3207_v58  ;;  %v3312_v53 = vadd.f32 %v3311_v18, %v3210_v44  ;;  %v3356_v18 = vld [vmem:[#allocation4 + $0xc8] sm:$0xff] }
 0x29a   : > { %3313 = vst.msk [vmem:[#allocation5 + $0x1] sm:$0x1] %vm10933_vm3, %v3312_v53 }
 0x29f   : > { %v3314_v63 = vld [vmem:[#allocation5] sm:$0x1] }
 0x2a0   : > { %v3315_v8 = vmul.f32 0.00390625, %v3314_v63 }
 0x2a1   : > { %v3316_v33 = vld [vmem:[#allocation5 + $0x1] sm:$0x1] }
 0x2a2   : > { %v3317_v56 = vmul.f32 0.00390625, %v3316_v33  ;;  %v3318_v10 = vmul.f32 %v3315_v8, %v3315_v8  ;;  %4229 = vst.msk [vmem:[#allocation5] sm:$0x3] %vm982_vm5, %v7530_v14  ;;  %v8943_v24 = vperm.slane %v3315_v8, 0  ;;  %v8947_v14 = vld [vmem:[#allocation4 + $0x18] sm:$0xff]  ;;  %vm11041_vm5 = vcmask 228352  }
 0x2a4   : > { %v3319_v60 = vsub.f32 %v3317_v56, %v3318_v10  ;;  %v3395_v3 = vsub.f32 %v3362_v5, %v8943_v24  ;;  %v3364_v25 = vsub.f32 %v3331_v59, %v8943_v24  ;;  %v3365_v1 = vsub.f32 %v3332_v50, %v8943_v24  ;;  %v3357_v56 = vld [vmem:[#allocation4 + $0xd0] sm:$0xff]  ;;  %v3358_v10 = vld [vmem:[#allocation4 + $0xd8] sm:$0xff] }
 0x2a5   : > { %v3366_v13 = vsub.f32 %v8945_v21, %v8943_v24  ;;  %v3382_v46 = vsub.f32 %v3349_v43, %v8943_v24  ;;  %v3383_v55 = vsub.f32 %v3350_v9, %v8943_v24  ;;  %v3367_v39 = vsub.f32 %v8947_v14, %v8943_v24 }
 0x2a6   : > { %v3320_v0 = vadd.f32 1e-05, %v3319_v60  ;;  %v3369_v27 = vsub.f32 %v3336_v41, %v8943_v24  ;;  %v3372_v17 = vsub.f32 %v3339_v15, %v8943_v24  ;;  %v3373_v34 = vsub.f32 %v3340_v38, %v8943_v24  ;;  %v3877_v38 = vld [vmem:[#allocation3 + $0x78] sm:$0xf] }
 0x2a7   : > { %v3376_v16 = vsub.f32 %v3343_v42, %v8943_v24  ;;  %v3377_v30 = vsub.f32 %v3344_v31, %v8943_v24  ;;  %v3378_v45 = vsub.f32 %v3345_v22, %v8943_v24  ;;  %v3384_v7 = vsub.f32 %v3351_v52, %v8943_v24 }
 0x2a8   : > { %7350 = vrsqrt.f32 %v3320_v0  ;;  %vm3327_vm3 = vweird.f32 %v3320_v0  ;;  %v3385_v11 = vsub.f32 %v3352_v6, %v8943_v24  ;;  %v3388_v63 = vsub.f32 %v3355_v62, %v8943_v24  ;;  %v3337_v62 = vld [vmem:[#allocation4 + $0x30] sm:$0xff] }
 0x2a9   : > { %v3389_v60 = vsub.f32 %v3356_v18, %v8943_v24  ;;  %v3390_v59 = vsub.f32 %v3357_v56, %v8943_v24  ;;  %v3391_v50 = vsub.f32 %v3358_v10, %v8943_v24  ;;  %v3370_v18 = vsub.f32 %v3337_v62, %v8943_v24  ;;  %v3835_v62 = vld [vmem:[#allocation3 + $0x30] sm:$0xf] }
 0x2ae   : > { %v7351_v54 = vpop.eup %7350 }
 0x2af   : > { %v3322_v36 = vmul.f32 %v7351_v54, %v3320_v0  ;;  %vm3328_vm11 = vweird.f32 %v7351_v54 }
 0x2b0   : > { %vm3329_vm1 = vmor %vm3327_vm3, %vm3328_vm11 }
 0x2b1   : > { %v3323_v49 = vmul.f32 %v7351_v54, %v3322_v36  ;;  %vm11047_vm11 = vmmov %vm11041_vm5 }
 0x2b2   : > { %vm11048_vm3 = vmmov %vm11041_vm5 }
 0x2b3   : > { %v3324_v4 = vmul.f32 0.5, %v3323_v49  ;;  %v3359_v49 = vld [vmem:[#allocation4 + $0xe0] sm:$0xff] }
 0x2b4   : > { %v3392_v21 = vsub.f32 %v3359_v49, %v8943_v24 }
 0x2b5   : > { %v3325_v61 = vsub.f32 1.5, %v3324_v4  ;;  %v3360_v4 = vld [vmem:[#allocation4 + $0xe8] sm:$0xff] }
 0x2b6   : > { %v3393_v5 = vsub.f32 %v3360_v4, %v8943_v24 }
 0x2b7   : > { %v3326_v48 = vmul.f32 %v7351_v54, %v3325_v61 }
 0x2b9   : > { %v3330_v28 = vsel %vm3329_vm1, %v7351_v54, %v3326_v48 }
 0x2ba   : > { %v8952_v20 = vperm.slane %v3330_v28, 0 }
 0x2bc   : > { %v3428_v40 = vmul.f32 %v8952_v20, %v3395_v3  ;;  %v3415_v2 = vmul.f32 %v8952_v20, %v3382_v46  ;;  %v3416_v47 = vmul.f32 %v8952_v20, %v3383_v55  ;;  %v8967_v57 = vmul.f32 %v8952_v20, %v3364_v25 }
 0x2bd   : > { %v8973_v29 = vmul.f32 %v8952_v20, %v3365_v1  ;;  %v8976_v32 = vmul.f32 %v8952_v20, %v3369_v27  ;;  %v8981_v44 = vmul.f32 %v8952_v20, %v3372_v17  ;;  %v8984_v58 = vmul.f32 %v8952_v20, %v3373_v34  ;;  %v3923_v1 = vld [vmem:[#allocation3 + $0xc8] sm:$0x1] }
 0x2be   : > { %v3460_v26 = vmax.f32 %v3428_v40, 0.0  ;;  %v3447_v51 = vmax.f32 %v3415_v2, 0.0  ;;  %v3448_v37 = vmax.f32 %v3416_v47, 0.0  ;;  %v8991_v0 = vmul.f32 %v8952_v20, %v3376_v16  ;;  %v3361_v27 = vld [vmem:[#allocation4 + $0xf0] sm:$0xff] }
 0x2bf   : > { %v8994_v54 = vmul.f32 %v8952_v20, %v3377_v30  ;;  %v8997_v36 = vmul.f32 %v8952_v20, %v3378_v45  ;;  %v3399_v43 = vmul.f32 %v8952_v20, %v3366_v13  ;;  %v9008_v25 = vmul.f32 %v8952_v20, %v3384_v7 }
 0x2c0   : > { %v8986_v53 = vpack.c.bf16 %v3460_v26, %v3460_v26  ;;  %v3479_v8 = vpack.c.bf16 %v3447_v51, %v3447_v51  ;;  %v3480_v33 = vpack.c.bf16 %v3448_v37, %v3448_v37  ;;  %v3400_v46 = vmul.f32 %v8952_v20, %v3367_v39 }
 0x2c1   : > { %v9014_v55 = vmul.f32 %v8952_v20, %v3385_v11  ;;  %v9018_v42 = vmul.f32 %v8952_v20, %v3388_v63  ;;  %v3394_v31 = vsub.f32 %v3361_v27, %v8943_v24  ;;  %v9023_v40 = vmul.f32 %v8952_v20, %v3389_v60  ;;  %v3338_v11 = vld [vmem:[#allocation4 + $0x38] sm:$0xff] }
 0x2c2   : > { %10934 = vst [vmem:[#allocation9_spill] sm:$0xff] %v8986_v53  ;;  %v3757_v61 = vshrl.u32 %v8986_v53, 16  ;;  %v3647_v48 = vshrl.u32 %v3479_v8, 16  ;;  %v3655_v14 = vshrl.u32 %v3480_v33, 16  ;;  %v3650_v3 = vshll.u32 %v3479_v8, 16 }
 0x2c3   : > { %v3658_v15 = vshll.u32 %v3480_v33, 16  ;;  %v9026_v39 = vmul.f32 %v8952_v20, %v3390_v59  ;;  %v9033_v16 = vmul.f32 %v8952_v20, %v3391_v50  ;;  %v9036_v30 = vmul.f32 %v8952_v20, %v3392_v21  ;;  %v3821_v59 = vld [vmem:[#allocation3 + $0x18] sm:$0xf] }
 0x2c4   : > { %v9005_v9 = vrot.slane %v3757_v61, 7  ;;  %v3649_v28 = vrot.slane %v3647_v48, 7  ;;  %v9010_v41 = vrot.slane %v3655_v14, 7  ;;  %v9041_v52 = vmul.f32 %v8952_v20, %v3393_v5 }
 0x2c5   : > { %v9044_v6 = vmul.f32 %v8952_v20, %v3394_v31  ;;  %v3431_v26 = vmax.f32 %v3399_v43, 0.0  ;;  %v3432_v51 = vmax.f32 %v3400_v46, 0.0  ;;  %v3371_v8 = vsub.f32 %v3338_v11, %v8943_v24 }
 0x2c6   : > { %10935 = vst [vmem:[#allocation10_spill] sm:$0xff] %v9005_v9  ;;  %v3764_v13 = vrot.slane %v9005_v9, 4  ;;  %v3652_v17 = vor.u32 %v3650_v3, %v3649_v28  ;;  %v3653_v34 = vrot.slane %v3649_v28, 4  ;;  %v3660_v22 = vor.u32 %v3658_v15, %v9010_v41 }
 0x2c7   : > { %10936 = vst [vmem:[#allocation11_spill] sm:$0xff] %v9041_v52  ;;  %v3463_v37 = vpack.c.bf16 %v3431_v26, %v3431_v26  ;;  %v3464_v7 = vpack.c.bf16 %v3432_v51, %v3432_v51  ;;  %v3403_v56 = vmul.f32 %v8952_v20, %v3370_v18  ;;  %v3404_v49 = vmul.f32 %v8952_v20, %v3371_v8  ;;  %v3346_v8 = vld [vmem:[#allocation4 + $0x78] sm:$0xff] }
 0x2c8   : > { %v3924_v2 = vsel %vm7593_vm7, %v3764_v13, %v3923_v1  ;;  %v3878_v47 = vsel %vm7585_vm6, %v3652_v17, %v3877_v38  ;;  %v3661_v45 = vsel %vm7577_vm4, %v3653_v34, %v3660_v22  ;;  %10937 = vst [vmem:[#allocation12_spill] sm:$0xff] %v9044_v6 }
 0x2c9   : > { %3925 = vst [vmem:[#allocation3 + $0xc8] sm:$0x1] %v3924_v2  ;;  %v3511_v63 = vshrl.u32 %v3463_v37, 16  ;;  %v3519_v33 = vshrl.u32 %v3464_v7, 16  ;;  %v3514_v60 = vshll.u32 %v3463_v37, 16  ;;  %v3522_v61 = vshll.u32 %v3464_v7, 16 }
 0x2ca   : > { %3879 = vst [vmem:[#allocation3 + $0x78] sm:$0xf] %v3878_v47  ;;  %v3435_v3 = vmax.f32 %v3403_v56, 0.0  ;;  %v3436_v38 = vmax.f32 %v3404_v49, 0.0  ;;  %v3347_v56 = vld [vmem:[#allocation4 + $0x80] sm:$0xff] }
 0x2cb   : > { %3880 = vst.msk [vmem:[#allocation3 + $0x7c] sm:$0xf] %vm560_vm2, %v3661_v45  ;;  %v3513_v10 = vrot.slane %v3511_v63, 7  ;;  %v9051_v4 = vrot.slane %v3519_v33, 7  ;;  %v3335_v63 = vld [vmem:[#allocation4 + $0x20] sm:$0xff] }
 0x2cc   : > { %v3467_v46 = vpack.c.bf16 %v3435_v3, %v3435_v3  ;;  %v3468_v27 = vpack.c.bf16 %v3436_v38, %v3436_v38  ;;  %v3368_v49 = vsub.f32 %v3335_v63, %v8943_v24 }
 0x2cd   : > { %v9053_v48 = vor.u32 %v3514_v60, %v3513_v10  ;;  %v3517_v21 = vrot.slane %v3513_v10, 4  ;;  %v3524_v14 = vor.u32 %v3522_v61, %v9051_v4  ;;  %v3341_v10 = vld [vmem:[#allocation4 + $0x50] sm:$0xff]  ;;  %v3342_v60 = vld [vmem:[#allocation4 + $0x58] sm:$0xff]  ;;  %v3379_v61 = vsub.f32 %v3346_v8, %v8943_v24 }
 0x2ce   : > { %v3545_v17 = vshrl.u32 %v3467_v46, 16  ;;  %v3553_v22 = vshrl.u32 %v3468_v27, 16  ;;  %v3548_v45 = vshll.u32 %v3467_v46, 16  ;;  %v3556_v37 = vshll.u32 %v3468_v27, 16 }
 0x2cf   : > { %v3822_v28 = vsel %vm7585_vm6, %v9053_v48, %v3821_v59  ;;  %v3525_v15 = vsel %vm7577_vm4, %v3517_v21, %v3524_v14  ;;  %v3353_v21 = vld [vmem:[#allocation4 + $0xb0] sm:$0xff]  ;;  %v3375_v14 = vsub.f32 %v3342_v60, %v8943_v24  ;;  %v3412_v38 = vmul.f32 %v8952_v20, %v3379_v61 }
 0x2d0   : > { %3823 = vst [vmem:[#allocation3 + $0x18] sm:$0xf] %v3822_v28  ;;  %v3547_v47 = vrot.slane %v3545_v17, 7  ;;  %v9071_v51 = vrot.slane %v3553_v22, 7  ;;  %v3354_v28 = vld [vmem:[#allocation4 + $0xb8] sm:$0xff]  ;;  %v3454_v61 = vmax.f32 %v9023_v40, 0.0 }
 0x2d1   : > { %v3951_v50 = vld [vmem:[#allocation3 + $0x78] sm:$0x2]  ;;  %v4061_v43 = vld [vmem:[#allocation3 + $0x78] sm:$0x1]  ;;  %3824 = vst.msk [vmem:[#allocation3 + $0x1c] sm:$0xf] %vm560_vm2, %v3525_v15  ;;  %v3387_v46 = vsub.f32 %v3354_v28, %v8943_v24 }
 0x2d2   : > { %v6889_v5 = vrot.slane %v3951_v50, 9  ;;  %3929 = vst.msk [vmem:[#allocation3 + $0x4] sm:$0xf] %vm560_vm2, %v3525_v15  ;;  %v3550_v7 = vor.u32 %v3548_v45, %v3547_v47  ;;  %v3551_v11 = vrot.slane %v3547_v47, 4  ;;  %v3558_v18 = vor.u32 %v3556_v37, %v9071_v51  ;;  %v3348_v50 = vld [vmem:[#allocation4 + $0x88] sm:$0xff] }
 0x2d3   : > { %10939 = vst [vmem:[#allocation14_spill] sm:$0xff] %v9071_v51  ;;  %v3381_v3 = vsub.f32 %v3348_v50, %v8943_v24  ;;  %v3401_v15 = vmul.f32 %v8952_v20, %v3368_v49  ;;  %v3420_v47 = vmul.f32 %v8952_v20, %v3387_v46  ;;  %v3429_v45 = vmax.f32 %v8967_v57, 0.0 }
 0x2d4   : > { %v4062_v1 = vsel %vm7593_vm7, %v6889_v5, %v4061_v43  ;;  %v3836_v33 = vsel %vm7585_vm6, %v3550_v7, %v3835_v62  ;;  %v3559_v59 = vsel %vm7577_vm4, %v3551_v11, %v3558_v18  ;;  %v3374_v5 = vsub.f32 %v3341_v10, %v8943_v24 }
 0x2d5   : > { %4063 = vst [vmem:[#allocation3 + $0x78] sm:$0x1] %v4062_v1  ;;  %v3380_v43 = vsub.f32 %v3347_v56, %v8943_v24  ;;  %v3386_v1 = vsub.f32 %v3353_v21, %v8943_v24  ;;  %v3430_v24 = vmax.f32 %v8973_v29, 0.0  ;;  %v3434_v37 = vmax.f32 %v8976_v32, 0.0 }
 0x2d6   : > { %3837 = vst [vmem:[#allocation3 + $0x30] sm:$0xf] %v3836_v33  ;;  %v3407_v27 = vmul.f32 %v8952_v20, %v3374_v5  ;;  %v3437_v62 = vmax.f32 %v8981_v44, 0.0  ;;  %v3444_v7 = vmax.f32 %v3412_v38, 0.0  ;;  %v3438_v11 = vmax.f32 %v8984_v58, 0.0 }
 0x2d7   : > { %v3943_v13 = vld [vmem:[#allocation3 + $0x18] sm:$0x2]  ;;  %v4037_v2 = vld [vmem:[#allocation3 + $0x18] sm:$0x1]  ;;  %3838 = vst.msk [vmem:[#allocation3 + $0x34] sm:$0xf] %vm560_vm2, %v3559_v59  ;;  %v3413_v17 = vmul.f32 %v8952_v20, %v3380_v43  ;;  %v9109_v32 = vpack.c.bf16 %v3429_v45, %v3429_v45  ;;  %v9112_v58 = vpack.c.bf16 %v3430_v24, %v3430_v24  ;;  %v9144_v46 = vpack.c.bf16 %v3454_v61, %v3454_v61 }
 0x2d8   : > { %v6881_v31 = vrot.slane %v3943_v13, 9  ;;  %v3408_v13 = vmul.f32 %v8952_v20, %v3375_v14  ;;  %v3439_v18 = vmax.f32 %v3407_v27, 0.0  ;;  %v3449_v57 = vmax.f32 %v9008_v25, 0.0 }
 0x2d9   : > { %v3445_v63 = vmax.f32 %v3413_v17, 0.0  ;;  %v3450_v29 = vmax.f32 %v9014_v55, 0.0  ;;  %v3452_v60 = vmax.f32 %v3420_v47, 0.0  ;;  %v3453_v49 = vmax.f32 %v9018_v42, 0.0 }
 0x2da   : > { %v4038_v26 = vsel %vm7593_vm7, %v6881_v31, %v4037_v2  ;;  %v3414_v31 = vmul.f32 %v8952_v20, %v3381_v3  ;;  %v3419_v2 = vmul.f32 %v8952_v20, %v3386_v1  ;;  %v3440_v20 = vmax.f32 %v3408_v13, 0.0 }
 0x2db   : > { %4039 = vst [vmem:[#allocation3 + $0x18] sm:$0x1] %v4038_v26  ;;  %v3433_v26 = vmax.f32 %v3401_v15, 0.0  ;;  %v9114_v59 = vpack.c.bf16 %v3444_v7, %v3444_v7  ;;  %v9120_v55 = vpack.c.bf16 %v3434_v37, %v3434_v37  ;;  %v9122_v21 = vpack.c.bf16 %v3437_v62, %v3437_v62 }
 0x2dc   : > { %v9065_v34 = vld [vmem:[#allocation3 + $0x78] sm:$0xff]   ;;  %v3446_v33 = vmax.f32 %v3414_v31, 0.0  ;;  %v3451_v10 = vmax.f32 %v3419_v2, 0.0  ;;  %v3470_v5 = vpack.c.bf16 %v3438_v11, %v3438_v11  ;;  %v9124_v42 = vpack.c.bf16 %v3439_v18, %v3439_v18 }
 0x2dd   : > { %10938 = vst [vmem:[#allocation13_spill] sm:$0xff] %v9065_v34  ;;  %5516 = vrot.lane.b32.xlu2 %v9065_v34, %s7523_s19  ;;  %v3945_v8 = vld [vmem:[#allocation3 + $0x30] sm:$0x2]  ;;  %v4043_v44 = vld [vmem:[#allocation3 + $0x30] sm:$0x1]  ;;  %v9118_v25 = vpack.c.bf16 %v3433_v26, %v3433_v26  ;;  %v9126_v14 = vpack.c.bf16 %v3440_v20, %v3440_v20  ;;  %v9128_v40 = vpack.c.bf16 %v3445_v63, %v3445_v63  ;;  %v3494_v27 = vshrl.u32 %v9109_v32, 16 }
 0x2de   : > { %v6883_v56 = vrot.slane %v3945_v8, 9  ;;  %v9130_v43 = vpack.c.bf16 %v3446_v33, %v3446_v33  ;;  %v9132_v28 = vpack.c.bf16 %v3449_v57, %v3449_v57  ;;  %v9134_v3 = vpack.c.bf16 %v3450_v29, %v3450_v29 }
 0x2df   : > { %v9136_v1 = vpack.c.bf16 %v3451_v10, %v3451_v10  ;;  %v9138_v15 = vpack.c.bf16 %v3452_v60, %v3452_v60  ;;  %v9142_v38 = vpack.c.bf16 %v3453_v49, %v3453_v49  ;;  %v3621_v13 = vshrl.u32 %v9114_v59, 16 }
 0x2e0   : > { %v4044_v50 = vsel %vm7593_vm7, %v6883_v56, %v4043_v44  ;;  %v3502_v17 = vshrl.u32 %v9112_v58, 16  ;;  %v3505_v31 = vshll.u32 %v9112_v58, 16  ;;  %v3528_v2 = vshrl.u32 %v9118_v25, 16 }
 0x2e1   : > { %4045 = vst [vmem:[#allocation3 + $0x30] sm:$0x1] %v4044_v50  ;;  %v3531_v47 = vshll.u32 %v9118_v25, 16  ;;  %v3536_v45 = vshrl.u32 %v9120_v55, 16  ;;  %v3539_v24 = vshll.u32 %v9120_v55, 16  ;;  %v3562_v26 = vshrl.u32 %v9122_v21, 16 }
 0x2e2   : > { %v9093_v22 = vld [vmem:[#allocation3 + $0x18] sm:$0xff]   ;;  %v3570_v62 = vshrl.u32 %v3470_v5, 16  ;;  %v3573_v7 = vshll.u32 %v3470_v5, 16  ;;  %v3579_v11 = vshrl.u32 %v9124_v42, 16  ;;  %v3587_v18 = vshrl.u32 %v9126_v14, 16 }
 0x2e3   : > { %10940 = vst [vmem:[#allocation15_spill] sm:$0xff] %v9093_v22  ;;  %5500 = vrot.lane.b32.xlu1 %v9093_v22, %s7523_s19  ;;  %4990 = vrot.lane.b32.xlu0 %v9093_v22, %s7522_s18  ;;  %v3630_v63 = vshrl.u32 %v9128_v40, 16  ;;  %v3633_v8 = vshll.u32 %v9128_v40, 16  ;;  %v3638_v33 = vshrl.u32 %v9130_v43, 16  ;;  %v9161_v57 = vrot.slane %v3621_v13, 7 }
 0x2e4   : > { %v3641_v29 = vshll.u32 %v9130_v43, 16  ;;  %v3664_v56 = vshrl.u32 %v9132_v28, 16  ;;  %v3672_v60 = vshrl.u32 %v9134_v3, 16  ;;  %v3675_v49 = vshll.u32 %v9134_v3, 16 }
 0x2e5   : > { %v3698_v44 = vshrl.u32 %v9142_v38, 16  ;;  %v3706_v61 = vshrl.u32 %v9144_v46, 16  ;;  %v9172_v58 = vrot.slane %v3502_v17, 7  ;;  %v3681_v50 = vshrl.u32 %v9136_v1, 16 }
 0x2e6   : > { %v9175_v25 = vrot.slane %v3528_v2, 7  ;;  %v9177_v55 = vrot.slane %v3536_v45, 7  ;;  %v9179_v5 = vrot.slane %v3570_v62, 7  ;;  %v3689_v40 = vshrl.u32 %v9138_v15, 16 }
 0x2e7   : > { %v3709_v43 = vshll.u32 %v9144_v46, 16  ;;  %v9183_v13 = vrot.slane %v3494_v27, 7  ;;  %v3628_v3 = vrot.slane %v9161_v57, 4  ;;  %v3564_v10 = vrot.slane %v3562_v26, 7 }
 0x2e8   : > { %v7241_v20 = vld [vmem:[#allocation3 + $0x30] sm:$0xff]   ;;  %10941 = vst [vmem:[#allocation16_spill] sm:$0xff] %v9179_v5  ;;  %v3632_v17 = vrot.slane %v3630_v63, 7  ;;  %v9186_v37 = vrot.slane %v3638_v33, 7  ;;  %v3666_v9 = vrot.slane %v3664_v56, 7  ;;  %v9188_v2 = vrot.slane %v3672_v60, 7 }
 0x2e9   : > { %4994 = vrot.lane.b32.xlu2 %v7241_v20, %s7522_s18  ;;  %v9190_v45 = vrot.slane %v3698_v44, 7  ;;  %v9192_v62 = vrot.slane %v3706_v61, 7  ;;  %v3507_v53 = vor.u32 %v3505_v31, %v9172_v58  ;;  %v3533_v46 = vor.u32 %v3531_v47, %v9175_v25  ;;  %v3891_v56 = vld [vmem:[#allocation3 + $0x90] sm:$0xf] }
 0x2ea   : > { %v3541_v27 = vor.u32 %v3539_v24, %v9177_v55  ;;  %v3575_v6 = vor.u32 %v3573_v7, %v9179_v5  ;;  %v3683_v22 = vrot.slane %v3681_v50, 7  ;;  %v3684_v26 = vshll.u32 %v9136_v1, 16 }
 0x2eb   : > { %5006 = vrot.lane.b32.xlu0 %v9065_v34, %s7522_s18  ;;  %5504 = vrot.lane.b32.xlu1 %v7241_v20, %s7523_s19  ;;  %v3867_v20 = vld [vmem:[#allocation3 + $0x68] sm:$0x1]  ;;  %v9199_v63 = vrot.slane %v3689_v40, 7  ;;  %v3692_v33 = vshll.u32 %v9138_v15, 16  ;;  %v3581_v31 = vrot.slane %v3579_v11, 7  ;;  %v3582_v47 = vshll.u32 %v9124_v42, 16 }
 0x2ec   : > { %v3868_v60 = vsel %vm7593_vm7, %v3628_v3, %v3867_v20  ;;  %v3687_v44 = vrot.slane %v3683_v22, 4  ;;  %v9205_v61 = vrot.slane %v3587_v18, 7  ;;  %v3635_v24 = vor.u32 %v3633_v8, %v3632_v17  ;;  %v3849_v40 = vld [vmem:[#allocation3 + $0x48] sm:$0xf]  ;;  %v3870_v3 = vld [vmem:[#allocation3 + $0x6c] sm:$0xf] }
 0x2ed   : > { %3869 = vst [vmem:[#allocation3 + $0x68] sm:$0x1] %v3868_v60  ;;  %v3686_v7 = vor.u32 %v3684_v26, %v3683_v22  ;;  %v3694_v50 = vor.u32 %v3692_v33, %v9199_v63  ;;  %v3590_v1 = vshll.u32 %v9126_v14, 16  ;;  %v3643_v15 = vor.u32 %v3641_v29, %v9186_v37 }
 0x2ee   : > { %v3584_v5 = vor.u32 %v3582_v47, %v3581_v31  ;;  %v3585_v51 = vrot.slane %v3581_v31, 4  ;;  %v3636_v52 = vrot.slane %v3632_v17, 4  ;;  %v3677_v20 = vor.u32 %v3675_v49, %v9188_v2  ;;  %v3828_v49 = vld [vmem:[#allocation3 + $0x24] sm:$0xf] }
 0x2ef   : > { %v3695_v42 = vsel %vm7577_vm4, %v3687_v44, %v3694_v50  ;;  %v3892_v11 = vsel %vm7585_vm6, %v3686_v7, %v3891_v56  ;;  %v3592_v22 = vor.u32 %v3590_v1, %v9205_v61  ;;  %v10942_v18 = vshll.u32 %v9122_v21, 16  ;;  %v3842_v44 = vld [vmem:[#allocation3 + $0x3c] sm:$0xf]  ;;  %v3884_v47 = vld [vmem:[#allocation3 + $0x84] sm:$0xf] }
 0x2f0   : > { %v3711_v8 = vor.u32 %v3709_v43, %v9192_v62  ;;  %3893 = vst [vmem:[#allocation3 + $0x90] sm:$0xf] %v3892_v11  ;;  %v3850_v29 = vsel %vm7585_vm6, %v3584_v5, %v3849_v40  ;;  %v3534_v17 = vrot.slane %v9175_v25, 4  ;;  %v3871_v33 = vsel %vm7585_vm6, %v3635_v24, %v3870_v3  ;;  %v3814_v40 = vld [vmem:[#allocation3 + $0xc] sm:$0xf] }
 0x2f1   : > { %v3567_v14 = vor.u32 %v10942_v18, %v3564_v10  ;;  %3894 = vst.msk [vmem:[#allocation3 + $0x94] sm:$0xf] %vm560_vm2, %v3695_v42  ;;  %v3593_v26 = vsel %vm7577_vm4, %v3585_v51, %v3592_v22  ;;  %v3568_v56 = vrot.slane %v3564_v10, 4  ;;  %v3670_v21 = vrot.slane %v3666_v9, 4 }
 0x2f2   : > { %v10943_v60 = vshll.u32 %v9132_v28, 16  ;;  %3851 = vst [vmem:[#allocation3 + $0x48] sm:$0xf] %v3850_v29  ;;  %v3644_v5 = vsel %vm7577_vm4, %v3636_v52, %v3643_v15  ;;  %v3500_v25 = vrot.slane %v9183_v13, 4  ;;  %v3829_v51 = vsel %vm7585_vm6, %v3533_v46, %v3828_v49  ;;  %v3898_v29 = vld [vmem:[#allocation3 + $0x9c] sm:$0xf] }
 0x2f3   : > { %3852 = vst.msk [vmem:[#allocation3 + $0x4c] sm:$0xf] %vm560_vm2, %v3593_v26  ;;  %v3576_v31 = vsel %vm7577_vm4, %v3568_v56, %v3575_v6  ;;  %v3678_v10 = vsel %vm7577_vm4, %v3670_v21, %v3677_v20  ;;  %v3443_v28 = vmax.f32 %v8997_v36, 0.0  ;;  %v3542_v52 = vsel %vm7577_vm4, %v3534_v17, %v3541_v27 }
 0x2f4   : > { %v3669_v43 = vor.u32 %v10943_v60, %v3666_v9  ;;  %v3704_v9 = vrot.slane %v9190_v45, 4  ;;  %3872 = vst [vmem:[#allocation3 + $0x6c] sm:$0xf] %v3871_v33  ;;  %v3508_v24 = vsel %vm7577_vm4, %v3500_v25, %v3507_v53  ;;  %v3497_v46 = vshll.u32 %v9109_v32, 16  ;;  %v3926_v25 = vld [vmem:[#allocation3] sm:$0xf] }
 0x2f5   : > { %3873 = vst.msk [vmem:[#allocation3 + $0x70] sm:$0xf] %vm560_vm2, %v3644_v5  ;;  %v3843_v6 = vsel %vm7585_vm6, %v3567_v14, %v3842_v44  ;;  %v3475_v53 = vpack.c.bf16 %v3443_v28, %v3443_v28  ;;  %v3701_v32 = vshll.u32 %v9142_v38, 16  ;;  %v3526_v26 = vrot.slane %v9051_v4, 4  ;;  %v3930_v28 = vld [vmem:[#allocation3 + $0x8] sm:$0x1] }
 0x2f6   : > { %v3712_v7 = vsel %vm7577_vm4, %v3704_v9, %v3711_v8  ;;  %3830 = vst [vmem:[#allocation3 + $0x24] sm:$0xf] %v3829_v51  ;;  %v3499_v36 = vor.u32 %v3497_v46, %v9183_v13  ;;  %v3885_v27 = vsel %vm7585_vm6, %v3669_v43, %v3884_v47 }
 0x2f7   : > { %v3953_v50 = vld [vmem:[#allocation3 + $0x90] sm:$0x2]  ;;  %3831 = vst.msk [vmem:[#allocation3 + $0x28] sm:$0xf] %vm560_vm2, %v3542_v52  ;;  %v4067_v15 = vld [vmem:[#allocation3 + $0x90] sm:$0x1]  ;;  %v3703_v42 = vor.u32 %v3701_v32, %v9190_v45 }
 0x2f8   : > { %v6891_v1 = vrot.slane %v3953_v50, 9  ;;  %3844 = vst [vmem:[#allocation3 + $0x3c] sm:$0xf] %v3843_v6  ;;  %v3815_v38 = vsel %vm7585_vm6, %v3499_v36, %v3814_v40  ;;  %v3613_v18 = vshrl.u32 %v3475_v53, 16  ;;  %v3509_v52 = vrot.slane %v9172_v58, 4 }
 0x2f9   : > { %v3947_v3 = vld [vmem:[#allocation3 + $0x48] sm:$0x2]  ;;  %3845 = vst.msk [vmem:[#allocation3 + $0x40] sm:$0xf] %vm560_vm2, %v3576_v31  ;;  %v4049_v11 = vld [vmem:[#allocation3 + $0x48] sm:$0x1]  ;;  %v3899_v60 = vsel %vm7585_vm6, %v3703_v42, %v3898_v29  ;;  %v3927_v36 = vsel %vm7585_vm6, %v9053_v48, %v3926_v25  ;;  %v3931_v58 = vsel %vm7593_vm7, %v3526_v26, %v3930_v28 }
 0x2fa   : > { %v4068_v20 = vsel %vm7593_vm7, %v6891_v1, %v4067_v15  ;;  %v6885_v13 = vrot.slane %v3947_v3, 9  ;;  %3886 = vst [vmem:[#allocation3 + $0x84] sm:$0xf] %v3885_v27  ;;  %v3615_v43 = vrot.slane %v3613_v18, 7  ;;  %v3818_v50 = vld [vmem:[#allocation3 + $0x14] sm:$0x1] }
 0x2fb   : > { %4069 = vst [vmem:[#allocation3 + $0x90] sm:$0x1] %v4068_v20  ;;  %v3950_v22 = vld [vmem:[#allocation3 + $0x6c] sm:$0x2]  ;;  %v4058_v17 = vld [vmem:[#allocation3 + $0x6c] sm:$0x1]  ;;  %v3819_v48 = vsel %vm7593_vm7, %v3509_v52, %v3818_v50 }
 0x2fc   : > { %v4050_v14 = vsel %vm7593_vm7, %v6885_v13, %v4049_v11  ;;  %v6888_v8 = vrot.slane %v3950_v22, 9  ;;  %3887 = vst.msk [vmem:[#allocation3 + $0x88] sm:$0xf] %vm560_vm2, %v3678_v10  ;;  %v3624_v27 = vshll.u32 %v9114_v59, 16  ;;  %v9290_v1 = vld [vmem:[#allocation3 + $0x6c] sm:$0xf0] }
 0x2fd   : > { %4051 = vst [vmem:[#allocation3 + $0x48] sm:$0x1] %v4050_v14  ;;  %v3944_v49 = vld [vmem:[#allocation3 + $0x24] sm:$0x2]  ;;  %v4040_v56 = vld [vmem:[#allocation3 + $0x24] sm:$0x1] }
 0x2fe   : > { %v4059_v45 = vsel %vm7593_vm7, %v6888_v8, %v4058_v17  ;;  %v6882_v33 = vrot.slane %v3944_v49, 9  ;;  %3816 = vst [vmem:[#allocation3 + $0xc] sm:$0xf] %v3815_v38  ;;  %v3619_v15 = vrot.slane %v3615_v43, 4  ;;  %v3626_v3 = vor.u32 %v3624_v27, %v9161_v57  ;;  %v9297_v13 = vld [vmem:[#allocation3 + $0x24] sm:$0xf0] }
 0x2ff   : > { %4060 = vst [vmem:[#allocation3 + $0x6c] sm:$0x1] %v4059_v45  ;;  %v3946_v21 = vld [vmem:[#allocation3 + $0x3c] sm:$0x2]  ;;  %v4046_v4 = vld [vmem:[#allocation3 + $0x3c] sm:$0x1] }
 0x300   : > { %v4041_v5 = vsel %vm7593_vm7, %v6882_v33, %v4040_v56  ;;  %v6884_v44 = vrot.slane %v3946_v21, 9  ;;  %3817 = vst.msk [vmem:[#allocation3 + $0x10] sm:$0xf] %vm560_vm2, %v3508_v24  ;;  %v3616_v24 = vshll.u32 %v3475_v53, 16  ;;  %v3863_v59 = vld [vmem:[#allocation3 + $0x60] sm:$0xf]  ;;  %v3627_v33 = vsel %vm7577_vm4, %v3619_v15, %v3626_v3 }
 0x301   : > { %4042 = vst [vmem:[#allocation3 + $0x24] sm:$0x1] %v4041_v5  ;;  %v3952_v51 = vld [vmem:[#allocation3 + $0x84] sm:$0x2]  ;;  %v4064_v47 = vld [vmem:[#allocation3 + $0x84] sm:$0x1] }
 0x302   : > { %v7245_v31 = vld [vmem:[#allocation3 + $0x90] sm:$0xff]   ;;  %v4047_v10 = vsel %vm7593_vm7, %v6884_v44, %v4046_v4  ;;  %v6890_v9 = vrot.slane %v3952_v51, 9  ;;  %3900 = vst [vmem:[#allocation3 + $0x9c] sm:$0xf] %v3899_v60  ;;  %v3618_v53 = vor.u32 %v3616_v24, %v3615_v43  ;;  %v9303_v14 = vld [vmem:[#allocation3 + $0x3c] sm:$0xf0] }
 0x303   : > { %5010 = vrot.lane.b32.xlu2 %v7245_v31, %s7522_s18  ;;  %5520 = vrot.lane.b32.xlu1 %v7245_v31, %s7523_s19  ;;  %4048 = vst [vmem:[#allocation3 + $0x3c] sm:$0x1] %v4047_v10  ;;  %v3543_v49 = vrot.slane %v9177_v55, 4  ;;  %v4085_v45 = vld [vmem:[#allocation3 + $0x4] sm:$0x8]  ;;  %v3645_v55 = vrot.slane %v9186_v37, 4 }
 0x304   : > { %v7249_v46 = vld [vmem:[#allocation3 + $0x48] sm:$0xff]   ;;  %v4065_v6 = vsel %vm7593_vm7, %v6890_v9, %v4064_v47  ;;  %3901 = vst.msk [vmem:[#allocation3 + $0xa0] sm:$0xf] %vm560_vm2, %v3712_v7  ;;  %v3825_v7 = vld [vmem:[#allocation3 + $0x20] sm:$0x1]  ;;  %v3864_v17 = vsel %vm7585_vm6, %v3618_v53, %v3863_v59  ;;  %v6897_v43 = vrot.slane %v4085_v45, 11 }
 0x305   : > { %5508 = vrot.lane.b32.xlu0 %v7249_v46, %s7523_s19  ;;  %4066 = vst [vmem:[#allocation3 + $0x84] sm:$0x1] %v4065_v6  ;;  %v3942_v40 = vld [vmem:[#allocation3 + $0xc] sm:$0x2]  ;;  %v4034_v11 = vld [vmem:[#allocation3 + $0xc] sm:$0x1]  ;;  %v3826_v38 = vsel %vm7593_vm7, %v3526_v26, %v3825_v7 }
 0x306   : > { %v9288_v32 = vld [vmem:[#allocation3 + $0x6c] sm:$0xff]   ;;  %3928 = vst [vmem:[#allocation3] sm:$0xf] %v3927_v36  ;;  %v6880_v42 = vrot.slane %v3942_v40, 9  ;;  %v9319_v21 = vld [vmem:[#allocation3 + $0x84] sm:$0xf0] }
 0x307   : > { %3932 = vst [vmem:[#allocation3 + $0x8] sm:$0x1] %v3931_v58  ;;  %v3832_v60 = vld [vmem:[#allocation3 + $0x2c] sm:$0x1]  ;;  %v3662_v44 = vrot.slane %v9010_v41, 4  ;;  %v3441_v25 = vmax.f32 %v8991_v0, 0.0 }
 0x308   : > { %v9295_v20 = vld [vmem:[#allocation3 + $0x24] sm:$0xff]   ;;  %v4035_v8 = vsel %vm7593_vm7, %v6880_v42, %v4034_v11  ;;  %3820 = vst [vmem:[#allocation3 + $0x14] sm:$0x1] %v3819_v48  ;;  %v3833_v5 = vsel %vm7593_vm7, %v3543_v49, %v3832_v60  ;;  %v3874_v4 = vld [vmem:[#allocation3 + $0x74] sm:$0x1]  ;;  %v3442_v31 = vmax.f32 %v8994_v54, 0.0 }
 0x309   : > { %v3954_v22 = vld [vmem:[#allocation3 + $0x9c] sm:$0x2]  ;;  %4036 = vst [vmem:[#allocation3 + $0xc] sm:$0x1] %v4035_v8  ;;  %v4070_v29 = vld [vmem:[#allocation3 + $0x9c] sm:$0x1]  ;;  %v3875_v36 = vsel %vm7593_vm7, %v3645_v55, %v3874_v4 }
 0x30a   : > { %v9301_v18 = vld [vmem:[#allocation3 + $0x3c] sm:$0xff]   ;;  %v6892_v57 = vrot.slane %v3954_v22, 9  ;;  %3827 = vst [vmem:[#allocation3 + $0x20] sm:$0x1] %v3826_v38  ;;  %v9332_v9 = vld [vmem:[#allocation3 + $0xc] sm:$0xf0] }
 0x30b   : > { %5004 = vrot.lane.b32.xlu2 %v9288_v32, %s7522_s18  ;;  %4998 = vrot.lane.b32.xlu1 %v7249_v46, %s7522_s18  ;;  %3865 = vst [vmem:[#allocation3 + $0x60] sm:$0xf] %v3864_v17  ;;  %v3881_v51 = vld [vmem:[#allocation3 + $0x80] sm:$0x1]  ;;  %v4086_v28 = vld [vmem:[#allocation3 + $0x10] sm:$0x8] }
 0x30c   : > { %v4071_v26 = vsel %vm7593_vm7, %v6892_v57, %v4070_v29  ;;  %v9317_v56 = vld [vmem:[#allocation3 + $0x84] sm:$0xff]   ;;  %3866 = vst.msk [vmem:[#allocation3 + $0x64] sm:$0xf] %vm560_vm2, %v3627_v33  ;;  %v4087_v37 = vld [vmem:[#allocation3 + $0x1c] sm:$0x8]  ;;  %v3455_v52 = vmax.f32 %v9026_v39, 0.0  ;;  %v3882_v27 = vsel %vm7593_vm7, %v3662_v44, %v3881_v51 }
 0x30d   : > { %4072 = vst [vmem:[#allocation3 + $0x9c] sm:$0x1] %v4071_v26  ;;  %5502 = vrot.lane.b32.xlu0 %v9295_v20, %s7523_s19  ;;  %v9339_v41 = vld [vmem:[#allocation3 + $0xc] sm:$0xf0]  ;;  %v9344_v46 = vld [vmem:[#allocation3 + $0x9c] sm:$0xf0] }
 0x30e   : > { %v4175_v47 = vld [vmem:[#allocation3 + $0x8] sm:$0x1]  ;;  %3834 = vst [vmem:[#allocation3 + $0x2c] sm:$0x1] %v3833_v5  ;;  %v9350_v50 = vld [vmem:[#allocation3 + $0x3c] sm:$0xff]   ;;  %v6898_v15 = vrot.slane %v4086_v28, 11 }
 0x30f   : > { %v4176_v6 = vsel %vm7627_vm8, %v6897_v43, %v4175_v47  ;;  %v9352_v58 = vld [vmem:[#allocation3 + $0x3c] sm:$0xf0]  ;;  %v9359_v40 = vld [vmem:[#allocation3 + $0x24] sm:$0xff]   ;;  %v6899_v48 = vrot.slane %v4087_v37, 11  ;;  %v5679_v3 = vshll.u32 %v9065_v34, 16  ;;  %v9374_v43 = vpack.c.bf16 %v3441_v25, %v3441_v25 }
 0x310   : > { %v9330_v10 = vld [vmem:[#allocation3 + $0xc] sm:$0xff]   ;;  %4177 = vst [vmem:[#allocation3 + $0x8] sm:$0x1] %v4176_v6  ;;  %v9361_v7 = vld [vmem:[#allocation3 + $0x24] sm:$0xf0]  ;;  %v3679_v5 = vrot.slane %v9188_v2, 4 }
 0x311   : > { %v9337_v24 = vld [vmem:[#allocation3 + $0xc] sm:$0xff]   ;;  %v10945_v42 = vld [vmem:[#allocation11_spill] sm:$0xff]  ;;  %v4178_v11 = vld [vmem:[#allocation3 + $0x14] sm:$0x1]  ;;  %3876 = vst [vmem:[#allocation3 + $0x74] sm:$0x1] %v3875_v36 }
 0x312   : > { %10944 = vst [vmem:[#allocation17_spill] sm:$0xff] %v9337_v24  ;;  %v4179_v22 = vsel %vm7627_vm8, %v6898_v15, %v4178_v11  ;;  %v4181_v8 = vld [vmem:[#allocation3 + $0x20] sm:$0x1]  ;;  %v4088_v57 = vld [vmem:[#allocation3 + $0x28] sm:$0x8]  ;;  %v9383_v15 = vrot.slane %v5679_v3, 1 }
 0x313   : > { %5506 = vrot.lane.b32.xlu2 %v9301_v18, %s7523_s19  ;;  %4988 = vrot.lane.b32.xlu1 %v9330_v10, %s7522_s18  ;;  %v4093_v38 = vld [vmem:[#allocation3 + $0x64] sm:$0x8]  ;;  %3883 = vst [vmem:[#allocation3 + $0x80] sm:$0x1] %v3882_v27  ;;  %v7256_v17 = vld [vmem:[#allocation3] sm:$0xe]  ;;  %v4182_v26 = vsel %vm7627_vm8, %v6899_v48, %v4181_v8  ;;  %v9385_v48 = vpack.c.bf16 %v3442_v31, %v3442_v31 }
 0x314   : > { %v9342_v54 = vld [vmem:[#allocation3 + $0x9c] sm:$0xff]   ;;  %4180 = vst [vmem:[#allocation3 + $0x14] sm:$0x1] %v4179_v22  ;;  %v7255_v29 = vld [vmem:[#allocation3] sm:$0xf0]  ;;  %v6905_v60 = vrot.slane %v4093_v38, 11 }
 0x315   : > { %5518 = vrot.lane.b32.xlu0 %v9317_v56, %s7523_s19  ;;  %v7431_v49 = vld [vmem:[#allocation3 + $0xc] sm:$0xe]  ;;  %v4199_v45 = vld [vmem:[#allocation3 + $0x68] sm:$0x1]  ;;  %4183 = vst [vmem:[#allocation3 + $0x20] sm:$0x1] %v4182_v26  ;;  %v7257_v38 = vor.u32 %v7256_v17, %v7255_v29 }
 0x316   : > { %v4094_v55 = vld [vmem:[#allocation3 + $0x70] sm:$0x8]  ;;  %v6900_v4 = vrot.slane %v4088_v57, 11  ;;  %v4095_v51 = vld [vmem:[#allocation3 + $0x7c] sm:$0x8]  ;;  %v9377_v37 = vld [vmem:[#allocation3 + $0x84] sm:$0xff]   ;;  %v4200_v6 = vsel %vm7627_vm8, %v6905_v60, %v4199_v45  ;;  %v7432_v3 = vor.u32 %v7431_v49, %v9339_v41 }
 0x317   : > { %v4264_v44 = vld [vmem:[#allocation3 + $0x8] sm:$0x1]  ;;  %10946 = vst [vmem:[#allocation11_spill] sm:$0xff] %v9377_v37  ;;  %v4184_v36 = vld [vmem:[#allocation3 + $0x2c] sm:$0x1]  ;;  %v6906_v11 = vrot.slane %v4094_v55, 11 }
 0x318   : > { %v4524_v28 = vunpack.c.l.b16 %v4264_v44  ;;  %v9379_v47 = vld [vmem:[#allocation3 + $0x84] sm:$0xf0]  ;;  %v3888_v27 = vld [vmem:[#allocation3 + $0x8c] sm:$0x1]  ;;  %10947 = vst [vmem:[#allocation18_spill] sm:$0xff] %v9383_v15  ;;  %v4185_v2 = vsel %vm7627_vm8, %v6900_v4, %v4184_v36  ;;  %v6907_v8 = vrot.slane %v4095_v51, 11 }
 0x319   : > { %v7434_v25 = vld [vmem:[#allocation3 + $0xc] sm:$0xe]  ;;  %4201 = vst [vmem:[#allocation3 + $0x68] sm:$0x1] %v4200_v6  ;;  %v4202_v31 = vld [vmem:[#allocation3 + $0x74] sm:$0x1]  ;;  %v3889_v55 = vsel %vm7593_vm7, %v3679_v5, %v3888_v27 }
 0x31a   : > { %v9393_v22 = vpack.c.b16 %v4524_v28, %v4524_v28  ;;  %4186 = vst [vmem:[#allocation3 + $0x2c] sm:$0x1] %v4185_v2  ;;  %v4203_v45 = vsel %vm7627_vm8, %v6906_v11, %v4202_v31  ;;  %v4205_v60 = vld [vmem:[#allocation3 + $0x80] sm:$0x1]  ;;  %v4828_v6 = vrot.slane %v7257_v38, 1  ;;  %v4831_v2 = vrot.slane %v7432_v3, 1 }
 0x31b   : > { %5522 = vrot.lane.b32.xlu2 %v9342_v54, %s7523_s19  ;;  %4992 = vrot.lane.b32.xlu1 %v9359_v40, %s7522_s18  ;;  %v4265_v57 = vld [vmem:[#allocation3 + $0x14] sm:$0x1]  ;;  %4204 = vst [vmem:[#allocation3 + $0x74] sm:$0x1] %v4203_v45  ;;  %v4206_v41 = vsel %vm7627_vm8, %v6907_v8, %v4205_v60  ;;  %v10948_v29 = vld [vmem:[#allocation14_spill] sm:$0xff]  ;;  %v7435_v31 = vor.u32 %v7434_v25, %v9332_v9 }
 0x31c   : > { %v4330_v26 = vld [vmem:[#allocation3 + $0x14] sm:$0x1]  ;;  %v4829_v44 = vrot.slane %v9393_v22, 1  ;;  %v4525_v4 = vunpack.c.l.b16 %v4265_v57  ;;  %v4331_v51 = vld [vmem:[#allocation3 + $0x20] sm:$0x1] }
 0x31d   : > { %4996 = vrot.lane.b32.xlu0 %v9350_v50, %s7522_s18  ;;  %v5036_v28 = vunpack.c.l.b16 %v4330_v26  ;;  %4207 = vst [vmem:[#allocation3 + $0x80] sm:$0x1] %v4206_v41  ;;  %v5037_v11 = vunpack.c.l.b16 %v4331_v51  ;;  %v7268_v57 = vld [vmem:[#allocation3 + $0x60] sm:$0xe]  ;;  %v4096_v8 = vld [vmem:[#allocation3 + $0x88] sm:$0x8] }
 0x31e   : > { %v9405_v36 = vpack.c.b16 %v4525_v4, %v4525_v4  ;;  %3890 = vst [vmem:[#allocation3 + $0x8c] sm:$0x1] %v3889_v55  ;;  %v4830_v26 = vsel %vm1588_vm9, %v4828_v6, %v4829_v44  ;;  %v7267_v38 = vld [vmem:[#allocation3 + $0x60] sm:$0xf0]  ;;  %v9414_v41 = vld [vmem:[#allocation3 + $0x6c] sm:$0xff]   ;;  %v9421_v55 = vpack.c.bf16 %v3455_v52, %v3455_v52  ;;  %v6908_v39 = vrot.slane %v4096_v8, 11 }
 0x31f   : > { %v9412_v60 = vpack.c.b16 %v5036_v28, %v5036_v28  ;;  %10950 = vst [vmem:[#allocation19_spill] sm:$0xff] %v9414_v41  ;;  %v9416_v3 = vld [vmem:[#allocation3 + $0x6c] sm:$0xf0]  ;;  %v7279_v9 = vld [vmem:[#allocation3 + $0x18] sm:$0xf0]  ;;  %v9428_v5 = vpack.c.b16 %v5037_v11, %v5037_v11  ;;  %v5340_v0 = vrot.slane %v7435_v31, 1 }
 0x320   : > { %10949 = vst [vmem:[#allocation14_spill] sm:$0xff] %v9405_v36  ;;  %v4832_v45 = vrot.slane %v9405_v36, 1  ;;  %v4272_v4 = vld [vmem:[#allocation3 + $0x68] sm:$0x1]  ;;  %v7280_v25 = vld [vmem:[#allocation3 + $0x18] sm:$0xe] }
 0x321   : > { %10951 = vst [vmem:[#allocation20_spill] sm:$0xff] %v9421_v55  ;;  %v4532_v44 = vunpack.c.l.b16 %v4272_v4  ;;  %v4396_v51 = vld [vmem:[#allocation3 + $0x20] sm:$0x1]  ;;  %v7437_v6 = vld [vmem:[#allocation3 + $0x6c] sm:$0xe]  ;;  %v5341_v28 = vrot.slane %v9412_v60, 1  ;;  %v7281_v27 = vor.u32 %v7280_v25, %v7279_v9 }
 0x322   : > { %v4833_v33 = vsel %vm1588_vm9, %v4831_v2, %v4832_v45  ;;  %v7440_v59 = vld [vmem:[#allocation3 + $0x24] sm:$0xe]  ;;  %v4397_v53 = vld [vmem:[#allocation3 + $0x2c] sm:$0x1]  ;;  %v4338_v4 = vld [vmem:[#allocation3 + $0x74] sm:$0x1]  ;;  %v5548_v49 = vunpack.c.l.b16 %v4396_v51  ;;  %v7438_v9 = vor.u32 %v7437_v6, %v9290_v1 }
 0x323   : > { %5008 = vrot.lane.b32.xlu1 %v9377_v37, %s7522_s18  ;;  %4878 = vrot.lane.b32.xlu2 %v4833_v33, %s7524_s20  ;;  %v9431_v52 = vpack.c.b16 %v4532_v44, %v4532_v44  ;;  %v10952_v2 = vld [vmem:[#allocation15_spill] sm:$0xff]  ;;  %v7303_v11 = vld [vmem:[#allocation3 + $0x18] sm:$0xf0]  ;;  %v5044_v37 = vunpack.c.l.b16 %v4338_v4  ;;  %v5344_v41 = vrot.slane %v9428_v5, 1  ;;  %v7304_v33 = vld [vmem:[#allocation3 + $0x18] sm:$0xe]  ;;  %v5549_v44 = vunpack.c.l.b16 %v4397_v53 }
 0x324   : > { %v5583_v45 = vshll.u32 %v10952_v2, 16  ;;  %v10953_v31 = vld [vmem:[#allocation16_spill] sm:$0xff]  ;;  %v7441_v51 = vor.u32 %v7440_v59, %v9297_v13  ;;  %v5342_v24 = vsel %vm1588_vm9, %v5340_v0, %v5341_v28  ;;  %v5343_v4 = vrot.slane %v7281_v27, 1  ;;  %v3846_v6 = vld [vmem:[#allocation3 + $0x44] sm:$0x1] }
 0x325   : > { %4876 = vrot.lane.b32.xlu0 %v4830_v26, %s7524_s20  ;;  %v7269_v26 = vor.u32 %v7268_v57, %v7267_v38  ;;  %v4853_v17 = vrot.slane %v9431_v52, 1  ;;  %v4208_v8 = vld [vmem:[#allocation3 + $0x8c] sm:$0x1]  ;;  %v3839_v38 = vld [vmem:[#allocation3 + $0x38] sm:$0x1]  ;;  %v3577_v36 = vrot.slane %v10953_v31, 4  ;;  %v9443_v15 = vpack.c.b16 %v5548_v49, %v5548_v49 }
 0x326   : > { %v4209_v57 = vsel %vm7627_vm8, %v6908_v39, %v4208_v8  ;;  %v7305_v34 = vor.u32 %v7304_v33, %v7303_v11  ;;  %v9447_v39 = vpack.c.b16 %v5044_v37, %v5044_v37  ;;  %v4404_v8 = vld [vmem:[#allocation3 + $0x80] sm:$0x1]  ;;  %v10954_v31 = vrot.slane %v10948_v29, 4  ;;  %v4089_v28 = vld [vmem:[#allocation3 + $0x34] sm:$0x8]  ;;  %v9486_v55 = vld [vmem:[#allocation3 + $0x84] sm:$0xff]  }
 0x327   : > { %v4852_v25 = vrot.slane %v7269_v26, 1  ;;  %4210 = vst [vmem:[#allocation3 + $0x8c] sm:$0x1] %v4209_v57  ;;  %v9454_v0 = vrot.slane %v5583_v45, 1  ;;  %v5345_v59 = vsel %vm1588_vm9, %v5343_v4, %v5344_v41  ;;  %v10955_v29 = vshrl.u32 %v9374_v43, 16  ;;  %v9467_v26 = vld [vmem:[#allocation3 + $0x24] sm:$0xff]  }
 0x328   : > { %v3840_v1 = vsel %vm7593_vm7, %v10954_v31, %v3839_v38  ;;  %v3696_v27 = vrot.slane %v9199_v63, 4  ;;  %10956 = vst [vmem:[#allocation15_spill] sm:$0xff] %v9467_v26  ;;  %v9469_v41 = vld [vmem:[#allocation3 + $0x24] sm:$0xf0]  ;;  %v7443_v45 = vld [vmem:[#allocation3 + $0x84] sm:$0xe]  ;;  %v3847_v57 = vsel %vm7593_vm7, %v3577_v36, %v3846_v6 }
 0x329   : > { %v4854_v53 = vsel %vm1588_vm9, %v4852_v25, %v4853_v17  ;;  %v4266_v17 = vld [vmem:[#allocation3 + $0x20] sm:$0x1]  ;;  %3841 = vst [vmem:[#allocation3 + $0x38] sm:$0x1] %v3840_v1  ;;  %v9463_v49 = vrot.slane %v10955_v29, 7  ;;  %v5853_v11 = vrot.slane %v9443_v15, 1 }
 0x32a   : > { %v5855_v33 = vrot.slane %v7441_v51, 1  ;;  %v3895_v38 = vld [vmem:[#allocation3 + $0x98] sm:$0x1]  ;;  %v5852_v25 = vrot.slane %v7305_v34, 1  ;;  %v5364_v4 = vrot.slane %v7438_v9, 1  ;;  %v5365_v63 = vrot.slane %v9447_v39, 1 }
 0x32b   : > { %4892 = vrot.lane.b32.xlu1 %v4854_v53, %s7524_s20  ;;  %5390 = vrot.lane.b32.xlu2 %v5345_v59, %s7525_s21  ;;  %v4526_v53 = vunpack.c.l.b16 %v4266_v17  ;;  %3848 = vst [vmem:[#allocation3 + $0x44] sm:$0x1] %v3847_v57  ;;  %v6901_v59 = vrot.slane %v4089_v28, 11  ;;  %v4090_v29 = vld [vmem:[#allocation3 + $0x40] sm:$0x8]  ;;  %v7444_v17 = vor.u32 %v7443_v45, %v9319_v21 }
 0x32c   : > { %v7315_v37 = vld [vmem:[#allocation3 + $0x78] sm:$0xf0]  ;;  %v7316_v13 = vld [vmem:[#allocation3 + $0x78] sm:$0xe]  ;;  %v5854_v36 = vsel %vm1588_vm9, %v5852_v25, %v5853_v11  ;;  %v4332_v6 = vld [vmem:[#allocation3 + $0x2c] sm:$0x1]  ;;  %v5366_v28 = vsel %vm1588_vm9, %v5364_v4, %v5365_v63 }
 0x32d   : > { %5388 = vrot.lane.b32.xlu0 %v5342_v24, %s7525_s21  ;;  %v9458_v24 = vpack.c.b16 %v5549_v44, %v5549_v44  ;;  %v5556_v44 = vunpack.c.l.b16 %v4404_v8  ;;  %v7258_v26 = vld [vmem:[#allocation3 + $0x18] sm:$0xf0]  ;;  %v3896_v8 = vsel %vm7593_vm7, %v3696_v27, %v3895_v38  ;;  %v7259_v9 = vld [vmem:[#allocation3 + $0x18] sm:$0xe]  ;;  %v4097_v19 = vld [vmem:[#allocation3 + $0x94] sm:$0x8]  ;;  %v7317_v38 = vor.u32 %v7316_v13, %v7315_v37 }
 0x32e   : > { %v4405_v1 = vld [vmem:[#allocation3 + $0x8c] sm:$0x1]  ;;  %3897 = vst [vmem:[#allocation3 + $0x98] sm:$0x1] %v3896_v8  ;;  %v9488_v27 = vld [vmem:[#allocation3 + $0x84] sm:$0xf0]  ;;  %v9492_v21 = vpack.c.b16 %v4526_v53, %v4526_v53  ;;  %v7260_v63 = vor.u32 %v7259_v9, %v7258_v26 }
 0x32f   : > { %v5856_v31 = vrot.slane %v9458_v24, 1  ;;  %v5557_v51 = vunpack.c.l.b16 %v4405_v1  ;;  %v9479_v34 = vpack.c.b16 %v5556_v44, %v5556_v44  ;;  %v6902_v1 = vrot.slane %v4090_v29, 11  ;;  %10957 = vst [vmem:[#allocation16_spill] sm:$0xff] %v9486_v55  ;;  %v7446_v11 = vld [vmem:[#allocation3 + $0x24] sm:$0xe] }
 0x330   : > { %v4187_v23 = vld [vmem:[#allocation3 + $0x38] sm:$0x1]  ;;  %10958 = vst [vmem:[#allocation21_spill] sm:$0xff] %v9492_v21  ;;  %v3713_v25 = vrot.slane %v9192_v62, 4  ;;  %v3594_v4 = vrot.slane %v9205_v61, 4  ;;  %v5038_v29 = vunpack.c.l.b16 %v4332_v6  ;;  %v6909_v8 = vrot.slane %v4097_v19, 11 }
 0x331   : > { %v9484_v57 = vpack.c.b16 %v5557_v51, %v5557_v51  ;;  %v5857_v44 = vsel %vm1588_vm9, %v5855_v33, %v5856_v31  ;;  %v4188_v45 = vsel %vm7627_vm8, %v6901_v59, %v4187_v23  ;;  %v4273_v51 = vld [vmem:[#allocation3 + $0x74] sm:$0x1]  ;;  %v5877_v33 = vrot.slane %v9479_v34, 1  ;;  %v3853_v13 = vld [vmem:[#allocation3 + $0x50] sm:$0x1] }
 0x332   : > { %4189 = vst [vmem:[#allocation3 + $0x38] sm:$0x1] %v4188_v45  ;;  %v4190_v31 = vld [vmem:[#allocation3 + $0x44] sm:$0x1]  ;;  %v5879_v37 = vrot.slane %v7444_v17, 1  ;;  %v5876_v62 = vrot.slane %v7317_v38, 1  ;;  %v4533_v59 = vunpack.c.l.b16 %v4273_v51  ;;  %v7447_v26 = vor.u32 %v7446_v11, %v9361_v7 }
 0x333   : > { %5404 = vrot.lane.b32.xlu1 %v5366_v28, %s7525_s21  ;;  %5902 = vrot.lane.b32.xlu2 %v5857_v44, %s7526_s22  ;;  %v5880_v53 = vrot.slane %v9484_v57, 1  ;;  %v4191_v23 = vsel %vm7627_vm8, %v6902_v1, %v4190_v31  ;;  %v4835_v61 = vrot.slane %v9492_v21, 1  ;;  %v4834_v9 = vrot.slane %v7260_v63, 1  ;;  %v3902_v17 = vld [vmem:[#allocation3 + $0xa4] sm:$0x1] }
 0x334   : > { %4192 = vst [vmem:[#allocation3 + $0x44] sm:$0x1] %v4191_v23  ;;  %v9505_v6 = vpack.c.b16 %v5038_v29, %v5038_v29  ;;  %v3854_v19 = vsel %vm7593_vm7, %v3594_v4, %v3853_v13  ;;  %v5878_v44 = vsel %vm1588_vm9, %v5876_v62, %v5877_v33  ;;  %v7282_v45 = vld [vmem:[#allocation3 + $0x30] sm:$0xf0]  ;;  %v7283_v55 = vld [vmem:[#allocation3 + $0x30] sm:$0xe]  ;;  %v9526_v31 = vpack.c.b16 %v4533_v59, %v4533_v59 }
 0x335   : > { %5900 = vrot.lane.b32.xlu0 %v5854_v36, %s7526_s22  ;;  %v7449_v36 = vld [vmem:[#allocation3 + $0x6c] sm:$0xe]  ;;  %v4211_v28 = vld [vmem:[#allocation3 + $0x98] sm:$0x1]  ;;  %3855 = vst [vmem:[#allocation3 + $0x50] sm:$0x1] %v3854_v19  ;;  %v5881_v7 = vsel %vm1588_vm9, %v5879_v37, %v5880_v53  ;;  %v4836_v33 = vsel %vm1588_vm9, %v4834_v9, %v4835_v61  ;;  %v3903_v37 = vsel %vm7593_vm7, %v3713_v25, %v3902_v17 }
 0x336   : > { %v4212_v1 = vsel %vm7627_vm8, %v6909_v8, %v4211_v28  ;;  %v10959_v38 = vshrl.u32 %v9385_v48, 16  ;;  %v4091_v11 = vld [vmem:[#allocation3 + $0x4c] sm:$0x8]  ;;  %v9518_v4 = vld [vmem:[#allocation3 + $0x3c] sm:$0xff]   ;;  %10961 = vst [vmem:[#allocation23_spill] sm:$0xff] %v9526_v31  ;;  %v7450_v8 = vor.u32 %v7449_v36, %v9416_v3  ;;  %v5346_v53 = vrot.slane %v7447_v26, 1 }
 0x337   : > { %4213 = vst [vmem:[#allocation3 + $0x98] sm:$0x1] %v4212_v1  ;;  %v9520_v63 = vld [vmem:[#allocation3 + $0x3c] sm:$0xf0]  ;;  %v9522_v29 = vld [vmem:[#allocation3 + $0x3c] sm:$0xe]  ;;  %v7284_v19 = vor.u32 %v7283_v55, %v7282_v45 }
 0x338   : > { %v9514_v51 = vrot.slane %v10959_v38, 7  ;;  %10960 = vst [vmem:[#allocation22_spill] sm:$0xff] %v9518_v4  ;;  %v5347_v62 = vrot.slane %v9505_v6, 1  ;;  %v6903_v9 = vrot.slane %v4091_v11, 11  ;;  %v4098_v59 = vld [vmem:[#allocation3 + $0xa0] sm:$0x8] }
 0x339   : > { %v4333_v13 = vld [vmem:[#allocation3 + $0x38] sm:$0x1]  ;;  %3904 = vst [vmem:[#allocation3 + $0xa4] sm:$0x1] %v3903_v37  ;;  %v7306_v3 = vld [vmem:[#allocation3 + $0x30] sm:$0xf0] }
 0x33a   : > { %v4398_v23 = vld [vmem:[#allocation3 + $0x38] sm:$0x1]  ;;  %v5039_v28 = vunpack.c.l.b16 %v4333_v13  ;;  %v7307_v36 = vld [vmem:[#allocation3 + $0x30] sm:$0xe]  ;;  %v4856_v25 = vrot.slane %v9526_v31, 1  ;;  %v5348_v26 = vsel %vm1588_vm9, %v5346_v53, %v5347_v62  ;;  %v5349_v4 = vrot.slane %v7284_v19, 1 }
 0x33b   : > { %5918 = vrot.lane.b32.xlu1 %v5881_v7, %s7526_s22  ;;  %4880 = vrot.lane.b32.xlu2 %v4836_v33, %s7524_s20  ;;  %v5550_v61 = vunpack.c.l.b16 %v4398_v23  ;;  %v4399_v38 = vld [vmem:[#allocation3 + $0x44] sm:$0x1]  ;;  %v4855_v7 = vrot.slane %v7450_v8, 1  ;;  %v6910_v13 = vrot.slane %v4098_v59, 11  ;;  %v7308_v11 = vor.u32 %v7307_v36, %v7306_v3  ;;  %v7291_v37 = vld [vmem:[#allocation3 + $0x78] sm:$0xf0] }
 0x33c   : > { %v9533_v1 = vpack.c.b16 %v5039_v28, %v5039_v28  ;;  %v5551_v33 = vunpack.c.l.b16 %v4399_v38  ;;  %v4193_v45 = vld [vmem:[#allocation3 + $0x50] sm:$0x1]  ;;  %v7292_v28 = vld [vmem:[#allocation3 + $0x78] sm:$0xe]  ;;  %v4267_v19 = vld [vmem:[#allocation3 + $0x2c] sm:$0x1] }
 0x33d   : > { %5916 = vrot.lane.b32.xlu0 %v5878_v44, %s7526_s22  ;;  %v4339_v44 = vld [vmem:[#allocation3 + $0x80] sm:$0x1]  ;;  %v9538_v23 = vpack.c.b16 %v5550_v61, %v5550_v61  ;;  %v4194_v21 = vsel %vm7627_vm8, %v6903_v9, %v4193_v45  ;;  %v4857_v61 = vsel %vm1588_vm9, %v4855_v7, %v4856_v25  ;;  %v4268_v9 = vld [vmem:[#allocation3 + $0x38] sm:$0x1]  ;;  %v3949_v36 = vld [vmem:[#allocation3 + $0x60] sm:$0x2]  ;;  %v9568_v45 = vpop.permute.xlu2 %5516 }
 0x33e   : > { %v5045_v17 = vunpack.c.l.b16 %v4339_v44  ;;  %v5350_v55 = vrot.slane %v9533_v1, 1  ;;  %v7453_v44 = vor.u32 %v9522_v29, %v9303_v14  ;;  %v9547_v62 = vpack.c.b16 %v5551_v33, %v5551_v33  ;;  %4195 = vst [vmem:[#allocation3 + $0x50] sm:$0x1] %v4194_v21  ;;  %v7455_v7 = vld [vmem:[#allocation3 + $0x24] sm:$0xe] }
 0x33f   : > { %10962 = vst [vmem:[#allocation24_spill] sm:$0xff] %v9538_v23  ;;  %v10963_v38 = vmax.f32 %v9033_v16, 0.0  ;;  %v7293_v21 = vor.u32 %v7292_v28, %v7291_v37  ;;  %v4406_v25 = vld [vmem:[#allocation3 + $0x98] sm:$0x1]  ;;  %v3941_v33 = vld [vmem:[#allocation3] sm:$0x2] }
 0x340   : > { %v5351_v53 = vsel %vm1588_vm9, %v5349_v4, %v5350_v55  ;;  %v9551_v59 = vpack.c.b16 %v5045_v17, %v5045_v17  ;;  %v4214_v3 = vld [vmem:[#allocation3 + $0xa4] sm:$0x1]  ;;  %v10964_v4 = vmax.f32 %v9036_v30, 0.0  ;;  %v5858_v16 = vrot.slane %v7308_v11, 1  ;;  %10965 = vst [vmem:[#allocation25_spill] sm:$0xff] %v9568_v45 }
 0x341   : > { %v9556_v14 = vpack.c.bf16 %v10963_v38, %v10963_v38  ;;  %v4215_v17 = vsel %vm7627_vm8, %v6910_v13, %v4214_v3  ;;  %v5859_v55 = vrot.slane %v9538_v23, 1  ;;  %v4527_v30 = vunpack.c.l.b16 %v4267_v19  ;;  %v4055_v13 = vld [vmem:[#allocation3 + $0x60] sm:$0x1]  ;;  %v7262_v23 = vld [vmem:[#allocation3 + $0x30] sm:$0xe] }
 0x342   : > { %v9561_v29 = vpack.c.bf16 %v10964_v4, %v10964_v4  ;;  %4216 = vst [vmem:[#allocation3 + $0xa4] sm:$0x1] %v4215_v17  ;;  %v5862_v38 = vrot.slane %v9547_v62, 1  ;;  %v6887_v37 = vrot.slane %v3949_v36, 9  ;;  %v5368_v28 = vrot.slane %v9551_v59, 1 }
 0x343   : > { %5394 = vrot.lane.b32.xlu1 %v5351_v53, %s7525_s21  ;;  %4894 = vrot.lane.b32.xlu2 %v4857_v61, %s7524_s20  ;;  %v5861_v53 = vrot.slane %v7453_v44, 1  ;;  %v4528_v61 = vunpack.c.l.b16 %v4268_v9  ;;  %v7318_v4 = vld [vmem:[#allocation3 + $0x90] sm:$0xf0]  ;;  %v5558_v8 = vunpack.c.l.b16 %v4406_v25  ;;  %v6879_v3 = vrot.slane %v3941_v33, 9  ;;  %v7319_v17 = vld [vmem:[#allocation3 + $0x90] sm:$0xe] }
 0x344   : > { %v5167_v45 = vshll.u32 %v9288_v32, 16  ;;  %v5367_v19 = vrot.slane %v7293_v21, 1  ;;  %v4056_v44 = vsel %vm7593_vm7, %v6887_v37, %v4055_v13  ;;  %v4031_v9 = vld [vmem:[#allocation3] sm:$0x1]  ;;  %v5860_v36 = vsel %vm1588_vm9, %v5858_v16, %v5859_v55  ;;  %v7261_v33 = vld [vmem:[#allocation3 + $0x30] sm:$0xf0] }
 0x345   : > { %5392 = vrot.lane.b32.xlu0 %v5348_v26, %s7525_s21  ;;  %v10966_v26 = vshrl.u32 %v10952_v2, 16  ;;  %v9581_v31 = vpack.c.b16 %v4527_v30, %v4527_v30  ;;  %v7456_v25 = vor.u32 %v7455_v7, %v9469_v41  ;;  %4057 = vst [vmem:[#allocation3 + $0x60] sm:$0x1] %v4056_v44  ;;  %v4032_v2 = vsel %vm7593_vm7, %v6879_v3, %v4031_v9  ;;  %v4274_v16 = vld [vmem:[#allocation3 + $0x80] sm:$0x1] }
 0x346   : > { %v5595_v21 = vshll.u32 %v9295_v20, 16  ;;  %v9590_v37 = vpack.c.b16 %v4528_v61, %v4528_v61  ;;  %4033 = vst [vmem:[#allocation3] sm:$0x1] %v4032_v2  ;;  %v5619_v41 = vshll.u32 %v9301_v18, 16  ;;  %v5369_v7 = vsel %vm1588_vm9, %v5367_v19, %v5368_v28  ;;  %v4275_v30 = vld [vmem:[#allocation3 + $0x8c] sm:$0x1] }
 0x347   : > { %v9575_v11 = vor.u32 %v9454_v0, %v10966_v26  ;;  %10967 = vst [vmem:[#allocation26_spill] sm:$0xff] %v9581_v31  ;;  %v5863_v26 = vsel %vm1588_vm9, %v5861_v53, %v5862_v38  ;;  %v9595_v55 = vpack.c.b16 %v5558_v8, %v5558_v8  ;;  %v5588_v13 = vshll.u32 %v9443_v15, 16  ;;  %v7458_v53 = vld [vmem:[#allocation3 + $0x3c] sm:$0xe]  ;;  %v4334_v9 = vld [vmem:[#allocation3 + $0x44] sm:$0x1] }
 0x348   : > { %10968 = vst [vmem:[#allocation27_spill] sm:$0xff] %v9590_v37  ;;  %v9598_v3 = vrot.slane %v5167_v45, 1  ;;  %v7320_v38 = vor.u32 %v7319_v17, %v7318_v4  ;;  %v7263_v61 = vor.u32 %v7262_v23, %v7261_v33  ;;  %v4838_v28 = vrot.slane %v9581_v31, 1  ;;  %v7461_v2 = vld [vmem:[#allocation3 + $0x84] sm:$0xe]  ;;  %v9610_v4 = vpop.permute.xlu2 %4994 }
 0x349   : > { %10969 = vst [vmem:[#allocation28_spill] sm:$0xff] %v9595_v55  ;;  %v4534_v19 = vunpack.c.l.b16 %v4274_v16  ;;  %v5590_v8 = vrot.slane %v5588_v13, 1  ;;  %v4841_v45 = vrot.slane %v9590_v37, 1  ;;  %v4535_v0 = vunpack.c.l.b16 %v4275_v30  ;;  %v7271_v16 = vld [vmem:[#allocation3 + $0x78] sm:$0xe] }
 0x34a   : > { %v9607_v44 = vrot.slane %v5619_v41, 1  ;;  %10970 = vst [vmem:[#allocation29_spill] sm:$0xff] %v9610_v4  ;;  %v5040_v23 = vunpack.c.l.b16 %v4334_v9  ;;  %v4840_v33 = vrot.slane %v7263_v61, 1  ;;  %v5095_v13 = vshll.u32 %v9359_v40, 16  ;;  %v4340_v61 = vld [vmem:[#allocation3 + $0x8c] sm:$0x1] }
 0x34b   : > { %5906 = vrot.lane.b32.xlu1 %v5863_v26, %s7526_s22  ;;  %5406 = vrot.lane.b32.xlu2 %v5369_v7, %s7525_s21  ;;  %v9603_v26 = vrot.slane %v5595_v21, 1  ;;  %v5883_v7 = vrot.slane %v9595_v55, 1  ;;  %v9614_v17 = vsel %vm1315_vm10, %v9575_v11, %v5590_v8  ;;  %v7270_v21 = vld [vmem:[#allocation3 + $0x78] sm:$0xf0]  ;;  %v5882_v41 = vrot.slane %v7320_v38, 1 }
 0x34c   : > { %10971 = vst [vmem:[#allocation30_spill] sm:$0xff] %v9614_v17  ;;  %v9619_v15 = vpack.c.b16 %v4534_v19, %v4534_v19  ;;  %v7459_v31 = vor.u32 %v7458_v53, %v9352_v58  ;;  %v4842_v9 = vsel %vm1588_vm9, %v4840_v33, %v4841_v45  ;;  %v9624_v8 = vpack.c.b16 %v4535_v0, %v4535_v0  ;;  %v9628_v55 = vld [vmem:[#allocation3 + $0x9c] sm:$0xe]  ;;  %v4341_v58 = vld [vmem:[#allocation3 + $0x98] sm:$0x1] }
 0x34d   : > { %5904 = vrot.lane.b32.xlu0 %v5860_v36, %s7526_s22  ;;  %v4837_v36 = vrot.slane %v7456_v25, 1  ;;  %v5119_v25 = vshll.u32 %v9350_v50, 16  ;;  %v7462_v4 = vor.u32 %v7461_v2, %v9488_v27  ;;  %v7272_v38 = vor.u32 %v7271_v16, %v7270_v21  ;;  %v4407_v17 = vld [vmem:[#allocation3 + $0xa4] sm:$0x1] }
 0x34e   : > { %10972 = vst [vmem:[#allocation31_spill] sm:$0xff] %v9619_v15  ;;  %v10974_v53 = vmax.f32 %v10945_v42, 0.0  ;;  %v10975_v27 = vshll.u32 %v9374_v43, 16  ;;  %v9649_v21 = vrot.slane %v5095_v13, 1  ;;  %v4859_v42 = vrot.slane %v9619_v15, 1 }
 0x34f   : > { %v4839_v30 = vsel %vm1588_vm9, %v4837_v36, %v4838_v28  ;;  %10973 = vst [vmem:[#allocation32_spill] sm:$0xff] %v9624_v8  ;;  %v5884_v36 = vsel %vm1588_vm9, %v5882_v41, %v5883_v7  ;;  %v9632_v28 = vpack.c.b16 %v5040_v23, %v5040_v23  ;;  %v7464_v7 = vld [vmem:[#allocation3 + $0x84] sm:$0xe]  ;;  %v4400_v23 = vld [vmem:[#allocation3 + $0x50] sm:$0x1]  ;;  %v9647_v33 = vrot.slane %v5119_v25, 1 }
 0x350   : > { %v9637_v0 = vpack.c.bf16 %v10974_v53, %v10974_v53  ;;  %v9642_v19 = vor.u32 %v10975_v27, %v9463_v49  ;;  %v5046_v16 = vunpack.c.l.b16 %v4340_v61  ;;  %v5352_v41 = vrot.slane %v7459_v31, 1  ;;  %v7310_v53 = vld [vmem:[#allocation3 + $0x48] sm:$0xe]  ;;  %v7294_v15 = vld [vmem:[#allocation3 + $0x90] sm:$0xf0] }
 0x351   : > { %v4861_v43 = vrot.slane %v7462_v4, 1  ;;  %v5047_v27 = vunpack.c.l.b16 %v4341_v58  ;;  %v4858_v37 = vrot.slane %v7272_v38, 1  ;;  %v5353_v45 = vrot.slane %v9632_v28, 1  ;;  %v7295_v31 = vld [vmem:[#allocation3 + $0x90] sm:$0xe] }
 0x352   : > { %v10976_v25 = vshll.u32 %v9385_v48, 16  ;;  %v5069_v13 = vshrl.u32 %v9330_v10, 16  ;;  %v5071_v61 = vshll.u32 %v9330_v10, 16  ;;  %v9664_v58 = vpack.c.b16 %v5046_v16, %v5046_v16 }
 0x353   : > { %4884 = vrot.lane.b32.xlu1 %v4842_v9, %s7524_s20  ;;  %5920 = vrot.lane.b32.xlu2 %v5884_v36, %s7526_s22  ;;  %v4862_v9 = vrot.slane %v9624_v8, 1  ;;  %v5552_v36 = vunpack.c.l.b16 %v4400_v23  ;;  %v4860_v4 = vsel %vm1588_vm9, %v4858_v37, %v4859_v42  ;;  %v7465_v38 = vor.u32 %v7464_v7, %v9379_v47 }
 0x354   : > { %v9657_v2 = vor.u32 %v10976_v25, %v9514_v51  ;;  %v9669_v25 = vpack.c.b16 %v5047_v27, %v5047_v27  ;;  %v10978_v10 = vshrl.u32 %v9295_v20, 16  ;;  %v5600_v37 = vshll.u32 %v9458_v24, 16  ;;  %v7470_v27 = vld [vmem:[#allocation3 + $0x3c] sm:$0xe] }
 0x355   : > { %4882 = vrot.lane.b32.xlu0 %v4839_v30, %s7524_s20  ;;  %v7309_v30 = vld [vmem:[#allocation3 + $0x48] sm:$0xf0]  ;;  %v4863_v48 = vsel %vm1588_vm9, %v4861_v43, %v4862_v9  ;;  %v7468_v42 = vor.u32 %v9628_v55, %v9344_v46  ;;  %v5354_v16 = vsel %vm1588_vm9, %v5352_v41, %v5353_v45  ;;  %v9679_v47 = vpack.c.b16 %v5552_v36, %v5552_v36  ;;  %v9687_v45 = vpop.permute.xlu1 %5500 }
 0x356   : > { %v7311_v23 = vor.u32 %v7310_v53, %v7309_v30  ;;  %v5598_v12 = vor.u32 %v9603_v26, %v10978_v10  ;;  %v7296_v7 = vor.u32 %v7295_v31, %v7294_v15  ;;  %v4269_v30 = vld [vmem:[#allocation3 + $0x44] sm:$0x1]  ;;  %v5073_v43 = vrot.slane %v5071_v61, 1 }
 0x357   : > { %v5602_v9 = vrot.slane %v5600_v37, 1  ;;  %v10979_v20 = vshrl.u32 %v9288_v32, 16  ;;  %v5172_v24 = vshll.u32 %v9447_v39, 16  ;;  %v5370_v53 = vrot.slane %v7465_v38, 1 }
 0x358   : > { %v5371_v46 = vrot.slane %v9664_v58, 1  ;;  %v5864_v55 = vrot.slane %v7311_v23, 1  ;;  %v5559_v41 = vunpack.c.l.b16 %v4407_v17  ;;  %v5374_v15 = vrot.slane %v9669_v25, 1 }
 0x359   : > { %v5170_v26 = vor.u32 %v9598_v3, %v10979_v20  ;;  %v4529_v36 = vunpack.c.l.b16 %v4269_v30  ;;  %v9691_v61 = vsel %vm1315_vm10, %v5598_v12, %v5602_v9  ;;  %v5174_v31 = vrot.slane %v5172_v24, 1 }
 0x35a   : > { %v5865_v32 = vrot.slane %v9679_v47, 1  ;;  %v5373_v3 = vrot.slane %v7296_v7, 1  ;;  %v10980_v39 = vshrl.u32 %v9301_v18, 16  ;;  %v5624_v23 = vshll.u32 %v9547_v62, 16 }
 0x35b   : > { %4898 = vrot.lane.b32.xlu1 %v4863_v48, %s7524_s20  ;;  %5396 = vrot.lane.b32.xlu2 %v5354_v16, %s7525_s21  ;;  %v5088_v17 = vshll.u32 %v9428_v5, 16  ;;  %v9702_v48 = vsel %vm1315_vm10, %v5170_v26, %v5174_v31  ;;  %v5074_v10 = vor.u32 %v5073_v43, %v5069_v13  ;;  %v5076_v12 = vshll.u32 %v9412_v60, 16  ;;  %v7044_v31 = vld [vmem:[#allocation3] sm:$0xff]  }
 0x35c   : > { %v5622_v38 = vor.u32 %v9607_v44, %v10980_v39  ;;  %v5372_v37 = vsel %vm1588_vm9, %v5370_v53, %v5371_v46  ;;  %v5575_v7 = vpack.c.b16 %v5559_v41, %v5559_v41  ;;  %v5626_v30 = vrot.slane %v5624_v23, 1  ;;  %v7236_v46 = vld [vmem:[#allocation3 + $0x60] sm:$0xff]  }
 0x35d   : > { %v9662_v8 = vpop.permute.xlu2 %5010  ;;  %4896 = vrot.lane.b32.xlu0 %v4860_v4, %s7524_s20  ;;  %v9694_v4 = vpop.permute.xlu0 %4990  ;;  %v5715_v18 = vshll.u32 %v9342_v54, 16  ;;  %v5375_v62 = vsel %vm1588_vm9, %v5373_v3, %v5374_v15  ;;  %v9711_v44 = vpack.c.b16 %v4529_v36, %v4529_v36  ;;  %v5078_v5 = vrot.slane %v5076_v12, 1 }
 0x35e   : > { %10977 = vst [vmem:[#allocation33_spill] sm:$0xff] %v9662_v8  ;;  %v5093_v9 = vshrl.u32 %v9359_v40, 16  ;;  %v5866_v13 = vsel %vm1588_vm9, %v5864_v55, %v5865_v32  ;;  %v7471_v60 = vor.u32 %v7470_v27, %v9520_v63  ;;  %v9718_v43 = vsel %vm1315_vm10, %v5622_v38, %v5626_v30  ;;  %v9734_v38 = vpop.permute.xlu1 %5504  ;;  %v9996_v8 = vld [vmem:[#allocation3 + $0x9c] sm:$0xf0] }
 0x35f   : > { %v10981_v20 = vshll.u32 %v9317_v56, 16  ;;  %v5713_v24 = vshrl.u32 %v9342_v54, 16  ;;  %v5090_v53 = vrot.slane %v5088_v17, 1  ;;  %v9725_v40 = vsel %vm1315_vm10, %v5074_v10, %v5078_v5  ;;  %v3856_v5 = vld [vmem:[#allocation3 + $0x54] sm:$0xf] }
 0x360   : > { %v5885_v55 = vrot.slane %v7468_v42, 1  ;;  %v5886_v41 = vrot.slane %v5575_v7, 1  ;;  %v5098_v15 = vor.u32 %v9649_v21, %v5093_v9  ;;  %v5100_v63 = vshll.u32 %v9505_v6, 16 }
 0x361   : > { %v5693_v26 = vrot.slane %v10981_v20, 1  ;;  %v5717_v27 = vrot.slane %v5715_v18, 1  ;;  %v4844_v36 = vrot.slane %v9711_v44, 1  ;;  %v10982_v32 = vshrl.u32 %v9350_v50, 16  ;;  %v3860_v20 = vld [vmem:[#allocation3 + $0x5c] sm:$0x1] }
 0x362   : > { %v5124_v3 = vshll.u32 %v9632_v28, 16  ;;  %v4843_v39 = vrot.slane %v7471_v60, 1  ;;  %v4655_v23 = vshll.u32 %v7236_v46, 16  ;;  %v4660_v42 = vshll.u32 %v9431_v52, 16 }
 0x363   : > { %5410 = vrot.lane.b32.xlu1 %v5375_v62, %s7525_s21  ;;  %5908 = vrot.lane.b32.xlu2 %v5866_v13, %s7526_s22  ;;  %v5122_v54 = vor.u32 %v9647_v33, %v10982_v32  ;;  %v5102_v17 = vrot.slane %v5100_v63, 1  ;;  %v5091_v6 = vsel %vm1315_vm10, %v9575_v11, %v5090_v53  ;;  %v10983_v10 = vshrl.u32 %v9317_v56, 16 }
 0x364   : > { %v5126_v21 = vrot.slane %v5124_v3, 1  ;;  %v5696_v50 = vshll.u32 %v9484_v57, 16  ;;  %v5887_v33 = vsel %vm1588_vm9, %v5885_v55, %v5886_v41  ;;  %v4559_v28 = vshll.u32 %v7044_v31, 16 }
 0x365   : > { %v9706_v16 = vpop.permute.xlu2 %5004  ;;  %5408 = vrot.lane.b32.xlu0 %v5372_v37, %s7525_s21  ;;  %v5694_v12 = vor.u32 %v5693_v26, %v10983_v10  ;;  %v9743_v37 = vpop.permute.xlu0 %5006  ;;  %v5684_v30 = vshll.u32 %v9479_v34, 16  ;;  %v9747_v18 = vsel %vm1315_vm10, %v5098_v15, %v5102_v17  ;;  %v5718_v62 = vor.u32 %v5717_v27, %v5713_v24  ;;  %v10985_v26 = vld [vmem:[#allocation20_spill] sm:$0xff]  ;;  %v7233_v15 = vld [vmem:[#allocation3 + $0x18] sm:$0xff]  }
 0x366   : > { %v9753_v11 = vsel %vm1315_vm10, %v5122_v54, %v5126_v21  ;;  %v5698_v56 = vrot.slane %v5696_v50, 1  ;;  %v5720_v57 = vshll.u32 %v5575_v7, 16  ;;  %v3723_v9 = vshrl.u32 %v9556_v14, 16 }
 0x367   : > { %v4845_v13 = vsel %vm1588_vm9, %v4843_v39, %v4844_v36  ;;  %v4657_v34 = vrot.slane %v4655_v23, 1  ;;  %v4564_v60 = vshll.u32 %v9393_v22, 16  ;;  %v10986_v53 = vshrl.u32 %v10985_v26, 16 }
 0x368   : > { %v4662_v41 = vrot.slane %v4660_v42, 1  ;;  %v9763_v7 = vsel %vm1315_vm10, %v5694_v12, %v5698_v56  ;;  %v5722_v24 = vrot.slane %v5720_v57, 1  ;;  %v4653_v63 = vshrl.u32 %v7236_v46, 16  ;;  %v10993_v12 = vld [vmem:[#allocation18_spill] sm:$0xff] }
 0x369   : > { %v3717_v55 = vrot.slane %v10986_v53, 7  ;;  %v4561_v27 = vrot.slane %v4559_v28, 1  ;;  %v10987_v36 = vrot.slane %v9463_v49, 4  ;;  %v3857_v3 = vsel %vm7585_vm6, %v9642_v19, %v3856_v5  ;;  %v10991_v19 = vld [vmem:[#allocation13_spill] sm:$0xff]  ;;  %v3905_v5 = vld [vmem:[#allocation3 + $0xa8] sm:$0xf] }
 0x36a   : > { %v3718_v39 = vshll.u32 %v10985_v26, 16  ;;  %v5686_v23 = vrot.slane %v5684_v30, 1  ;;  %v9775_v42 = vsel %vm1315_vm10, %v5718_v62, %v5722_v24  ;;  %3858 = vst [vmem:[#allocation3 + $0x54] sm:$0xf] %v3857_v3  ;;  %v10990_v46 = vrot.slane %v9514_v51, 4  ;;  %v10995_v62 = vld [vmem:[#allocation21_spill] sm:$0xff] }
 0x36b   : > { %5262 = vrot.lane.b32.xlu1 %v5091_v6, %s7527_s23  ;;  %4886 = vrot.lane.b32.xlu2 %v4845_v13, %s7524_s20  ;;  %v3610_v22 = vsel %vm7577_vm4, %v10987_v36, %v9657_v2  ;;  %v9781_v49 = vor.u32 %v4657_v34, %v4653_v63  ;;  %v4557_v6 = vshrl.u32 %v7044_v31, 16  ;;  %v4566_v2 = vrot.slane %v4564_v60, 1 }
 0x36c   : > { %v3861_v17 = vsel %vm7593_vm7, %v10990_v46, %v3860_v20  ;;  %v4583_v21 = vshll.u32 %v7233_v15, 16  ;;  %3859 = vst.msk [vmem:[#allocation3 + $0x58] sm:$0xf] %vm560_vm2, %v3610_v22  ;;  %v10992_v10 = vshrl.u32 %v10991_v19, 16  ;;  %v3725_v28 = vrot.slane %v3723_v9, 7 }
 0x36d   : > { %5922 = vrot.lane.b32.xlu0 %v5887_v33, %s7526_s22  ;;  %v9750_v52 = vpop.permute.xlu2 %5506  ;;  %v3732_v33 = vshrl.u32 %v9561_v29, 16  ;;  %3862 = vst [vmem:[#allocation3 + $0x5c] sm:$0x1] %v3861_v17  ;;  %v4663_v51 = vsel %vm1315_vm10, %v9781_v49, %v4662_v41  ;;  %v4562_v30 = vor.u32 %v4561_v27, %v4557_v6  ;;  %v4588_v31 = vshll.u32 %v10995_v62, 16  ;;  %v7362_v27 = vld [vmem:[#allocation3 + $0x30] sm:$0xff]  }
 0x36e   : > { %10984 = vst [vmem:[#allocation34_spill] sm:$0xff] %v9750_v52  ;;  %v5682_v50 = vor.u32 %v10993_v12, %v10992_v10  ;;  %v3720_v57 = vor.u32 %v3718_v39, %v3717_v55  ;;  %v3726_v13 = vshll.u32 %v9556_v14, 16  ;;  %v5184_v60 = vshll.u32 %v9551_v59, 16 }
 0x36f   : > { %v3740_v9 = vshrl.u32 %v9637_v0, 16  ;;  %v4567_v20 = vsel %vm1315_vm10, %v4562_v30, %v4566_v2  ;;  %v4585_v53 = vrot.slane %v4583_v21, 1  ;;  %v3721_v41 = vrot.slane %v3717_v55, 4  ;;  %v3909_v55 = vld [vmem:[#allocation3 + $0xb0] sm:$0x1] }
 0x370   : > { %v5687_v34 = vsel %vm1315_vm10, %v5682_v50, %v5686_v23  ;;  %v9802_v24 = vrot.slane %v3732_v33, 7  ;;  %v3728_v63 = vor.u32 %v3726_v13, %v3725_v28  ;;  %v3906_v59 = vsel %vm7585_vm6, %v3720_v57, %v3905_v5  ;;  %v7363_v33 = vld [vmem:[#allocation3 + $0x48] sm:$0xff]  }
 0x371   : > { %v5107_v36 = vshll.u32 %v7362_v27, 16  ;;  %v3730_v22 = vrot.slane %v3725_v28, 4  ;;  %v4581_v3 = vshrl.u32 %v7233_v15, 16  ;;  %v4590_v39 = vrot.slane %v4588_v31, 1  ;;  %v3948_v23 = vld [vmem:[#allocation3 + $0x54] sm:$0x2] }
 0x372   : > { %v5186_v46 = vrot.slane %v5184_v60, 1  ;;  %v6886_v17 = vrot.slane %v3948_v23, 9  ;;  %v9809_v2 = vrot.slane %v3740_v9, 7  ;;  %v4052_v19 = vld [vmem:[#allocation3 + $0x54] sm:$0x1]  ;;  %v3729_v12 = vsel %vm7577_vm4, %v3721_v41, %v3728_v63 }
 0x373   : > { %5788 = vrot.lane.b32.xlu1 %v5687_v34, %s7529_s25  ;;  %4748 = vrot.lane.b32.xlu2 %v4567_v20, %s7528_s24  ;;  %v4092_v6 = vld [vmem:[#allocation3 + $0x58] sm:$0x8]  ;;  %v4586_v21 = vor.u32 %v4585_v53, %v4581_v3  ;;  %3907 = vst [vmem:[#allocation3 + $0xa8] sm:$0xf] %v3906_v59  ;;  %v3743_v30 = vshll.u32 %v9637_v0, 16  ;;  %v5112_v31 = vshll.u32 %v9533_v1, 16  ;;  %v3910_v9 = vsel %vm7593_vm7, %v3730_v22, %v3909_v55 }
 0x374   : > { %v6904_v10 = vrot.slane %v4092_v6, 11  ;;  %v4053_v15 = vsel %vm7593_vm7, %v6886_v17, %v4052_v19  ;;  %v4196_v28 = vld [vmem:[#allocation3 + $0x5c] sm:$0x1]  ;;  %3908 = vst.msk [vmem:[#allocation3 + $0xac] sm:$0xf] %vm560_vm2, %v3729_v12  ;;  %v5109_v13 = vrot.slane %v5107_v36, 1  ;;  %v5187_v34 = vsel %vm1315_vm10, %v5682_v50, %v5186_v46 }
 0x375   : > { %v9790_v56 = vpop.permute.xlu1 %5520  ;;  %4764 = vrot.lane.b32.xlu0 %v4663_v51, %s7528_s24  ;;  %v9805_v14 = vpop.permute.xlu2 %5522  ;;  %v5631_v51 = vshll.u32 %v7363_v33, 16  ;;  %v4591_v62 = vsel %vm1315_vm10, %v4586_v21, %v4590_v39  ;;  %4054 = vst [vmem:[#allocation3 + $0x54] sm:$0x1] %v4053_v15  ;;  %v5636_v60 = vshll.u32 %v9679_v47, 16  ;;  %v3738_v0 = vrot.slane %v9802_v24, 4  ;;  %v11000_v53 = vld [vmem:[#allocation24_spill] sm:$0xff] }
 0x376   : > { %10994 = vst [vmem:[#allocation20_spill] sm:$0xff] %v9790_v56  ;;  %v4197_v5 = vsel %vm7627_vm8, %v6904_v10, %v4196_v28  ;;  %v3745_v20 = vor.u32 %v3743_v30, %v9809_v2  ;;  %v5612_v41 = vshll.u32 %v11000_v53, 16  ;;  %v5105_v63 = vshrl.u32 %v7362_v27, 16  ;;  %v11001_v50 = vld [vmem:[#allocation30_spill] sm:$0xff]  ;;  %v11002_v17 = vld [vmem:[#allocation17_spill] sm:$0xff]  ;;  %v11004_v53 = vld [vmem:[#allocation31_spill] sm:$0xff] }
 0x377   : > { %v9800_v26 = vpop.permute.xlu0 %5508  ;;  %10997 = vst [vmem:[#allocation7_spill] sm:$0xff] %v9805_v14  ;;  %v5633_v59 = vrot.slane %v5631_v51, 1  ;;  %v5114_v36 = vrot.slane %v5112_v31, 1  ;;  %v5629_v3 = vshrl.u32 %v7363_v33, 16  ;;  %v5638_v23 = vrot.slane %v5636_v60, 1  ;;  %v9838_v46 = vld [vmem:[#allocation3 + $0x78] sm:$0xff]  }
 0x378   : > { %10996 = vst [vmem:[#allocation6_spill] sm:$0xff] %v9800_v26  ;;  %v5110_v22 = vor.u32 %v5109_v13, %v5105_v63  ;;  %v4571_v6 = vshll.u32 %v11002_v17, 16  ;;  %v7364_v21 = vld [vmem:[#allocation3 + $0x90] sm:$0xff]   ;;  %v5614_v27 = vrot.slane %v5612_v41, 1  ;;  %v3746_v51 = vsel %vm7577_vm4, %v3738_v0, %v3745_v20 }
 0x379   : > { %4198 = vst [vmem:[#allocation3 + $0x5c] sm:$0x1] %v4197_v5  ;;  %v5203_v19 = vshll.u32 %v7364_v21, 16  ;;  %v9843_v15 = vor.u32 %v5633_v59, %v5629_v3  ;;  %v4679_v5 = vshll.u32 %v9838_v46, 16  ;;  %v4684_v41 = vshll.u32 %v11004_v53, 16 }
 0x37a   : > { %3911 = vst [vmem:[#allocation3 + $0xb0] sm:$0x1] %v3910_v9  ;;  %v3955_v55 = vld [vmem:[#allocation3 + $0xa8] sm:$0x2]  ;;  %v4073_v28 = vld [vmem:[#allocation3 + $0xa8] sm:$0x1]  ;;  %v5115_v30 = vsel %vm1315_vm10, %v5110_v22, %v5114_v36  ;;  %v5615_v20 = vsel %vm1315_vm10, %v5110_v22, %v5614_v27 }
 0x37b   : > { %5278 = vrot.lane.b32.xlu1 %v5187_v34, %s7527_s23  ;;  %5772 = vrot.lane.b32.xlu2 %v11001_v50, %s7529_s25  ;;  %v6893_v10 = vrot.slane %v3955_v55, 9  ;;  %v4099_v12 = vld [vmem:[#allocation3 + $0xac] sm:$0x8]  ;;  %v5639_v34 = vsel %vm1315_vm10, %v9843_v15, %v5638_v23  ;;  %v4573_v60 = vrot.slane %v4571_v6, 1  ;;  %v5205_v0 = vrot.slane %v5203_v19, 1  ;;  %v11005_v36 = vld [vmem:[#allocation14_spill] sm:$0xff] }
 0x37c   : > { %v6911_v33 = vrot.slane %v4099_v12, 11  ;;  %3915 = vst.msk [vmem:[#allocation3 + $0xb8] sm:$0xf] %vm560_vm2, %v3746_v51  ;;  %v4569_v50 = vshrl.u32 %v11002_v17, 16  ;;  %v4576_v3 = vshll.u32 %v11005_v36, 16  ;;  %v5201_v23 = vshrl.u32 %v7364_v21, 16 }
 0x37d   : > { %4752 = vrot.lane.b32.xlu0 %v4591_v62, %s7528_s24  ;;  %v9829_v1 = vpop.permute.xlu1 %4998  ;;  %v9836_v39 = vpop.permute.xlu2 %4878  ;;  %v11003_v62 = vld [vmem:[#allocation28_spill] sm:$0xff]  ;;  %v4074_v13 = vsel %vm7593_vm7, %v6893_v10, %v4073_v28  ;;  %v4681_v55 = vrot.slane %v4679_v5, 1  ;;  %3937 = vst.msk [vmem:[#allocation3 + $0xd0] sm:$0xf] %vm560_vm2, %v3746_v51  ;;  %v4677_v28 = vshrl.u32 %v9838_v46, 16 }
 0x37e   : > { %10999 = vst [vmem:[#allocation13_spill] sm:$0xff] %v9829_v1  ;;  %v5708_v31 = vshll.u32 %v11003_v62, 16  ;;  %v4574_v27 = vor.u32 %v4573_v60, %v4569_v50  ;;  %v9869_v10 = vld [vmem:[#allocation3 + $0x30] sm:$0xff]   ;;  %v5206_v12 = vor.u32 %v5205_v0, %v5201_v23  ;;  %v4578_v62 = vrot.slane %v4576_v3, 1  ;;  %v3916_v36 = vld [vmem:[#allocation3 + $0xbc] sm:$0x1] }
 0x37f   : > { %v9834_v47 = vpop.permute.xlu0 %5502  ;;  %4075 = vst [vmem:[#allocation3 + $0xa8] sm:$0x1] %v4074_v13  ;;  %v4335_v13 = vld [vmem:[#allocation3 + $0x50] sm:$0x1]  ;;  %v4607_v51 = vshll.u32 %v9869_v10, 16  ;;  %v11007_v23 = vld [vmem:[#allocation19_spill] sm:$0xff] }
 0x380   : > { %v5710_v6 = vrot.slane %v5708_v31, 1  ;;  %v5208_v31 = vshll.u32 %v9669_v25, 16  ;;  %v4579_v60 = vsel %vm1315_vm10, %v4574_v27, %v4578_v62  ;;  %v3912_v53 = vld [vmem:[#allocation3 + $0xb4] sm:$0xf]  ;;  %v4605_v27 = vshrl.u32 %v9869_v10, 16  ;;  %v11008_v62 = vld [vmem:[#allocation12_spill] sm:$0xff] }
 0x381   : > { %v4217_v9 = vld [vmem:[#allocation3 + $0xb0] sm:$0x1]  ;;  %v4609_v50 = vrot.slane %v4607_v51, 1 }
 0x382   : > { %v4218_v63 = vsel %vm7627_vm8, %v6911_v33, %v4217_v9  ;;  %v4686_v33 = vrot.slane %v4684_v41, 1  ;;  %v5711_v21 = vsel %vm1315_vm10, %v5206_v12, %v5710_v6  ;;  %v10914_v41 = vrot.slane %v9809_v2, 4 }
 0x383   : > { %5780 = vrot.lane.b32.xlu1 %v5639_v34, %s7529_s25  ;;  %5776 = vrot.lane.b32.xlu2 %v5615_v20, %s7529_s25  ;;  %4219 = vst [vmem:[#allocation3 + $0xb0] sm:$0x1] %v4218_v63  ;;  %v4682_v34 = vor.u32 %v4681_v55, %v4677_v28  ;;  %v5041_v20 = vunpack.c.l.b16 %v4335_v13  ;;  %v5210_v63 = vrot.slane %v5208_v31, 1  ;;  %v4667_v6 = vshll.u32 %v11007_v23, 16  ;;  %v4100_v51 = vld [vmem:[#allocation3 + $0xb8] sm:$0x8] }
 0x384   : > { %v3459_v13 = vmax.f32 %v11008_v62, 0.0 }
 0x385   : > { %5266 = vrot.lane.b32.xlu0 %v5115_v30, %s7527_s23  ;;  %v9864_v22 = vpop.permute.xlu1 %4988  ;;  %v9867_v19 = vpop.permute.xlu2 %5390  ;;  %v3735_v30 = vshll.u32 %v9561_v29, 16  ;;  %v4687_v9 = vsel %vm1315_vm10, %v4682_v34, %v4686_v33  ;;  %v11006_v29 = vld [vmem:[#allocation27_spill] sm:$0xff]  ;;  %v9897_v33 = vpack.c.b16 %v5041_v20, %v5041_v20  ;;  %v4610_v34 = vor.u32 %v4609_v50, %v4605_v27 }
 0x386   : > { %v4612_v0 = vshll.u32 %v11006_v29, 16  ;;  %v4669_v31 = vrot.slane %v4667_v6, 1  ;;  %v6912_v50 = vrot.slane %v4100_v51, 11 }
 0x387   : > { %v9860_v59 = vpop.permute.xlu0 %5518  ;;  %v9877_v5 = vor.u32 %v3735_v30, %v9802_v24  ;;  %v3917_v30 = vsel %vm7593_vm7, %v10914_v41, %v3916_v36 }
 0x388   : > { %v4614_v28 = vrot.slane %v4612_v0, 1  ;;  %3918 = vst [vmem:[#allocation3 + $0xbc] sm:$0x1] %v3917_v30  ;;  %v4665_v0 = vshrl.u32 %v11007_v23, 16 }
 0x389   : > { %v3913_v55 = vsel %vm7585_vm6, %v9877_v5, %v3912_v53  ;;  %v3491_v53 = vpack.c.bf16 %v3459_v13, %v3459_v13 }
 0x38a   : > { %3914 = vst [vmem:[#allocation3 + $0xb4] sm:$0xf] %v3913_v55  ;;  %v4670_v6 = vor.u32 %v4669_v31, %v4665_v0  ;;  %v11010_v55 = vld [vmem:[#allocation15_spill] sm:$0xff] }
 0x38b   : > { %4750 = vrot.lane.b32.xlu1 %v4579_v60, %s7528_s24  ;;  %4768 = vrot.lane.b32.xlu2 %v4687_v9, %s7528_s24  ;;  %v4615_v60 = vsel %vm1315_vm10, %v4610_v34, %v4614_v28  ;;  %v5136_v9 = vshll.u32 %v9897_v33, 16  ;;  %v4595_v27 = vshll.u32 %v11010_v55, 16 }
 0x38d   : > { %5792 = vrot.lane.b32.xlu0 %v5711_v21, %s7529_s25  ;;  %v9888_v24 = vpop.permute.xlu1 %4992  ;;  %v9890_v3 = vpop.permute.xlu2 %5902  ;;  %v5211_v21 = vsel %vm1315_vm10, %v5206_v12, %v5210_v63  ;;  %v11009_v12 = vld [vmem:[#allocation23_spill] sm:$0xff]  ;;  %v5138_v28 = vrot.slane %v5136_v9, 1  ;;  %v4597_v51 = vrot.slane %v4595_v27, 1 }
 0x38e   : > { %v4672_v20 = vshll.u32 %v11009_v12, 16  ;;  %v4593_v12 = vshrl.u32 %v11010_v55, 16 }
 0x38f   : > { %v9886_v25 = vpop.permute.xlu0 %4996  ;;  %v4220_v34 = vld [vmem:[#allocation3 + $0xbc] sm:$0x1]  ;;  %v5139_v9 = vsel %vm1315_vm10, %v9843_v15, %v5138_v28  ;;  %v3752_v15 = vshll.u32 %v3491_v53, 16 }
 0x390   : > { %v4674_v62 = vrot.slane %v4672_v20, 1  ;;  %v4221_v13 = vsel %vm7627_vm8, %v6912_v50, %v4220_v34  ;;  %v11011_v20 = vld [vmem:[#allocation26_spill] sm:$0xff]  ;;  %v4598_v27 = vor.u32 %v4597_v51, %v4593_v12 }
 0x391   : > { %4222 = vst [vmem:[#allocation3 + $0xbc] sm:$0x1] %v4221_v13  ;;  %v4600_v50 = vshll.u32 %v11011_v20, 16 }
 0x392   : > { %v4675_v31 = vsel %vm1315_vm10, %v4670_v6, %v4674_v62 }
 0x393   : > { %5774 = vrot.lane.b32.xlu1 %v9691_v61, %s7529_s25  ;;  %4756 = vrot.lane.b32.xlu2 %v4615_v60, %s7528_s24  ;;  %v3956_v61 = vld [vmem:[#allocation3 + $0xb4] sm:$0x2]  ;;  %v3749_v60 = vshrl.u32 %v3491_v53, 16  ;;  %v4602_v28 = vrot.slane %v4600_v50, 1 }
 0x394   : > { %v6894_v30 = vrot.slane %v3956_v61, 9  ;;  %v11012_v61 = vld [vmem:[#allocation16_spill] sm:$0xff] }
 0x395   : > { %5282 = vrot.lane.b32.xlu0 %v5211_v21, %s7527_s23  ;;  %v9915_v63 = vpop.permute.xlu1 %5008  ;;  %v9917_v36 = vpop.permute.xlu2 %4880  ;;  %v4076_v21 = vld [vmem:[#allocation3 + $0xb4] sm:$0x1]  ;;  %v4603_v34 = vsel %vm1315_vm10, %v4598_v27, %v4602_v28  ;;  %v4689_v13 = vshrl.u32 %v11012_v61, 16  ;;  %v11016_v27 = vld [vmem:[#allocation10_spill] sm:$0xff] }
 0x396   : > { %v4077_v41 = vsel %vm7593_vm7, %v6894_v30, %v4076_v21  ;;  %v3751_v30 = vrot.slane %v3749_v60, 7  ;;  %v11014_v60 = vld [vmem:[#allocation32_spill] sm:$0xff] }
 0x397   : > { %v9911_v29 = vpop.permute.xlu0 %4876  ;;  %4078 = vst [vmem:[#allocation3 + $0xb4] sm:$0x1] %v4077_v41  ;;  %v4696_v1 = vshll.u32 %v11014_v60, 16 }
 0x398   : > { %v3754_v21 = vor.u32 %v3752_v15, %v3751_v30 }
 0x39b   : > { %4766 = vrot.lane.b32.xlu1 %v4675_v31, %s7528_s24  ;;  %5270 = vrot.lane.b32.xlu2 %v5139_v9, %s7527_s23  ;;  %v3919_v31 = vld [vmem:[#allocation3 + $0xc0] sm:$0xf]  ;;  %v11013_v9 = vld [vmem:[#allocation9_spill] sm:$0xff] }
 0x39c   : > { %v3760_v20 = vshll.u32 %v11013_v9, 16  ;;  %v3920_v28 = vsel %vm7585_vm6, %v3754_v21, %v3919_v31  ;;  %v4624_v31 = vshll.u32 %v9711_v44, 16  ;;  %v11018_v44 = vrot.slane %v9809_v2, 4 }
 0x39d   : > { %5276 = vrot.lane.b32.xlu0 %v9702_v48, %s7527_s23  ;;  %v4691_v48 = vshll.u32 %v11012_v61, 16  ;;  %v9936_v6 = vpop.permute.xlu1 %4892  ;;  %v9938_v41 = vpop.permute.xlu2 %4894  ;;  %3921 = vst [vmem:[#allocation3 + $0xc0] sm:$0xf] %v3920_v28 }
 0x39e   : > { %v3762_v15 = vor.u32 %v3760_v20, %v11016_v27  ;;  %v9974_v20 = vld [vmem:[#allocation3 + $0x54] sm:$0xf0]  ;;  %v7286_v27 = vld [vmem:[#allocation3 + $0x48] sm:$0xe] }
 0x39f   : > { %v9931_v0 = vpop.permute.xlu0 %5388  ;;  %v4693_v62 = vrot.slane %v4691_v48, 1  ;;  %v3755_v48 = vrot.slane %v3751_v30, 4  ;;  %v3938_v30 = vld [vmem:[#allocation3 + $0xd4] sm:$0x1] }
 0x3a1   : > { %v4694_v51 = vor.u32 %v4693_v62, %v4689_v13  ;;  %v3934_v13 = vld [vmem:[#allocation3 + $0xcc] sm:$0xf] }
 0x3a3   : > { %4754 = vrot.lane.b32.xlu1 %v4603_v34, %s7528_s24  ;;  %5260 = vrot.lane.b32.xlu2 %v9725_v40, %s7527_s23  ;;  %v4698_v34 = vrot.slane %v4696_v1, 1  ;;  %v3763_v40 = vsel %vm7577_vm4, %v3755_v48, %v3762_v15  ;;  %v9972_v1 = vld [vmem:[#allocation3 + $0x54] sm:$0xff]   ;;  %v7285_v48 = vld [vmem:[#allocation3 + $0x48] sm:$0xf0]  ;;  %vm11040_vm4 = vcmask 195584  }
 0x3a4   : > { %3922 = vst.msk [vmem:[#allocation3 + $0xc4] sm:$0xf] %vm560_vm2, %v3763_v40  ;;  %v3957_v15 = vld [vmem:[#allocation3 + $0xc0] sm:$0x2]  ;;  %v7287_v14 = vor.u32 %v7286_v27, %v7285_v48  ;;  %v5356_v27 = vrot.slane %v9897_v33, 1  ;;  %v5643_v33 = vshll.u32 %v9972_v1, 16  ;;  %vm11046_vm1 = vmmov %vm11040_vm4 }
 0x3a5   : > { %5778 = vrot.lane.b32.xlu0 %v9718_v43, %s7529_s25  ;;  %v9951_v12 = vpop.permute.xlu1 %5404  ;;  %v11015_v43 = vld [vmem:[#allocation22_spill] sm:$0xff]  ;;  %v9957_v9 = vpop.permute.xlu2 %5406  ;;  %v4699_v60 = vsel %vm1315_vm10, %v4694_v51, %v4698_v34  ;;  %v3935_v51 = vsel %vm7585_vm6, %v9877_v5, %v3934_v13  ;;  %v4276_v34 = vld [vmem:[#allocation3 + $0x98] sm:$0x1]  ;;  %v6895_v40 = vrot.slane %v3957_v15, 9  ;;  %vm11031_vm2 = vcmask 1041408  }
 0x3a6   : > { %v4619_v50 = vshll.u32 %v11015_v43, 16  ;;  %v4617_v21 = vshrl.u32 %v11015_v43, 16  ;;  %3936 = vst [vmem:[#allocation3 + $0xcc] sm:$0xf] %v3935_v51  ;;  %v11020_v43 = vld [vmem:[#allocation11_spill] sm:$0xff]  ;;  %v4536_v15 = vunpack.c.l.b16 %v4276_v34  ;;  %v5645_v35 = vrot.slane %v5643_v33, 1 }
 0x3a7   : > { %v9949_v53 = vpop.permute.xlu0 %5900  ;;  %v5191_v54 = vshll.u32 %v11020_v43, 16  ;;  %v4079_v5 = vld [vmem:[#allocation3 + $0xc0] sm:$0x1]  ;;  %v4223_v51 = vld [vmem:[#allocation3 + $0xc8] sm:$0x1]  ;;  %vm11042_vm6 = vcmask 261120  }
 0x3a8   : > { %v4621_v62 = vrot.slane %v4619_v50, 1  ;;  %v7473_v34 = vld [vmem:[#allocation3 + $0x54] sm:$0xe] }
 0x3ab   : > { %5268 = vrot.lane.b32.xlu1 %v9753_v11, %s7527_s23  ;;  %5264 = vrot.lane.b32.xlu2 %v9747_v18, %s7527_s23  ;;  %v4622_v11 = vor.u32 %v4621_v62, %v4617_v21  ;;  %v3939_v18 = vsel %vm7593_vm7, %v11018_v44, %v3938_v30  ;;  %v4080_v62 = vsel %vm7593_vm7, %v6895_v40, %v4079_v5  ;;  %v4101_v13 = vld [vmem:[#allocation3 + $0xc4] sm:$0x8]  ;;  %v4102_v21 = vld [vmem:[#allocation3 + $0xd0] sm:$0x8]  ;;  %v4401_v44 = vld [vmem:[#allocation3 + $0x5c] sm:$0x1] }
 0x3ac   : > { %3940 = vst [vmem:[#allocation3 + $0xd4] sm:$0x1] %v3939_v18  ;;  %v6913_v30 = vrot.slane %v4101_v13, 11  ;;  %v9994_v18 = vld [vmem:[#allocation3 + $0x9c] sm:$0xff]   ;;  %v5196_v5 = vshll.u32 %v9664_v58, 16  ;;  %v7238_v13 = vld [vmem:[#allocation3 + $0x90] sm:$0xff]  }
 0x3ad   : > { %4770 = vrot.lane.b32.xlu0 %v4699_v60, %s7528_s24  ;;  %v9979_v50 = vpop.permute.xlu1 %5918  ;;  %v9985_v28 = vpop.permute.xlu2 %5920  ;;  %v4626_v60 = vrot.slane %v4624_v31, 1  ;;  %4081 = vst [vmem:[#allocation3 + $0xc0] sm:$0x1] %v4080_v62  ;;  %v5193_v31 = vrot.slane %v5191_v54, 1  ;;  %v5189_v54 = vshrl.u32 %v11020_v43, 16  ;;  %v5553_v62 = vunpack.c.l.b16 %v4401_v44 }
 0x3ae   : > { %11017 = vst [vmem:[#allocation18_spill] sm:$0xff] %v9979_v50  ;;  %v4224_v40 = vsel %vm7627_vm8, %v6913_v30, %v4223_v51  ;;  %v10011_v30 = vpack.c.b16 %v4536_v15, %v4536_v15  ;;  %v4703_v61 = vshll.u32 %v7238_v13, 16  ;;  %v5198_v44 = vrot.slane %v5196_v5, 1 }
 0x3af   : > { %v9970_v32 = vpop.permute.xlu0 %5916  ;;  %11019 = vst [vmem:[#allocation21_spill] sm:$0xff] %v9985_v28  ;;  %v4627_v2 = vsel %vm1315_vm10, %v4622_v11, %v4626_v60  ;;  %v6914_v11 = vrot.slane %v4102_v21, 11  ;;  %v5194_v28 = vor.u32 %v5193_v31, %v5189_v54  ;;  %v5569_v52 = vpack.c.b16 %v5553_v62, %v5553_v62 }
 0x3b0   : > { %4225 = vst [vmem:[#allocation3 + $0xc8] sm:$0x1] %v4224_v40  ;;  %v4082_v40 = vld [vmem:[#allocation3 + $0xcc] sm:$0x1]  ;;  %v7474_v15 = vor.u32 %v7473_v34, %v9974_v20  ;;  %v4708_v31 = vshll.u32 %v10011_v30, 16  ;;  %v5641_v5 = vshrl.u32 %v9972_v1, 16 }
 0x3b1   : > { %v5199_v57 = vsel %vm1315_vm10, %v5194_v28, %v5198_v44  ;;  %v5868_v34 = vrot.slane %v5569_v52, 1  ;;  %v5648_v62 = vshll.u32 %v5569_v52, 16  ;;  %v4701_v28 = vshrl.u32 %v7238_v13, 16 }
 0x3b2   : > { %v5867_v20 = vrot.slane %v7474_v15, 1  ;;  %v5646_v33 = vor.u32 %v5645_v35, %v5641_v5  ;;  %v5213_v35 = vshrl.u32 %v9994_v18, 16 }
 0x3b3   : > { %5794 = vrot.lane.b32.xlu1 %v9775_v42, %s7529_s25  ;;  %5790 = vrot.lane.b32.xlu2 %v9763_v7, %s7529_s25  ;;  %v5355_v42 = vrot.slane %v7287_v14, 1  ;;  %v4226_v51 = vld [vmem:[#allocation3 + $0xd4] sm:$0x1]  ;;  %v5650_v44 = vrot.slane %v5648_v62, 1 }
 0x3b4   : > { %v4227_v14 = vsel %vm7627_vm8, %v6914_v11, %v4226_v51  ;;  %v4710_v51 = vrot.slane %v4708_v31, 1  ;;  %vm11044_vm8 = vmmov %vm11040_vm4 }
 0x3b5   : > { %4758 = vrot.lane.b32.xlu0 %v4627_v2, %s7528_s24  ;;  %v10005_v60 = vpop.permute.xlu1 %5394  ;;  %v3958_v2 = vld [vmem:[#allocation3 + $0xcc] sm:$0x2]  ;;  %v10009_v21 = vpop.permute.xlu2 %5396  ;;  %4228 = vst [vmem:[#allocation3 + $0xd4] sm:$0x1] %v4227_v14  ;;  %v5357_v43 = vsel %vm1588_vm9, %v5355_v42, %v5356_v27  ;;  %v4705_v27 = vrot.slane %v4703_v61, 1  ;;  %v5869_v61 = vsel %vm1588_vm9, %v5867_v20, %v5868_v34  ;;  %v5651_v13 = vsel %vm1315_vm10, %v5646_v33, %v5650_v44 }
 0x3b6   : > { %11021 = vst [vmem:[#allocation8_spill] sm:$0xff] %v10005_v60  ;;  %v6896_v7 = vrot.slane %v3958_v2, 9  ;;  %v4342_v2 = vld [vmem:[#allocation3 + $0xa4] sm:$0x1]  ;;  %v4270_v14 = vld [vmem:[#allocation3 + $0x50] sm:$0x1] }
 0x3b7   : > { %v10002_v48 = vpop.permute.xlu0 %5392  ;;  %11022 = vst [vmem:[#allocation24_spill] sm:$0xff] %v10009_v21  ;;  %v5048_v42 = vunpack.c.l.b16 %v4342_v2  ;;  %v7273_v2 = vld [vmem:[#allocation3 + $0x90] sm:$0xf0]  ;;  %v10045_v34 = vld [vmem:[#allocation3 + $0x48] sm:$0xff]  }
 0x3b8   : > { %v4083_v58 = vsel %vm7593_vm7, %v6896_v7, %v4082_v40  ;;  %v5215_v40 = vshll.u32 %v9994_v18, 16  ;;  %11027 = vst [vmem:[#allocation14_spill] sm:$0xff] %v10045_v34  ;;  %vm11043_vm7 = vcmask 293888  }
 0x3b9   : > { %4084 = vst [vmem:[#allocation3 + $0xcc] sm:$0x1] %v4083_v58  ;;  %v4706_v58 = vor.u32 %v4705_v27, %v4701_v28  ;;  %v7476_v28 = vld [vmem:[#allocation3 + $0x9c] sm:$0xe] }
 0x3ba   : > { %v5217_v52 = vrot.slane %v5215_v40, 1  ;;  %v4865_v40 = vrot.slane %v10011_v30, 1  ;;  %v7477_v30 = vor.u32 %v7476_v28, %v9996_v8 }
 0x3bb   : > { %5510 = vrot.lane.b32.xlu1 %v9972_v1, %s7523_s19  ;;  %5280 = vrot.lane.b32.xlu2 %v5199_v57, %s7527_s23  ;;  %v4711_v15 = vsel %vm1315_vm10, %v4706_v58, %v4710_v51  ;;  %v7274_v1 = vld [vmem:[#allocation3 + $0x90] sm:$0xe]  ;;  %v4530_v57 = vunpack.c.l.b16 %v4270_v14  ;;  %v4631_v14 = vshll.u32 %v10045_v34, 16  ;;  %v4408_v58 = vld [vmem:[#allocation3 + $0xb0] sm:$0x1] }
 0x3bc   : > { %v7275_v20 = vor.u32 %v7274_v1, %v7273_v2  ;;  %v5218_v62 = vor.u32 %v5217_v52, %v5213_v35  ;;  %v10054_v2 = vld [vmem:[#allocation3 + $0x54] sm:$0xff]  }
 0x3bd   : > { %5398 = vrot.lane.b32.xlu0 %v5357_v43, %s7525_s21  ;;  %v10028_v54 = vpop.permute.xlu1 %5906  ;;  %v10031_v7 = vpop.permute.xlu2 %5908  ;;  %v5064_v43 = vpack.c.b16 %v5048_v42, %v5048_v42  ;;  %v4546_v51 = vpack.c.b16 %v4530_v57, %v4530_v57  ;;  %v10056_v1 = vld [vmem:[#allocation3 + $0x54] sm:$0xf0]  ;;  %v5560_v57 = vunpack.c.l.b16 %v4408_v58  ;;  %v4633_v35 = vrot.slane %v4631_v14, 1  ;;  %v4336_v58 = vld [vmem:[#allocation3 + $0x5c] sm:$0x1] }
 0x3be   : > { %11024 = vst [vmem:[#allocation17_spill] sm:$0xff] %v10028_v54  ;;  %v7322_v14 = vld [vmem:[#allocation3 + $0xa8] sm:$0xe] }
 0x3bf   : > { %v10026_v11 = vpop.permute.xlu0 %5904  ;;  %11025 = vst [vmem:[#allocation28_spill] sm:$0xff] %v10031_v7  ;;  %v5220_v27 = vshll.u32 %v5064_v43, 16  ;;  %v5576_v8 = vpack.c.b16 %v5560_v57, %v5560_v57  ;;  %v7321_v7 = vld [vmem:[#allocation3 + $0xa8] sm:$0xf0]  ;;  %v4847_v60 = vrot.slane %v4546_v51, 1 }
 0x3c0   : > { %11023 = vst [vmem:[#allocation30_spill] sm:$0xff] %v10026_v11  ;;  %v7323_v57 = vor.u32 %v7322_v14, %v7321_v7  ;;  %v5143_v11 = vshll.u32 %v10054_v2, 16 }
 0x3c1   : > { %v5222_v33 = vrot.slane %v5220_v27, 1 }
 0x3c3   : > { %4772 = vrot.lane.b32.xlu1 %v4711_v15, %s7528_s24  ;;  %5782 = vrot.lane.b32.xlu2 %v5651_v13, %s7529_s25  ;;  %v5223_v44 = vsel %vm1315_vm10, %v5218_v62, %v5222_v33  ;;  %v4636_v15 = vshll.u32 %v4546_v51, 16  ;;  %v4629_v62 = vshrl.u32 %v10045_v34, 16 }
 0x3c5   : > { %5910 = vrot.lane.b32.xlu0 %v5869_v61, %s7526_s22  ;;  %v10043_v42 = vpop.permute.xlu1 %4884  ;;  %v10047_v5 = vpop.permute.xlu2 %4886  ;;  %v4864_v61 = vrot.slane %v7275_v20, 1  ;;  %v10068_v20 = vld [vmem:[#allocation3 + $0xa8] sm:$0xff]   ;;  %v4638_v33 = vrot.slane %v4636_v15, 1  ;;  %v4634_v28 = vor.u32 %v4633_v35, %v4629_v62  ;;  %v5042_v15 = vunpack.c.l.b16 %v4336_v58 }
 0x3c6   : > { %11028 = vst [vmem:[#allocation27_spill] sm:$0xff] %v10047_v5  ;;  %v7265_v5 = vld [vmem:[#allocation3 + $0x48] sm:$0xe]  ;;  %v4402_v35 = vld [vmem:[#allocation3 + $0x68] sm:$0x1]  ;;  %v5888_v58 = vrot.slane %v7323_v57, 1 }
 0x3c7   : > { %v10040_v31 = vpop.permute.xlu0 %4882  ;;  %v4866_v52 = vsel %vm1588_vm9, %v4864_v61, %v4865_v40  ;;  %v5376_v40 = vrot.slane %v7477_v30, 1  ;;  %v5377_v61 = vrot.slane %v5064_v43, 1  ;;  %v4639_v54 = vsel %vm1315_vm10, %v4634_v28, %v4638_v33  ;;  %v7479_v33 = vld [vmem:[#allocation3 + $0x54] sm:$0xe] }
 0x3c8   : > { %11026 = vst [vmem:[#allocation31_spill] sm:$0xff] %v10040_v31  ;;  %v5732_v43 = vshll.u32 %v5576_v8, 16  ;;  %v5058_v7 = vpack.c.b16 %v5042_v15, %v5042_v15 }
 0x3c9   : > { %v5378_v34 = vsel %vm1588_vm9, %v5376_v40, %v5377_v61  ;;  %v5889_v61 = vrot.slane %v5576_v8, 1  ;;  %v7480_v8 = vor.u32 %v7479_v33, %v10056_v1  ;;  %v6946_v1 = vld [vmem:[%s10873_s2 + $0x8] sm:$0xff] }
 0x3ca   : > { %v5148_v15 = vshll.u32 %v5058_v7, 16 }
 0x3cb   : > { %5284 = vrot.lane.b32.xlu1 %v5223_v44, %s7527_s23  ;;  %4900 = vrot.lane.b32.xlu2 %v4866_v52, %s7524_s20  ;;  %v7264_v44 = vld [vmem:[#allocation3 + $0x48] sm:$0xf0]  ;;  %v5727_v52 = vshll.u32 %v10068_v20, 16 }
 0x3cd   : > { %5012 = vrot.lane.b32.xlu0 %v9994_v18, %s7522_s18  ;;  %v10064_v18 = vpop.permute.xlu1 %4898  ;;  %v10066_v27 = vpop.permute.xlu2 %4748  ;;  %v5729_v62 = vrot.slane %v5727_v52, 1  ;;  %v5554_v52 = vunpack.c.l.b16 %v4402_v35  ;;  %v7481_v35 = vld [vmem:[#allocation3 + $0x9c] sm:$0xf0] }
 0x3ce   : > { %11029 = vst [vmem:[#allocation19_spill] sm:$0xff] %v10064_v18  ;;  %v7266_v18 = vor.u32 %v7265_v5, %v7264_v44  ;;  %v5734_v44 = vrot.slane %v5732_v43, 1  ;;  %v5141_v43 = vshrl.u32 %v10054_v2, 16 }
 0x3cf   : > { %v10062_v13 = vpop.permute.xlu0 %4896 }
 0x3d0   : > { %v4846_v40 = vrot.slane %v7266_v18, 1  ;;  %v5890_v18 = vsel %vm1588_vm9, %v5888_v58, %v5889_v61 }
 0x3d2   : > { %v4848_v51 = vsel %vm1588_vm9, %v4846_v40, %v4847_v60  ;;  %v5570_v40 = vpack.c.b16 %v5554_v52, %v5554_v52 }
 0x3d3   : > { %4760 = vrot.lane.b32.xlu1 %v4639_v54, %s7528_s24  ;;  %5412 = vrot.lane.b32.xlu2 %v5378_v34, %s7525_s21  ;;  %v6192_v54 = vld [vmem:[%s10873_s2 + $0x10] sm:$0x3]  ;;  %v5725_v34 = vshrl.u32 %v10068_v20, 16 }
 0x3d4   : > { %v6202_v28 = vunpack.c.l.b16 %v6192_v54  ;;  %v5359_v54 = vrot.slane %v5058_v7, 1  ;;  %v5660_v58 = vshll.u32 %v5570_v40, 16 }
 0x3d5   : > { %5524 = vrot.lane.b32.xlu0 %v10068_v20, %s7523_s19  ;;  %v10080_v56 = vpop.permute.xlu1 %5410  ;;  %v10083_v5 = vpop.permute.xlu2 %5772  ;;  %v10089_v14 = vor.u32 %v5729_v62, %v5725_v34  ;;  %v7312_v34 = vld [vmem:[#allocation3 + $0x60] sm:$0xf0] }
 0x3d6   : > { %11030 = vst [vmem:[#allocation12_spill] sm:$0xff] %v10080_v56  ;;  %v5145_v56 = vrot.slane %v5143_v11, 1  ;;  %v6205_v50 = vpack.c.b16 %v6202_v28, %v6202_v28  ;;  %v10103_v11 = vld [vmem:[#allocation3 + $0x9c] sm:$0xff]  }
 0x3d7   : > { %v10078_v30 = vpop.permute.xlu0 %5408  ;;  %v5735_v31 = vsel %vm1315_vm10, %v10089_v14, %v5734_v44  ;;  %11033 = vst [vmem:[#allocation26_spill] sm:$0xff] %v10103_v11  ;;  %v6945_v44 = vld [vmem:[%s10873_s2] sm:$0xff] }
 0x3d8   : > { %v6241_v57 = vsel %vm11031_vm2, %v6205_v50, 0  ;;  %v5146_v33 = vor.u32 %v5145_v56, %v5141_v43  ;;  %v5358_v50 = vrot.slane %v7480_v8, 1  ;;  %v7482_v8 = vld [vmem:[#allocation3 + $0x9c] sm:$0xe]  ;;  %vm11049_vm2 = vmmov %vm11042_vm6 }
 0x3d9   : > { %6248 = vmatpush.bf16.msra.mxu1 %v6241_v57  ;;  %7330 = vmatpush.bf16.msra.mxu3 %v6241_v57  ;;  %v5662_v57 = vrot.slane %v5660_v58, 1  ;;  %v10136_v58 = vld [vmem:[#allocation3 + $0xb4] sm:$0xff]  }
 0x3da   : > { %v5360_v56 = vsel %vm1588_vm9, %v5358_v50, %v5359_v54  ;;  %v4715_v54 = vshll.u32 %v10103_v11, 16 }
 0x3db   : > { %5924 = vrot.lane.b32.xlu1 %v5890_v18, %s7526_s22  ;;  %5796 = vrot.lane.b32.xlu2 %v5735_v31, %s7529_s25  ;;  %v5150_v31 = vrot.slane %v5148_v15, 1  ;;  %v4277_v18 = vld [vmem:[#allocation3 + $0xa4] sm:$0x1] }
 0x3dc   : > { %v4537_v43 = vunpack.c.l.b16 %v4277_v18  ;;  %v7483_v18 = vor.u32 %v7482_v8, %v7481_v35  ;;  %v4713_v35 = vshrl.u32 %v10103_v11, 16  ;;  %v10148_v8 = vld [vmem:[#allocation3 + $0x54] sm:$0xff]   ;;  %v4409_v11 = vld [vmem:[#allocation3 + $0xbc] sm:$0x1] }
 0x3dd   : > { %4888 = vrot.lane.b32.xlu0 %v4848_v51, %s7524_s20  ;;  %v10108_v62 = vpop.permute.xlu1 %5262  ;;  %v10110_v61 = vpop.permute.xlu2 %5776  ;;  %6249 = vmatpush.bf16.msra.mxu1 %v6946_v1  ;;  %v5151_v28 = vsel %vm1315_vm10, %v5146_v33, %v5150_v31  ;;  %v7313_v51 = vld [vmem:[#allocation3 + $0x60] sm:$0xe]  ;;  %v5871_v33 = vrot.slane %v5570_v40, 1  ;;  %v4343_v31 = vld [vmem:[#allocation3 + $0xb0] sm:$0x1]  ;;  %11035 = vst [vmem:[#allocation32_spill] sm:$0xff] %v10148_v8 }
 0x3de   : > { %11034 = vst [vmem:[#allocation9_spill] sm:$0xff] %v10110_v61  ;;  %7331 = vmatpush.bf16.msra.mxu3 %v6946_v1  ;;  %v7314_v52 = vor.u32 %v7313_v51, %v7312_v34  ;;  %v5663_v51 = vsel %vm1315_vm10, %v9781_v49, %v5662_v57 }
 0x3df   : > { %v10101_v60 = vpop.permute.xlu0 %5922 }
 0x3e0   : > { %11032 = vst [vmem:[#allocation23_spill] sm:$0xff] %v10101_v60  ;;  %v5870_v34 = vrot.slane %v7314_v52, 1  ;;  %v7298_v60 = vld [vmem:[#allocation3 + $0xa8] sm:$0xe] }
 0x3e1   : > { %6250 = vmatpush.bf16.msra.mxu1 %v6945_v44 }
 0x3e2   : > { %7332 = vmatpush.bf16.msra.mxu3 %v6945_v44  ;;  %v5872_v40 = vsel %vm1588_vm9, %v5870_v34, %v5871_v33  ;;  %v5049_v44 = vunpack.c.l.b16 %v4343_v31 }
 0x3e3   : > { %5400 = vrot.lane.b32.xlu1 %v5360_v56, %s7525_s21  ;;  %5000 = vrot.lane.b32.xlu2 %v10054_v2, %s7522_s18  ;;  %v4717_v56 = vrot.slane %v4715_v54, 1 }
 0x3e4   : > { %v5065_v31 = vpack.c.b16 %v5049_v44, %v5049_v44 }
 0x3e5   : > { %5272 = vrot.lane.b32.xlu0 %v5151_v28, %s7527_s23  ;;  %v10123_v15 = vpop.permute.xlu1 %5788  ;;  %v4769_v1 = vpop.permute.xlu2 %4768  ;;  %v4553_v28 = vpack.c.b16 %v4537_v43, %v4537_v43  ;;  %v7484_v43 = vld [vmem:[#allocation3 + $0x54] sm:$0xf0]  ;;  %v4718_v34 = vor.u32 %v4717_v56, %v4713_v35  ;;  %v5561_v56 = vunpack.c.l.b16 %v4409_v11  ;;  %v7485_v35 = vld [vmem:[#allocation3 + $0x54] sm:$0xe]  ;;  %v7366_v11 = vld [vmem:[#allocation3] sm:$0xff]  }
 0x3e6   : > { %v5953_v50 = vsel %vm2693_vm12, %v9838_v46, %v4769_v1  ;;  %v10138_v46 = vld [vmem:[#allocation3 + $0xb4] sm:$0xf0]  ;;  %v4867_v1 = vrot.slane %v7483_v18, 1  ;;  %v5232_v18 = vshll.u32 %v5065_v31, 16 }
 0x3e7   : > { %v10121_v7 = vpop.permute.xlu0 %4764  ;;  %v10130_v2 = vsel %vm2726_vm13, %v5953_v50, %v10062_v13  ;;  %v10141_v13 = vld [vmem:[#allocation3 + $0x60] sm:$0xff]   ;;  %v4868_v49 = vrot.slane %v4553_v28, 1  ;;  %v4720_v33 = vshll.u32 %v4553_v28, 16  ;;  %v4271_v28 = vld [vmem:[#allocation3 + $0x5c] sm:$0x1] }
 0x3e9   : > { %v4869_v26 = vsel %vm1588_vm9, %v4867_v1, %v4868_v49  ;;  %v4722_v61 = vrot.slane %v4720_v33, 1  ;;  %v5380_v49 = vrot.slane %v5065_v31, 1  ;;  %v5739_v1 = vshll.u32 %v10136_v58, 16 }
 0x3eb   : > { %5912 = vrot.lane.b32.xlu1 %v5872_v40, %s7526_s22  ;;  %5512 = vrot.lane.b32.xlu2 %v10141_v13, %s7523_s19  ;;  %v7297_v40 = vld [vmem:[#allocation3 + $0xa8] sm:$0xf0]  ;;  %v4723_v44 = vsel %vm1315_vm10, %v4718_v34, %v4722_v61  ;;  %v10171_v34 = vpack.c.b16 %v5561_v56, %v5561_v56  ;;  %v5737_v56 = vshrl.u32 %v10136_v58, 16 }
 0x3ed   : > { %5784 = vrot.lane.b32.xlu0 %v5663_v51, %s7529_s25  ;;  %v10150_v57 = vpop.permute.xlu1 %5278  ;;  %v4757_v50 = vpop.permute.xlu2 %4756 }
 0x3ee   : > { %v5941_v54 = vsel %vm2693_vm12, %v9869_v10, %v4757_v50  ;;  %v7299_v10 = vor.u32 %v7298_v60, %v7297_v40  ;;  %v4337_v60 = vld [vmem:[#allocation3 + $0x68] sm:$0x1]  ;;  %v5933_v40 = vsel %vm2693_vm12, %v7366_v11, %v10066_v27  ;;  %v5744_v27 = vshll.u32 %v10171_v34, 16 }
 0x3ef   : > { %v10145_v52 = vpop.permute.xlu0 %4752  ;;  %v10156_v51 = vsel %vm2726_vm13, %v5941_v54, %v10043_v42  ;;  %v5234_v54 = vrot.slane %v5232_v18, 1 }
 0x3f0   : > { %v5379_v61 = vrot.slane %v7299_v10, 1  ;;  %v5965_v10 = vsel %vm2726_vm13, %v5933_v40, %v9911_v29  ;;  %v7243_v40 = vld [vmem:[#allocation3 + $0x60] sm:$0xff]  }
 0x3f1   : > { %v5235_v18 = vsel %vm1315_vm10, %v10089_v14, %v5234_v54 }
 0x3f3   : > { %5014 = vrot.lane.b32.xlu1 %v10068_v20, %s7522_s18  ;;  %4774 = vrot.lane.b32.xlu2 %v4723_v44, %s7528_s24  ;;  %v4643_v20 = vshll.u32 %v10148_v8, 16  ;;  %v5381_v44 = vsel %vm1588_vm9, %v5379_v61, %v5380_v49 }
 0x3f5   : > { %4902 = vrot.lane.b32.xlu0 %v4869_v26, %s7524_s20  ;;  %v10166_v50 = vpop.permute.xlu1 %5780  ;;  %v4531_v26 = vunpack.c.l.b16 %v4271_v28  ;;  %v10169_v33 = vpop.permute.xlu2 %5270  ;;  %v5043_v28 = vunpack.c.l.b16 %v4337_v60  ;;  %v4645_v49 = vrot.slane %v4643_v20, 1  ;;  %v5997_v20 = vsel %vm2759_vm14, %v5965_v10, %v9864_v22 }
 0x3f6   : > { %11037 = vst [vmem:[#allocation11_spill] sm:$0xff] %v10166_v50  ;;  %v7486_v50 = vor.u32 %v7485_v35, %v7484_v43  ;;  %v10188_v43 = vld [vmem:[#allocation3 + $0x6c] sm:$0xf0] }
 0x3f7   : > { %v10164_v42 = vpop.permute.xlu0 %5266  ;;  %11038 = vst [vmem:[#allocation35_spill] sm:$0xff] %v10169_v33  ;;  %v4547_v31 = vpack.c.b16 %v4531_v26, %v4531_v26  ;;  %v4641_v26 = vshrl.u32 %v10148_v8, 16  ;;  %v10196_v33 = vpack.c.b16 %v5043_v28, %v5043_v28 }
 0x3f8   : > { %11036 = vst [vmem:[#allocation10_spill] sm:$0xff] %v10164_v42  ;;  %v5741_v42 = vrot.slane %v5739_v1, 1  ;;  %v10186_v1 = vld [vmem:[#allocation3 + $0x6c] sm:$0xff]   ;;  %v4849_v60 = vrot.slane %v7486_v50, 1  ;;  %v5155_v50 = vshll.u32 %v7243_v40, 16 }
 0x3f9   : > { %v4648_v61 = vshll.u32 %v4547_v31, 16  ;;  %v4850_v11 = vrot.slane %v4547_v31, 1  ;;  %v4646_v55 = vor.u32 %v4645_v49, %v4641_v26  ;;  %v5153_v26 = vshrl.u32 %v7243_v40, 16 }
 0x3fa   : > { %v5742_v29 = vor.u32 %v5741_v42, %v5737_v56 }
 0x3fb   : > { %5526 = vrot.lane.b32.xlu1 %v10136_v58, %s7523_s19  ;;  %5286 = vrot.lane.b32.xlu2 %v5235_v18, %s7527_s23  ;;  %v7488_v58 = vld [vmem:[#allocation3 + $0xb4] sm:$0xe]  ;;  %v5746_v18 = vrot.slane %v5744_v27, 1  ;;  %v4650_v56 = vrot.slane %v4648_v61, 1  ;;  %v4851_v28 = vsel %vm1588_vm9, %v4849_v60, %v4850_v11  ;;  %v5160_v27 = vshll.u32 %v10196_v33, 16 }
 0x3fc   : > { %v5892_v60 = vrot.slane %v10171_v34, 1  ;;  %v7289_v34 = vld [vmem:[#allocation3 + $0x60] sm:$0xe] }
 0x3fd   : > { %5414 = vrot.lane.b32.xlu0 %v5381_v44, %s7525_s21  ;;  %v4751_v54 = vpop.permute.xlu1 %4750  ;;  %v5261_v44 = vpop.permute.xlu2 %5260  ;;  %v5747_v31 = vsel %vm1315_vm10, %v5742_v29, %v5746_v18  ;;  %v4278_v29 = vld [vmem:[#allocation3 + $0xb0] sm:$0x1] }
 0x3fe   : > { %v6029_v21 = vsel %vm2792_vm15, %v5997_v20, %v5261_v44  ;;  %v5935_v42 = vsel %vm2693_vm12, %v11002_v17, %v4751_v54  ;;  %v5162_v54 = vrot.slane %v5160_v27, 1  ;;  %v10239_v44 = vld [vmem:[#allocation3 + $0xb4] sm:$0xf0] }
 0x3ff   : > { %v10191_v35 = vpop.permute.xlu0 %5792  ;;  %v6061_v8 = vsel %vm2825_vm0, %v6029_v21, %v9931_v0  ;;  %v5967_v17 = vsel %vm2726_vm13, %v5935_v42, %v9836_v39  ;;  %v4651_v21 = vsel %vm1315_vm10, %v4646_v55, %v4650_v56  ;;  %v5949_v39 = vsel %vm2693_vm12, %v10141_v13, %v10121_v7  ;;  %v7288_v42 = vld [vmem:[#allocation3 + $0x60] sm:$0xf0] }
 0x400   : > { %11039 = vst [vmem:[#allocation36_spill] sm:$0xff] %v10191_v35  ;;  %v4403_v35 = vld [vmem:[#allocation3 + $0x74] sm:$0x1]  ;;  %v6093_v22 = vsel %vm11040_vm4, %v6061_v8, %v9687_v45  ;;  %v7489_v45 = vor.u32 %v7488_v58, %v10138_v46  ;;  %v5157_v8 = vrot.slane %v5155_v50, 1  ;;  %v5999_v55 = vsel %vm2759_vm14, %v5967_v17, %v9694_v4  ;;  %vm11050_vm4 = vmmov %vm11043_vm7 }
 0x401   : > { %v6125_v10 = vsel %vm11041_vm5, %v6093_v22, %v10083_v5  ;;  %v5555_v0 = vunpack.c.l.b16 %v4403_v35  ;;  %v5667_v46 = vshll.u32 %v10186_v1, 16  ;;  %v5981_v20 = vsel %vm2726_vm13, %v5949_v39, %v9936_v6  ;;  %v10237_v4 = vld [vmem:[#allocation3 + $0xb4] sm:$0xff]   ;;  %vm11051_vm5 = vmmov %vm11049_vm2 }
 0x402   : > { %v6157_v49 = vsel %vm11042_vm6, %v6125_v10, %v9949_v53  ;;  %v5891_v61 = vrot.slane %v7489_v45, 1  ;;  %v5158_v58 = vor.u32 %v5157_v8, %v5153_v26  ;;  %v6031_v7 = vsel %vm2792_vm15, %v5999_v55, %v10108_v62  ;;  %v7491_v8 = vld [vmem:[#allocation3 + $0x6c] sm:$0xe]  ;;  %v11045_v55 = vld [vmem:[#allocation25_spill] sm:$0xff]  ;;  %vm11052_vm6 = vmmov %vm11050_vm4 }
 0x403   : > { %4890 = vrot.lane.b32.xlu1 %v4851_v28, %s7524_s20  ;;  %4762 = vrot.lane.b32.xlu2 %v4651_v21, %s7528_s24  ;;  %v10231_v11 = vpack.c.b16 %v5555_v0, %v5555_v0  ;;  %v4538_v13 = vunpack.c.l.b16 %v4278_v29  ;;  %v5669_v50 = vrot.slane %v5667_v46, 1  ;;  %v5665_v6 = vshrl.u32 %v10186_v1, 16  ;;  %v7276_v26 = vld [vmem:[#allocation3 + $0xa8] sm:$0xf0]  ;;  %v7277_v46 = vld [vmem:[#allocation3 + $0xa8] sm:$0xe] }
 0x404   : > { %6923 = vmatmul.msk.bf16.vlgmr.msra.gmra.mxu1 %vm11043_vm7, %v6157_v49  ;;  %v5163_v18 = vsel %vm1315_vm10, %v5158_v58, %v5162_v54  ;;  %v6063_v56 = vsel %vm2825_vm0, %v6031_v7, %v9867_v19  ;;  %v7290_v27 = vor.u32 %v7289_v34, %v7288_v42  ;;  %v5362_v19 = vrot.slane %v10196_v33, 1  ;;  %v4344_v29 = vld [vmem:[#allocation3 + $0xbc] sm:$0x1]  ;;  %vm11053_vm7 = vmmov %vm11046_vm1 }
 0x405   : > { %5798 = vrot.lane.b32.xlu0 %v5747_v31, %s7529_s25  ;;  %v5775_v35 = vpop.permute.xlu1 %5774  ;;  %v10227_v53 = vpop.permute.xlu2 %5264  ;;  %v5893_v31 = vsel %vm1588_vm9, %v5891_v61, %v5892_v60  ;;  %v5672_v62 = vshll.u32 %v10231_v11, 16  ;;  %v4554_v0 = vpack.c.b16 %v4538_v13, %v4538_v13  ;;  %v5670_v45 = vor.u32 %v5669_v50, %v5665_v6  ;;  %v7367_v61 = vld [vmem:[#allocation3 + $0x18] sm:$0xff]   ;;  %v7494_v13 = vld [vmem:[#allocation3 + $0xb4] sm:$0xe] }
 0x406   : > { %v5361_v58 = vrot.slane %v7290_v27, 1  ;;  %v7278_v7 = vor.u32 %v7277_v46, %v7276_v26  ;;  %v5239_v42 = vshll.u32 %v10237_v4, 16  ;;  %v7495_v27 = vor.u32 %v7494_v13, %v10239_v44  ;;  %v10327_v26 = vld [vmem:[#allocation3 + $0xb4] sm:$0xf0] }
 0x407   : > { %v10220_v5 = vpop.permute.xlu0 %5282 }
 0x40b   : > { %5274 = vrot.lane.b32.xlu1 %v5163_v18, %s7527_s23  ;;  %5926 = vrot.lane.b32.xlu2 %v5893_v31, %s7526_s22  ;;  %v7492_v18 = vor.u32 %v7491_v8, %v10188_v43  ;;  %v5874_v31 = vrot.slane %v10231_v11, 1  ;;  %v6017_v43 = vsel %vm2759_vm14, %v10130_v2, %v9915_v63  ;;  %v10325_v8 = vld [vmem:[#allocation3 + $0xb4] sm:$0xff]  }
 0x40d   : > { %5002 = vrot.lane.b32.xlu0 %v7243_v40, %s7522_s18  ;;  %v6013_v40 = vsel %vm2759_vm14, %v5981_v20, %v9706_v16  ;;  %v4767_v10 = vpop.permute.xlu1 %4766  ;;  %v10255_v21 = vpop.permute.xlu2 %5790  ;;  %v6095_v16 = vsel %vm11044_vm8, %v6063_v56, %v9834_v47  ;;  %vm11054_vm8 = vmmov %vm11046_vm1 }
 0x40e   : > { %v5951_v49 = vsel %vm2693_vm12, %v11007_v23, %v4767_v10  ;;  %v5937_v23 = vsel %vm2693_vm12, %v7367_v61, %v10145_v52  ;;  %v6127_v33 = vsel %vm11047_vm11, %v6095_v16, %v5775_v35  ;;  %v5050_v35 = vunpack.c.l.b16 %v4344_v29 }
 0x40f   : > { %v5277_v22 = vpop.permute.xlu0 %5276  ;;  %v5983_v39 = vsel %vm2726_vm13, %v5951_v49, %v9938_v41  ;;  %v4732_v41 = vshll.u32 %v4554_v0, 16  ;;  %v4870_v10 = vrot.slane %v7278_v7, 1  ;;  %v6005_v16 = vsel %vm2759_vm14, %v10156_v51, %v9886_v25 }
 0x410   : > { %v6045_v28 = vsel %vm2792_vm15, %v6013_v40, %v5277_v22  ;;  %v6015_v20 = vsel %vm2759_vm14, %v5983_v39, %v9743_v37  ;;  %v6159_v37 = vsel %vm11051_vm5, %v6127_v33, %v9890_v3  ;;  %v5066_v56 = vpack.c.b16 %v5050_v35, %v5050_v35  ;;  %v4410_v22 = vld [vmem:[#allocation3 + $0xc8] sm:$0x1]  ;;  %v11063_v35 = vld [vmem:[#allocation18_spill] sm:$0xff]  ;;  %vm11066_vm5 = vmmov %vm11052_vm6 }
 0x411   : > { %v6077_v17 = vsel %vm2825_vm0, %v6045_v28, %v9951_v12  ;;  %v5674_v12 = vrot.slane %v5672_v62, 1  ;;  %v4734_v50 = vrot.slane %v4732_v41, 1  ;;  %v4871_v62 = vrot.slane %v4554_v0, 1  ;;  %v11060_v41 = vld [vmem:[#allocation6_spill] sm:$0xff] }
 0x412   : > { %v6109_v54 = vsel %vm11046_vm1, %v6077_v17, %v11045_v55  ;;  %v5873_v28 = vrot.slane %v7492_v18, 1  ;;  %v5562_v0 = vunpack.c.l.b16 %v4410_v22  ;;  %v5244_v49 = vshll.u32 %v5066_v56, 16  ;;  %vm11056_vm1 = vmmov %vm11048_vm3 }
 0x413   : > { %v6141_v60 = vsel %vm11048_vm3, %v6109_v54, %v10123_v15  ;;  %v5675_v52 = vsel %vm1315_vm10, %v5670_v45, %v5674_v12  ;;  %v5969_v15 = vsel %vm2726_vm13, %v5937_v23, %v9917_v36  ;;  %v6047_v36 = vsel %vm2792_vm15, %v6015_v20, %v10150_v57  ;;  %v10323_v45 = vld [vmem:[#allocation3 + $0xc0] sm:$0xff]   ;;  %vm11059_vm11 = vmmov %vm11056_vm1 }
 0x414   : > { %v6173_v47 = vsel %vm11049_vm2, %v6141_v60, %v9970_v32  ;;  %v5363_v32 = vsel %vm1588_vm9, %v5361_v58, %v5362_v19  ;;  %5786 = vrot.lane.b32.xlu1 %v5675_v52, %s7529_s25  ;;  %6924 = vmatmul.msk.bf16.gmra.mxu1 %vm11052_vm6, %v6159_v37  ;;  %v6001_v3 = vsel %vm2759_vm14, %v5969_v15, %v9888_v24  ;;  %v5241_v24 = vrot.slane %v5239_v42, 1  ;;  %v11055_v12 = vld [vmem:[#allocation15_spill] sm:$0xff]  ;;  %v11057_v60 = vld [vmem:[#allocation24_spill] sm:$0xff]  ;;  %vm11061_vm3 = vmmov %vm11053_vm7 }
 0x415   : > { %5514 = vrot.lane.b32.xlu0 %v10186_v1, %s7523_s19  ;;  %6931 = vmatmul.msk.bf16.vlgmr.msra.gmra.mxu3 %vm11050_vm4, %v6173_v47  ;;  %v4755_v34 = vpop.permute.xlu1 %4754  ;;  %v5281_v6 = vpop.permute.xlu2 %5280  ;;  %v6033_v40 = vsel %vm2792_vm15, %v6001_v3, %v10227_v53  ;;  %v6079_v63 = vsel %vm2825_vm0, %v6047_v36, %v9957_v9  ;;  %v4735_v2 = vsel %vm1315_vm10, %v10089_v14, %v4734_v50  ;;  %v5383_v55 = vrot.slane %v5066_v56, 1  ;;  %v11062_v52 = vld [vmem:[#allocation31_spill] sm:$0xff]  ;;  %vm11065_vm4 = vmmov %vm11056_vm1  ;;  %v4279_v36 = vld [vmem:[#allocation3 + $0xbc] sm:$0x1] }
 0x416   : > { %5402 = vrot.lane.b32.xlu2 %v5363_v32, %s7525_s21  ;;  %v6049_v57 = vsel %vm2792_vm15, %v6017_v43, %v5281_v6  ;;  %v6065_v53 = vsel %vm2825_vm0, %v6033_v40, %v10002_v48  ;;  %v4872_v17 = vsel %vm1588_vm9, %v4870_v10, %v4871_v62  ;;  %v5875_v19 = vsel %vm1588_vm9, %v5873_v28, %v5874_v31  ;;  %v7325_v15 = vld [vmem:[#allocation3 + $0xc0] sm:$0xe]  ;;  %vm11068_vm6 = vmmov %vm11049_vm2  ;;  %v11069_v3 = vld [vmem:[#allocation29_spill] sm:$0xff] }
 0x417   : > { %v10288_v1 = vpop.permute.xlu0 %5778  ;;  %v10304_v11 = vsel %vm2825_vm0, %v6049_v57, %v10078_v30  ;;  %v5237_v30 = vshrl.u32 %v10237_v4, 16  ;;  %v6111_v9 = vsel %vm11053_vm7, %v6079_v63, %v9860_v59  ;;  %v5382_v48 = vrot.slane %v7495_v27, 1  ;;  %v11064_v37 = vld [vmem:[#allocation11_spill] sm:$0xff]  ;;  %vm11070_vm7 = vmmov %vm11066_vm5  ;;  %v7497_v56 = vld [vmem:[#allocation3 + $0xb4] sm:$0xe] }
 0x418   : > { %v6097_v59 = vsel %vm11054_vm8, %v6065_v53, %v9734_v38  ;;  %v5578_v54 = vpack.c.b16 %v5562_v0, %v5562_v0  ;;  %v5939_v46 = vsel %vm2693_vm12, %v11055_v12, %v4755_v34  ;;  %v5246_v23 = vrot.slane %v5244_v49, 1  ;;  %v11058_v38 = vld [vmem:[#allocation9_spill] sm:$0xff]  ;;  %v11067_v34 = vld [vmem:[#allocation30_spill] sm:$0xff]  ;;  %v4345_v53 = vld [vmem:[#allocation3 + $0xc8] sm:$0x1] }
 0x419   : > { %v5242_v44 = vor.u32 %v5241_v24, %v5237_v30  ;;  %v6143_v33 = vsel %vm11056_vm1, %v6111_v9, %v10255_v21  ;;  %v5751_v51 = vshll.u32 %v10323_v45, 16  ;;  %v6129_v58 = vsel %vm11059_vm11, %v6097_v59, %v11058_v38  ;;  %v7324_v21 = vld [vmem:[#allocation3 + $0xc0] sm:$0xf0]  ;;  %v11071_v27 = vld [vmem:[#allocation10_spill] sm:$0xff]  ;;  %v11072_v9 = vld [vmem:[#allocation8_spill] sm:$0xff] }
 0x41a   : > { %v5971_v7 = vsel %vm2726_vm13, %v5939_v46, %v11062_v52  ;;  %v6175_v13 = vsel %vm11049_vm2, %v6143_v33, %v11063_v35  ;;  %v5756_v32 = vshll.u32 %v5578_v54, 16  ;;  %v5384_v42 = vsel %vm1588_vm9, %v5382_v48, %v5383_v55  ;;  %v11073_v48 = vld [vmem:[#allocation20_spill] sm:$0xff]  ;;  %vm11074_vm8 = vmmov %vm11061_vm3  ;;  %v7301_v52 = vld [vmem:[#allocation3 + $0xc0] sm:$0xe] }
 0x41b   : > { %v5247_v47 = vsel %vm1315_vm10, %v5242_v44, %v5246_v23  ;;  %v6161_v50 = vsel %vm11068_vm6, %v6129_v58, %v11067_v34  ;;  %v5753_v31 = vrot.slane %v5751_v51, 1  ;;  %v6003_v43 = vsel %vm2759_vm14, %v5971_v7, %v11069_v3  ;;  %v7499_v12 = vld [vmem:[#allocation3 + $0xcc] sm:$0xf0]  ;;  %vm11076_vm1 = vmmov %vm11061_vm3  ;;  %v7500_v3 = vld [vmem:[#allocation3 + $0xcc] sm:$0xe] }
 0x41c   : > { %4904 = vrot.lane.b32.xlu1 %v4872_v17, %s7524_s20  ;;  %v7326_v62 = vor.u32 %v7325_v15, %v7324_v21  ;;  %v5749_v40 = vshrl.u32 %v10323_v45, 16  ;;  %v5758_v57 = vrot.slane %v5756_v32, 1  ;;  %v4539_v28 = vunpack.c.l.b16 %v4279_v36  ;;  %v11078_v38 = vld [vmem:[#allocation36_spill] sm:$0xff]  ;;  %vm11079_vm11 = vmmov %vm11065_vm4  ;;  %v11082_v15 = vld [vmem:[#allocation21_spill] sm:$0xff] }
 0x41d   : > { %4776 = vrot.lane.b32.xlu0 %v4735_v2, %s7528_s24  ;;  %v5269_v39 = vpop.permute.xlu1 %5268  ;;  %v10336_v29 = vpop.permute.xlu2 %5782  ;;  %v5895_v24 = vrot.slane %v5578_v54, 1  ;;  %v6035_v63 = vsel %vm2792_vm15, %v6003_v43, %v11071_v27  ;;  %v7498_v49 = vor.u32 %v7497_v56, %v10327_v26  ;;  %v5051_v55 = vunpack.c.l.b16 %v4345_v53  ;;  %v4394_v54 = vld [vmem:[#allocation3 + $0xcc] sm:$0xff]   ;;  %v4411_v36 = vld [vmem:[#allocation3 + $0xd4] sm:$0x1] }
 0x41e   : > { %5914 = vrot.lane.b32.xlu2 %v5875_v19, %s7526_s22  ;;  %v6037_v61 = vsel %vm2792_vm15, %v6005_v16, %v5269_v39  ;;  %v10377_v2 = vor.u32 %v5753_v31, %v5749_v40  ;;  %v5894_v0 = vrot.slane %v7326_v62, 1  ;;  %v4555_v30 = vpack.c.b16 %v4539_v28, %v4539_v28  ;;  %v11084_v34 = vld [vmem:[#allocation17_spill] sm:$0xff] }
 0x41f   : > { %v10321_v14 = vpop.permute.xlu0 %4770  ;;  %v6069_v25 = vsel %vm2825_vm0, %v6037_v61, %v11057_v60  ;;  %v6067_v44 = vsel %vm2825_vm0, %v6035_v63, %v11072_v9  ;;  %v6113_v16 = vsel %vm11074_vm8, %v10304_v11, %v11073_v48  ;;  %v4737_v26 = vshrl.u32 %v10325_v8, 16  ;;  %v11075_v61 = vld [vmem:[#allocation34_spill] sm:$0xff]  ;;  %v11077_v11 = vld [vmem:[#allocation16_spill] sm:$0xff]  ;;  %v11086_v43 = vld [vmem:[#allocation33_spill] sm:$0xff] }
 0x420   : > { %v6101_v20 = vsel %vm11061_vm3, %v6069_v25, %v11060_v41  ;;  %v5759_v17 = vsel %vm1315_vm10, %v10377_v2, %v5758_v57  ;;  %v5896_v19 = vsel %vm1588_vm9, %v5894_v0, %v5895_v24  ;;  %v6099_v23 = vsel %vm11076_vm1, %v6067_v44, %v11075_v61  ;;  %vm11080_vm3 = vmmov %vm11065_vm4  ;;  %v11089_v48 = vld [vmem:[#allocation7_spill] sm:$0xff] }
 0x421   : > { %v10355_v18 = vsel %vm11065_vm4, %v6101_v20, %v11064_v37  ;;  %v4744_v33 = vshll.u32 %v4555_v30, 16  ;;  %v4873_v60 = vrot.slane %v7498_v49, 1  ;;  %v4874_v25 = vrot.slane %v4555_v30, 1  ;;  %v7300_v20 = vld [vmem:[#allocation3 + $0xc0] sm:$0xf0]  ;;  %vm11083_vm4 = vmmov %vm11066_vm5  ;;  %v11088_v30 = vld [vmem:[#allocation12_spill] sm:$0xff] }
 0x422   : > { %v5955_v51 = vsel %vm2693_vm12, %v11077_v11, %v10321_v14  ;;  %v6145_v58 = vsel %vm11079_vm11, %v6113_v16, %v11078_v38  ;;  %v5067_v7 = vpack.c.b16 %v5051_v55, %v5051_v55  ;;  %v6131_v35 = vsel %vm11080_vm3, %v6099_v23, %v10288_v1  ;;  %vm11087_vm6 = vmmov %vm11083_vm4 }
 0x423   : > { %v6177_v32 = vsel %vm11049_vm2, %v6145_v58, %v11082_v15  ;;  %v4746_v37 = vrot.slane %v4744_v33, 1  ;;  %v4875_v14 = vsel %vm1588_vm9, %v4873_v60, %v4874_v25  ;;  %v5563_v28 = vunpack.c.l.b16 %v4411_v36  ;;  %vm11091_vm8 = vmmov %vm11080_vm3  ;;  %v11092_v60 = vld [vmem:[#allocation23_spill] sm:$0xff]  ;;  %v7368_v58 = vld [vmem:[#allocation3 + $0x90] sm:$0xff]  }
 0x424   : > { %5416 = vrot.lane.b32.xlu1 %v5384_v42, %s7525_s21  ;;  %6925 = vmatmul.msk.bf16.gmra.mxu1 %vm11070_vm7, %v6161_v50  ;;  %v7302_v42 = vor.u32 %v7301_v52, %v7300_v20  ;;  %v5256_v31 = vshll.u32 %v5067_v7, 16  ;;  %v5386_v57 = vrot.slane %v5067_v7, 1  ;;  %v7501_v0 = vor.u32 %v7500_v3, %v7499_v12  ;;  %vm11090_vm7 = vmmov %vm11076_vm1  ;;  %v11099_v7 = vld [vmem:[#allocation27_spill] sm:$0xff] }
 0x425   : > { %5288 = vrot.lane.b32.xlu0 %v5247_v47, %s7527_s23  ;;  %6932 = vmatmul.msk.bf16.gmra.mxu3 %vm11066_vm5, %v6175_v13  ;;  %v10370_v22 = vpop.permute.xlu1 %5794  ;;  %v10373_v10 = vpop.permute.xlu2 %4900  ;;  %v11081_v13 = vld [vmem:[#allocation19_spill] sm:$0xff]  ;;  %vm11085_vm5 = vmmov %vm11049_vm2 }
 0x426   : > { %5016 = vrot.lane.b32.xlu2 %v10237_v4, %s7522_s18  ;;  %v4739_v4 = vshll.u32 %v10325_v8, 16  ;;  %v5987_v21 = vsel %vm2726_vm13, %v5955_v51, %v11081_v13  ;;  %v6163_v50 = vsel %vm11085_vm5, %v6131_v35, %v11084_v34  ;;  %v5385_v63 = vrot.slane %v7302_v42, 1  ;;  %vm11093_vm1 = vmmov %vm11049_vm2  ;;  %v11094_v51 = vld [vmem:[#allocation22_spill] sm:$0xff] }
 0x427   : > { %v10368_v6 = vpop.permute.xlu0 %4758  ;;  %v6019_v62 = vsel %vm2759_vm14, %v5987_v21, %v11086_v43  ;;  %v5897_v44 = vrot.slane %v7501_v0, 1  ;;  %vm11095_vm11 = vmmov %vm11083_vm4 }
 0x428   : > { %v4741_v39 = vrot.slane %v4739_v4, 1  ;;  %v6051_v27 = vsel %vm2792_vm15, %v6019_v62, %v10220_v5  ;;  %v5258_v4 = vrot.slane %v5256_v31, 1  ;;  %v5387_v53 = vsel %vm1588_vm9, %v5385_v63, %v5386_v57  ;;  %vm11097_vm3 = vmmov %vm11093_vm1 }
 0x429   : > { %v6083_v49 = vsel %vm2825_vm0, %v6051_v27, %v11088_v30  ;;  %v5943_v38 = vsel %vm2693_vm12, %v11094_v51, %v10368_v6  ;;  %vm11098_vm2 = vmmov %vm11083_vm4 }
 0x42a   : > { %v4742_v41 = vor.u32 %v4741_v39, %v4737_v26  ;;  %v6115_v16 = vsel %vm11090_vm7, %v6083_v49, %v11089_v48  ;;  %v5761_v26 = vshrl.u32 %v4394_v54, 16  ;;  %v5975_v6 = vsel %vm2726_vm13, %v5943_v38, %v11099_v7  ;;  %vm11105_vm5 = vmmov %vm11093_vm1 }
 0x42b   : > { %v6147_v61 = vsel %vm11091_vm8, %v6115_v16, %v10370_v22  ;;  %v11096_v22 = vld [vmem:[#allocation28_spill] sm:$0xff] }
 0x42c   : > { %5928 = vrot.lane.b32.xlu1 %v5896_v19, %s7526_s22  ;;  %v4747_v1 = vsel %vm1315_vm10, %v4742_v41, %v4746_v37  ;;  %v5259_v19 = vsel %vm1315_vm10, %v10377_v2, %v5258_v4  ;;  %v6179_v2 = vsel %vm11093_vm1, %v6147_v61, %v11092_v60 }
 0x42d   : > { %5800 = vrot.lane.b32.xlu0 %v5759_v17, %s7529_s25  ;;  %v10396_v46 = vpop.permute.xlu1 %5510  ;;  %v10403_v47 = vpop.permute.xlu2 %5412  ;;  %v5579_v17 = vpack.c.b16 %v5563_v28, %v5563_v28 }
 0x42e   : > { %5528 = vrot.lane.b32.xlu2 %v10323_v45, %s7523_s19 }
 0x42f   : > { %v10393_v59 = vpop.permute.xlu0 %5398  ;;  %v5898_v55 = vrot.slane %v5579_v17, 1  ;;  %v5768_v12 = vshll.u32 %v5579_v17, 16 }
 0x431   : > { %v5899_v25 = vsel %vm1588_vm9, %v5897_v44, %v5898_v55  ;;  %v5770_v11 = vrot.slane %v5768_v12, 1  ;;  %vm11102_vm9 = vmmov %vm11090_vm7 }
 0x434   : > { %5018 = vrot.lane.b32.xlu1 %v10323_v45, %s7522_s18  ;;  %6926 = vmatmul.msk.bf16.gmra.mxu1 %vm11087_vm6, %v6163_v50  ;;  %v5763_v45 = vshll.u32 %v4394_v54, 16 }
 0x435   : > { %6933 = vmatmul.msk.bf16.gmra.mxu3 %vm11083_vm4, %v6177_v32  ;;  %4906 = vrot.lane.b32.xlu0 %v4875_v14, %s7524_s20  ;;  %v4773_v40 = vpop.permute.xlu1 %4772  ;;  %v5797_v24 = vpop.permute.xlu2 %5796  ;;  %v11100_v32 = vld [vmem:[#allocation13_spill] sm:$0xff]  ;;  %v11101_v14 = vld [vmem:[#allocation35_spill] sm:$0xff]  ;;  %vm11104_vm4 = vmmov %vm11091_vm8 }
 0x436   : > { %4778 = vrot.lane.b32.xlu2 %v4747_v1, %s7528_s24  ;;  %v5765_v9 = vrot.slane %v5763_v45, 1  ;;  %v5957_v41 = vsel %vm2693_vm12, %v7368_v58, %v4773_v40  ;;  %vm11106_vm6 = vmmov %vm11104_vm4 }
 0x437   : > { %v5911_v56 = vpop.permute.xlu0 %5910  ;;  %v5989_v35 = vsel %vm2726_vm13, %v5957_v41, %v10373_v10  ;;  %vm11108_vm8 = vmmov %vm11093_vm1 }
 0x438   : > { %v5766_v33 = vor.u32 %v5765_v9, %v5761_v26  ;;  %vm11110_vm1 = vmmov %vm11098_vm2  ;;  %v11115_v9 = vld [vmem:[#allocation26_spill] sm:$0xff] }
 0x43a   : > { %v5771_v20 = vsel %vm1315_vm10, %v5766_v33, %v5770_v11  ;;  %vm11103_vm10 = vmmov %vm11090_vm7  ;;  %v11119_v11 = vld [vmem:[#allocation32_spill] sm:$0xff] }
 0x43b   : > { %vm11107_vm7 = vmmov %vm11098_vm2 }
 0x43c   : > { %5530 = vrot.lane.b32.xlu1 %v4394_v54, %s7523_s19  ;;  %v6165_v54 = vsel %vm11097_vm3, %v10355_v18, %v11096_v22  ;;  %v6007_v18 = vsel %vm2759_vm14, %v5975_v6, %v11100_v32  ;;  %vm11112_vm3 = vmmov %vm11104_vm4 }
 0x43d   : > { %5418 = vrot.lane.b32.xlu0 %v5387_v53, %s7525_s21  ;;  %v5285_v39 = vpop.permute.xlu1 %5284  ;;  %v5001_v23 = vpop.permute.xlu2 %5000  ;;  %v6039_v42 = vsel %vm2792_vm15, %v6007_v18, %v11101_v14 }
 0x43e   : > { %5290 = vrot.lane.b32.xlu2 %v5259_v19, %s7527_s23  ;;  %v6071_v36 = vsel %vm2825_vm0, %v6039_v42, %v10393_v59 }
 0x43f   : > { %v5013_v5 = vpop.permute.xlu0 %5012  ;;  %v6103_v3 = vsel %vm11103_vm10, %v6071_v36, %v10396_v46 }
 0x440   : > { %v6021_v21 = vsel %vm2759_vm14, %v5989_v35, %v5013_v5  ;;  %v6135_v40 = vsel %vm11106_vm6, %v6103_v3, %v10336_v29  ;;  %vm11118_vm6 = vmmov %vm11110_vm1 }
 0x441   : > { %v6053_v37 = vsel %vm2792_vm15, %v6021_v21, %v5285_v39  ;;  %v6167_v59 = vsel %vm11108_vm8, %v6135_v40, %v5911_v56  ;;  %vm11121_vm8 = vmmov %vm11112_vm3 }
 0x442   : > { %v6085_v34 = vsel %vm2825_vm0, %v6053_v37, %v10403_v47  ;;  %v11109_v47 = vld [vmem:[#allocation14_spill] sm:$0xff] }
 0x444   : > { %6927 = vmatmul.msk.bf16.gmra.mxu1 %vm11098_vm2, %v6165_v54  ;;  %vm11113_vm2 = vmmov %vm11105_vm5 }
 0x445   : > { %6934 = vmatmul.msk.bf16.gmra.mxu3 %vm11095_vm11, %v6179_v2  ;;  %5930 = vrot.lane.b32.xlu0 %v5899_v25, %s7526_s22  ;;  %v4761_v13 = vpop.permute.xlu1 %4760  ;;  %v5513_v15 = vpop.permute.xlu2 %5512  ;;  %vm11111_vm11 = vmmov %vm11102_vm9 }
 0x446   : > { %5802 = vrot.lane.b32.xlu2 %v5771_v20, %s7529_s25  ;;  %v5945_v57 = vsel %vm2693_vm12, %v11109_v47, %v4761_v13 }
 0x447   : > { %v5525_v52 = vpop.permute.xlu0 %5524 }
 0x448   : > { %v6117_v10 = vsel %vm11102_vm9, %v6085_v34, %v5525_v52  ;;  %vm11114_vm9 = vmmov %vm11110_vm1 }
 0x449   : > { %v6149_v43 = vsel %vm11104_vm4, %v6117_v10, %v5797_v24  ;;  %vm11116_vm4 = vmmov %vm11112_vm3 }
 0x44d   : > { %v5925_v1 = vpop.permute.xlu1 %5924  ;;  %v4775_v31 = vpop.permute.xlu2 %4774 }
 0x44e   : > { %v6181_v62 = vsel %vm11105_vm5, %v6149_v43, %v5925_v1  ;;  %v5959_v5 = vsel %vm2693_vm12, %v11115_v9, %v4775_v31  ;;  %vm11117_vm5 = vmmov %vm11113_vm2  ;;  %v7369_v43 = vld [vmem:[#allocation3 + $0xa8] sm:$0xff]  }
 0x44f   : > { %v4889_v50 = vpop.permute.xlu0 %4888 }
 0x450   : > { %v5977_v27 = vsel %vm2726_vm13, %v5945_v57, %v4889_v50 }
 0x451   : > { %v6009_v24 = vsel %vm2759_vm14, %v5977_v27, %v5001_v23 }
 0x454   : > { %6928 = vmatmul.msk.bf16.gmra.mxu1 %vm11110_vm1, %v6167_v59  ;;  %vm11122_vm1 = vmmov %vm11113_vm2 }
 0x455   : > { %6935 = vmatmul.msk.bf16.gmra.mxu3 %vm11107_vm7, %v6181_v62  ;;  %v5401_v46 = vpop.permute.xlu1 %5400  ;;  %v5287_v63 = vpop.permute.xlu2 %5286  ;;  %vm11120_vm7 = vmmov %vm11103_vm10 }
 0x457   : > { %v5273_v28 = vpop.permute.xlu0 %5272 }
 0x458   : > { %v6041_v4 = vsel %vm2792_vm15, %v6009_v24, %v5273_v28 }
 0x459   : > { %v6073_v29 = vsel %vm2825_vm0, %v6041_v4, %v5401_v46 }
 0x45a   : > { %v6105_v56 = vsel %vm11111_vm11, %v6073_v29, %v5513_v15  ;;  %vm11123_vm11 = vmmov %vm11118_vm6 }
 0x45d   : > { %v5913_v0 = vpop.permute.xlu1 %5912  ;;  %v4763_v17 = vpop.permute.xlu2 %4762 }
 0x45e   : > { %v5947_v51 = vsel %vm2693_vm12, %v11119_v11, %v4763_v17 }
 0x45f   : > { %v5785_v45 = vpop.permute.xlu0 %5784 }
 0x460   : > { %v6137_v53 = vsel %vm11112_vm3, %v6105_v56, %v5785_v45  ;;  %vm11124_vm3 = vmmov %vm11120_vm7 }
 0x461   : > { %v6169_v30 = vsel %vm11113_vm2, %v6137_v53, %v5913_v0  ;;  %vm11125_vm2 = vmmov %vm11116_vm4 }
 0x464   : > { %6929 = vmatmul.msk.bf16.gmra.mxu1 %vm11114_vm9, %v6169_v30  ;;  %vm11126_vm9 = vmmov %vm11122_vm1 }
 0x465   : > { %v5015_v19 = vpop.permute.xlu1 %5014  ;;  %v5927_v48 = vpop.permute.xlu2 %5926 }
 0x467   : > { %v4903_v49 = vpop.permute.xlu0 %4902 }
 0x468   : > { %v5991_v44 = vsel %vm2726_vm13, %v5959_v5, %v4903_v49 }
 0x469   : > { %v6023_v39 = vsel %vm2759_vm14, %v5991_v44, %v5015_v19 }
 0x46a   : > { %v6055_v26 = vsel %vm2792_vm15, %v6023_v39, %v5287_v63 }
 0x46d   : > { %v5527_v55 = vpop.permute.xlu1 %5526 }
 0x46f   : > { %v5415_v16 = vpop.permute.xlu0 %5414 }
 0x470   : > { %v6087_v12 = vsel %vm2825_vm0, %v6055_v26, %v5415_v16  ;;  %v5403_v2 = vpop.permute.xlu2 %5402 }
 0x471   : > { %v6119_v61 = vsel %vm11103_vm10, %v6087_v12, %v5527_v55  ;;  %vm11127_vm10 = vmmov %vm11118_vm6 }
 0x475   : > { %v4891_v60 = vpop.permute.xlu1 %4890 }
 0x476   : > { %v5979_v58 = vsel %vm2726_vm13, %v5947_v51, %v4891_v60 }
 0x477   : > { %v5799_v23 = vpop.permute.xlu0 %5798 }
 0x478   : > { %v6151_v33 = vsel %vm11116_vm4, %v6119_v61, %v5799_v23  ;;  %v5915_v54 = vpop.permute.xlu2 %5914  ;;  %vm11132_vm4 = vcmask 24576  }
 0x479   : > { %v6183_v25 = vsel %vm11117_vm5, %v6151_v33, %v5927_v48  ;;  %vm11133_vm5 = vmmov %vm11132_vm4 }
 0x47a   : > { %6936 = vmatmul.msk.bf16.gmra.mxu3 %vm11118_vm6, %v6183_v25 }
 0x47d   : > { %v5275_v41 = vpop.permute.xlu1 %5274 }
 0x47f   : > { %v5003_v38 = vpop.permute.xlu0 %5002 }
 0x480   : > { %v6011_v22 = vsel %vm2759_vm14, %v5979_v58, %v5003_v38  ;;  %v5017_v37 = vpop.permute.xlu2 %5016 }
 0x481   : > { %v6043_v20 = vsel %vm2792_vm15, %v6011_v22, %v5275_v41  ;;  %v6252_v52 = vpop.f32.mrf.mxu1 }
 0x482   : > { %6332 = vst.msk [vmem:[#allocation4] sm:$0xff] %vm2693_vm12, %v6252_v52  ;;  %v6075_v6 = vsel %vm2825_vm0, %v6043_v20, %v5403_v2  ;;  %v6437_v32 = vmul.f32 %v6252_v52, %v6252_v52  ;;  %v6365_v14 = vsel %vm2693_vm12, %v6252_v52, 0.0 }
 0x484   : > { %v6469_v50 = vsel %vm2693_vm12, %v6437_v32, 0.0 }
 0x486   : > { %v5787_v13 = vpop.permute.xlu1 %5786 }
 0x487   : > { %v5515_v7 = vpop.permute.xlu0 %5514 }
 0x488   : > { %v6107_v35 = vsel %vm11120_vm7, %v6075_v6, %v5515_v7  ;;  %v5529_v27 = vpop.permute.xlu2 %5528 }
 0x489   : > { %v6139_v21 = vsel %vm11121_vm8, %v6107_v35, %v5787_v13  ;;  %v6254_v18 = vpop.f32.mrf.mxu1 }
 0x48a   : > { %v6171_v15 = vsel %vm11122_vm1, %v6139_v21, %v5915_v54  ;;  %6333 = vst.msk [vmem:[#allocation4 + $0x8] sm:$0xff] %vm2693_vm12, %v6254_v18  ;;  %v6366_v42 = vsel %vm2693_vm12, %v6254_v18, 0.0  ;;  %v6438_v36 = vmul.f32 %v6254_v18, %v6254_v18 }
 0x48b   : > { %6930 = vmatmul.msk.bf16.gmra.mxu1 %vm11123_vm11, %v6171_v15  ;;  %v6367_v34 = vadd.f32 %v6366_v42, %v6365_v14 }
 0x48c   : > { %v6470_v10 = vsel %vm2693_vm12, %v6438_v36, 0.0 }
 0x48d   : > { %v6471_v31 = vadd.f32 %v6470_v10, %v6469_v50 }
 0x48e   : > { %v4905_v3 = vpop.permute.xlu1 %4904 }
 0x48f   : > { %v4777_v1 = vpop.permute.xlu0 %4776 }
 0x490   : > { %v5961_v62 = vsel %vm2693_vm12, %v7369_v43, %v4777_v1  ;;  %v4779_v26 = vpop.permute.xlu2 %4778 }
 0x491   : > { %v6257_v40 = vpop.f32.mrf.mxu1  ;;  %v5993_v59 = vsel %vm2726_vm13, %v5961_v62, %v4905_v3  ;;  %v5963_v38 = vsel %vm2693_vm12, %v10325_v8, %v4779_v26 }
 0x492   : > { %6334 = vst.msk [vmem:[#allocation4 + $0x10] sm:$0xff] %vm2693_vm12, %v6257_v40  ;;  %v6368_v47 = vsel %vm2693_vm12, %v6257_v40, 0.0  ;;  %v6439_v57 = vmul.f32 %v6257_v40, %v6257_v40  ;;  %v6025_v4 = vsel %vm2759_vm14, %v5993_v59, %v5017_v37 }
 0x493   : > { %v6369_v28 = vadd.f32 %v6368_v47, %v6367_v34 }
 0x494   : > { %v6472_v46 = vsel %vm2693_vm12, %v6439_v57, 0.0 }
 0x495   : > { %v6473_v63 = vadd.f32 %v6472_v46, %v6471_v31 }
 0x496   : > { %v5417_v29 = vpop.permute.xlu1 %5416 }
 0x497   : > { %v5289_v24 = vpop.permute.xlu0 %5288 }
 0x498   : > { %v10520_v45 = vpop.f32.mrf.mxu3  ;;  %v6057_v0 = vsel %vm2792_vm15, %v6025_v4, %v5289_v24  ;;  %v5291_v41 = vpop.permute.xlu2 %5290 }
 0x499   : > { %6348 = vst.msk [vmem:[#allocation4 + $0x80] sm:$0xff] %vm2693_vm12, %v10520_v45  ;;  %v6089_v56 = vsel %vm2825_vm0, %v6057_v0, %v5417_v29  ;;  %v6259_v53 = vpop.f32.mrf.mxu1 }
 0x49a   : > { %6335 = vst.msk [vmem:[#allocation4 + $0x18] sm:$0xff] %vm2693_vm12, %v6259_v53  ;;  %v6370_v17 = vsel %vm2693_vm12, %v6259_v53, 0.0  ;;  %v6440_v30 = vmul.f32 %v6259_v53, %v6259_v53  ;;  %v6121_v9 = vsel %vm11124_vm3, %v6089_v56, %v5529_v27 }
 0x49b   : > { %v6371_v49 = vadd.f32 %v6370_v17, %v6369_v28 }
 0x49c   : > { %v6474_v19 = vsel %vm2693_vm12, %v6440_v30, 0.0 }
 0x49d   : > { %v6475_v44 = vadd.f32 %v6474_v19, %v6473_v63 }
 0x49e   : > { %v5929_v48 = vpop.permute.xlu1 %5928 }
 0x49f   : > { %v5801_v5 = vpop.permute.xlu0 %5800 }
 0x4a0   : > { %v6153_v16 = vsel %vm11125_vm2, %v6121_v9, %v5801_v5  ;;  %v10531_v39 = vpop.f32.mrf.mxu3  ;;  %v5803_v36 = vpop.permute.xlu2 %5802 }
 0x4a1   : > { %6349 = vst.msk [vmem:[#allocation4 + $0x88] sm:$0xff] %vm2693_vm12, %v10531_v39  ;;  %v6185_v55 = vsel %vm11126_vm9, %v6153_v16, %v5929_v48  ;;  %v6262_v12 = vpop.f32.mrf.mxu1 }
 0x4a2   : > { %6937 = vmatmul.msk.bf16.gmra.mxu3 %vm11127_vm10, %v6185_v55  ;;  %6336 = vst.msk [vmem:[#allocation4 + $0x20] sm:$0xff] %vm2693_vm12, %v6262_v12  ;;  %v6372_v61 = vsel %vm2693_vm12, %v6262_v12, 0.0  ;;  %v6441_v23 = vmul.f32 %v6262_v12, %v6262_v12 }
 0x4a3   : > { %v6373_v33 = vadd.f32 %v6372_v61, %v6371_v49 }
 0x4a4   : > { %v6476_v60 = vsel %vm2693_vm12, %v6441_v23, 0.0 }
 0x4a5   : > { %v6477_v25 = vadd.f32 %v6476_v60, %v6475_v44 }
 0x4a6   : > { %v5019_v11 = vpop.permute.xlu1 %5018 }
 0x4a7   : > { %v4907_v2 = vpop.permute.xlu0 %4906 }
 0x4a8   : > { %v10540_v51 = vpop.f32.mrf.mxu3  ;;  %v5995_v58 = vsel %vm2726_vm13, %v5963_v38, %v4907_v2  ;;  %vm11128_vm13 = vmmov %vm11124_vm3 }
 0x4a9   : > { %6350 = vst.msk [vmem:[#allocation4 + $0x90] sm:$0xff] %vm2693_vm12, %v10540_v51  ;;  %v6264_v22 = vpop.f32.mrf.mxu1  ;;  %v6027_v54 = vsel %vm2759_vm14, %v5995_v58, %v5019_v11  ;;  %vm11129_vm14 = vmmov %vm11125_vm2 }
 0x4aa   : > { %6337 = vst.msk [vmem:[#allocation4 + $0x28] sm:$0xff] %vm2693_vm12, %v6264_v22  ;;  %v6374_v20 = vsel %vm2693_vm12, %v6264_v22, 0.0  ;;  %v6442_v52 = vmul.f32 %v6264_v22, %v6264_v22  ;;  %v6059_v8 = vsel %vm2792_vm15, %v6027_v54, %v5291_v41  ;;  %vm11130_vm15 = vmmov %vm11122_vm1 }
 0x4ab   : > { %v6375_v7 = vadd.f32 %v6374_v20, %v6373_v33 }
 0x4ac   : > { %v6478_v6 = vsel %vm2693_vm12, %v6442_v52, 0.0 }
 0x4ad   : > { %v6479_v13 = vadd.f32 %v6478_v6, %v6477_v25 }
 0x4ae   : > { %v5531_v15 = vpop.permute.xlu1 %5530 }
 0x4af   : > { %v5419_v35 = vpop.permute.xlu0 %5418 }
 0x4b0   : > { %v10552_v21 = vpop.f32.mrf.mxu3  ;;  %v6091_v32 = vsel %vm2825_vm0, %v6059_v8, %v5419_v35  ;;  %vm11131_vm0 = vmmov %vm11118_vm6 }
 0x4b1   : > { %6351 = vst.msk [vmem:[#allocation4 + $0x98] sm:$0xff] %vm2693_vm12, %v10552_v21  ;;  %v6123_v18 = vsel %vm11128_vm13, %v6091_v32, %v5531_v15  ;;  %v6267_v37 = vpop.f32.mrf.mxu1 }
 0x4b2   : > { %6338 = vst.msk [vmem:[#allocation4 + $0x30] sm:$0xff] %vm2693_vm12, %v6267_v37  ;;  %v6376_v14 = vsel %vm2693_vm12, %v6267_v37, 0.0  ;;  %v6443_v42 = vmul.f32 %v6267_v37, %v6267_v37  ;;  %v6155_v1 = vsel %vm11129_vm14, %v6123_v18, %v5803_v36 }
 0x4b3   : > { %v6377_v34 = vadd.f32 %v6376_v14, %v6375_v7 }
 0x4b4   : > { %v6480_v50 = vsel %vm2693_vm12, %v6443_v42, 0.0 }
 0x4b5   : > { %v6481_v31 = vadd.f32 %v6480_v50, %v6479_v13 }
 0x4b7   : > { %v5931_v10 = vpop.permute.xlu0 %5930 }
 0x4b8   : > { %v10562_v3 = vpop.f32.mrf.mxu3  ;;  %v6187_v43 = vsel %vm11130_vm15, %v6155_v1, %v5931_v10  ;;  %v6453_v10 = vmul.f32 %v10520_v45, %v10520_v45 }
 0x4b9   : > { %6352 = vst.msk [vmem:[#allocation4 + $0xa0] sm:$0xff] %vm2693_vm12, %v10562_v3  ;;  %6938 = vmatmul.msk.bf16.gmra.mxu3 %vm11131_vm0, %v6187_v43  ;;  %v6269_v62 = vpop.f32.mrf.mxu1 }
 0x4ba   : > { %6339 = vst.msk [vmem:[#allocation4 + $0x38] sm:$0xff] %vm2693_vm12, %v6269_v62  ;;  %v6378_v40 = vsel %vm2693_vm12, %v6269_v62, 0.0  ;;  %v6444_v59 = vmul.f32 %v6269_v62, %v6269_v62 }
 0x4bb   : > { %v6379_v47 = vadd.f32 %v6378_v40, %v6377_v34  ;;  %v6396_v40 = vsel %vm2693_vm12, %v10520_v45, 0.0  ;;  %v6400_v45 = vsel %vm2693_vm12, %v10540_v51, 0.0 }
 0x4bc   : > { %v6482_v57 = vsel %vm2693_vm12, %v6444_v59, 0.0  ;;  %v6454_v59 = vmul.f32 %v10531_v39, %v10531_v39 }
 0x4bd   : > { %v6483_v28 = vadd.f32 %v6482_v57, %v6481_v31 }
 0x4c0   : > { %v10571_v27 = vpop.f32.mrf.mxu3 }
 0x4c1   : > { %6353 = vst.msk [vmem:[#allocation4 + $0xa8] sm:$0xff] %vm2693_vm12, %v10571_v27  ;;  %v6272_v46 = vpop.f32.mrf.mxu1 }
 0x4c2   : > { %6340 = vst.msk [vmem:[#allocation4 + $0x40] sm:$0xff] %vm2693_vm12, %v6272_v46  ;;  %v6380_v24 = vsel %vm2693_vm12, %v6272_v46, 0.0  ;;  %v6445_v63 = vmul.f32 %v6272_v46, %v6272_v46  ;;  %v6500_v46 = vsel %vm2693_vm12, %v6453_v10, 0.0 }
 0x4c3   : > { %v6381_v4 = vadd.f32 %v6380_v24, %v6379_v47  ;;  %v6398_v24 = vsel %vm2693_vm12, %v10531_v39, 0.0  ;;  %v6402_v39 = vsel %vm2693_vm12, %v10552_v21, 0.0 }
 0x4c4   : > { %v6484_v29 = vsel %vm2693_vm12, %v6445_v63, 0.0  ;;  %v6455_v63 = vmul.f32 %v10540_v51, %v10540_v51  ;;  %v6404_v51 = vsel %vm2693_vm12, %v10562_v3, 0.0 }
 0x4c5   : > { %v6485_v0 = vadd.f32 %v6484_v29, %v6483_v28 }
 0x4c8   : > { %v10578_v56 = vpop.f32.mrf.mxu3 }
 0x4c9   : > { %6354 = vst.msk [vmem:[#allocation4 + $0xb0] sm:$0xff] %vm2693_vm12, %v10578_v56  ;;  %v6274_v53 = vpop.f32.mrf.mxu1 }
 0x4ca   : > { %6341 = vst.msk [vmem:[#allocation4 + $0x48] sm:$0xff] %vm2693_vm12, %v6274_v53  ;;  %v6382_v17 = vsel %vm2693_vm12, %v6274_v53, 0.0  ;;  %v6446_v30 = vmul.f32 %v6274_v53, %v6274_v53  ;;  %v6456_v53 = vmul.f32 %v10552_v21, %v10552_v21  ;;  %v6406_v21 = vsel %vm2693_vm12, %v10571_v27, 0.0 }
 0x4cb   : > { %v6383_v49 = vadd.f32 %v6382_v17, %v6381_v4 }
 0x4cc   : > { %v6486_v19 = vsel %vm2693_vm12, %v6446_v30, 0.0 }
 0x4cd   : > { %v6487_v9 = vadd.f32 %v6486_v19, %v6485_v0  ;;  %v6502_v0 = vsel %vm2693_vm12, %v6454_v59, 0.0  ;;  %v6457_v19 = vmul.f32 %v10562_v3, %v10562_v3  ;;  %v6408_v3 = vsel %vm2693_vm12, %v10578_v56, 0.0 }
 0x4d0   : > { %v10585_v5 = vpop.f32.mrf.mxu3 }
 0x4d1   : > { %6355 = vst.msk [vmem:[#allocation4 + $0xb8] sm:$0xff] %vm2693_vm12, %v10585_v5  ;;  %v6277_v44 = vpop.f32.mrf.mxu1 }
 0x4d2   : > { %6342 = vst.msk [vmem:[#allocation4 + $0x50] sm:$0xff] %vm2693_vm12, %v6277_v44  ;;  %v6384_v48 = vsel %vm2693_vm12, %v6277_v44, 0.0  ;;  %v6447_v16 = vmul.f32 %v6277_v44, %v6277_v44 }
 0x4d3   : > { %v6385_v55 = vadd.f32 %v6384_v48, %v6383_v49  ;;  %v6504_v49 = vsel %vm2693_vm12, %v6455_v63, 0.0  ;;  %v6506_v48 = vsel %vm2693_vm12, %v6456_v53, 0.0 }
 0x4d4   : > { %v6488_v26 = vsel %vm2693_vm12, %v6447_v16, 0.0  ;;  %v6458_v16 = vmul.f32 %v10571_v27, %v10571_v27  ;;  %v6410_v27 = vsel %vm2693_vm12, %v10585_v5, 0.0 }
 0x4d5   : > { %v6489_v12 = vadd.f32 %v6488_v26, %v6487_v9 }
 0x4d8   : > { %v10592_v61 = vpop.f32.mrf.mxu3 }
 0x4d9   : > { %6356 = vst.msk [vmem:[#allocation4 + $0xc0] sm:$0xff] %vm2693_vm12, %v10592_v61  ;;  %v6279_v23 = vpop.f32.mrf.mxu1 }
 0x4da   : > { %6343 = vst.msk [vmem:[#allocation4 + $0x58] sm:$0xff] %vm2693_vm12, %v6279_v23  ;;  %v6386_v33 = vsel %vm2693_vm12, %v6279_v23, 0.0  ;;  %v6448_v60 = vmul.f32 %v6279_v23, %v6279_v23  ;;  %v6459_v23 = vmul.f32 %v10578_v56, %v10578_v56  ;;  %v6412_v56 = vsel %vm2693_vm12, %v10592_v61, 0.0 }
 0x4db   : > { %v6387_v2 = vadd.f32 %v6386_v33, %v6385_v55 }
 0x4dc   : > { %v6490_v25 = vsel %vm2693_vm12, %v6448_v60, 0.0 }
 0x4dd   : > { %v6491_v11 = vadd.f32 %v6490_v25, %v6489_v12  ;;  %v6508_v12 = vsel %vm2693_vm12, %v6457_v19, 0.0  ;;  %v6460_v25 = vmul.f32 %v10585_v5, %v10585_v5 }
 0x4e0   : > { %v10599_v38 = vpop.f32.mrf.mxu3 }
 0x4e1   : > { %6357 = vst.msk [vmem:[#allocation4 + $0xc8] sm:$0xff] %vm2693_vm12, %v10599_v38  ;;  %v6282_v58 = vpop.f32.mrf.mxu1  ;;  %v6414_v5 = vsel %vm2693_vm12, %v10599_v38, 0.0 }
 0x4e2   : > { %6344 = vst.msk [vmem:[#allocation4 + $0x60] sm:$0xff] %vm2693_vm12, %v6282_v58  ;;  %v6449_v20 = vmul.f32 %v6282_v58, %v6282_v58  ;;  %v6388_v7 = vsel %vm2693_vm12, %v6282_v58, 0.0 }
 0x4e3   : > { %v6389_v15 = vadd.f32 %v6388_v7, %v6387_v2  ;;  %v6510_v2 = vsel %vm2693_vm12, %v6458_v16, 0.0 }
 0x4e4   : > { %v6492_v35 = vsel %vm2693_vm12, %v6449_v20, 0.0  ;;  %v6461_v20 = vmul.f32 %v10592_v61, %v10592_v61 }
 0x4e5   : > { %v6493_v37 = vadd.f32 %v6492_v35, %v6491_v11  ;;  %v6462_v35 = vmul.f32 %v10599_v38, %v10599_v38 }
 0x4e9   : > { %v6284_v41 = vpop.f32.mrf.mxu1 }
 0x4ea   : > { %6345 = vst.msk [vmem:[#allocation4 + $0x68] sm:$0xff] %vm2693_vm12, %v6284_v41  ;;  %v6450_v6 = vmul.f32 %v6284_v41, %v6284_v41  ;;  %v6390_v13 = vsel %vm2693_vm12, %v6284_v41, 0.0  ;;  %v6512_v41 = vsel %vm2693_vm12, %v6459_v23, 0.0 }
 0x4eb   : > { %v6391_v14 = vadd.f32 %v6390_v13, %v6389_v15  ;;  %v6516_v15 = vsel %vm2693_vm12, %v6461_v20, 0.0 }
 0x4ec   : > { %v6494_v32 = vsel %vm2693_vm12, %v6450_v6, 0.0  ;;  %v6514_v6 = vsel %vm2693_vm12, %v6460_v25, 0.0 }
 0x4ed   : > { %v6495_v36 = vadd.f32 %v6494_v32, %v6493_v37 }
 0x4fd   : > { %v10605_v22 = vpop.f32.mrf.mxu3 }
 0x4fe   : > { %6358 = vst.msk [vmem:[#allocation4 + $0xd0] sm:$0xff] %vm2693_vm12, %v10605_v22  ;;  %v6463_v61 = vmul.f32 %v10605_v22, %v10605_v22 }
 0x500   : > { %v6520_v38 = vsel %vm2693_vm12, %v6463_v61, 0.0  ;;  %v6557_v61 = vld [vmem:[#allocation4] sm:$0xff] }
 0x505   : > { %v10609_v54 = vpop.f32.mrf.mxu3 }
 0x506   : > { %6359 = vst.msk [vmem:[#allocation4 + $0xd8] sm:$0xff] %vm2693_vm12, %v10609_v54  ;;  %v6464_v10 = vmul.f32 %v10609_v54, %v10609_v54 }
 0x508   : > { %v6287_v52 = vpop.f32.mrf.mxu1 }
 0x509   : > { %6346 = vst.msk [vmem:[#allocation4 + $0x70] sm:$0xff] %vm2693_vm12, %v6287_v52  ;;  %v6451_v8 = vmul.f32 %v6287_v52, %v6287_v52  ;;  %v6392_v18 = vsel %vm2693_vm12, %v6287_v52, 0.0 }
 0x50a   : > { %v6393_v34 = vadd.f32 %v6392_v18, %v6391_v14  ;;  %v6518_v14 = vsel %vm2693_vm12, %v6462_v35, 0.0 }
 0x50b   : > { %v6496_v42 = vsel %vm2693_vm12, %v6451_v8, 0.0 }
 0x50c   : > { %v6497_v43 = vadd.f32 %v6496_v42, %v6495_v36 }
 0x510   : > { %v6289_v50 = vpop.f32.mrf.mxu1 }
 0x511   : > { %6347 = vst.msk [vmem:[#allocation4 + $0x78] sm:$0xff] %vm2693_vm12, %v6289_v50  ;;  %v6394_v1 = vsel %vm2693_vm12, %v6289_v50, 0.0  ;;  %v6452_v31 = vmul.f32 %v6289_v50, %v6289_v50 }
 0x512   : > { %v6395_v62 = vadd.f32 %v6394_v1, %v6393_v34  ;;  %v6416_v34 = vsel %vm2693_vm12, %v10605_v22, 0.0 }
 0x513   : > { %v6498_v47 = vsel %vm2693_vm12, %v6452_v31, 0.0  ;;  %v6418_v31 = vsel %vm2693_vm12, %v10609_v54, 0.0 }
 0x514   : > { %v6397_v57 = vadd.f32 %v6396_v40, %v6395_v62  ;;  %v6499_v28 = vadd.f32 %v6498_v47, %v6497_v43  ;;  %v6522_v62 = vsel %vm2693_vm12, %v6464_v10, 0.0 }
 0x516   : > { %v6399_v4 = vadd.f32 %v6398_v24, %v6397_v57  ;;  %v6501_v29 = vadd.f32 %v6500_v46, %v6499_v28 }
 0x518   : > { %v6401_v17 = vadd.f32 %v6400_v45, %v6399_v4  ;;  %v6503_v30 = vadd.f32 %v6502_v0, %v6501_v29 }
 0x51a   : > { %v6403_v9 = vadd.f32 %v6402_v39, %v6401_v17  ;;  %v6505_v44 = vadd.f32 %v6504_v49, %v6503_v30 }
 0x51c   : > { %v6405_v55 = vadd.f32 %v6404_v51, %v6403_v9  ;;  %v6507_v26 = vadd.f32 %v6506_v48, %v6505_v44 }
 0x51e   : > { %v6407_v33 = vadd.f32 %v6406_v21, %v6405_v55  ;;  %v6509_v60 = vadd.f32 %v6508_v12, %v6507_v26 }
 0x520   : > { %v6511_v11 = vadd.f32 %v6510_v2, %v6509_v60  ;;  %v6409_v58 = vadd.f32 %v6408_v3, %v6407_v33  ;;  %v6364_v2 = vld [vmem:[#allocation5] sm:$0x1] }
 0x522   : > { %v6411_v52 = vadd.f32 %v6410_v27, %v6409_v58  ;;  %v6513_v7 = vadd.f32 %v6512_v41, %v6511_v11  ;;  %v6436_v11 = vld [vmem:[#allocation5 + $0x1] sm:$0x1] }
 0x524   : > { %v6413_v13 = vadd.f32 %v6412_v56, %v6411_v52  ;;  %v6515_v8 = vadd.f32 %v6514_v6, %v6513_v7 }
 0x525   : > { %v6322_v32 = vpop.f32.mrf.mxu3 }
 0x526   : > { %6360 = vst.msk [vmem:[#allocation4 + $0xe0] sm:$0xff] %vm2693_vm12, %v6322_v32  ;;  %v6415_v18 = vadd.f32 %v6414_v5, %v6413_v13  ;;  %v6517_v37 = vadd.f32 %v6516_v15, %v6515_v8  ;;  %v6465_v40 = vmul.f32 %v6322_v32, %v6322_v32  ;;  %v6420_v57 = vsel %vm2693_vm12, %v6322_v32, 0.0 }
 0x528   : > { %v6519_v42 = vadd.f32 %v6518_v14, %v6517_v37  ;;  %v6417_v50 = vadd.f32 %v6416_v34, %v6415_v18  ;;  %v6524_v46 = vsel %vm2693_vm12, %v6465_v40, 0.0  ;;  %v6558_v34 = vld [vmem:[#allocation4 + $0x8] sm:$0xff] }
 0x529   : > { %v6562_v40 = vld [vmem:[#allocation4 + $0x28] sm:$0xff] }
 0x52a   : > { %v6521_v1 = vadd.f32 %v6520_v38, %v6519_v42  ;;  %v6419_v43 = vadd.f32 %v6418_v31, %v6417_v50  ;;  %v6559_v50 = vld [vmem:[#allocation4 + $0x10] sm:$0xff]  ;;  %v6560_v38 = vld [vmem:[#allocation4 + $0x18] sm:$0xff] }
 0x52c   : > { %v6523_v59 = vadd.f32 %v6522_v62, %v6521_v1  ;;  %v6421_v22 = vadd.f32 %v6420_v57, %v6419_v43  ;;  %v6561_v43 = vld [vmem:[#allocation4 + $0x20] sm:$0xff] }
 0x52d   : > { %v6324_v36 = vpop.f32.mrf.mxu3 }
 0x52e   : > { %6361 = vst.msk [vmem:[#allocation4 + $0xe8] sm:$0xff] %vm2693_vm12, %v6324_v36  ;;  %v6466_v28 = vmul.f32 %v6324_v36, %v6324_v36  ;;  %v6422_v24 = vsel %vm2693_vm12, %v6324_v36, 0.0  ;;  %v6525_v4 = vadd.f32 %v6524_v46, %v6523_v59  ;;  %v6563_v59 = vld [vmem:[#allocation4 + $0x30] sm:$0xff] }
 0x52f   : > { %v6423_v0 = vadd.f32 %v6422_v24, %v6421_v22 }
 0x530   : > { %v6526_v54 = vsel %vm2693_vm12, %v6466_v28, 0.0 }
 0x531   : > { %v6527_v53 = vadd.f32 %v6526_v54, %v6525_v4  ;;  %v6656_v4 = vld [vmem:[%s7567_s17 + $0x8] sm:$0xff]  ;;  %v6657_v54 = vld [vmem:[%s7567_s17 + $0x10] sm:$0xff] }
 0x53c   : > { %v6327_v47 = vpop.f32.mrf.mxu3 }
 0x53d   : > { %6362 = vst.msk [vmem:[#allocation4 + $0xf0] sm:$0xff] %vm2693_vm12, %v6327_v47  ;;  %v6467_v63 = vmul.f32 %v6327_v47, %v6327_v47  ;;  %v6424_v29 = vsel %vm2693_vm12, %v6327_v47, 0.0 }
 0x53e   : > { %v6425_v17 = vadd.f32 %v6424_v29, %v6423_v0  ;;  %v6564_v29 = vld [vmem:[#allocation4 + $0x38] sm:$0xff]  ;;  %v6565_v0 = vld [vmem:[#allocation4 + $0x40] sm:$0xff] }
 0x53f   : > { %v6528_v45 = vsel %vm2693_vm12, %v6467_v63, 0.0  ;;  %v6655_v63 = vld [vmem:[%s7567_s17] sm:$0xff] }
 0x540   : > { %v6529_v19 = vadd.f32 %v6528_v45, %v6527_v53 }
 0x544   : > { %v6329_v30 = vpop.f32.mrf.mxu3 }
 0x545   : > { %6363 = vst.msk [vmem:[#allocation4 + $0xf8] sm:$0xff] %vm2693_vm12, %v6329_v30  ;;  %v6426_v49 = vsel %vm2693_vm12, %v6329_v30, 0.0  ;;  %v6468_v39 = vmul.f32 %v6329_v30, %v6329_v30 }
 0x546   : > { %v6427_v9 = vadd.f32 %v6426_v49, %v6425_v17  ;;  %v6658_v17 = vld [vmem:[%s7567_s17 + $0x18] sm:$0xff] }
 0x547   : > { %v6530_v44 = vsel %vm2693_vm12, %v6468_v39, 0.0 }
 0x548   : > { %v6428_v48 = vrot.slane %v6427_v9, 4  ;;  %v6531_v51 = vadd.f32 %v6530_v44, %v6529_v19  ;;  %v6659_v19 = vld [vmem:[%s7567_s17 + $0x20] sm:$0xff] }
 0x54a   : > { %v6429_v16 = vadd.f32 %v6428_v48, %v6427_v9  ;;  %v6532_v55 = vrot.slane %v6531_v51, 4  ;;  %v6566_v9 = vld [vmem:[#allocation4 + $0x48] sm:$0xff]  ;;  %v6660_v48 = vld [vmem:[%s7567_s17 + $0x28] sm:$0xff] }
 0x54c   : > { %v6430_v26 = vrot.slane %v6429_v16, 2  ;;  %v6533_v12 = vadd.f32 %v6532_v55, %v6531_v51 }
 0x54e   : > { %v6431_v21 = vadd.f32 %v6430_v26, %v6429_v16  ;;  %v6534_v23 = vrot.slane %v6533_v12, 2  ;;  %v6567_v26 = vld [vmem:[#allocation4 + $0x50] sm:$0xff] }
 0x550   : > { %v6432_v33 = vrot.slane %v6431_v21, 1  ;;  %v6535_v60 = vadd.f32 %v6534_v23, %v6533_v12  ;;  %v6661_v23 = vld [vmem:[%s7567_s17 + $0x30] sm:$0xff] }
 0x552   : > { %v6433_v3 = vadd.f32 %v6432_v33, %v6431_v21  ;;  %v6536_v25 = vrot.slane %v6535_v60, 1 }
 0x554   : > { %v6434_v58 = vadd.f32 %v6433_v3, %v6364_v2  ;;  %v6537_v41 = vadd.f32 %v6536_v25, %v6535_v60  ;;  %v6568_v60 = vld [vmem:[#allocation4 + $0x58] sm:$0xff]  ;;  %v6662_v25 = vld [vmem:[%s7567_s17 + $0x38] sm:$0xff] }
 0x556   : > { %6435 = vst.msk [vmem:[#allocation5] sm:$0x1] %vm11132_vm4, %v6434_v58  ;;  %v6538_v27 = vadd.f32 %v6537_v41, %v6436_v11  ;;  %v6569_v58 = vld [vmem:[#allocation4 + $0x60] sm:$0xff] }
 0x558   : > { %6539 = vst.msk [vmem:[#allocation5 + $0x1] sm:$0x1] %vm11133_vm5, %v6538_v27 }
 0x55d   : > { %v6540_v20 = vld [vmem:[#allocation5] sm:$0x1] }
 0x55e   : > { %v6541_v52 = vmul.f32 0.00390625, %v6540_v20  ;;  %v6663_v20 = vld [vmem:[%s7567_s17 + $0x40] sm:$0xff] }
 0x55f   : > { %v6542_v7 = vld [vmem:[#allocation5 + $0x1] sm:$0x1] }
 0x560   : > { %v6543_v6 = vmul.f32 0.00390625, %v6542_v7  ;;  %v6544_v56 = vmul.f32 %v6541_v52, %v6541_v52  ;;  %v10697_v42 = vperm.slane %v6541_v52, 0  ;;  %v6570_v7 = vld [vmem:[#allocation4 + $0x68] sm:$0xff] }
 0x562   : > { %v6545_v35 = vsub.f32 %v6543_v6, %v6544_v56  ;;  %v6590_v10 = vsub.f32 %v6557_v61, %v10697_v42  ;;  %v6591_v1 = vsub.f32 %v6558_v34, %v10697_v42  ;;  %v6592_v31 = vsub.f32 %v6559_v50, %v10697_v42  ;;  %v6666_v34 = vld [vmem:[%s7567_s17 + $0x58] sm:$0xff] }
 0x563   : > { %v6593_v62 = vsub.f32 %v6560_v38, %v10697_v42  ;;  %v6594_v47 = vsub.f32 %v6561_v43, %v10697_v42  ;;  %v6595_v46 = vsub.f32 %v6562_v40, %v10697_v42  ;;  %v6596_v45 = vsub.f32 %v6563_v59, %v10697_v42  ;;  %v6573_v38 = vld [vmem:[#allocation4 + $0x80] sm:$0xff] }
 0x564   : > { %v6546_v13 = vadd.f32 1e-05, %v6545_v35  ;;  %v6597_v30 = vsub.f32 %v6564_v29, %v10697_v42  ;;  %v6598_v49 = vsub.f32 %v6565_v0, %v10697_v42  ;;  %v6599_v12 = vsub.f32 %v6566_v9, %v10697_v42  ;;  %v6664_v35 = vld [vmem:[%s7567_s17 + $0x48] sm:$0xff]  ;;  %v6670_v0 = vld [vmem:[%s7567_s17 + $0x78] sm:$0xff] }
 0x565   : > { %v6600_v2 = vsub.f32 %v6567_v26, %v10697_v42  ;;  %v6601_v41 = vsub.f32 %v6568_v60, %v10697_v42  ;;  %v6602_v6 = vsub.f32 %v6569_v58, %v10697_v42  ;;  %v6606_v40 = vsub.f32 %v6573_v38, %v10697_v42 }
 0x566   : > { %7352 = vrsqrt.f32 %v6546_v13  ;;  %vm6553_vm7 = vweird.f32 %v6546_v13 }
 0x56c   : > { %v7353_v8 = vpop.eup %7352 }
 0x56d   : > { %v6548_v15 = vmul.f32 %v7353_v8, %v6546_v13  ;;  %vm6554_vm6 = vweird.f32 %v7353_v8 }
 0x56e   : > { %vm6555_vm8 = vmor %vm6553_vm7, %vm6554_vm6 }
 0x56f   : > { %v6549_v5 = vmul.f32 %v7353_v8, %v6548_v15  ;;  %v6603_v15 = vsub.f32 %v6570_v7, %v10697_v42 }
 0x571   : > { %v6550_v32 = vmul.f32 0.5, %v6549_v5 }
 0x573   : > { %v6551_v18 = vsub.f32 1.5, %v6550_v32  ;;  %v6665_v32 = vld [vmem:[%s7567_s17 + $0x50] sm:$0xff] }
 0x575   : > { %v6552_v37 = vmul.f32 %v7353_v8, %v6551_v18 }
 0x577   : > { %v6556_v14 = vsel %vm6555_vm8, %v7353_v8, %v6552_v37  ;;  %v6571_v8 = vld [vmem:[#allocation4 + $0x70] sm:$0xff]  ;;  %v6572_v37 = vld [vmem:[#allocation4 + $0x78] sm:$0xff] }
 0x578   : > { %v10699_v36 = vperm.slane %v6556_v14, 0  ;;  %v6604_v14 = vsub.f32 %v6571_v8, %v10697_v42 }
 0x57a   : > { %v6623_v57 = vmul.f32 %v10699_v36, %v6590_v10  ;;  %v6624_v28 = vmul.f32 %v10699_v36, %v6591_v1  ;;  %v6625_v22 = vmul.f32 %v10699_v36, %v6592_v31  ;;  %v6626_v24 = vmul.f32 %v10699_v36, %v6593_v62  ;;  %v6667_v31 = vld [vmem:[%s7567_s17 + $0x60] sm:$0xff]  ;;  %v6574_v62 = vld [vmem:[#allocation4 + $0x88] sm:$0xff] }
 0x57b   : > { %v6627_v53 = vmul.f32 %v10699_v36, %v6594_v47  ;;  %v6628_v39 = vmul.f32 %v10699_v36, %v6595_v46  ;;  %v6629_v44 = vmul.f32 %v10699_v36, %v6596_v45  ;;  %v6630_v21 = vmul.f32 %v10699_v36, %v6597_v30  ;;  %v6668_v47 = vld [vmem:[%s7567_s17 + $0x68] sm:$0xff] }
 0x57c   : > { %v6687_v51 = vadd.f32 %v6655_v63, %v6623_v57  ;;  %v6688_v16 = vadd.f32 %v6656_v4, %v6624_v28  ;;  %v6689_v55 = vadd.f32 %v6657_v54, %v6625_v22  ;;  %v6690_v33 = vadd.f32 %v6658_v17, %v6626_v24  ;;  %v6575_v28 = vld [vmem:[#allocation4 + $0x90] sm:$0xff]  ;;  %v6669_v24 = vld [vmem:[%s7567_s17 + $0x70] sm:$0xff]  ;;  %v6576_v4 = vld [vmem:[#allocation4 + $0x98] sm:$0xff] }
 0x57d   : > { %v6631_v3 = vmul.f32 %v10699_v36, %v6598_v49  ;;  %v6691_v11 = vadd.f32 %v6659_v19, %v6627_v53  ;;  %v6632_v27 = vmul.f32 %v10699_v36, %v6599_v12  ;;  %v6692_v52 = vadd.f32 %v6660_v48, %v6628_v39  ;;  %v6577_v53 = vld [vmem:[#allocation4 + $0xa0] sm:$0xff]  ;;  %v6671_v49 = vld [vmem:[%s7567_s17 + $0x80] sm:$0xff]  ;;  %v6578_v19 = vld [vmem:[#allocation4 + $0xa8] sm:$0xff] }
 0x57e   : > { %6719 = vst.msk [vmem:[%s10722_s16] sm:$0xff] %vm2693_vm12, %v6687_v51  ;;  %v6633_v56 = vmul.f32 %v10699_v36, %v6600_v2  ;;  %v6693_v13 = vadd.f32 %v6661_v23, %v6629_v44  ;;  %v6634_v5 = vmul.f32 %v10699_v36, %v6601_v41  ;;  %v6694_v18 = vadd.f32 %v6662_v25, %v6630_v21  ;;  %v6672_v48 = vld [vmem:[%s7567_s17 + $0x88] sm:$0xff]  ;;  %v6673_v12 = vld [vmem:[%s7567_s17 + $0x90] sm:$0xff]  ;;  %v6674_v2 = vld [vmem:[%s7567_s17 + $0x98] sm:$0xff] }
 0x57f   : > { %6720 = vst.msk [vmem:[%s10722_s16 + $0x8] sm:$0xff] %vm2693_vm12, %v6688_v16  ;;  %v6635_v61 = vmul.f32 %v10699_v36, %v6602_v6  ;;  %v6695_v50 = vadd.f32 %v6663_v20, %v6631_v3  ;;  %v6605_v10 = vsub.f32 %v6572_v37, %v10697_v42  ;;  %v6636_v1 = vmul.f32 %v10699_v36, %v6603_v15  ;;  %v6579_v16 = vld [vmem:[#allocation4 + $0xb0] sm:$0xff]  ;;  %v6580_v23 = vld [vmem:[#allocation4 + $0xb8] sm:$0xff]  ;;  %v6581_v25 = vld [vmem:[#allocation4 + $0xc0] sm:$0xff] }
 0x580   : > { %6721 = vst.msk [vmem:[%s10722_s16 + $0x10] sm:$0xff] %vm2693_vm12, %v6689_v55  ;;  %v6696_v43 = vadd.f32 %v6664_v35, %v6632_v27  ;;  %v6637_v59 = vmul.f32 %v10699_v36, %v6604_v14  ;;  %v6697_v57 = vadd.f32 %v6665_v32, %v6633_v56  ;;  %v6607_v22 = vsub.f32 %v6574_v62, %v10697_v42  ;;  %v6675_v41 = vld [vmem:[%s7567_s17 + $0xa0] sm:$0xff]  ;;  %v6582_v20 = vld [vmem:[#allocation4 + $0xc8] sm:$0xff]  ;;  %v6676_v6 = vld [vmem:[%s7567_s17 + $0xa8] sm:$0xff] }
 0x581   : > { %6722 = vst.msk [vmem:[%s10722_s16 + $0x18] sm:$0xff] %vm2693_vm12, %v6690_v33  ;;  %v6638_v46 = vmul.f32 %v10699_v36, %v6605_v10  ;;  %v6698_v63 = vadd.f32 %v6666_v34, %v6634_v5  ;;  %v6608_v54 = vsub.f32 %v6575_v28, %v10697_v42  ;;  %v6639_v29 = vmul.f32 %v10699_v36, %v6606_v40  ;;  %v6583_v35 = vld [vmem:[#allocation4 + $0xd0] sm:$0xff]  ;;  %v6677_v15 = vld [vmem:[%s7567_s17 + $0xb0] sm:$0xff]  ;;  %v6584_v32 = vld [vmem:[#allocation4 + $0xd8] sm:$0xff] }
 0x582   : > { %6723 = vst.msk [vmem:[%s10722_s16 + $0x20] sm:$0xff] %vm2693_vm12, %v6691_v11  ;;  %v6699_v45 = vadd.f32 %v6667_v31, %v6635_v61  ;;  %v6609_v17 = vsub.f32 %v6576_v4, %v10697_v42  ;;  %v6640_v30 = vmul.f32 %v10699_v36, %v6607_v22  ;;  %v6700_v39 = vadd.f32 %v6668_v47, %v6636_v1  ;;  %v6678_v14 = vld [vmem:[%s7567_s17 + $0xb8] sm:$0xff]  ;;  %v6585_v34 = vld [vmem:[#allocation4 + $0xe0] sm:$0xff]  ;;  %v6679_v10 = vld [vmem:[%s7567_s17 + $0xc0] sm:$0xff] }
 0x583   : > { %6724 = vst.msk [vmem:[%s10722_s16 + $0x28] sm:$0xff] %vm2693_vm12, %v6692_v52  ;;  %v6610_v9 = vsub.f32 %v6577_v53, %v10697_v42  ;;  %v6641_v44 = vmul.f32 %v10699_v36, %v6608_v54  ;;  %v6701_v51 = vadd.f32 %v6669_v24, %v6637_v59  ;;  %v6611_v55 = vsub.f32 %v6578_v19, %v10697_v42  ;;  %v6586_v31 = vld [vmem:[#allocation4 + $0xe8] sm:$0xff]  ;;  %v6680_v40 = vld [vmem:[%s7567_s17 + $0xc8] sm:$0xff]  ;;  %v6587_v47 = vld [vmem:[#allocation4 + $0xf0] sm:$0xff] }
 0x584   : > { %6725 = vst.msk [vmem:[%s10722_s16 + $0x30] sm:$0xff] %vm2693_vm12, %v6693_v13  ;;  %v6642_v26 = vmul.f32 %v10699_v36, %v6609_v17  ;;  %v6702_v21 = vadd.f32 %v6670_v0, %v6638_v46  ;;  %v6612_v33 = vsub.f32 %v6579_v16, %v10697_v42  ;;  %v6703_v3 = vadd.f32 %v6671_v49, %v6639_v29  ;;  %v6681_v22 = vld [vmem:[%s7567_s17 + $0xd0] sm:$0xff]  ;;  %v6588_v24 = vld [vmem:[#allocation4 + $0xf8] sm:$0xff]  ;;  %v6682_v54 = vld [vmem:[%s7567_s17 + $0xd8] sm:$0xff] }
 0x585   : > { %6726 = vst.msk [vmem:[%s10722_s16 + $0x38] sm:$0xff] %vm2693_vm12, %v6694_v18  ;;  %v6643_v60 = vmul.f32 %v10699_v36, %v6610_v9  ;;  %v6613_v11 = vsub.f32 %v6580_v23, %v10697_v42  ;;  %v6644_v58 = vmul.f32 %v10699_v36, %v6611_v55  ;;  %v6704_v27 = vadd.f32 %v6672_v48, %v6640_v30  ;;  %v6683_v53 = vld [vmem:[%s7567_s17 + $0xe0] sm:$0xff]  ;;  %v6684_v49 = vld [vmem:[%s7567_s17 + $0xe8] sm:$0xff]  ;;  %v6685_v19 = vld [vmem:[%s7567_s17 + $0xf0] sm:$0xff] }
 0x586   : > { %6727 = vst.msk [vmem:[%s10722_s16 + $0x40] sm:$0xff] %vm2693_vm12, %v6695_v50  ;;  %v6614_v52 = vsub.f32 %v6581_v25, %v10697_v42  ;;  %v6645_v7 = vmul.f32 %v10699_v36, %v6612_v33  ;;  %v6705_v56 = vadd.f32 %v6673_v12, %v6641_v44  ;;  %v6615_v13 = vsub.f32 %v6582_v20, %v10697_v42  ;;  %v6686_v44 = vld [vmem:[%s7567_s17 + $0xf8] sm:$0xff] }
 0x587   : > { %6728 = vst.msk [vmem:[%s10722_s16 + $0x48] sm:$0xff] %vm2693_vm12, %v6696_v43  ;;  %v6646_v8 = vmul.f32 %v10699_v36, %v6613_v11  ;;  %v6706_v5 = vadd.f32 %v6674_v2, %v6642_v26  ;;  %v6616_v18 = vsub.f32 %v6583_v35, %v10697_v42  ;;  %v6707_v61 = vadd.f32 %v6675_v41, %v6643_v60 }
 0x588   : > { %6729 = vst.msk [vmem:[%s10722_s16 + $0x50] sm:$0xff] %vm2693_vm12, %v6697_v57  ;;  %v6647_v37 = vmul.f32 %v10699_v36, %v6614_v52  ;;  %v6617_v50 = vsub.f32 %v6584_v32, %v10697_v42  ;;  %v6648_v38 = vmul.f32 %v10699_v36, %v6615_v13  ;;  %v6708_v1 = vadd.f32 %v6676_v6, %v6644_v58 }
 0x589   : > { %6730 = vst.msk [vmem:[%s10722_s16 + $0x58] sm:$0xff] %vm2693_vm12, %v6698_v63  ;;  %v6618_v43 = vsub.f32 %v6585_v34, %v10697_v42  ;;  %v6649_v62 = vmul.f32 %v10699_v36, %v6616_v18  ;;  %v6709_v59 = vadd.f32 %v6677_v15, %v6645_v7  ;;  %v6619_v57 = vsub.f32 %v6586_v31, %v10697_v42 }
 0x58a   : > { %6731 = vst.msk [vmem:[%s10722_s16 + $0x60] sm:$0xff] %vm2693_vm12, %v6699_v45  ;;  %v6650_v28 = vmul.f32 %v10699_v36, %v6617_v50  ;;  %v6710_v46 = vadd.f32 %v6678_v14, %v6646_v8  ;;  %v6620_v63 = vsub.f32 %v6587_v47, %v10697_v42  ;;  %v6711_v29 = vadd.f32 %v6679_v10, %v6647_v37 }
 0x58b   : > { %6732 = vst.msk [vmem:[%s10722_s16 + $0x68] sm:$0xff] %vm2693_vm12, %v6700_v39  ;;  %v6651_v4 = vmul.f32 %v10699_v36, %v6618_v43  ;;  %v6621_v0 = vsub.f32 %v6588_v24, %v10697_v42  ;;  %v6652_v45 = vmul.f32 %v10699_v36, %v6619_v57  ;;  %v6712_v17 = vadd.f32 %v6680_v40, %v6648_v38 }
 0x58c   : > { %6733 = vst.msk [vmem:[%s10722_s16 + $0x70] sm:$0xff] %vm2693_vm12, %v6701_v51  ;;  %v6653_v30 = vmul.f32 %v10699_v36, %v6620_v63  ;;  %v6713_v39 = vadd.f32 %v6681_v22, %v6649_v62  ;;  %v6714_v9 = vadd.f32 %v6682_v54, %v6650_v28 }
 0x58d   : > { %6734 = vst.msk [vmem:[%s10722_s16 + $0x78] sm:$0xff] %vm2693_vm12, %v6702_v21  ;;  %v6654_v42 = vmul.f32 %v10699_v36, %v6621_v0  ;;  %v6715_v48 = vadd.f32 %v6683_v53, %v6651_v4  ;;  %v6716_v51 = vadd.f32 %v6684_v49, %v6652_v45 }
 0x58e   : > { %6735 = vst.msk [vmem:[%s10722_s16 + $0x80] sm:$0xff] %vm2693_vm12, %v6703_v3  ;;  %v6717_v16 = vadd.f32 %v6685_v19, %v6653_v30 }
 0x58f   : > { %6736 = vst.msk [vmem:[%s10722_s16 + $0x88] sm:$0xff] %vm2693_vm12, %v6704_v27  ;;  %v6718_v55 = vadd.f32 %v6686_v44, %v6654_v42 }
 0x590   : > { %6737 = vst.msk [vmem:[%s10722_s16 + $0x90] sm:$0xff] %vm2693_vm12, %v6705_v56 }
 0x591   : > { %6738 = vst.msk [vmem:[%s10722_s16 + $0x98] sm:$0xff] %vm2693_vm12, %v6706_v5 }
 0x592   : > { %6739 = vst.msk [vmem:[%s10722_s16 + $0xa0] sm:$0xff] %vm2693_vm12, %v6707_v61 }
 0x593   : > { %6740 = vst.msk [vmem:[%s10722_s16 + $0xa8] sm:$0xff] %vm2693_vm12, %v6708_v1 }
 0x594   : > { %6741 = vst.msk [vmem:[%s10722_s16 + $0xb0] sm:$0xff] %vm2693_vm12, %v6709_v59 }
 0x595   : > { %6742 = vst.msk [vmem:[%s10722_s16 + $0xb8] sm:$0xff] %vm2693_vm12, %v6710_v46 }
 0x596   : > { %6743 = vst.msk [vmem:[%s10722_s16 + $0xc0] sm:$0xff] %vm2693_vm12, %v6711_v29 }
 0x597   : > { %6744 = vst.msk [vmem:[%s10722_s16 + $0xc8] sm:$0xff] %vm2693_vm12, %v6712_v17 }
 0x598   : > { %6745 = vst.msk [vmem:[%s10722_s16 + $0xd0] sm:$0xff] %vm2693_vm12, %v6713_v39 }
 0x599   : > { %6746 = vst.msk [vmem:[%s10722_s16 + $0xd8] sm:$0xff] %vm2693_vm12, %v6714_v9 }
 0x59a   : > { %6747 = vst.msk [vmem:[%s10722_s16 + $0xe0] sm:$0xff] %vm2693_vm12, %v6715_v48 }
 0x59b   : > { %6748 = vst.msk [vmem:[%s10722_s16 + $0xe8] sm:$0xff] %vm2693_vm12, %v6716_v51 }
 0x59c   : > { %6749 = vst.msk [vmem:[%s10722_s16 + $0xf0] sm:$0xff] %vm2693_vm12, %v6717_v16 }
 0x59d   : > { %6750 = vst.msk [vmem:[%s10722_s16 + $0xf8] sm:$0xff] %vm2693_vm12, %v6718_v55 }
 0x59e PF: > { %s13_s12 = sadd.s32 1, %s7520_s12  }
 0x59f   : > { %p10_p4 = scmp.ge.s32.totalorder %s13_s12, 4  }
 0x5a1   :  { %12 = sbr.rel (!%p10_p4) target bundleno = 1 (0x1), region = 73 }

</bundles_post_ra>
